<compile_context>
chip_gen: v5e
topology: v5e:2x2
jax: 0.10.0
libtpu: 0.0.40
codegen_flags: <defaults>
</compile_context>

<pallas_src>
import functools

import jax
import jax.numpy as jnp
import numpy as np
from jax import lax
from jax.experimental import pallas as pl
from jax.experimental.pallas import tpu as pltpu

EPS = 1e-5
NEG_SLOPE = 0.01                 # torch.nn.LeakyReLU default
LANE = 128
VMEM_LIMIT = 48 * 1024 * 1024    # raised vs. default scoped limit; still inside v7x's 64 MiB


def _round_up(x, m):
    return (x + m - 1) // m * m


def _pick_block_rows(nd, hw, target_rows=2048):
    """Rows per block = db*hw with db | nd, so the row grid tiles exactly (no row padding)."""
    best = 1
    for db in range(1, nd + 1):
        if nd % db == 0 and db * hw <= target_rows:
            best = db
    if best == nd and nd > 1:        # keep >=2 grid steps so v7x's two TensorCores both get work
        for db in range(nd - 1, 0, -1):
            if nd % db == 0:
                best = db
                break
    tm = best * hw
    if tm % 8 != 0:                  # (8,128) block constraint; fall back to one full block
        tm = nd * hw
    return tm


# ---------------------------------------------------------------------------
# 1x1x1 conv pass-1 kernels: tiled matmul + per-tile BN partial statistics.
# The `_act_` variant additionally applies the *previous* layer's folded BN + LeakyReLU
# to the loaded tile (i.e. the previous layer's pass-2 is fused here).
# ---------------------------------------------------------------------------
def _mm_stats_kernel(x_ref, w_ref, h_ref, stats_ref):
    xb = x_ref[...].astype(jnp.bfloat16)                       # in-kernel bf16 cast (no HBM copy)
    h = jnp.dot(xb, w_ref[...], preferred_element_type=jnp.float32)
    h_ref[...] = h.astype(h_ref.dtype)                         # bf16 writeback
    s = jnp.sum(h, axis=0, keepdims=True)                      # stats from the f32 accumulator
    ss = jnp.sum(h * h, axis=0, keepdims=True)
    stats_ref[...] = jnp.concatenate([s, ss], axis=0)[None]    # (1, 2, Cout)


def _act_mm_stats_kernel(x_ref, scale_ref, shift_ref, w_ref, h_ref, stats_ref):
    y = x_ref[...].astype(jnp.float32) * scale_ref[...] + shift_ref[...]
    y = jnp.where(y > 0, y, NEG_SLOPE * y)                     # fused BN + LeakyReLU of prev layer
    h = jnp.dot(y.astype(jnp.bfloat16), w_ref[...], preferred_element_type=jnp.float32)
    h_ref[...] = h.astype(h_ref.dtype)
    s = jnp.sum(h, axis=0, keepdims=True)
    ss = jnp.sum(h * h, axis=0, keepdims=True)
    stats_ref[...] = jnp.concatenate([s, ss], axis=0)[None]


def matmul_bn_stats(x, w, tm, scale=None, shift=None):
    """x: (M, K), w: (K, N) bf16 -> (bf16 raw conv out, (G, 2, N) partial BN stats)."""
    m, k = x.shape
    n = w.shape[1]
    assert m % tm == 0
    g = m // tm
    if scale is None:
        kern = _mm_stats_kernel
        in_specs = [pl.BlockSpec((tm, k), lambda i: (i, 0)),
                    pl.BlockSpec((k, n), lambda i: (0, 0))]
        args = (x, w)
    else:
        kern = _act_mm_stats_kernel
        in_specs = [pl.BlockSpec((tm, k), lambda i: (i, 0)),
                    pl.BlockSpec((1, k), lambda i: (0, 0)),
                    pl.BlockSpec((1, k), lambda i: (0, 0)),
                    pl.BlockSpec((k, n), lambda i: (0, 0))]
        args = (x, scale, shift, w)
    bytes_accessed = int(x.size * x.dtype.itemsize + w.size * 2 + m * n * 2 + g * 2 * n * 4)
    return pl.pallas_call(
        kern,
        grid=(g,),
        in_specs=in_specs,
        out_specs=(pl.BlockSpec((tm, n), lambda i: (i, 0)),
                   pl.BlockSpec((1, 2, n), lambda i: (i, 0, 0))),
        out_shape=(jax.ShapeDtypeStruct((m, n), jnp.bfloat16),
                   jax.ShapeDtypeStruct((g, 2, n), jnp.float32)),
        compiler_params=pltpu.CompilerParams(
            dimension_semantics=("parallel",), vmem_limit_bytes=VMEM_LIMIT),
        cost_estimate=pl.CostEstimate(flops=2 * m * k * n, transcendentals=0,
                                      bytes_accessed=bytes_accessed),
    )(*args)


# ---------------------------------------------------------------------------
# 3x3x3 conv (pad=1) pass-1 kernel with conv1's BN + LeakyReLU fused on its inputs.
# Depth taps are packed along K (K = 3*Cb); the 9 spatial taps are realized with static
# in-register row shifts of the (H*W, 3*Cb) plane plus precomputed border masks
# (no padded HBM volume, no (H, W, C) reshape/retile copies).
# ---------------------------------------------------------------------------
def _conv2_kernel(prev_ref, cur_ref, next_ref, scale_ref, shift_ref, w_ref, mask_ref,
                  h_ref, stats_ref, *, H, W, D):
    hw = cur_ref.shape[1]
    cb = cur_ref.shape[2]
    z = pl.program_id(1)
    scale = scale_ref[...]
    shift = shift_ref[...]

    def activate(ref, valid=None):                 # fused BN1 + LeakyReLU (+ depth validity)
        y = ref[0].astype(jnp.float32) * scale + shift
        y = jnp.where(y > 0, y, NEG_SLOPE * y)
        if valid is not None:
            y = y * valid
        return y.astype(jnp.bfloat16)

    prev = activate(prev_ref, (z > 0).astype(jnp.float32))
    cur = activate(cur_ref)
    nxt = activate(next_ref, (z < D - 1).astype(jnp.float32))
    stacked = jnp.concatenate([prev, cur, nxt], axis=1)          # (HW, 3*Cb) bf16, K-packed

    acc = jnp.zeros((hw, cb), jnp.float32)
    for kh in range(3):
        for kw in range(3):
            s = (kh - 1) * W + (kw - 1)                          # static row shift
            if s == 0:
                shifted = stacked
            else:
                shifted = jnp.concatenate([stacked[s:], stacked[:s]], axis=0)
            valid = mask_ref[kh * 3 + kw] > 0.5                  # (HW, 1) border mask
            shifted = jnp.where(valid, shifted, jnp.zeros_like(shifted))
            acc = acc + jnp.dot(shifted, w_ref[kh * 3 + kw],
                                preferred_element_type=jnp.float32)

    h_ref[0] = acc.astype(jnp.bfloat16)
    s_ = jnp.sum(acc, axis=0, keepdims=True)
    ss = jnp.sum(acc * acc, axis=0, keepdims=True)
    stats_ref[...] = jnp.concatenate([s_, ss], axis=0)[None]


def conv3x3x3_bn_stats(h1_vol, scale1, shift1, w_taps, tap_masks, spatial):
    nd, hw, cb = h1_vol.shape
    n, d, hh, ww = spatial
    assert nd == n * d and hw == hh * ww
    kern = functools.partial(_conv2_kernel, H=hh, W=ww, D=d)
    bytes_accessed = int(3 * h1_vol.size * 2 + w_taps.size * 2 + nd * hw * cb * 2 + nd * 2 * cb * 4)
    return pl.pallas_call(
        kern,
        grid=(n, d),
        in_specs=[
            pl.BlockSpec((1, hw, cb), lambda b, z: (b * d + jnp.maximum(z - 1, 0), 0, 0)),
            pl.BlockSpec((1, hw, cb), lambda b, z: (b * d + z, 0, 0)),
            pl.BlockSpec((1, hw, cb), lambda b, z: (b * d + jnp.minimum(z + 1, d - 1), 0, 0)),
            pl.BlockSpec((1, cb), lambda b, z: (0, 0)),
            pl.BlockSpec((1, cb), lambda b, z: (0, 0)),
            pl.BlockSpec((9, 3 * cb, cb), lambda b, z: (0, 0, 0)),
            pl.BlockSpec((9, hw, 1), lambda b, z: (0, 0, 0)),
        ],
        out_specs=(
            pl.BlockSpec((1, hw, cb), lambda b, z: (b * d + z, 0, 0)),
            pl.BlockSpec((1, 2, cb), lambda b, z: (b * d + z, 0, 0)),
        ),
        out_shape=(
            jax.ShapeDtypeStruct((nd, hw, cb), jnp.bfloat16),
            jax.ShapeDtypeStruct((nd, 2, cb), jnp.float32),
        ),
        compiler_params=pltpu.CompilerParams(
            dimension_semantics=("parallel", "parallel"), vmem_limit_bytes=VMEM_LIMIT),
        cost_estimate=pl.CostEstimate(flops=2 * nd * hw * 27 * cb * cb, transcendentals=0,
                                      bytes_accessed=bytes_accessed),
    )(h1_vol, h1_vol, h1_vol, scale1, shift1, w_taps, tap_masks)


# ---------------------------------------------------------------------------
# Final epilogue: BN3 + LeakyReLU + residual add (only un-fusable pass-2 left).
# ---------------------------------------------------------------------------
def _bn_act_res_kernel(h_ref, scale_ref, shift_ref, res_ref, out_ref):
    y = h_ref[...].astype(jnp.float32) * scale_ref[...] + shift_ref[...]
    y = jnp.where(y > 0, y, NEG_SLOPE * y)
    out_ref[...] = (y + res_ref[...]).astype(out_ref.dtype)


def bn_act_residual(h_raw, scale, shift, res, tm):
    m, c = h_raw.shape
    assert m % tm == 0
    g = m // tm
    bytes_accessed = int(h_raw.size * 2 + res.size * 4 + m * c * 4 + 4 * c * 4)
    return pl.pallas_call(
        _bn_act_res_kernel,
        grid=(g,),
        in_specs=[pl.BlockSpec((tm, c), lambda i: (i, 0)),
                  pl.BlockSpec((1, c), lambda i: (0, 0)),
                  pl.BlockSpec((1, c), lambda i: (0, 0)),
                  pl.BlockSpec((tm, c), lambda i: (i, 0))],
        out_specs=pl.BlockSpec((tm, c), lambda i: (i, 0)),
        out_shape=jax.ShapeDtypeStruct((m, c), jnp.float32),
        compiler_params=pltpu.CompilerParams(
            dimension_semantics=("parallel",), vmem_limit_bytes=VMEM_LIMIT),
        cost_estimate=pl.CostEstimate(flops=4 * m * c, transcendentals=0,
                                      bytes_accessed=bytes_accessed),
    )(h_raw, scale, shift, res)


# ---------------------------------------------------------------------------
# Tiny per-channel finalize (plain JAX): partial sums -> folded BN scale/shift.
# ---------------------------------------------------------------------------
def _fold_bn(stats, m_real, gamma, beta):
    tot = jnp.sum(stats, axis=0)                                 # (2, C)
    mean = tot[0] / m_real
    var = jnp.maximum(tot[1] / m_real - mean * mean, 0.0)        # biased var (training-mode BN)
    inv = lax.rsqrt(var + EPS)
    scale = gamma * inv
    shift = beta - mean * scale
    return scale.reshape(1, -1), shift.reshape(1, -1)


def _border_masks(hh, ww):
    """(9, H*W, 1) f32 validity masks for the 9 spatial taps (trace-time constant)."""
    masks = np.zeros((9, hh * ww, 1), np.float32)
    yy, xx = np.meshgrid(np.arange(hh), np.arange(ww), indexing="ij")
    for kh in range(3):
        for kw in range(3):
            dh, dw = kh - 1, kw - 1
            valid = ((yy + dh >= 0) & (yy + dh < hh) & (xx + dw >= 0) & (xx + dw < ww))
            masks[kh * 3 + kw, :, 0] = valid.reshape(-1)
    return jnp.asarray(masks)


# ---------------------------------------------------------------------------
# BottleneckBlock forward (stride=1)
# ---------------------------------------------------------------------------
def bottleneck_block(x_ncdhw, params):
    n, c, d, hh, ww = x_ncdhw.shape
    hw = hh * ww
    nd = n * d
    m = nd * hw
    cp = params["w1"].shape[0]
    cbp = params["w1"].shape[1]
    tm = _pick_block_rows(nd, hw)

    # NCDHW -> channels-last rows + lane padding (layout plumbing at the module boundary).
    # TODO(synk): keep the whole UNet channels-last so these transposes disappear.
    x_rows = jnp.transpose(x_ncdhw, (0, 2, 3, 4, 1)).reshape(m, c)
    x_rows = jnp.pad(x_rows, ((0, 0), (0, cp - c)))              # (m, cp) f32; also the residual

    # conv1 (1x1x1): in-kernel bf16 cast, bf16 raw out + BN partial stats.
    h1_raw, st1 = matmul_bn_stats(x_rows, params["w1"], tm)
    scale1, shift1 = _fold_bn(st1, m, params["g1"], params["b1"])

    # conv2 (3x3x3, pad=1): BN1 + LeakyReLU fused on the inputs, depth taps packed along K.
    h2_raw, st2 = conv3x3x3_bn_stats(h1_raw.reshape(nd, hw, cbp), scale1, shift1,
                                     params["w2"], _border_masks(hh, ww), (n, d, hh, ww))
    scale2, shift2 = _fold_bn(st2, m, params["g2"], params["b2"])

    # conv3 (1x1x1): BN2 + LeakyReLU fused on the input.
    h3_raw, st3 = matmul_bn_stats(h2_raw.reshape(m, cbp), params["w3"], tm,
                                  scale=scale2, shift=shift2)
    scale3, shift3 = _fold_bn(st3, m, params["g3"], params["b3"])

    # BN3 + LeakyReLU + residual add.
    out_rows = bn_act_residual(h3_raw, scale3, shift3, x_rows, tm)

    out = out_rows[:, :c].reshape(n, d, hh, ww, c)
    return jnp.transpose(out, (0, 4, 1, 2, 3))


# ---------------------------------------------------------------------------
# Parameter construction (mirrors module __init__ shapes; lane-padded matmul layouts).
# ---------------------------------------------------------------------------
def make_params(key, in_channels):
    cb = max(in_channels // 4, 1)
    cp = _round_up(in_channels, LANE)
    cbp = _round_up(cb, LANE)
    k1, k2, k3 = jax.random.split(key, 3)
    # PyTorch Conv3d weights: (Cout, Cin, kD, kH, kW), bias=False.
    w1_t = jax.random.normal(k1, (cb, in_channels, 1, 1, 1), jnp.float32) * 0.1
    w2_t = jax.random.normal(k2, (cb, cb, 3, 3, 3), jnp.float32) * 0.1
    w3_t = jax.random.normal(k3, (in_channels, cb, 1, 1, 1), jnp.float32) * 0.1

    # Lane-padded matmul layouts (zero padding), bf16 for the MXU.
    w1 = jnp.zeros((cp, cbp), jnp.float32).at[:in_channels, :cb].set(
        jnp.transpose(w1_t.reshape(cb, in_channels), (1, 0)))
    # conv2: tap index t = kh*3 + kw ; K rows ordered (kd, cin) so the kernel's
    # [prev | cur | next] lane-concat lines up with kd = 0, 1, 2.
    w2_perm = jnp.transpose(w2_t, (3, 4, 2, 1, 0))               # (kh, kw, kd, cin, cout)
    w2 = jnp.zeros((3, 3, 3, cbp, cbp), jnp.float32).at[:, :, :, :cb, :cb].set(w2_perm)
    w2 = w2.reshape(9, 3 * cbp, cbp)
    w3 = jnp.zeros((cbp, cp), jnp.float32).at[:cb, :in_channels].set(
        jnp.transpose(w3_t.reshape(in_channels, cb), (1, 0)))
    return {
        "w1_t": w1_t, "w2_t": w2_t, "w3_t": w3_t,
        "w1": w1.astype(jnp.bfloat16), "w2": w2.astype(jnp.bfloat16),
        "w3": w3.astype(jnp.bfloat16),
        # BatchNorm3d init: weight=1, bias=0 (padded channels are harmless: their h is 0).
        "g1": jnp.ones((cbp,), jnp.float32), "b1": jnp.zeros((cbp,), jnp.float32),
        "g2": jnp.ones((cbp,), jnp.float32), "b2": jnp.zeros((cbp,), jnp.float32),
        "g3": jnp.ones((cp,), jnp.float32), "b3": jnp.zeros((cp,), jnp.float32),
    }


# ---------------------------------------------------------------------------
# Pure-JAX reference (independent conv lowering; bf16 matmul inputs, f32 BN epilogues).
# ---------------------------------------------------------------------------
def _ref_conv3d(x, w, padding):
    return lax.conv_general_dilated(
        x.astype(jnp.bfloat16), w.astype(jnp.bfloat16),
        window_strides=(1, 1, 1), padding=[(padding, padding)] * 3,
        dimension_numbers=("NCDHW", "OIDHW", "NCDHW"),
        preferred_element_type=jnp.float32)


def _ref_bn_lrelu(x):
    mean = jnp.mean(x, axis=(0, 2, 3, 4), keepdims=True)
    var = jnp.mean((x - mean) ** 2, axis=(0, 2, 3, 4), keepdims=True)
    xn = (x - mean) * lax.rsqrt(var + EPS)
    return jnp.where(xn > 0, xn, NEG_SLOPE * xn)


def reference_forward(x, params):
    h1 = _ref_bn_lrelu(_ref_conv3d(x, params["w1_t"], 0))
    h2 = _ref_bn_lrelu(_ref_conv3d(h1, params["w2_t"], 1))
    h3 = _ref_bn_lrelu(_ref_conv3d(h2, params["w3_t"], 0))
    return h3 + x


# ---------------------------------------------------------------------------
if __name__ == "__main__":
    N, C, D, H, W = 2, 16, 8, 8, 8   # in_channels=16 -> bottleneck=4
    key = jax.random.PRNGKey(0)
    kx, kp = jax.random.split(key)
    x = jax.random.normal(kx, (N, C, D, H, W), jnp.float32)
    params = make_params(kp, C)

    fwd = jax.jit(bottleneck_block)
    out = jax.block_until_ready(fwd(x, params))

    ref = jax.block_until_ready(reference_forward(x, params))
    # Tolerance reflects the bf16 storage of the pre-BN intermediates (the reference keeps
    # them in f32); BN statistics themselves are accumulated in f32 in both paths.
    np.testing.assert_allclose(np.asarray(out), np.asarray(ref), rtol=5e-2, atol=5e-2)

    assert out.shape == x.shape and out.dtype == jnp.float32
    print("KERNEL_OK")
</pallas_src>

<mosaic_0001>
module attributes {stable_mosaic.version = 11 : i64} {
  func.func @_mm_stats_kernel(%arg0: i32, %arg1: memref<512x128xf32, #tpu.memory_space<vmem>>, %arg2: memref<128x128xbf16, #tpu.memory_space<vmem>>, %arg3: memref<512x128xbf16, #tpu.memory_space<vmem>>, %arg4: memref<1x2x128xf32, #tpu.memory_space<vmem>>) attributes {dimension_semantics = [#tpu.dimension_semantics<parallel>], iteration_bounds = array<i64: 2>, scalar_prefetch = 0 : i64, scratch_operands = 0 : i64, tpu.core_type = #tpu.core_type<tc>, window_params = [{transform_indices = @transform_0, window_bounds = array<i64: 512, 128>}, {pipeline_mode = #tpu.pipeline_mode<synchronous>, transform_indices = @transform_1, window_bounds = array<i64: 128, 128>}, {transform_indices = @transform_2, window_bounds = array<i64: 512, 128>}, {transform_indices = @transform_3, window_bounds = array<i64: 1, 2, 128>}]} {
    %c0 = arith.constant 0 : index
    %c0_0 = arith.constant 0 : index
    %0 = vector.load %arg1[%c0, %c0_0] : memref<512x128xf32, #tpu.memory_space<vmem>>, vector<512x128xf32>
    %1 = arith.truncf %0 : vector<512x128xf32> to vector<512x128xbf16>
    %c0_1 = arith.constant 0 : index
    %c0_2 = arith.constant 0 : index
    %2 = vector.load %arg2[%c0_1, %c0_2] : memref<128x128xbf16, #tpu.memory_space<vmem>>, vector<128x128xbf16>
    %cst = arith.constant dense<0.000000e+00> : vector<512x128xf32>
    %3 = tpu.matmul %1, %2, %cst {dimension_numbers = #tpu.dot_dimension_numbers<[1], [0], [0], [1], [0, 0, 1, 1], [], []>} : vector<512x128xbf16>, vector<128x128xbf16>, vector<512x128xf32> -> vector<512x128xf32>
    %4 = arith.truncf %3 : vector<512x128xf32> to vector<512x128xbf16>
    %c0_3 = arith.constant 0 : index
    %c0_4 = arith.constant 0 : index
    %5 = vector.load %arg3[%c0_3, %c0_4] : memref<512x128xbf16, #tpu.memory_space<vmem>>, vector<512x128xbf16>
    tpu.vector_store %arg3[%c0_3, %c0_4], %4 {strides = array<i32>} : memref<512x128xbf16, #tpu.memory_space<vmem>>, vector<512x128xbf16>,
    %cst_5 = arith.constant dense<0.000000e+00> : vector<128xf32>
    %6 = vector.multi_reduction <add>, %3, %cst_5 [0] : vector<512x128xf32> to vector<128xf32>
    %7 = vector.shape_cast %6 : vector<128xf32> to vector<1x128xf32>
    %8 = arith.mulf %3, %3 : vector<512x128xf32>
    %cst_6 = arith.constant dense<0.000000e+00> : vector<128xf32>
    %9 = vector.multi_reduction <add>, %8, %cst_6 [0] : vector<512x128xf32> to vector<128xf32>
    %10 = vector.shape_cast %9 : vector<128xf32> to vector<1x128xf32>
    %11 = tpu.concatenate %7, %10 in 0 : vector<1x128xf32>, vector<1x128xf32> -> vector<2x128xf32>
    %12 = vector.shape_cast %11 : vector<2x128xf32> to vector<1x2x128xf32>
    %c0_7 = arith.constant 0 : index
    %c0_8 = arith.constant 0 : index
    %c0_9 = arith.constant 0 : index
    %13 = vector.load %arg4[%c0_7, %c0_8, %c0_9] : memref<1x2x128xf32, #tpu.memory_space<vmem>>, vector<1x2x128xf32>
    tpu.vector_store %arg4[%c0_7, %c0_8, %c0_9], %12 {strides = array<i32>} : memref<1x2x128xf32, #tpu.memory_space<vmem>>, vector<1x2x128xf32>,
    return
  }
  func.func @transform_0(%arg0: i32) -> (i32, i32) {
    %c0_i32 = arith.constant 0 : i32
    %c0_i32_0 = arith.constant 0 : i32
    return %arg0, %c0_i32 : i32, i32
  }
  func.func @transform_1(%arg0: i32) -> (i32, i32) {
    %c0_i32 = arith.constant 0 : i32
    %c0_i32_0 = arith.constant 0 : i32
    %c0_i32_1 = arith.constant 0 : i32
    return %c0_i32, %c0_i32_0 : i32, i32
  }
  func.func @transform_2(%arg0: i32) -> (i32, i32) {
    %c0_i32 = arith.constant 0 : i32
    %c0_i32_0 = arith.constant 0 : i32
    return %arg0, %c0_i32 : i32, i32
  }
  func.func @transform_3(%arg0: i32) -> (i32, i32, i32) {
    %c0_i32 = arith.constant 0 : i32
    %c0_i32_0 = arith.constant 0 : i32
    %c0_i32_1 = arith.constant 0 : i32
    return %arg0, %c0_i32, %c0_i32_0 : i32, i32, i32
  }
}

module attributes {stable_mosaic.version = 11 : i64} {
  func.func @_act_mm_stats_kernel(%arg0: i32, %arg1: memref<512x128xbf16, #tpu.memory_space<vmem>>, %arg2: memref<1x128xf32, #tpu.memory_space<vmem>>, %arg3: memref<1x128xf32, #tpu.memory_space<vmem>>, %arg4: memref<128x128xbf16, #tpu.memory_space<vmem>>, %arg5: memref<512x128xbf16, #tpu.memory_space<vmem>>, %arg6: memref<1x2x128xf32, #tpu.memory_space<vmem>>) attributes {dimension_semantics = [#tpu.dimension_semantics<parallel>], iteration_bounds = array<i64: 2>, scalar_prefetch = 0 : i64, scratch_operands = 0 : i64, tpu.core_type = #tpu.core_type<tc>, window_params = [{transform_indices = @transform_0, window_bounds = array<i64: 512, 128>}, {pipeline_mode = #tpu.pipeline_mode<synchronous>, transform_indices = @transform_1, window_bounds = array<i64: 1, 128>}, {pipeline_mode = #tpu.pipeline_mode<synchronous>, transform_indices = @transform_2, window_bounds = array<i64: 1, 128>}, {pipeline_mode = #tpu.pipeline_mode<synchronous>, transform_indices = @transform_3, window_bounds = array<i64: 128, 128>}, {transform_indices = @transform_4, window_bounds = array<i64: 512, 128>}, {transform_indices = @transform_5, window_bounds = array<i64: 1, 2, 128>}]} {
    %c0 = arith.constant 0 : index
    %c0_0 = arith.constant 0 : index
    %0 = vector.load %arg1[%c0, %c0_0] : memref<512x128xbf16, #tpu.memory_space<vmem>>, vector<512x128xbf16>
    %1 = arith.extf %0 : vector<512x128xbf16> to vector<512x128xf32>
    %c0_1 = arith.constant 0 : index
    %c0_2 = arith.constant 0 : index
    %2 = vector.load %arg2[%c0_1, %c0_2] : memref<1x128xf32, #tpu.memory_space<vmem>>, vector<1x128xf32>
    %3 = vector.broadcast %2 : vector<1x128xf32> to vector<512x128xf32>
    %4 = arith.mulf %1, %3 : vector<512x128xf32>
    %c0_3 = arith.constant 0 : index
    %c0_4 = arith.constant 0 : index
    %5 = vector.load %arg3[%c0_3, %c0_4] : memref<1x128xf32, #tpu.memory_space<vmem>>, vector<1x128xf32>
    %6 = vector.broadcast %5 : vector<1x128xf32> to vector<512x128xf32>
    %7 = arith.addf %4, %6 : vector<512x128xf32>
    %cst = arith.constant 0.000000e+00 : f32
    %8 = vector.broadcast %cst : f32 to vector<512x128xf32>
    %9 = arith.cmpf ogt, %7, %8 : vector<512x128xf32>
    %cst_5 = arith.constant 0.00999999977 : f32
    %10 = vector.broadcast %cst_5 : f32 to vector<512x128xf32>
    %11 = arith.mulf %10, %7 : vector<512x128xf32>
    %12 = arith.select %9, %7, %11 : vector<512x128xi1>, vector<512x128xf32>
    %13 = arith.truncf %12 : vector<512x128xf32> to vector<512x128xbf16>
    %c0_6 = arith.constant 0 : index
    %c0_7 = arith.constant 0 : index
    %14 = vector.load %arg4[%c0_6, %c0_7] : memref<128x128xbf16, #tpu.memory_space<vmem>>, vector<128x128xbf16>
    %cst_8 = arith.constant dense<0.000000e+00> : vector<512x128xf32>
    %15 = tpu.matmul %13, %14, %cst_8 {dimension_numbers = #tpu.dot_dimension_numbers<[1], [0], [0], [1], [0, 0, 1, 1], [], []>} : vector<512x128xbf16>, vector<128x128xbf16>, vector<512x128xf32> -> vector<512x128xf32>
    %16 = arith.truncf %15 : vector<512x128xf32> to vector<512x128xbf16>
    %c0_9 = arith.constant 0 : index
    %c0_10 = arith.constant 0 : index
    %17 = vector.load %arg5[%c0_9, %c0_10] : memref<512x128xbf16, #tpu.memory_space<vmem>>, vector<512x128xbf16>
    tpu.vector_store %arg5[%c0_9, %c0_10], %16 {strides = array<i32>} : memref<512x128xbf16, #tpu.memory_space<vmem>>, vector<512x128xbf16>,
    %cst_11 = arith.constant dense<0.000000e+00> : vector<128xf32>
    %18 = vector.multi_reduction <add>, %15, %cst_11 [0] : vector<512x128xf32> to vector<128xf32>
    %19 = vector.shape_cast %18 : vector<128xf32> to vector<1x128xf32>
    %20 = arith.mulf %15, %15 : vector<512x128xf32>
    %cst_12 = arith.constant dense<0.000000e+00> : vector<128xf32>
    %21 = vector.multi_reduction <add>, %20, %cst_12 [0] : vector<512x128xf32> to vector<128xf32>
    %22 = vector.shape_cast %21 : vector<128xf32> to vector<1x128xf32>
    %23 = tpu.concatenate %19, %22 in 0 : vector<1x128xf32>, vector<1x128xf32> -> vector<2x128xf32>
    %24 = vector.shape_cast %23 : vector<2x128xf32> to vector<1x2x128xf32>
    %c0_13 = arith.constant 0 : index
    %c0_14 = arith.constant 0 : index
    %c0_15 = arith.constant 0 : index
    %25 = vector.load %arg6[%c0_13, %c0_14, %c0_15] : memref<1x2x128xf32, #tpu.memory_space<vmem>>, vector<1x2x128xf32>
    tpu.vector_store %arg6[%c0_13, %c0_14, %c0_15], %24 {strides = array<i32>} : memref<1x2x128xf32, #tpu.memory_space<vmem>>, vector<1x2x128xf32>,
    return
  }
  func.func @transform_0(%arg0: i32) -> (i32, i32) {
    %c0_i32 = arith.constant 0 : i32
    %c0_i32_0 = arith.constant 0 : i32
    return %arg0, %c0_i32 : i32, i32
  }
  func.func @transform_1(%arg0: i32) -> (i32, i32) {
    %c0_i32 = arith.constant 0 : i32
    %c0_i32_0 = arith.constant 0 : i32
    %c0_i32_1 = arith.constant 0 : i32
    return %c0_i32, %c0_i32_0 : i32, i32
  }
  func.func @transform_2(%arg0: i32) -> (i32, i32) {
    %c0_i32 = arith.constant 0 : i32
    %c0_i32_0 = arith.constant 0 : i32
    %c0_i32_1 = arith.constant 0 : i32
    return %c0_i32, %c0_i32_0 : i32, i32
  }
  func.func @transform_3(%arg0: i32) -> (i32, i32) {
    %c0_i32 = arith.constant 0 : i32
    %c0_i32_0 = arith.constant 0 : i32
    %c0_i32_1 = arith.constant 0 : i32
    return %c0_i32, %c0_i32_0 : i32, i32
  }
  func.func @transform_4(%arg0: i32) -> (i32, i32) {
    %c0_i32 = arith.constant 0 : i32
    %c0_i32_0 = arith.constant 0 : i32
    return %arg0, %c0_i32 : i32, i32
  }
  func.func @transform_5(%arg0: i32) -> (i32, i32, i32) {
    %c0_i32 = arith.constant 0 : i32
    %c0_i32_0 = arith.constant 0 : i32
    %c0_i32_1 = arith.constant 0 : i32
    return %arg0, %c0_i32, %c0_i32_0 : i32, i32, i32
  }
}

module attributes {stable_mosaic.version = 11 : i64} {
  func.func @_conv2_kernel(%arg0: i32, %arg1: i32, %arg2: memref<1x64x128xbf16, #tpu.memory_space<vmem>>, %arg3: memref<1x64x128xbf16, #tpu.memory_space<vmem>>, %arg4: memref<1x64x128xbf16, #tpu.memory_space<vmem>>, %arg5: memref<1x128xf32, #tpu.memory_space<vmem>>, %arg6: memref<1x128xf32, #tpu.memory_space<vmem>>, %arg7: memref<9x384x128xbf16, #tpu.memory_space<vmem>>, %arg8: memref<9x64x1xf32, #tpu.memory_space<vmem>>, %arg9: memref<1x64x128xbf16, #tpu.memory_space<vmem>>, %arg10: memref<1x2x128xf32, #tpu.memory_space<vmem>>) attributes {dimension_semantics = [#tpu.dimension_semantics<parallel>, #tpu.dimension_semantics<parallel>], iteration_bounds = array<i64: 2, 8>, scalar_prefetch = 0 : i64, scratch_operands = 0 : i64, tpu.core_type = #tpu.core_type<tc>, window_params = [{transform_indices = @transform_0, window_bounds = array<i64: 1, 64, 128>}, {transform_indices = @transform_1, window_bounds = array<i64: 1, 64, 128>}, {transform_indices = @transform_2, window_bounds = array<i64: 1, 64, 128>}, {pipeline_mode = #tpu.pipeline_mode<synchronous>, transform_indices = @transform_3, window_bounds = array<i64: 1, 128>}, {pipeline_mode = #tpu.pipeline_mode<synchronous>, transform_indices = @transform_4, window_bounds = array<i64: 1, 128>}, {pipeline_mode = #tpu.pipeline_mode<synchronous>, transform_indices = @transform_5, window_bounds = array<i64: 9, 384, 128>}, {pipeline_mode = #tpu.pipeline_mode<synchronous>, transform_indices = @transform_6, window_bounds = array<i64: 9, 64, 1>}, {transform_indices = @transform_7, window_bounds = array<i64: 1, 64, 128>}, {transform_indices = @transform_8, window_bounds = array<i64: 1, 2, 128>}]} {
    %c0 = arith.constant 0 : index
    %c0_0 = arith.constant 0 : index
    %0 = vector.load %arg5[%c0, %c0_0] : memref<1x128xf32, #tpu.memory_space<vmem>>, vector<1x128xf32>
    %c0_1 = arith.constant 0 : index
    %c0_2 = arith.constant 0 : index
    %1 = vector.load %arg6[%c0_1, %c0_2] : memref<1x128xf32, #tpu.memory_space<vmem>>, vector<1x128xf32>
    %c0_i32 = arith.constant 0 : i32
    %2 = arith.cmpi sgt, %arg1, %c0_i32 : i32
    %3 = arith.extui %2 : i1 to i32
    %4 = arith.sitofp %3 : i32 to f32
    %c0_3 = arith.constant 0 : index
    %c0_4 = arith.constant 0 : index
    %c0_5 = arith.constant 0 : index
    %5 = vector.load %arg2[%c0_3, %c0_4, %c0_5] : memref<1x64x128xbf16, #tpu.memory_space<vmem>>, vector<1x64x128xbf16>
    %6 = vector.shape_cast %5 : vector<1x64x128xbf16> to vector<64x128xbf16>
    %7 = arith.extf %6 : vector<64x128xbf16> to vector<64x128xf32>
    %8 = vector.broadcast %0 : vector<1x128xf32> to vector<64x128xf32>
    %9 = arith.mulf %7, %8 : vector<64x128xf32>
    %10 = vector.broadcast %1 : vector<1x128xf32> to vector<64x128xf32>
    %11 = arith.addf %9, %10 : vector<64x128xf32>
    %cst = arith.constant 0.000000e+00 : f32
    %12 = vector.broadcast %cst : f32 to vector<64x128xf32>
    %13 = arith.cmpf ogt, %11, %12 : vector<64x128xf32>
    %cst_6 = arith.constant 0.00999999977 : f32
    %14 = vector.broadcast %cst_6 : f32 to vector<64x128xf32>
    %15 = arith.mulf %14, %11 : vector<64x128xf32>
    %16 = arith.select %13, %11, %15 : vector<64x128xi1>, vector<64x128xf32>
    %17 = vector.broadcast %4 : f32 to vector<64x128xf32>
    %18 = arith.mulf %16, %17 : vector<64x128xf32>
    %19 = arith.truncf %18 : vector<64x128xf32> to vector<64x128xbf16>
    %c0_7 = arith.constant 0 : index
    %c0_8 = arith.constant 0 : index
    %c0_9 = arith.constant 0 : index
    %20 = vector.load %arg3[%c0_7, %c0_8, %c0_9] : memref<1x64x128xbf16, #tpu.memory_space<vmem>>, vector<1x64x128xbf16>
    %21 = vector.shape_cast %20 : vector<1x64x128xbf16> to vector<64x128xbf16>
    %22 = arith.extf %21 : vector<64x128xbf16> to vector<64x128xf32>
    %23 = vector.broadcast %0 : vector<1x128xf32> to vector<64x128xf32>
    %24 = arith.mulf %22, %23 : vector<64x128xf32>
    %25 = vector.broadcast %1 : vector<1x128xf32> to vector<64x128xf32>
    %26 = arith.addf %24, %25 : vector<64x128xf32>
    %cst_10 = arith.constant 0.000000e+00 : f32
    %27 = vector.broadcast %cst_10 : f32 to vector<64x128xf32>
    %28 = arith.cmpf ogt, %26, %27 : vector<64x128xf32>
    %cst_11 = arith.constant 0.00999999977 : f32
    %29 = vector.broadcast %cst_11 : f32 to vector<64x128xf32>
    %30 = arith.mulf %29, %26 : vector<64x128xf32>
    %31 = arith.select %28, %26, %30 : vector<64x128xi1>, vector<64x128xf32>
    %32 = arith.truncf %31 : vector<64x128xf32> to vector<64x128xbf16>
    %c7_i32 = arith.constant 7 : i32
    %33 = arith.cmpi slt, %arg1, %c7_i32 : i32
    %34 = arith.extui %33 : i1 to i32
    %35 = arith.sitofp %34 : i32 to f32
    %c0_12 = arith.constant 0 : index
    %c0_13 = arith.constant 0 : index
    %c0_14 = arith.constant 0 : index
    %36 = vector.load %arg4[%c0_12, %c0_13, %c0_14] : memref<1x64x128xbf16, #tpu.memory_space<vmem>>, vector<1x64x128xbf16>
    %37 = vector.shape_cast %36 : vector<1x64x128xbf16> to vector<64x128xbf16>
    %38 = arith.extf %37 : vector<64x128xbf16> to vector<64x128xf32>
    %39 = vector.broadcast %0 : vector<1x128xf32> to vector<64x128xf32>
    %40 = arith.mulf %38, %39 : vector<64x128xf32>
    %41 = vector.broadcast %1 : vector<1x128xf32> to vector<64x128xf32>
    %42 = arith.addf %40, %41 : vector<64x128xf32>
    %cst_15 = arith.constant 0.000000e+00 : f32
    %43 = vector.broadcast %cst_15 : f32 to vector<64x128xf32>
    %44 = arith.cmpf ogt, %42, %43 : vector<64x128xf32>
    %cst_16 = arith.constant 0.00999999977 : f32
    %45 = vector.broadcast %cst_16 : f32 to vector<64x128xf32>
    %46 = arith.mulf %45, %42 : vector<64x128xf32>
    %47 = arith.select %44, %42, %46 : vector<64x128xi1>, vector<64x128xf32>
    %48 = vector.broadcast %35 : f32 to vector<64x128xf32>
    %49 = arith.mulf %47, %48 : vector<64x128xf32>
    %50 = arith.truncf %49 : vector<64x128xf32> to vector<64x128xbf16>
    %51 = tpu.concatenate %19, %32, %50 in 1 : vector<64x128xbf16>, vector<64x128xbf16>, vector<64x128xbf16> -> vector<64x384xbf16>
    %cst_17 = arith.constant 0.000000e+00 : f32
    %52 = vector.broadcast %cst_17 : f32 to vector<64x128xf32>
    %53 = vector.extract_strided_slice %51 {offsets = [55, 0], sizes = [9, 384], strides = [1, 1]} : vector<64x384xbf16> to vector<9x384xbf16>
    %54 = vector.extract_strided_slice %51 {offsets = [0, 0], sizes = [55, 384], strides = [1, 1]} : vector<64x384xbf16> to vector<55x384xbf16>
    %55 = tpu.concatenate %53, %54 in 0 : vector<9x384xbf16>, vector<55x384xbf16> -> vector<64x384xbf16>
    %c0_18 = arith.constant 0 : index
    %c0_19 = arith.constant 0 : index
    %c0_20 = arith.constant 0 : index
    %56 = vector.load %arg8[%c0_18, %c0_19, %c0_20] : memref<9x64x1xf32, #tpu.memory_space<vmem>>, vector<1x64x1xf32>
    %57 = vector.shape_cast %56 : vector<1x64x1xf32> to vector<64x1xf32>
    %cst_21 = arith.constant 5.000000e-01 : f32
    %58 = vector.broadcast %cst_21 : f32 to vector<64x1xf32>
    %59 = arith.cmpf ogt, %57, %58 : vector<64x1xf32>
    %cst_22 = arith.constant 0.000000e+00 : bf16
    %60 = vector.broadcast %cst_22 : bf16 to vector<64x384xbf16>
    %61 = vector.shape_cast %59 : vector<64x1xi1> to vector<64x1xi1>
    %62 = vector.broadcast %61 : vector<64x1xi1> to vector<64x384xi1>
    %63 = arith.select %62, %55, %60 : vector<64x384xi1>, vector<64x384xbf16>
    %c0_23 = arith.constant 0 : index
    %c0_24 = arith.constant 0 : index
    %c0_25 = arith.constant 0 : index
    %64 = vector.load %arg7[%c0_23, %c0_24, %c0_25] : memref<9x384x128xbf16, #tpu.memory_space<vmem>>, vector<1x384x128xbf16>
    %65 = vector.shape_cast %64 : vector<1x384x128xbf16> to vector<384x128xbf16>
    %cst_26 = arith.constant dense<0.000000e+00> : vector<64x128xf32>
    %66 = tpu.matmul %63, %65, %cst_26 {dimension_numbers = #tpu.dot_dimension_numbers<[1], [0], [0], [1], [0, 0, 1, 1], [], []>} : vector<64x384xbf16>, vector<384x128xbf16>, vector<64x128xf32> -> vector<64x128xf32>
    %67 = arith.addf %52, %66 : vector<64x128xf32>
    %68 = vector.extract_strided_slice %51 {offsets = [56, 0], sizes = [8, 384], strides = [1, 1]} : vector<64x384xbf16> to vector<8x384xbf16>
    %69 = vector.extract_strided_slice %51 {offsets = [0, 0], sizes = [56, 384], strides = [1, 1]} : vector<64x384xbf16> to vector<56x384xbf16>
    %70 = tpu.concatenate %68, %69 in 0 : vector<8x384xbf16>, vector<56x384xbf16> -> vector<64x384xbf16>
    %c1 = arith.constant 1 : index
    %c0_27 = arith.constant 0 : index
    %c0_28 = arith.constant 0 : index
    %71 = vector.load %arg8[%c1, %c0_27, %c0_28] : memref<9x64x1xf32, #tpu.memory_space<vmem>>, vector<1x64x1xf32>
    %72 = vector.shape_cast %71 : vector<1x64x1xf32> to vector<64x1xf32>
    %cst_29 = arith.constant 5.000000e-01 : f32
    %73 = vector.broadcast %cst_29 : f32 to vector<64x1xf32>
    %74 = arith.cmpf ogt, %72, %73 : vector<64x1xf32>
    %cst_30 = arith.constant 0.000000e+00 : bf16
    %75 = vector.broadcast %cst_30 : bf16 to vector<64x384xbf16>
    %76 = vector.shape_cast %74 : vector<64x1xi1> to vector<64x1xi1>
    %77 = vector.broadcast %76 : vector<64x1xi1> to vector<64x384xi1>
    %78 = arith.select %77, %70, %75 : vector<64x384xi1>, vector<64x384xbf16>
    %c1_31 = arith.constant 1 : index
    %c0_32 = arith.constant 0 : index
    %c0_33 = arith.constant 0 : index
    %79 = vector.load %arg7[%c1_31, %c0_32, %c0_33] : memref<9x384x128xbf16, #tpu.memory_space<vmem>>, vector<1x384x128xbf16>
    %80 = vector.shape_cast %79 : vector<1x384x128xbf16> to vector<384x128xbf16>
    %cst_34 = arith.constant dense<0.000000e+00> : vector<64x128xf32>
    %81 = tpu.matmul %78, %80, %cst_34 {dimension_numbers = #tpu.dot_dimension_numbers<[1], [0], [0], [1], [0, 0, 1, 1], [], []>} : vector<64x384xbf16>, vector<384x128xbf16>, vector<64x128xf32> -> vector<64x128xf32>
    %82 = arith.addf %67, %81 : vector<64x128xf32>
    %83 = vector.extract_strided_slice %51 {offsets = [57, 0], sizes = [7, 384], strides = [1, 1]} : vector<64x384xbf16> to vector<7x384xbf16>
    %84 = vector.extract_strided_slice %51 {offsets = [0, 0], sizes = [57, 384], strides = [1, 1]} : vector<64x384xbf16> to vector<57x384xbf16>
    %85 = tpu.concatenate %83, %84 in 0 : vector<7x384xbf16>, vector<57x384xbf16> -> vector<64x384xbf16>
    %c2 = arith.constant 2 : index
    %c0_35 = arith.constant 0 : index
    %c0_36 = arith.constant 0 : index
    %86 = vector.load %arg8[%c2, %c0_35, %c0_36] : memref<9x64x1xf32, #tpu.memory_space<vmem>>, vector<1x64x1xf32>
    %87 = vector.shape_cast %86 : vector<1x64x1xf32> to vector<64x1xf32>
    %cst_37 = arith.constant 5.000000e-01 : f32
    %88 = vector.broadcast %cst_37 : f32 to vector<64x1xf32>
    %89 = arith.cmpf ogt, %87, %88 : vector<64x1xf32>
    %cst_38 = arith.constant 0.000000e+00 : bf16
    %90 = vector.broadcast %cst_38 : bf16 to vector<64x384xbf16>
    %91 = vector.shape_cast %89 : vector<64x1xi1> to vector<64x1xi1>
    %92 = vector.broadcast %91 : vector<64x1xi1> to vector<64x384xi1>
    %93 = arith.select %92, %85, %90 : vector<64x384xi1>, vector<64x384xbf16>
    %c2_39 = arith.constant 2 : index
    %c0_40 = arith.constant 0 : index
    %c0_41 = arith.constant 0 : index
    %94 = vector.load %arg7[%c2_39, %c0_40, %c0_41] : memref<9x384x128xbf16, #tpu.memory_space<vmem>>, vector<1x384x128xbf16>
    %95 = vector.shape_cast %94 : vector<1x384x128xbf16> to vector<384x128xbf16>
    %cst_42 = arith.constant dense<0.000000e+00> : vector<64x128xf32>
    %96 = tpu.matmul %93, %95, %cst_42 {dimension_numbers = #tpu.dot_dimension_numbers<[1], [0], [0], [1], [0, 0, 1, 1], [], []>} : vector<64x384xbf16>, vector<384x128xbf16>, vector<64x128xf32> -> vector<64x128xf32>
    %97 = arith.addf %82, %96 : vector<64x128xf32>
    %98 = vector.extract_strided_slice %51 {offsets = [63, 0], sizes = [1, 384], strides = [1, 1]} : vector<64x384xbf16> to vector<1x384xbf16>
    %99 = vector.extract_strided_slice %51 {offsets = [0, 0], sizes = [63, 384], strides = [1, 1]} : vector<64x384xbf16> to vector<63x384xbf16>
    %100 = tpu.concatenate %98, %99 in 0 : vector<1x384xbf16>, vector<63x384xbf16> -> vector<64x384xbf16>
    %c3 = arith.constant 3 : index
    %c0_43 = arith.constant 0 : index
    %c0_44 = arith.constant 0 : index
    %101 = vector.load %arg8[%c3, %c0_43, %c0_44] : memref<9x64x1xf32, #tpu.memory_space<vmem>>, vector<1x64x1xf32>
    %102 = vector.shape_cast %101 : vector<1x64x1xf32> to vector<64x1xf32>
    %cst_45 = arith.constant 5.000000e-01 : f32
    %103 = vector.broadcast %cst_45 : f32 to vector<64x1xf32>
    %104 = arith.cmpf ogt, %102, %103 : vector<64x1xf32>
    %cst_46 = arith.constant 0.000000e+00 : bf16
    %105 = vector.broadcast %cst_46 : bf16 to vector<64x384xbf16>
    %106 = vector.shape_cast %104 : vector<64x1xi1> to vector<64x1xi1>
    %107 = vector.broadcast %106 : vector<64x1xi1> to vector<64x384xi1>
    %108 = arith.select %107, %100, %105 : vector<64x384xi1>, vector<64x384xbf16>
    %c3_47 = arith.constant 3 : index
    %c0_48 = arith.constant 0 : index
    %c0_49 = arith.constant 0 : index
    %109 = vector.load %arg7[%c3_47, %c0_48, %c0_49] : memref<9x384x128xbf16, #tpu.memory_space<vmem>>, vector<1x384x128xbf16>
    %110 = vector.shape_cast %109 : vector<1x384x128xbf16> to vector<384x128xbf16>
    %cst_50 = arith.constant dense<0.000000e+00> : vector<64x128xf32>
    %111 = tpu.matmul %108, %110, %cst_50 {dimension_numbers = #tpu.dot_dimension_numbers<[1], [0], [0], [1], [0, 0, 1, 1], [], []>} : vector<64x384xbf16>, vector<384x128xbf16>, vector<64x128xf32> -> vector<64x128xf32>
    %112 = arith.addf %97, %111 : vector<64x128xf32>
    %c4 = arith.constant 4 : index
    %c0_51 = arith.constant 0 : index
    %c0_52 = arith.constant 0 : index
    %113 = vector.load %arg8[%c4, %c0_51, %c0_52] : memref<9x64x1xf32, #tpu.memory_space<vmem>>, vector<1x64x1xf32>
    %114 = vector.shape_cast %113 : vector<1x64x1xf32> to vector<64x1xf32>
    %cst_53 = arith.constant 5.000000e-01 : f32
    %115 = vector.broadcast %cst_53 : f32 to vector<64x1xf32>
    %116 = arith.cmpf ogt, %114, %115 : vector<64x1xf32>
    %cst_54 = arith.constant 0.000000e+00 : bf16
    %117 = vector.broadcast %cst_54 : bf16 to vector<64x384xbf16>
    %118 = vector.shape_cast %116 : vector<64x1xi1> to vector<64x1xi1>
    %119 = vector.broadcast %118 : vector<64x1xi1> to vector<64x384xi1>
    %120 = arith.select %119, %51, %117 : vector<64x384xi1>, vector<64x384xbf16>
    %c4_55 = arith.constant 4 : index
    %c0_56 = arith.constant 0 : index
    %c0_57 = arith.constant 0 : index
    %121 = vector.load %arg7[%c4_55, %c0_56, %c0_57] : memref<9x384x128xbf16, #tpu.memory_space<vmem>>, vector<1x384x128xbf16>
    %122 = vector.shape_cast %121 : vector<1x384x128xbf16> to vector<384x128xbf16>
    %cst_58 = arith.constant dense<0.000000e+00> : vector<64x128xf32>
    %123 = tpu.matmul %120, %122, %cst_58 {dimension_numbers = #tpu.dot_dimension_numbers<[1], [0], [0], [1], [0, 0, 1, 1], [], []>} : vector<64x384xbf16>, vector<384x128xbf16>, vector<64x128xf32> -> vector<64x128xf32>
    %124 = arith.addf %112, %123 : vector<64x128xf32>
    %125 = vector.extract_strided_slice %51 {offsets = [1, 0], sizes = [63, 384], strides = [1, 1]} : vector<64x384xbf16> to vector<63x384xbf16>
    %126 = vector.extract_strided_slice %51 {offsets = [0, 0], sizes = [1, 384], strides = [1, 1]} : vector<64x384xbf16> to vector<1x384xbf16>
    %127 = tpu.concatenate %125, %126 in 0 : vector<63x384xbf16>, vector<1x384xbf16> -> vector<64x384xbf16>
    %c5 = arith.constant 5 : index
    %c0_59 = arith.constant 0 : index
    %c0_60 = arith.constant 0 : index
    %128 = vector.load %arg8[%c5, %c0_59, %c0_60] : memref<9x64x1xf32, #tpu.memory_space<vmem>>, vector<1x64x1xf32>
    %129 = vector.shape_cast %128 : vector<1x64x1xf32> to vector<64x1xf32>
    %cst_61 = arith.constant 5.000000e-01 : f32
    %130 = vector.broadcast %cst_61 : f32 to vector<64x1xf32>
    %131 = arith.cmpf ogt, %129, %130 : vector<64x1xf32>
    %cst_62 = arith.constant 0.000000e+00 : bf16
    %132 = vector.broadcast %cst_62 : bf16 to vector<64x384xbf16>
    %133 = vector.shape_cast %131 : vector<64x1xi1> to vector<64x1xi1>
    %134 = vector.broadcast %133 : vector<64x1xi1> to vector<64x384xi1>
    %135 = arith.select %134, %127, %132 : vector<64x384xi1>, vector<64x384xbf16>
    %c5_63 = arith.constant 5 : index
    %c0_64 = arith.constant 0 : index
    %c0_65 = arith.constant 0 : index
    %136 = vector.load %arg7[%c5_63, %c0_64, %c0_65] : memref<9x384x128xbf16, #tpu.memory_space<vmem>>, vector<1x384x128xbf16>
    %137 = vector.shape_cast %136 : vector<1x384x128xbf16> to vector<384x128xbf16>
    %cst_66 = arith.constant dense<0.000000e+00> : vector<64x128xf32>
    %138 = tpu.matmul %135, %137, %cst_66 {dimension_numbers = #tpu.dot_dimension_numbers<[1], [0], [0], [1], [0, 0, 1, 1], [], []>} : vector<64x384xbf16>, vector<384x128xbf16>, vector<64x128xf32> -> vector<64x128xf32>
    %139 = arith.addf %124, %138 : vector<64x128xf32>
    %140 = vector.extract_strided_slice %51 {offsets = [7, 0], sizes = [57, 384], strides = [1, 1]} : vector<64x384xbf16> to vector<57x384xbf16>
    %141 = vector.extract_strided_slice %51 {offsets = [0, 0], sizes = [7, 384], strides = [1, 1]} : vector<64x384xbf16> to vector<7x384xbf16>
    %142 = tpu.concatenate %140, %141 in 0 : vector<57x384xbf16>, vector<7x384xbf16> -> vector<64x384xbf16>
    %c6 = arith.constant 6 : index
    %c0_67 = arith.constant 0 : index
    %c0_68 = arith.constant 0 : index
    %143 = vector.load %arg8[%c6, %c0_67, %c0_68] : memref<9x64x1xf32, #tpu.memory_space<vmem>>, vector<1x64x1xf32>
    %144 = vector.shape_cast %143 : vector<1x64x1xf32> to vector<64x1xf32>
    %cst_69 = arith.constant 5.000000e-01 : f32
    %145 = vector.broadcast %cst_69 : f32 to vector<64x1xf32>
    %146 = arith.cmpf ogt, %144, %145 : vector<64x1xf32>
    %cst_70 = arith.constant 0.000000e+00 : bf16
    %147 = vector.broadcast %cst_70 : bf16 to vector<64x384xbf16>
    %148 = vector.shape_cast %146 : vector<64x1xi1> to vector<64x1xi1>
    %149 = vector.broadcast %148 : vector<64x1xi1> to vector<64x384xi1>
    %150 = arith.select %149, %142, %147 : vector<64x384xi1>, vector<64x384xbf16>
    %c6_71 = arith.constant 6 : index
    %c0_72 = arith.constant 0 : index
    %c0_73 = arith.constant 0 : index
    %151 = vector.load %arg7[%c6_71, %c0_72, %c0_73] : memref<9x384x128xbf16, #tpu.memory_space<vmem>>, vector<1x384x128xbf16>
    %152 = vector.shape_cast %151 : vector<1x384x128xbf16> to vector<384x128xbf16>
    %cst_74 = arith.constant dense<0.000000e+00> : vector<64x128xf32>
    %153 = tpu.matmul %150, %152, %cst_74 {dimension_numbers = #tpu.dot_dimension_numbers<[1], [0], [0], [1], [0, 0, 1, 1], [], []>} : vector<64x384xbf16>, vector<384x128xbf16>, vector<64x128xf32> -> vector<64x128xf32>
    %154 = arith.addf %139, %153 : vector<64x128xf32>
    %155 = vector.extract_strided_slice %51 {offsets = [8, 0], sizes = [56, 384], strides = [1, 1]} : vector<64x384xbf16> to vector<56x384xbf16>
    %156 = vector.extract_strided_slice %51 {offsets = [0, 0], sizes = [8, 384], strides = [1, 1]} : vector<64x384xbf16> to vector<8x384xbf16>
    %157 = tpu.concatenate %155, %156 in 0 : vector<56x384xbf16>, vector<8x384xbf16> -> vector<64x384xbf16>
    %c7 = arith.constant 7 : index
    %c0_75 = arith.constant 0 : index
    %c0_76 = arith.constant 0 : index
    %158 = vector.load %arg8[%c7, %c0_75, %c0_76] : memref<9x64x1xf32, #tpu.memory_space<vmem>>, vector<1x64x1xf32>
    %159 = vector.shape_cast %158 : vector<1x64x1xf32> to vector<64x1xf32>
    %cst_77 = arith.constant 5.000000e-01 : f32
    %160 = vector.broadcast %cst_77 : f32 to vector<64x1xf32>
    %161 = arith.cmpf ogt, %159, %160 : vector<64x1xf32>
    %cst_78 = arith.constant 0.000000e+00 : bf16
    %162 = vector.broadcast %cst_78 : bf16 to vector<64x384xbf16>
    %163 = vector.shape_cast %161 : vector<64x1xi1> to vector<64x1xi1>
    %164 = vector.broadcast %163 : vector<64x1xi1> to vector<64x384xi1>
    %165 = arith.select %164, %157, %162 : vector<64x384xi1>, vector<64x384xbf16>
    %c7_79 = arith.constant 7 : index
    %c0_80 = arith.constant 0 : index
    %c0_81 = arith.constant 0 : index
    %166 = vector.load %arg7[%c7_79, %c0_80, %c0_81] : memref<9x384x128xbf16, #tpu.memory_space<vmem>>, vector<1x384x128xbf16>
    %167 = vector.shape_cast %166 : vector<1x384x128xbf16> to vector<384x128xbf16>
    %cst_82 = arith.constant dense<0.000000e+00> : vector<64x128xf32>
    %168 = tpu.matmul %165, %167, %cst_82 {dimension_numbers = #tpu.dot_dimension_numbers<[1], [0], [0], [1], [0, 0, 1, 1], [], []>} : vector<64x384xbf16>, vector<384x128xbf16>, vector<64x128xf32> -> vector<64x128xf32>
    %169 = arith.addf %154, %168 : vector<64x128xf32>
    %170 = vector.extract_strided_slice %51 {offsets = [9, 0], sizes = [55, 384], strides = [1, 1]} : vector<64x384xbf16> to vector<55x384xbf16>
    %171 = vector.extract_strided_slice %51 {offsets = [0, 0], sizes = [9, 384], strides = [1, 1]} : vector<64x384xbf16> to vector<9x384xbf16>
    %172 = tpu.concatenate %170, %171 in 0 : vector<55x384xbf16>, vector<9x384xbf16> -> vector<64x384xbf16>
    %c8 = arith.constant 8 : index
    %c0_83 = arith.constant 0 : index
    %c0_84 = arith.constant 0 : index
    %173 = vector.load %arg8[%c8, %c0_83, %c0_84] : memref<9x64x1xf32, #tpu.memory_space<vmem>>, vector<1x64x1xf32>
    %174 = vector.shape_cast %173 : vector<1x64x1xf32> to vector<64x1xf32>
    %cst_85 = arith.constant 5.000000e-01 : f32
    %175 = vector.broadcast %cst_85 : f32 to vector<64x1xf32>
    %176 = arith.cmpf ogt, %174, %175 : vector<64x1xf32>
    %cst_86 = arith.constant 0.000000e+00 : bf16
    %177 = vector.broadcast %cst_86 : bf16 to vector<64x384xbf16>
    %178 = vector.shape_cast %176 : vector<64x1xi1> to vector<64x1xi1>
    %179 = vector.broadcast %178 : vector<64x1xi1> to vector<64x384xi1>
    %180 = arith.select %179, %172, %177 : vector<64x384xi1>, vector<64x384xbf16>
    %c8_87 = arith.constant 8 : index
    %c0_88 = arith.constant 0 : index
    %c0_89 = arith.constant 0 : index
    %181 = vector.load %arg7[%c8_87, %c0_88, %c0_89] : memref<9x384x128xbf16, #tpu.memory_space<vmem>>, vector<1x384x128xbf16>
    %182 = vector.shape_cast %181 : vector<1x384x128xbf16> to vector<384x128xbf16>
    %cst_90 = arith.constant dense<0.000000e+00> : vector<64x128xf32>
    %183 = tpu.matmul %180, %182, %cst_90 {dimension_numbers = #tpu.dot_dimension_numbers<[1], [0], [0], [1], [0, 0, 1, 1], [], []>} : vector<64x384xbf16>, vector<384x128xbf16>, vector<64x128xf32> -> vector<64x128xf32>
    %184 = arith.addf %169, %183 : vector<64x128xf32>
    %185 = arith.truncf %184 : vector<64x128xf32> to vector<64x128xbf16>
    %c0_91 = arith.constant 0 : index
    %c0_92 = arith.constant 0 : index
    %c0_93 = arith.constant 0 : index
    %186 = vector.load %arg9[%c0_91, %c0_92, %c0_93] : memref<1x64x128xbf16, #tpu.memory_space<vmem>>, vector<1x64x128xbf16>
    %187 = vector.shape_cast %186 : vector<1x64x128xbf16> to vector<64x128xbf16>
    %188 = vector.shape_cast %185 : vector<64x128xbf16> to vector<1x64x128xbf16>
    tpu.vector_store %arg9[%c0_91, %c0_92, %c0_93], %188 {strides = array<i32>} : memref<1x64x128xbf16, #tpu.memory_space<vmem>>, vector<1x64x128xbf16>,
    %cst_94 = arith.constant dense<0.000000e+00> : vector<128xf32>
    %189 = vector.multi_reduction <add>, %184, %cst_94 [0] : vector<64x128xf32> to vector<128xf32>
    %190 = vector.shape_cast %189 : vector<128xf32> to vector<1x128xf32>
    %191 = arith.mulf %184, %184 : vector<64x128xf32>
    %cst_95 = arith.constant dense<0.000000e+00> : vector<128xf32>
    %192 = vector.multi_reduction <add>, %191, %cst_95 [0] : vector<64x128xf32> to vector<128xf32>
    %193 = vector.shape_cast %192 : vector<128xf32> to vector<1x128xf32>
    %194 = tpu.concatenate %190, %193 in 0 : vector<1x128xf32>, vector<1x128xf32> -> vector<2x128xf32>
    %195 = vector.shape_cast %194 : vector<2x128xf32> to vector<1x2x128xf32>
    %c0_96 = arith.constant 0 : index
    %c0_97 = arith.constant 0 : index
    %c0_98 = arith.constant 0 : index
    %196 = vector.load %arg10[%c0_96, %c0_97, %c0_98] : memref<1x2x128xf32, #tpu.memory_space<vmem>>, vector<1x2x128xf32>
    tpu.vector_store %arg10[%c0_96, %c0_97, %c0_98], %195 {strides = array<i32>} : memref<1x2x128xf32, #tpu.memory_space<vmem>>, vector<1x2x128xf32>,
    return
  }
  func.func @transform_0(%arg0: i32, %arg1: i32) -> (i32, i32, i32) {
    %c8_i32 = arith.constant 8 : i32
    %0 = arith.muli %arg0, %c8_i32 : i32
    %c1_i32 = arith.constant 1 : i32
    %1 = arith.subi %arg1, %c1_i32 : i32
    %c0_i32 = arith.constant 0 : i32
    %2 = arith.maxsi %1, %c0_i32 : i32
    %3 = arith.addi %0, %2 : i32
    %c0_i32_0 = arith.constant 0 : i32
    %c0_i32_1 = arith.constant 0 : i32
    %c0_i32_2 = arith.constant 0 : i32
    return %3, %c0_i32_0, %c0_i32_1 : i32, i32, i32
  }
  func.func @transform_1(%arg0: i32, %arg1: i32) -> (i32, i32, i32) {
    %c8_i32 = arith.constant 8 : i32
    %0 = arith.muli %arg0, %c8_i32 : i32
    %1 = arith.addi %0, %arg1 : i32
    %c0_i32 = arith.constant 0 : i32
    %c0_i32_0 = arith.constant 0 : i32
    %c0_i32_1 = arith.constant 0 : i32
    return %1, %c0_i32, %c0_i32_0 : i32, i32, i32
  }
  func.func @transform_2(%arg0: i32, %arg1: i32) -> (i32, i32, i32) {
    %c8_i32 = arith.constant 8 : i32
    %0 = arith.muli %arg0, %c8_i32 : i32
    %c1_i32 = arith.constant 1 : i32
    %1 = arith.addi %arg1, %c1_i32 : i32
    %c7_i32 = arith.constant 7 : i32
    %2 = arith.minsi %1, %c7_i32 : i32
    %3 = arith.addi %0, %2 : i32
    %c0_i32 = arith.constant 0 : i32
    %c0_i32_0 = arith.constant 0 : i32
    %c0_i32_1 = arith.constant 0 : i32
    return %3, %c0_i32, %c0_i32_0 : i32, i32, i32
  }
  func.func @transform_3(%arg0: i32, %arg1: i32) -> (i32, i32) {
    %c0_i32 = arith.constant 0 : i32
    %c0_i32_0 = arith.constant 0 : i32
    %c0_i32_1 = arith.constant 0 : i32
    return %c0_i32, %c0_i32_0 : i32, i32
  }
  func.func @transform_4(%arg0: i32, %arg1: i32) -> (i32, i32) {
    %c0_i32 = arith.constant 0 : i32
    %c0_i32_0 = arith.constant 0 : i32
    %c0_i32_1 = arith.constant 0 : i32
    return %c0_i32, %c0_i32_0 : i32, i32
  }
  func.func @transform_5(%arg0: i32, %arg1: i32) -> (i32, i32, i32) {
    %c0_i32 = arith.constant 0 : i32
    %c0_i32_0 = arith.constant 0 : i32
    %c0_i32_1 = arith.constant 0 : i32
    %c0_i32_2 = arith.constant 0 : i32
    return %c0_i32, %c0_i32_0, %c0_i32_1 : i32, i32, i32
  }
  func.func @transform_6(%arg0: i32, %arg1: i32) -> (i32, i32, i32) {
    %c0_i32 = arith.constant 0 : i32
    %c0_i32_0 = arith.constant 0 : i32
    %c0_i32_1 = arith.constant 0 : i32
    %c0_i32_2 = arith.constant 0 : i32
    return %c0_i32, %c0_i32_0, %c0_i32_1 : i32, i32, i32
  }
  func.func @transform_7(%arg0: i32, %arg1: i32) -> (i32, i32, i32) {
    %c8_i32 = arith.constant 8 : i32
    %0 = arith.muli %arg0, %c8_i32 : i32
    %1 = arith.addi %0, %arg1 : i32
    %c0_i32 = arith.constant 0 : i32
    %c0_i32_0 = arith.constant 0 : i32
    %c0_i32_1 = arith.constant 0 : i32
    return %1, %c0_i32, %c0_i32_0 : i32, i32, i32
  }
  func.func @transform_8(%arg0: i32, %arg1: i32) -> (i32, i32, i32) {
    %c8_i32 = arith.constant 8 : i32
    %0 = arith.muli %arg0, %c8_i32 : i32
    %1 = arith.addi %0, %arg1 : i32
    %c0_i32 = arith.constant 0 : i32
    %c0_i32_0 = arith.constant 0 : i32
    %c0_i32_1 = arith.constant 0 : i32
    return %1, %c0_i32, %c0_i32_0 : i32, i32, i32
  }
}

module attributes {stable_mosaic.version = 11 : i64} {
  func.func @_bn_act_res_kernel(%arg0: i32, %arg1: memref<512x128xbf16, #tpu.memory_space<vmem>>, %arg2: memref<1x128xf32, #tpu.memory_space<vmem>>, %arg3: memref<1x128xf32, #tpu.memory_space<vmem>>, %arg4: memref<512x128xf32, #tpu.memory_space<vmem>>, %arg5: memref<512x128xf32, #tpu.memory_space<vmem>>) attributes {dimension_semantics = [#tpu.dimension_semantics<parallel>], iteration_bounds = array<i64: 2>, scalar_prefetch = 0 : i64, scratch_operands = 0 : i64, tpu.core_type = #tpu.core_type<tc>, window_params = [{transform_indices = @transform_0, window_bounds = array<i64: 512, 128>}, {pipeline_mode = #tpu.pipeline_mode<synchronous>, transform_indices = @transform_1, window_bounds = array<i64: 1, 128>}, {pipeline_mode = #tpu.pipeline_mode<synchronous>, transform_indices = @transform_2, window_bounds = array<i64: 1, 128>}, {transform_indices = @transform_3, window_bounds = array<i64: 512, 128>}, {transform_indices = @transform_4, window_bounds = array<i64: 512, 128>}]} {
    %c0 = arith.constant 0 : index
    %c0_0 = arith.constant 0 : index
    %0 = vector.load %arg1[%c0, %c0_0] : memref<512x128xbf16, #tpu.memory_space<vmem>>, vector<512x128xbf16>
    %1 = arith.extf %0 : vector<512x128xbf16> to vector<512x128xf32>
    %c0_1 = arith.constant 0 : index
    %c0_2 = arith.constant 0 : index
    %2 = vector.load %arg2[%c0_1, %c0_2] : memref<1x128xf32, #tpu.memory_space<vmem>>, vector<1x128xf32>
    %3 = vector.broadcast %2 : vector<1x128xf32> to vector<512x128xf32>
    %4 = arith.mulf %1, %3 : vector<512x128xf32>
    %c0_3 = arith.constant 0 : index
    %c0_4 = arith.constant 0 : index
    %5 = vector.load %arg3[%c0_3, %c0_4] : memref<1x128xf32, #tpu.memory_space<vmem>>, vector<1x128xf32>
    %6 = vector.broadcast %5 : vector<1x128xf32> to vector<512x128xf32>
    %7 = arith.addf %4, %6 : vector<512x128xf32>
    %cst = arith.constant 0.000000e+00 : f32
    %8 = vector.broadcast %cst : f32 to vector<512x128xf32>
    %9 = arith.cmpf ogt, %7, %8 : vector<512x128xf32>
    %cst_5 = arith.constant 0.00999999977 : f32
    %10 = vector.broadcast %cst_5 : f32 to vector<512x128xf32>
    %11 = arith.mulf %10, %7 : vector<512x128xf32>
    %12 = arith.select %9, %7, %11 : vector<512x128xi1>, vector<512x128xf32>
    %c0_6 = arith.constant 0 : index
    %c0_7 = arith.constant 0 : index
    %13 = vector.load %arg4[%c0_6, %c0_7] : memref<512x128xf32, #tpu.memory_space<vmem>>, vector<512x128xf32>
    %14 = arith.addf %12, %13 : vector<512x128xf32>
    %c0_8 = arith.constant 0 : index
    %c0_9 = arith.constant 0 : index
    %15 = vector.load %arg5[%c0_8, %c0_9] : memref<512x128xf32, #tpu.memory_space<vmem>>, vector<512x128xf32>
    tpu.vector_store %arg5[%c0_8, %c0_9], %14 {strides = array<i32>} : memref<512x128xf32, #tpu.memory_space<vmem>>, vector<512x128xf32>,
    return
  }
  func.func @transform_0(%arg0: i32) -> (i32, i32) {
    %c0_i32 = arith.constant 0 : i32
    %c0_i32_0 = arith.constant 0 : i32
    return %arg0, %c0_i32 : i32, i32
  }
  func.func @transform_1(%arg0: i32) -> (i32, i32) {
    %c0_i32 = arith.constant 0 : i32
    %c0_i32_0 = arith.constant 0 : i32
    %c0_i32_1 = arith.constant 0 : i32
    return %c0_i32, %c0_i32_0 : i32, i32
  }
  func.func @transform_2(%arg0: i32) -> (i32, i32) {
    %c0_i32 = arith.constant 0 : i32
    %c0_i32_0 = arith.constant 0 : i32
    %c0_i32_1 = arith.constant 0 : i32
    return %c0_i32, %c0_i32_0 : i32, i32
  }
  func.func @transform_3(%arg0: i32) -> (i32, i32) {
    %c0_i32 = arith.constant 0 : i32
    %c0_i32_0 = arith.constant 0 : i32
    return %arg0, %c0_i32 : i32, i32
  }
  func.func @transform_4(%arg0: i32) -> (i32, i32) {
    %c0_i32 = arith.constant 0 : i32
    %c0_i32_0 = arith.constant 0 : i32
    return %arg0, %c0_i32 : i32, i32
  }
}

</mosaic_0001>

<bundles_post_ra>
// kernel: bottleneck_block.4
= control target key start
LH: loop header
LB: loop body
LE: loop exit
PB: predicated region body
PF: predicated region fallthrough
CT: control target
= control target key end

     0   :  { %s1237_s12 = smov 0   ;;  %s1678_s0 = inlined_call_operand.vmem [shape: f32[1024,128], index: 0, kind: input, shape index: {}]   ;;  %s1679_s1 = inlined_call_operand.vmem [shape: bf16[128,128], index: 1, kind: input, shape index: {}]   ;;  %s1680_s2 = inlined_call_operand.vmem [shape: bf16[1024,128], index: 2, kind: output, shape index: {0}]   ;;  %s1681_s3 = inlined_call_operand.vmem [shape: f32[2,2,128], index: 3, kind: output, shape index: {1}]  }
   0x1 LB: > { %s1243_s13 = sadd.s32 4294967295, %s1215_s12   ;;  %p938_p0 = scmp.ge.s32.totalorder %s1215_s12, 1  ;;  %s1215_s12 = sphi %s1237_s12, %s14_s12  }
   0x2   : > { %p141_p1 = scmp.lt.s32.totalorder %s1215_s12, 3 }
   0x4   : > { %p142_p2 = pnand %p938_p0, %p141_p1 }
   0x5   : > { %s939_s20 = sshll.u32 (!%p142_p2), %s1243_s13, 6  ;;  %p181_p4 = scmp.lt.s32.totalorder (!%p142_p2), %s1243_s13, 1 }
   0x6   : > { %145 = sbr.rel (%p142_p2) target bundleno = 403 (0x193), region = 28  ;;  %p170_p3 = scmp.lt.s32.totalorder (!%p142_p2), %s939_s20, 127 }
   0xb   : > { %v985_v0 = vld [vmem:[%s1679_s1 + $0x38] sm:$0xff]  ;;  %v984_v1 = vld [vmem:[%s1679_s1 + $0x30] sm:$0xff]  ;;  %v983_v2 = vld [vmem:[%s1679_s1 + $0x28] sm:$0xff]  ;;  %s1683_s20 = smov (!%p170_p3, %s939_s20), 127  ;;  %s1685_s13 = smov (!%p181_p4, %s1243_s13), 1  ;;  %vm844_vm0 = vcmask 1040384  }
   0xc   : > { %345 = vmatpush.bf16.msra.mxu0 %v985_v0  ;;  %1177 = vmatpush.bf16.msra.mxu1 %v985_v0  ;;  %v982_v3 = vld [vmem:[%s1679_s1 + $0x20] sm:$0xff]  ;;  %v981_v4 = vld [vmem:[%s1679_s1 + $0x18] sm:$0xff]  ;;  %v980_v5 = vld [vmem:[%s1679_s1 + $0x10] sm:$0xff]  ;;  %s940_s27 = sshll.u32 %s1683_s20, 3  ;;  %s942_s8 = sshll.u32 %s1683_s20, 2 }
   0xd   : > { %1178 = vmatpush.bf16.msra.mxu2 %v985_v0  ;;  %1179 = vmatpush.bf16.msra.mxu3 %v985_v0  ;;  %v979_v6 = vld [vmem:[%s1679_s1 + $0x8] sm:$0xff]  ;;  %s1275_s5 = scalar_lea.vmem %s1678_s0, %s940_s27  ;;  %v978_v7 = vld [vmem:[%s1679_s1] sm:$0xff]  ;;  %s1346_s11 = scalar_lea.vmem %s1680_s2, %s942_s8 }
   0xe   : > { %v185_v8 = vld [vmem:[%s1275_s5] sm:$0xff]  ;;  %v186_v9 = vld [vmem:[%s1275_s5 + $0x8] sm:$0xff]  ;;  %v187_v14 = vld [vmem:[%s1275_s5 + $0x10] sm:$0xff]  ;;  %s943_s14 = sshll.u32 %s1685_s13, 1 }
   0xf   : > { %v201_v10 = vld [vmem:[%s1275_s5 + $0x80] sm:$0xff]  ;;  %v202_v11 = vld [vmem:[%s1275_s5 + $0x88] sm:$0xff]  ;;  %v249_v12 = vpack.c.bf16 %v186_v9, %v185_v8  ;;  %v188_v15 = vld [vmem:[%s1275_s5 + $0x18] sm:$0xff]  ;;  %s184_s17 = scalar_lea.vmem %s1681_s3, %s943_s14 }
  0x10   : > { %346 = vmatpush.bf16.msra.mxu0 %v984_v1  ;;  %1180 = vmatpush.bf16.msra.mxu1 %v984_v1  ;;  %v257_v13 = vpack.c.bf16 %v202_v11, %v201_v10  ;;  %v203_v16 = vld [vmem:[%s1275_s5 + $0x90] sm:$0xff]  ;;  %v204_v17 = vld [vmem:[%s1275_s5 + $0x98] sm:$0xff]  ;;  %v250_v18 = vpack.c.bf16 %v188_v15, %v187_v14  ;;  %v217_v20 = vld [vmem:[%s1275_s5 + $0x100] sm:$0xff] }
  0x11   : > { %1181 = vmatpush.bf16.msra.mxu2 %v984_v1  ;;  %1182 = vmatpush.bf16.msra.mxu3 %v984_v1  ;;  %v258_v19 = vpack.c.bf16 %v204_v17, %v203_v16  ;;  %v218_v21 = vld [vmem:[%s1275_s5 + $0x108] sm:$0xff]  ;;  %v189_v23 = vld [vmem:[%s1275_s5 + $0x20] sm:$0xff]  ;;  %v219_v29 = vld [vmem:[%s1275_s5 + $0x110] sm:$0xff] }
  0x12   : > { %v265_v22 = vpack.c.bf16 %v218_v21, %v217_v20  ;;  %v190_v24 = vld [vmem:[%s1275_s5 + $0x28] sm:$0xff]  ;;  %v205_v25 = vld [vmem:[%s1275_s5 + $0xa0] sm:$0xff]  ;;  %v220_v30 = vld [vmem:[%s1275_s5 + $0x118] sm:$0xff] }
  0x13   : > { %v206_v26 = vld [vmem:[%s1275_s5 + $0xa8] sm:$0xff]  ;;  %v251_v27 = vpack.c.bf16 %v190_v24, %v189_v23  ;;  %v266_v31 = vpack.c.bf16 %v220_v30, %v219_v29  ;;  %v191_v32 = vld [vmem:[%s1275_s5 + $0x30] sm:$0xff]  ;;  %v192_v33 = vld [vmem:[%s1275_s5 + $0x38] sm:$0xff] }
  0x14   : > { %347 = vmatpush.bf16.msra.mxu0 %v983_v2  ;;  %1183 = vmatpush.bf16.msra.mxu1 %v983_v2  ;;  %v259_v28 = vpack.c.bf16 %v206_v26, %v205_v25  ;;  %v207_v34 = vld [vmem:[%s1275_s5 + $0xb0] sm:$0xff]  ;;  %v208_v35 = vld [vmem:[%s1275_s5 + $0xb8] sm:$0xff]  ;;  %v252_v36 = vpack.c.bf16 %v192_v33, %v191_v32  ;;  %v221_v38 = vld [vmem:[%s1275_s5 + $0x120] sm:$0xff] }
  0x15   : > { %1184 = vmatpush.bf16.msra.mxu2 %v983_v2  ;;  %1185 = vmatpush.bf16.msra.mxu3 %v983_v2  ;;  %v260_v37 = vpack.c.bf16 %v208_v35, %v207_v34  ;;  %v222_v39 = vld [vmem:[%s1275_s5 + $0x128] sm:$0xff]  ;;  %v233_v40 = vld [vmem:[%s1275_s5 + $0x180] sm:$0xff]  ;;  %v223_v50 = vld [vmem:[%s1275_s5 + $0x130] sm:$0xff] }
  0x16   : > { %v267_v41 = vpack.c.bf16 %v222_v39, %v221_v38  ;;  %v234_v42 = vld [vmem:[%s1275_s5 + $0x188] sm:$0xff]  ;;  %v193_v44 = vld [vmem:[%s1275_s5 + $0x40] sm:$0xff]  ;;  %v224_v51 = vld [vmem:[%s1275_s5 + $0x138] sm:$0xff] }
  0x17   : > { %v273_v43 = vpack.c.bf16 %v234_v42, %v233_v40  ;;  %v194_v45 = vld [vmem:[%s1275_s5 + $0x48] sm:$0xff]  ;;  %v209_v46 = vld [vmem:[%s1275_s5 + $0xc0] sm:$0xff]  ;;  %v235_v52 = vld [vmem:[%s1275_s5 + $0x190] sm:$0xff]  ;;  %v268_v53 = vpack.c.bf16 %v224_v51, %v223_v50 }
  0x18   : > { %348 = vmatpush.bf16.msra.mxu0 %v982_v3  ;;  %1186 = vmatpush.bf16.msra.mxu1 %v982_v3  ;;  %v210_v47 = vld [vmem:[%s1275_s5 + $0xc8] sm:$0xff]  ;;  %v253_v48 = vpack.c.bf16 %v194_v45, %v193_v44  ;;  %v236_v54 = vld [vmem:[%s1275_s5 + $0x198] sm:$0xff]  ;;  %v195_v56 = vld [vmem:[%s1275_s5 + $0x50] sm:$0xff] }
  0x19   : > { %1187 = vmatpush.bf16.msra.mxu2 %v982_v3  ;;  %1188 = vmatpush.bf16.msra.mxu3 %v982_v3  ;;  %v261_v49 = vpack.c.bf16 %v210_v47, %v209_v46  ;;  %v274_v55 = vpack.c.bf16 %v236_v54, %v235_v52  ;;  %v196_v57 = vld [vmem:[%s1275_s5 + $0x58] sm:$0xff]  ;;  %v211_v58 = vld [vmem:[%s1275_s5 + $0xd0] sm:$0xff]  ;;  %v225_v62 = vld [vmem:[%s1275_s5 + $0x140] sm:$0xff] }
  0x1a   : > { %v212_v59 = vld [vmem:[%s1275_s5 + $0xd8] sm:$0xff]  ;;  %v254_v60 = vpack.c.bf16 %v196_v57, %v195_v56  ;;  %v226_v63 = vld [vmem:[%s1275_s5 + $0x148] sm:$0xff]  ;;  %v237_v0 = vld [vmem:[%s1275_s5 + $0x1a0] sm:$0xff] }
  0x1b   : > { %v262_v61 = vpack.c.bf16 %v212_v59, %v211_v58  ;;  %v269_v1 = vpack.c.bf16 %v226_v63, %v225_v62  ;;  %v238_v2 = vld [vmem:[%s1275_s5 + $0x1a8] sm:$0xff]  ;;  %v227_v10 = vld [vmem:[%s1275_s5 + $0x150] sm:$0xff]  ;;  %v228_v11 = vld [vmem:[%s1275_s5 + $0x158] sm:$0xff] }
  0x1c   : > { %349 = vmatpush.bf16.msra.mxu0 %v981_v4  ;;  %1189 = vmatpush.bf16.msra.mxu1 %v981_v4  ;;  %v275_v3 = vpack.c.bf16 %v238_v2, %v237_v0  ;;  %v240_v14 = vld [vmem:[%s1275_s5 + $0x1b8] sm:$0xff]  ;;  %v199_v16 = vld [vmem:[%s1275_s5 + $0x70] sm:$0xff]  ;;  %v230_v23 = vld [vmem:[%s1275_s5 + $0x168] sm:$0xff] }
  0x1d   : > { %1190 = vmatpush.bf16.msra.mxu2 %v981_v4  ;;  %1191 = vmatpush.bf16.msra.mxu3 %v981_v4  ;;  %v197_v4 = vld [vmem:[%s1275_s5 + $0x60] sm:$0xff]  ;;  %v200_v17 = vld [vmem:[%s1275_s5 + $0x78] sm:$0xff]  ;;  %v242_v26 = vld [vmem:[%s1275_s5 + $0x1c8] sm:$0xff] }
  0x1e   : > { %v256_v20 = vpack.c.bf16 %v200_v17, %v199_v16  ;;  %v241_v24 = vld [vmem:[%s1275_s5 + $0x1c0] sm:$0xff]  ;;  %v231_v30 = vld [vmem:[%s1275_s5 + $0x170] sm:$0xff]  ;;  %v244_v34 = vld [vmem:[%s1275_s5 + $0x1d8] sm:$0xff] }
  0x1f   : > { %v243_v32 = vld [vmem:[%s1275_s5 + $0x1d0] sm:$0xff] }
  0x20   : > { %350 = vmatpush.bf16.msra.mxu0 %v980_v5  ;;  %1192 = vmatpush.bf16.msra.mxu1 %v980_v5  ;;  %v278_v35 = vpack.c.bf16 %v244_v34, %v243_v32  ;;  %v247_v2 = vld [vmem:[%s1275_s5 + $0x1f0] sm:$0xff] }
  0x21   : > { %1193 = vmatpush.bf16.msra.mxu2 %v980_v5  ;;  %1194 = vmatpush.bf16.msra.mxu3 %v980_v5  ;;  %v198_v5 = vld [vmem:[%s1275_s5 + $0x68] sm:$0xff] }
  0x22   : > { %v255_v8 = vpack.c.bf16 %v198_v5, %v197_v4 }
  0x24   : > { %351 = vmatpush.bf16.msra.mxu0 %v979_v6  ;;  %1195 = vmatpush.bf16.msra.mxu1 %v979_v6 }
  0x25   : > { %1196 = vmatpush.bf16.msra.mxu2 %v979_v6  ;;  %1197 = vmatpush.bf16.msra.mxu3 %v979_v6  ;;  %v213_v6 = vld [vmem:[%s1275_s5 + $0xe0] sm:$0xff] }
  0x28   : > { %352 = vmatpush.bf16.msra.mxu0 %v978_v7  ;;  %1198 = vmatpush.bf16.msra.mxu1 %v978_v7 }
  0x29   : > { %1199 = vmatpush.bf16.msra.mxu2 %v978_v7  ;;  %1200 = vmatpush.bf16.msra.mxu3 %v978_v7  ;;  %v214_v7 = vld [vmem:[%s1275_s5 + $0xe8] sm:$0xff] }
  0x2a   : > { %v263_v9 = vpack.c.bf16 %v214_v7, %v213_v6 }
  0x2b   : > { %353 = vmatmul.bf16.vlgmr.msra.gmra.mxu0 %v249_v12  ;;  %393 = vmatmul.bf16.vlgmr.msra.gmra.mxu1 %v257_v13  ;;  %v239_v12 = vld [vmem:[%s1275_s5 + $0x1b0] sm:$0xff]  ;;  %v270_v13 = vpack.c.bf16 %v228_v11, %v227_v10 }
  0x2c   : > { %433 = vmatmul.bf16.vlgmr.msra.gmra.mxu2 %v265_v22  ;;  %473 = vmatmul.bf16.vlgmr.msra.gmra.mxu3 %v273_v43  ;;  %v276_v15 = vpack.c.bf16 %v240_v14, %v239_v12  ;;  %v229_v22 = vld [vmem:[%s1275_s5 + $0x160] sm:$0xff] }
  0x2d   : > { %v271_v25 = vpack.c.bf16 %v230_v23, %v229_v22 }
  0x3b   : > { %358 = vmatmul.bf16.gmra.mxu0 %v250_v18  ;;  %398 = vmatmul.bf16.gmra.mxu1 %v258_v19  ;;  %v215_v18 = vld [vmem:[%s1275_s5 + $0xf0] sm:$0xff]  ;;  %v216_v19 = vld [vmem:[%s1275_s5 + $0xf8] sm:$0xff] }
  0x3c   : > { %438 = vmatmul.bf16.gmra.mxu2 %v266_v31  ;;  %478 = vmatmul.bf16.gmra.mxu3 %v274_v55  ;;  %v264_v21 = vpack.c.bf16 %v216_v19, %v215_v18  ;;  %v232_v31 = vld [vmem:[%s1275_s5 + $0x178] sm:$0xff] }
  0x3d   : > { %v272_v33 = vpack.c.bf16 %v232_v31, %v231_v30 }
  0x4b   : > { %363 = vmatmul.bf16.gmra.mxu0 %v251_v27  ;;  %403 = vmatmul.bf16.gmra.mxu1 %v259_v28  ;;  %v277_v27 = vpack.c.bf16 %v242_v26, %v241_v24 }
  0x4c   : > { %443 = vmatmul.bf16.gmra.mxu2 %v267_v41  ;;  %483 = vmatmul.bf16.gmra.mxu3 %v275_v3  ;;  %v248_v3 = vld [vmem:[%s1275_s5 + $0x1f8] sm:$0xff] }
  0x4d   : > { %v280_v5 = vpack.c.bf16 %v248_v3, %v247_v2 }
  0x5b   : > { %368 = vmatmul.bf16.gmra.mxu0 %v252_v36  ;;  %408 = vmatmul.bf16.gmra.mxu1 %v260_v37 }
  0x5c   : > { %448 = vmatmul.bf16.gmra.mxu2 %v268_v53  ;;  %488 = vmatmul.bf16.gmra.mxu3 %v276_v15 }
  0x6b   : > { %373 = vmatmul.bf16.gmra.mxu0 %v253_v48  ;;  %413 = vmatmul.bf16.gmra.mxu1 %v261_v49  ;;  %v245_v48 = vld [vmem:[%s1275_s5 + $0x1e0] sm:$0xff]  ;;  %v246_v49 = vld [vmem:[%s1275_s5 + $0x1e8] sm:$0xff] }
  0x6c   : > { %453 = vmatmul.bf16.gmra.mxu2 %v269_v1  ;;  %493 = vmatmul.bf16.gmra.mxu3 %v277_v27  ;;  %v279_v51 = vpack.c.bf16 %v246_v49, %v245_v48 }
  0x7b   : > { %378 = vmatmul.bf16.gmra.mxu0 %v254_v60  ;;  %418 = vmatmul.bf16.gmra.mxu1 %v262_v61 }
  0x7c   : > { %458 = vmatmul.bf16.gmra.mxu2 %v270_v13  ;;  %498 = vmatmul.bf16.gmra.mxu3 %v278_v35 }
  0x8b   : > { %383 = vmatmul.bf16.gmra.mxu0 %v255_v8  ;;  %423 = vmatmul.bf16.gmra.mxu1 %v263_v9 }
  0x8c   : > { %463 = vmatmul.bf16.gmra.mxu2 %v271_v25  ;;  %503 = vmatmul.bf16.gmra.mxu3 %v279_v51 }
  0x9b   : > { %388 = vmatmul.bf16.gmra.mxu0 %v256_v20  ;;  %428 = vmatmul.bf16.gmra.mxu1 %v264_v21 }
  0x9c   : > { %468 = vmatmul.bf16.gmra.mxu2 %v272_v33  ;;  %508 = vmatmul.bf16.gmra.mxu3 %v280_v5 }
  0xa8   : > { %v354_v28 = vpop.f32.mrf.mxu0  ;;  %v1336_v29 = vpop.f32.mrf.mxu1 }
  0xa9   : > { %v711_v36 = vmul.f32 %v354_v28, %v354_v28 }
  0xaf   : > { %v1362_v58 = vpop.f32.mrf.mxu2  ;;  %v1400_v20 = vpop.f32.mrf.mxu3 }
  0xb0   : > { %v356_v37 = vpop.f32.mrf.mxu0  ;;  %v1348_v38 = vpop.f32.mrf.mxu1 }
  0xb1   : > { %v989_v39 = vpack.c.bf16 %v356_v37, %v354_v28  ;;  %v642_v40 = vadd.f32 %v356_v37, %v354_v28  ;;  %v712_v41 = vmul.f32 %v356_v37, %v356_v37  ;;  %v1029_v42 = vpack.c.bf16 %v1348_v38, %v1336_v29 }
  0xb3   : > { %990 = vst [vmem:[%s1346_s11] sm:$0xff] %v989_v39   ;;  %v775_v43 = vadd.f32 %v712_v41, %v711_v36 }
  0xb4   : > { %1153 = vst [vmem:[%s1346_s11 + $0x40] sm:$0xff] %v1029_v42  }
  0xb7   : > { %v1370_v0 = vpop.f32.mrf.mxu2  ;;  %v1408_v24 = vpop.f32.mrf.mxu3 }
  0xb8   : > { %v359_v44 = vpop.f32.mrf.mxu0  ;;  %v1354_v45 = vpop.f32.mrf.mxu1  ;;  %v1069_v1 = vpack.c.bf16 %v1370_v0, %v1362_v58  ;;  %v1109_v26 = vpack.c.bf16 %v1408_v24, %v1400_v20 }
  0xb9   : > { %v643_v46 = vadd.f32 %v642_v40, %v359_v44  ;;  %v713_v47 = vmul.f32 %v359_v44, %v359_v44 }
  0xba   : > { %1161 = vst [vmem:[%s1346_s11 + $0x80] sm:$0xff] %v1069_v1  }
  0xbb   : > { %v776_v50 = vadd.f32 %v775_v43, %v713_v47  ;;  %1169 = vst [vmem:[%s1346_s11 + $0xc0] sm:$0xff] %v1109_v26  }
  0xbf   : > { %v1383_v10 = vpop.f32.mrf.mxu2  ;;  %v1422_v33 = vpop.f32.mrf.mxu3 }
  0xc0   : > { %v361_v52 = vpop.f32.mrf.mxu0  ;;  %v1358_v53 = vpop.f32.mrf.mxu1 }
  0xc1   : > { %v994_v54 = vpack.c.bf16 %v361_v52, %v359_v44  ;;  %v644_v55 = vadd.f32 %v643_v46, %v361_v52  ;;  %v714_v56 = vmul.f32 %v361_v52, %v361_v52  ;;  %v1034_v57 = vpack.c.bf16 %v1358_v53, %v1354_v45 }
  0xc3   : > { %1146 = vst [vmem:[%s1346_s11 + $0x8] sm:$0xff] %v994_v54   ;;  %v777_v59 = vadd.f32 %v776_v50, %v714_v56 }
  0xc4   : > { %1154 = vst [vmem:[%s1346_s11 + $0x48] sm:$0xff] %v1034_v57  }
  0xc7   : > { %v1389_v13 = vpop.f32.mrf.mxu2  ;;  %v1430_v37 = vpop.f32.mrf.mxu3 }
  0xc8   : > { %v364_v60 = vpop.f32.mrf.mxu0  ;;  %v1366_v61 = vpop.f32.mrf.mxu1  ;;  %v1074_v14 = vpack.c.bf16 %v1389_v13, %v1383_v10  ;;  %v1114_v40 = vpack.c.bf16 %v1430_v37, %v1422_v33 }
  0xc9   : > { %v1368_v62 = vadd.f32 %v644_v55, %v364_v60  ;;  %v715_v63 = vmul.f32 %v364_v60, %v364_v60 }
  0xca   : > { %1162 = vst [vmem:[%s1346_s11 + $0x88] sm:$0xff] %v1074_v14  }
  0xcb   : > { %v1376_v4 = vadd.f32 %v777_v59, %v715_v63  ;;  %1170 = vst [vmem:[%s1346_s11 + $0xc8] sm:$0xff] %v1114_v40  }
  0xcf   : > { %v1398_v19 = vpop.f32.mrf.mxu2  ;;  %v1444_v47 = vpop.f32.mrf.mxu3 }
  0xd0   : > { %v366_v6 = vpop.f32.mrf.mxu0  ;;  %v1379_v7 = vpop.f32.mrf.mxu1 }
  0xd1   : > { %v999_v8 = vpack.c.bf16 %v366_v6, %v364_v60  ;;  %v1039_v9 = vpack.c.bf16 %v1379_v7, %v1366_v61  ;;  %v716_v52 = vmul.f32 %v366_v6, %v366_v6  ;;  %v646_v57 = vadd.f32 %v1368_v62, %v366_v6 }
  0xd3   : > { %1147 = vst [vmem:[%s1346_s11 + $0x10] sm:$0xff] %v999_v8   ;;  %v779_v59 = vadd.f32 %v1376_v4, %v716_v52 }
  0xd4   : > { %1155 = vst [vmem:[%s1346_s11 + $0x50] sm:$0xff] %v1039_v9  }
  0xd7   : > { %v1406_v23 = vpop.f32.mrf.mxu2  ;;  %v1452_v51 = vpop.f32.mrf.mxu3 }
  0xd8   : > { %v369_v11 = vpop.f32.mrf.mxu0  ;;  %v1387_v12 = vpop.f32.mrf.mxu1  ;;  %v1079_v25 = vpack.c.bf16 %v1406_v23, %v1398_v19  ;;  %v1119_v55 = vpack.c.bf16 %v1452_v51, %v1444_v47 }
  0xd9   : > { %v717_v56 = vmul.f32 %v369_v11, %v369_v11  ;;  %v647_v63 = vadd.f32 %v646_v57, %v369_v11 }
  0xda   : > { %1163 = vst [vmem:[%s1346_s11 + $0x90] sm:$0xff] %v1079_v25  }
  0xdb   : > { %1171 = vst [vmem:[%s1346_s11 + $0xd0] sm:$0xff] %v1119_v55   ;;  %v780_v1 = vadd.f32 %v779_v59, %v717_v56 }
  0xdf   : > { %v1420_v32 = vpop.f32.mrf.mxu2  ;;  %v1468_v62 = vpop.f32.mrf.mxu3 }
  0xe0   : > { %v371_v15 = vpop.f32.mrf.mxu0  ;;  %v1394_v16 = vpop.f32.mrf.mxu1 }
  0xe1   : > { %v1004_v17 = vpack.c.bf16 %v371_v15, %v369_v11  ;;  %v1044_v18 = vpack.c.bf16 %v1394_v16, %v1387_v12  ;;  %v718_v60 = vmul.f32 %v371_v15, %v371_v15  ;;  %v648_v8 = vadd.f32 %v647_v63, %v371_v15 }
  0xe3   : > { %1148 = vst [vmem:[%s1346_s11 + $0x18] sm:$0xff] %v1004_v17   ;;  %v781_v6 = vadd.f32 %v780_v1, %v718_v60 }
  0xe4   : > { %1156 = vst [vmem:[%s1346_s11 + $0x58] sm:$0xff] %v1044_v18  }
  0xe7   : > { %v1428_v36 = vpop.f32.mrf.mxu2  ;;  %v1476_v55 = vpop.f32.mrf.mxu3 }
  0xe8   : > { %v374_v21 = vpop.f32.mrf.mxu0  ;;  %v1404_v22 = vpop.f32.mrf.mxu1  ;;  %v1084_v39 = vpack.c.bf16 %v1428_v36, %v1420_v32  ;;  %v1124_v57 = vpack.c.bf16 %v1476_v55, %v1468_v62 }
  0xe9   : > { %v719_v2 = vmul.f32 %v374_v21, %v374_v21  ;;  %v649_v4 = vadd.f32 %v648_v8, %v374_v21 }
  0xea   : > { %1164 = vst [vmem:[%s1346_s11 + $0x98] sm:$0xff] %v1084_v39  }
  0xeb   : > { %v782_v11 = vadd.f32 %v781_v6, %v719_v2  ;;  %1172 = vst [vmem:[%s1346_s11 + $0xd8] sm:$0xff] %v1124_v57  }
  0xef   : > { %v1442_v46 = vpop.f32.mrf.mxu2 }
  0xf0   : > { %v376_v27 = vpop.f32.mrf.mxu0  ;;  %v1416_v28 = vpop.f32.mrf.mxu1 }
  0xf1   : > { %v1009_v30 = vpack.c.bf16 %v376_v27, %v374_v21  ;;  %v1049_v31 = vpack.c.bf16 %v1416_v28, %v1404_v22  ;;  %v720_v18 = vmul.f32 %v376_v27, %v376_v27  ;;  %v650_v26 = vadd.f32 %v649_v4, %v376_v27 }
  0xf3   : > { %1149 = vst [vmem:[%s1346_s11 + $0x20] sm:$0xff] %v1009_v30   ;;  %v783_v30 = vadd.f32 %v782_v11, %v720_v18  ;;  %v1490_v11 = vpop.f32.mrf.mxu3 }
  0xf4   : > { %1157 = vst [vmem:[%s1346_s11 + $0x60] sm:$0xff] %v1049_v31  }
  0xf7   : > { %v1450_v50 = vpop.f32.mrf.mxu2 }
  0xf8   : > { %v379_v34 = vpop.f32.mrf.mxu0  ;;  %v1426_v35 = vpop.f32.mrf.mxu1  ;;  %v1089_v54 = vpack.c.bf16 %v1450_v50, %v1442_v46 }
  0xf9   : > { %v721_v25 = vmul.f32 %v379_v34, %v379_v34  ;;  %v651_v15 = vadd.f32 %v650_v26, %v379_v34 }
  0xfa   : > { %1165 = vst [vmem:[%s1346_s11 + $0xa0] sm:$0xff] %v1089_v54  }
  0xfb   : > { %v784_v39 = vadd.f32 %v783_v30, %v721_v25  ;;  %v728_v30 = vmul.f32 %v1348_v38, %v1348_v38 }
  0xff   : > { %v1466_v17 = vpop.f32.mrf.mxu2 }
 0x100   : > { %v381_v41 = vpop.f32.mrf.mxu0  ;;  %v1438_v42 = vpop.f32.mrf.mxu1 }
 0x101   : > { %v1014_v43 = vpack.c.bf16 %v381_v41, %v379_v34  ;;  %v1054_v44 = vpack.c.bf16 %v1438_v42, %v1426_v35  ;;  %v722_v31 = vmul.f32 %v381_v41, %v381_v41  ;;  %v652_v52 = vadd.f32 %v651_v15, %v381_v41 }
 0x103   : > { %1150 = vst [vmem:[%s1346_s11 + $0x28] sm:$0xff] %v1014_v43   ;;  %v785_v21 = vadd.f32 %v784_v39, %v722_v31  ;;  %v729_v39 = vmul.f32 %v1354_v45, %v1354_v45 }
 0x104   : > { %1158 = vst [vmem:[%s1346_s11 + $0x68] sm:$0xff] %v1054_v44  }
 0x107   : > { %v1474_v54 = vpop.f32.mrf.mxu2 }
 0x108   : > { %v384_v48 = vpop.f32.mrf.mxu0  ;;  %v1448_v49 = vpop.f32.mrf.mxu1  ;;  %v1094_v27 = vpack.c.bf16 %v1474_v54, %v1466_v17 }
 0x109   : > { %v723_v40 = vmul.f32 %v384_v48, %v384_v48  ;;  %v653_v34 = vadd.f32 %v652_v52, %v384_v48  ;;  %v730_v52 = vmul.f32 %v1358_v53, %v1358_v53 }
 0x10a   : > { %1166 = vst [vmem:[%s1346_s11 + $0xa8] sm:$0xff] %v1094_v27   ;;  %v1508_v27 = vpop.f32.mrf.mxu3 }
 0x10b   : > { %v786_v59 = vadd.f32 %v785_v21, %v723_v40  ;;  %v1129_v57 = vpack.c.bf16 %v1508_v27, %v1490_v11 }
 0x10d   : > { %1173 = vst [vmem:[%s1346_s11 + $0xe0] sm:$0xff] %v1129_v57  }
 0x110   : > { %v386_v3 = vpop.f32.mrf.mxu0  ;;  %v1462_v5 = vpop.f32.mrf.mxu1 }
 0x111   : > { %v1019_v9 = vpack.c.bf16 %v386_v3, %v384_v48  ;;  %v1059_v14 = vpack.c.bf16 %v1462_v5, %v1448_v49  ;;  %v724_v56 = vmul.f32 %v386_v3, %v386_v3  ;;  %v654_v63 = vadd.f32 %v653_v34, %v386_v3  ;;  %v1488_v48 = vpop.f32.mrf.mxu2 }
 0x112   : > { %v727_v3 = vmul.f32 %v1336_v29, %v1336_v29  ;;  %v740_v57 = vmul.f32 %v1462_v5, %v1462_v5 }
 0x113   : > { %1151 = vst [vmem:[%s1346_s11 + $0x30] sm:$0xff] %v1019_v9   ;;  %v787_v41 = vadd.f32 %v786_v59, %v724_v56 }
 0x114   : > { %1159 = vst [vmem:[%s1346_s11 + $0x70] sm:$0xff] %v1059_v14  }
 0x118   : > { %v389_v43 = vpop.f32.mrf.mxu0  ;;  %v1472_v44 = vpop.f32.mrf.mxu1 }
 0x119   : > { %v725_v60 = vmul.f32 %v389_v43, %v389_v43  ;;  %v655_v1 = vadd.f32 %v654_v63, %v389_v43  ;;  %v1506_v56 = vpop.f32.mrf.mxu2 }
 0x11b   : > { %v788_v2 = vadd.f32 %v787_v41, %v725_v60  ;;  %v733_v41 = vmul.f32 %v1387_v12, %v1387_v12 }
 0x120   : > { %v391_v8 = vpop.f32.mrf.mxu0  ;;  %v1484_v9 = vpop.f32.mrf.mxu1 }
 0x121   : > { %v1024_v14 = vpack.c.bf16 %v391_v8, %v389_v43  ;;  %v656_v6 = vadd.f32 %v655_v1, %v391_v8  ;;  %v726_v18 = vmul.f32 %v391_v8, %v391_v8  ;;  %v1064_v4 = vpack.c.bf16 %v1484_v9, %v1472_v44 }
 0x122   : > { %v734_v8 = vmul.f32 %v1394_v16, %v1394_v16 }
 0x123   : > { %1152 = vst [vmem:[%s1346_s11 + $0x38] sm:$0xff] %v1024_v14   ;;  %v657_v25 = vadd.f32 %v656_v6, %v1336_v29  ;;  %v789_v26 = vadd.f32 %v788_v2, %v726_v18  ;;  %v1528_v6 = vpop.f32.mrf.mxu2  ;;  %v1530_v18 = vpop.f32.mrf.mxu3 }
 0x124   : > { %1160 = vst [vmem:[%s1346_s11 + $0x78] sm:$0xff] %v1064_v4  }
 0x125   : > { %v658_v31 = vadd.f32 %v657_v25, %v1348_v38  ;;  %v790_v15 = vadd.f32 %v789_v26, %v727_v3  ;;  %v1099_v38 = vpack.c.bf16 %v1506_v56, %v1488_v48  ;;  %v736_v25 = vmul.f32 %v1416_v28, %v1416_v28 }
 0x127   : > { %v659_v40 = vadd.f32 %v658_v31, %v1354_v45  ;;  %v791_v43 = vadd.f32 %v790_v15, %v728_v30  ;;  %v731_v45 = vmul.f32 %v1366_v61, %v1366_v61  ;;  %1167 = vst [vmem:[%s1346_s11 + $0xb0] sm:$0xff] %v1099_v38   ;;  %v738_v15 = vmul.f32 %v1438_v42, %v1438_v42 }
 0x129   : > { %v660_v29 = vadd.f32 %v659_v40, %v1358_v53  ;;  %v792_v21 = vadd.f32 %v791_v43, %v729_v39  ;;  %v732_v53 = vmul.f32 %v1379_v7, %v1379_v7 }
 0x12b   : > { %v661_v34 = vadd.f32 %v660_v29, %v1366_v61  ;;  %v793_v59 = vadd.f32 %v792_v21, %v730_v52  ;;  %v1544_v40 = vpop.f32.mrf.mxu2  ;;  %v1546_v43 = vpop.f32.mrf.mxu3  ;;  %v739_v29 = vmul.f32 %v1448_v49, %v1448_v49 }
 0x12c   : > { %v1134_v52 = vpack.c.bf16 %v1546_v43, %v1530_v18 }
 0x12d   : > { %v662_v60 = vadd.f32 %v661_v34, %v1379_v7  ;;  %v794_v63 = vadd.f32 %v793_v59, %v731_v45  ;;  %v735_v7 = vmul.f32 %v1404_v22, %v1404_v22  ;;  %v741_v59 = vmul.f32 %v1472_v44, %v1472_v44 }
 0x12e   : > { %1174 = vst [vmem:[%s1346_s11 + $0xe8] sm:$0xff] %v1134_v52   ;;  %v751_v52 = vmul.f32 %v1442_v46, %v1442_v46 }
 0x12f   : > { %v795_v1 = vadd.f32 %v794_v63, %v732_v53  ;;  %v663_v2 = vadd.f32 %v662_v60, %v1387_v12 }
 0x131   : > { %v664_v61 = vadd.f32 %v663_v2, %v1394_v16  ;;  %v796_v14 = vadd.f32 %v795_v1, %v733_v41  ;;  %v737_v16 = vmul.f32 %v1426_v35, %v1426_v35  ;;  %v743_v41 = vmul.f32 %v1362_v58, %v1362_v58 }
 0x132   : > { %v744_v2 = vmul.f32 %v1370_v0, %v1370_v0 }
 0x133   : > { %v665_v4 = vadd.f32 %v664_v61, %v1404_v22  ;;  %v797_v3 = vadd.f32 %v796_v14, %v734_v8  ;;  %v1566_v63 = vpop.f32.mrf.mxu3  ;;  %v745_v61 = vmul.f32 %v1383_v10, %v1383_v10 }
 0x135   : > { %v666_v12 = vadd.f32 %v665_v4, %v1416_v28  ;;  %v798_v26 = vadd.f32 %v797_v3, %v735_v7  ;;  %v1104_v28 = vpack.c.bf16 %v1544_v40, %v1528_v6  ;;  %v746_v7 = vmul.f32 %v1389_v13, %v1389_v13 }
 0x137   : > { %v667_v30 = vadd.f32 %v666_v12, %v1426_v35  ;;  %v799_v31 = vadd.f32 %v798_v26, %v736_v25  ;;  %1168 = vst [vmem:[%s1346_s11 + $0xb8] sm:$0xff] %v1104_v28  }
 0x139   : > { %v668_v22 = vadd.f32 %v667_v30, %v1438_v42  ;;  %v800_v39 = vadd.f32 %v799_v31, %v737_v16 }
 0x13b   : > { %v669_v35 = vadd.f32 %v668_v22, %v1448_v49  ;;  %v801_v21 = vadd.f32 %v800_v39, %v738_v15  ;;  %v742_v49 = vmul.f32 %v1484_v9, %v1484_v9  ;;  %v1580_v3 = vpop.f32.mrf.mxu3  ;;  %v750_v22 = vmul.f32 %v1428_v36, %v1428_v36 }
 0x13c   : > { %v1139_v25 = vpack.c.bf16 %v1580_v3, %v1566_v63 }
 0x13d   : > { %v802_v38 = vadd.f32 %v801_v21, %v739_v29  ;;  %v670_v42 = vadd.f32 %v669_v35, %v1462_v5  ;;  %v752_v29 = vmul.f32 %v1450_v50, %v1450_v50 }
 0x13e   : > { %1175 = vst [vmem:[%s1346_s11 + $0xf0] sm:$0xff] %v1139_v25  }
 0x13f   : > { %v803_v45 = vadd.f32 %v802_v38, %v740_v57  ;;  %v671_v34 = vadd.f32 %v670_v42, %v1472_v44  ;;  %v753_v38 = vmul.f32 %v1466_v17, %v1466_v17 }
 0x141   : > { %v804_v53 = vadd.f32 %v803_v45, %v741_v59  ;;  %v672_v60 = vadd.f32 %v671_v34, %v1484_v9  ;;  %v754_v45 = vmul.f32 %v1474_v54, %v1474_v54 }
 0x143   : > { %v673_v5 = vadd.f32 %v672_v60, %v1362_v58  ;;  %v805_v1 = vadd.f32 %v804_v53, %v742_v49  ;;  %v1597_v28 = vpop.f32.mrf.mxu3 }
 0x145   : > { %v674_v44 = vadd.f32 %v673_v5, %v1370_v0  ;;  %v806_v8 = vadd.f32 %v805_v1, %v743_v41  ;;  %v747_v0 = vmul.f32 %v1398_v19, %v1398_v19  ;;  %v756_v41 = vmul.f32 %v1506_v56, %v1506_v56 }
 0x146   : > { %v757_v1 = vmul.f32 %v1528_v6, %v1528_v6 }
 0x147   : > { %v675_v9 = vadd.f32 %v674_v44, %v1383_v10  ;;  %v807_v14 = vadd.f32 %v806_v8, %v744_v2  ;;  %v748_v10 = vmul.f32 %v1406_v23, %v1406_v23  ;;  %v758_v8 = vmul.f32 %v1544_v40, %v1544_v40 }
 0x149   : > { %v676_v4 = vadd.f32 %v675_v9, %v1389_v13  ;;  %v808_v58 = vadd.f32 %v807_v14, %v745_v61  ;;  %v749_v13 = vmul.f32 %v1420_v32, %v1420_v32 }
 0x14b   : > { %v677_v12 = vadd.f32 %v676_v4, %v1398_v19  ;;  %v809_v26 = vadd.f32 %v808_v58, %v746_v7  ;;  %v511_v34 = vpop.f32.mrf.mxu3 }
 0x14c   : > { %v1144_v59 = vpack.c.bf16 %v511_v34, %v1597_v28 }
 0x14d   : > { %v678_v16 = vadd.f32 %v677_v12, %v1406_v23  ;;  %v810_v30 = vadd.f32 %v809_v26, %v747_v0 }
 0x14e   : > { %1176 = vst [vmem:[%s1346_s11 + $0xf8] sm:$0xff] %v1144_v59   ;;  %v774_v59 = vmul.f32 %v511_v34, %v511_v34 }
 0x14f   : > { %v811_v31 = vadd.f32 %v810_v30, %v748_v10  ;;  %v679_v15 = vadd.f32 %v678_v16, %v1420_v32 }
 0x151   : > { %v680_v39 = vadd.f32 %v679_v15, %v1428_v36  ;;  %v812_v19 = vadd.f32 %v811_v31, %v749_v13 }
 0x153   : > { %v681_v23 = vadd.f32 %v680_v39, %v1442_v46  ;;  %v813_v35 = vadd.f32 %v812_v19, %v750_v22 }
 0x155   : > { %v682_v32 = vadd.f32 %v681_v23, %v1450_v50  ;;  %v814_v21 = vadd.f32 %v813_v35, %v751_v52  ;;  %v755_v50 = vmul.f32 %v1488_v48, %v1488_v48 }
 0x157   : > { %v683_v36 = vadd.f32 %v682_v32, %v1466_v17  ;;  %v815_v42 = vadd.f32 %v814_v21, %v752_v29  ;;  %v770_v29 = vmul.f32 %v1546_v43, %v1546_v43 }
 0x159   : > { %v684_v57 = vadd.f32 %v683_v36, %v1474_v54  ;;  %v816_v46 = vadd.f32 %v815_v42, %v753_v38 }
 0x15b   : > { %v817_v53 = vadd.f32 %v816_v46, %v754_v45  ;;  %v685_v60 = vadd.f32 %v684_v57, %v1488_v48  ;;  %v759_v48 = vmul.f32 %v1400_v20, %v1400_v20 }
 0x15d   : > { %v818_v49 = vadd.f32 %v817_v53, %v755_v50  ;;  %v686_v17 = vadd.f32 %v685_v60, %v1506_v56  ;;  %v760_v56 = vmul.f32 %v1408_v24, %v1408_v24 }
 0x15f   : > { %v819_v5 = vadd.f32 %v818_v49, %v756_v41  ;;  %v687_v54 = vadd.f32 %v686_v17, %v1528_v6  ;;  %v761_v6 = vmul.f32 %v1422_v33, %v1422_v33 }
 0x161   : > { %v820_v2 = vadd.f32 %v819_v5, %v757_v1  ;;  %v688_v44 = vadd.f32 %v687_v54, %v1544_v40  ;;  %v762_v40 = vmul.f32 %v1430_v37, %v1430_v37 }
 0x163   : > { %v689_v61 = vadd.f32 %v688_v44, %v1400_v20  ;;  %v821_v9 = vadd.f32 %v820_v2, %v758_v8  ;;  %v763_v20 = vmul.f32 %v1444_v47, %v1444_v47 }
 0x165   : > { %v690_v14 = vadd.f32 %v689_v61, %v1408_v24  ;;  %v822_v7 = vadd.f32 %v821_v9, %v759_v48  ;;  %v764_v24 = vmul.f32 %v1452_v51, %v1452_v51 }
 0x167   : > { %v691_v4 = vadd.f32 %v690_v14, %v1422_v33  ;;  %v823_v58 = vadd.f32 %v822_v7, %v760_v56  ;;  %v765_v33 = vmul.f32 %v1468_v62, %v1468_v62 }
 0x169   : > { %v692_v25 = vadd.f32 %v691_v4, %v1430_v37  ;;  %v824_v0 = vadd.f32 %v823_v58, %v761_v6  ;;  %v766_v37 = vmul.f32 %v1476_v55, %v1476_v55 }
 0x16b   : > { %v693_v12 = vadd.f32 %v692_v25, %v1444_v47  ;;  %v825_v26 = vadd.f32 %v824_v0, %v762_v40  ;;  %v767_v47 = vmul.f32 %v1490_v11, %v1490_v11 }
 0x16d   : > { %v694_v10 = vadd.f32 %v693_v12, %v1452_v51  ;;  %v826_v16 = vadd.f32 %v825_v26, %v763_v20  ;;  %v768_v51 = vmul.f32 %v1508_v27, %v1508_v27 }
 0x16f   : > { %v827_v30 = vadd.f32 %v826_v16, %v764_v24  ;;  %v695_v13 = vadd.f32 %v694_v10, %v1468_v62  ;;  %v769_v62 = vmul.f32 %v1530_v18, %v1530_v18 }
 0x171   : > { %v696_v31 = vadd.f32 %v695_v13, %v1476_v55  ;;  %v828_v15 = vadd.f32 %v827_v30, %v765_v33 }
 0x173   : > { %v697_v22 = vadd.f32 %v696_v31, %v1490_v11  ;;  %v829_v39 = vadd.f32 %v828_v15, %v766_v37 }
 0x175   : > { %v698_v19 = vadd.f32 %v697_v22, %v1508_v27  ;;  %v830_v52 = vadd.f32 %v829_v39, %v767_v47  ;;  %v771_v27 = vmul.f32 %v1566_v63, %v1566_v63 }
 0x177   : > { %v699_v23 = vadd.f32 %v698_v19, %v1530_v18  ;;  %v831_v35 = vadd.f32 %v830_v52, %v768_v51  ;;  %v772_v18 = vmul.f32 %v1580_v3, %v1580_v3 }
 0x179   : > { %v700_v55 = vadd.f32 %v699_v23, %v1546_v43  ;;  %v832_v11 = vadd.f32 %v831_v35, %v769_v62  ;;  %v773_v43 = vmul.f32 %v1597_v28, %v1597_v28 }
 0x17b   : > { %v833_v32 = vadd.f32 %v832_v11, %v770_v29  ;;  %v701_v21 = vadd.f32 %v700_v55, %v1566_v63 }
 0x17d   : > { %v834_v38 = vadd.f32 %v833_v32, %v771_v27  ;;  %v702_v36 = vadd.f32 %v701_v21, %v1580_v3 }
 0x17f   : > { %v835_v42 = vadd.f32 %v834_v38, %v772_v18  ;;  %v703_v57 = vadd.f32 %v702_v36, %v1597_v28 }
 0x181   : > { %v836_v45 = vadd.f32 %v835_v42, %v773_v43  ;;  %v704_v46 = vadd.f32 %v703_v57, %v511_v34 }
 0x183   : > { %v705_v53 = vrot.slane %v704_v46, 4  ;;  %v837_v60 = vadd.f32 %v836_v45, %v774_v59 }
 0x185   : > { %v706_v63 = vadd.f32 %v705_v53, %v704_v46  ;;  %v838_v50 = vrot.slane %v837_v60, 4 }
 0x187   : > { %v707_v49 = vrot.slane %v706_v63, 2  ;;  %v839_v17 = vadd.f32 %v838_v50, %v837_v60 }
 0x189   : > { %v708_v41 = vadd.f32 %v707_v49, %v706_v63  ;;  %v840_v5 = vrot.slane %v839_v17, 2 }
 0x18b   : > { %v709_v3 = vrot.slane %v708_v41, 1  ;;  %v841_v54 = vadd.f32 %v840_v5, %v839_v17 }
 0x18d   : > { %v842_v1 = vrot.slane %v841_v54, 1  ;;  %v710_v28 = vadd.f32 %v709_v3, %v708_v41 }
 0x18f   : > { %v843_v34 = vadd.f32 %v842_v1, %v841_v54 }
 0x191   : > { %v845_v2 = vsel %vm844_vm0, %v710_v28, %v843_v34 }
 0x192   : > { %846 = vst [vmem:[%s184_s17] sm:$0x3] %v845_v2 }
 0x193 PF: > { %s14_s12 = sadd.s32 1, %s1215_s12  }
 0x194   : > { %p11_p5 = scmp.ge.s32.totalorder %s14_s12, 4  }
 0x196   :  { %13 = sbr.rel (!%p11_p5) target bundleno = 1 (0x1), region = 70 }

// kernel: bottleneck_block.6
= control target key start
LH: loop header
LB: loop body
LE: loop exit
PB: predicated region body
PF: predicated region fallthrough
CT: control target
= control target key end

     0   :  { %s1856_s18 = smov 0   ;;  %s2408_s0 = inlined_call_operand.vmem [shape: bf16[1024,128], index: 0, kind: input, shape index: {}]   ;;  %s2409_s1 = inlined_call_operand.vmem [shape: f32[1,128], index: 1, kind: input, shape index: {}]   ;;  %s2410_s2 = inlined_call_operand.vmem [shape: f32[1,128], index: 2, kind: input, shape index: {}]   ;;  %s2411_s3 = inlined_call_operand.vmem [shape: bf16[128,128], index: 3, kind: input, shape index: {}]   ;;  %s2412_s4 = inlined_call_operand.vmem [shape: bf16[1024,128], index: 4, kind: output, shape index: {0}]   ;;  %s2413_s5 = inlined_call_operand.vmem [shape: f32[2,2,128], index: 5, kind: output, shape index: {1}]  }
   0x1 LB: > { %s1862_s19 = sadd.s32 4294967295, %s1824_s18   ;;  %p1384_p0 = scmp.ge.s32.totalorder %s1824_s18, 1  ;;  %s1824_s18 = sphi %s1856_s18, %s16_s18  }
   0x2   : > { %p191_p1 = scmp.lt.s32.totalorder %s1824_s18, 3 }
   0x4   : > { %p192_p2 = pnand %p1384_p0, %p191_p1 }
   0x5   : > { %s1385_s22 = sshll.u32 (!%p192_p2), %s1862_s19, 6  ;;  %p235_p4 = scmp.lt.s32.totalorder (!%p192_p2), %s1862_s19, 1 }
   0x6   : > { %195 = sbr.rel (%p192_p2) target bundleno = 403 (0x193), region = 36  ;;  %p224_p3 = scmp.lt.s32.totalorder (!%p192_p2), %s1385_s22, 127 }
   0xb   : > { %v1431_v0 = vld [vmem:[%s2411_s3 + $0x38] sm:$0xff]  ;;  %v1430_v1 = vld [vmem:[%s2411_s3 + $0x30] sm:$0xff]  ;;  %s2415_s22 = smov (!%p224_p3, %s1385_s22), 127  ;;  %v1429_v2 = vld [vmem:[%s2411_s3 + $0x28] sm:$0xff]  ;;  %s2417_s19 = smov (!%p235_p4, %s1862_s19), 1 }
   0xc   : > { %791 = vmatpush.bf16.msra.mxu0 %v1431_v0  ;;  %1782 = vmatpush.bf16.msra.mxu1 %v1431_v0  ;;  %s1386_s25 = sshll.u32 %s2415_s22, 2  ;;  %v1890_v5 = vld [vmem:[%s2409_s1] ss:$0 sm:$0xff]  ;;  %v1427_v11 = vld [vmem:[%s2411_s3 + $0x18] sm:$0xff]  ;;  %v1426_v16 = vld [vmem:[%s2411_s3 + $0x10] sm:$0xff]  ;;  %s1389_s29 = sshll.u32 %s2417_s19, 1 }
   0xd   : > { %1783 = vmatpush.bf16.msra.mxu2 %v1431_v0  ;;  %1784 = vmatpush.bf16.msra.mxu3 %v1431_v0  ;;  %s1884_s30 = scalar_lea.vmem %s2408_s0, %s1386_s25  ;;  %v1428_v6 = vld [vmem:[%s2411_s3 + $0x20] sm:$0xff]  ;;  %v1425_v22 = vld [vmem:[%s2411_s3 + $0x8] sm:$0xff]  ;;  %s2068_s26 = scalar_lea.vmem %s2412_s4, %s1386_s25 }
   0xe   : > { %v1433_v3 = vld [vmem:[%s1884_s30] sm:$0xff]   ;;  %v1720_v24 = vld [vmem:[%s1884_s30 + $0x8] sm:$0xff]   ;;  %v1721_v50 = vld [vmem:[%s1884_s30 + $0x10] sm:$0xff]   ;;  %s238_s7 = scalar_lea.vmem %s2413_s5, %s1389_s29 }
   0xf   : > { %v1434_v4 = vunpack.c.l.bf16 %v1433_v3  ;;  %v1435_v7 = vunpack.c.h.bf16 %v1433_v3  ;;  %v1899_v9 = vld [vmem:[%s2410_s2] ss:$0 sm:$0xff]  ;;  %v1438_v29 = vunpack.c.l.bf16 %v1720_v24  ;;  %v1439_v30 = vunpack.c.h.bf16 %v1720_v24  ;;  %v1728_v39 = vld [vmem:[%s1884_s30 + $0x48] sm:$0xff]  }
  0x10   : > { %792 = vmatpush.bf16.msra.mxu0 %v1430_v1  ;;  %1785 = vmatpush.bf16.msra.mxu1 %v1430_v1  ;;  %v1727_v10 = vld [vmem:[%s1884_s30 + $0x40] sm:$0xff]   ;;  %v1470_v40 = vunpack.c.l.bf16 %v1728_v39  ;;  %v1471_v41 = vunpack.c.h.bf16 %v1728_v39  ;;  %v1442_v58 = vunpack.c.l.bf16 %v1721_v50  ;;  %v1443_v59 = vunpack.c.h.bf16 %v1721_v50 }
  0x11   : > { %1786 = vmatpush.bf16.msra.mxu2 %v1430_v1  ;;  %1787 = vmatpush.bf16.msra.mxu3 %v1430_v1  ;;  %v371_v8 = vmul.f32 %v1890_v5, %v1434_v4  ;;  %v372_v12 = vmul.f32 %v1890_v5, %v1435_v7  ;;  %v1466_v13 = vunpack.c.l.bf16 %v1727_v10  ;;  %v1467_v14 = vunpack.c.h.bf16 %v1727_v10  ;;  %v1424_v31 = vld [vmem:[%s2411_s3] sm:$0xff]  ;;  %v1729_v7 = vld [vmem:[%s1884_s30 + $0x50] sm:$0xff]  }
  0x12   : > { %v373_v36 = vmul.f32 %v1890_v5, %v1438_v29  ;;  %v374_v37 = vmul.f32 %v1890_v5, %v1439_v30  ;;  %v389_v42 = vmul.f32 %v1890_v5, %v1470_v40  ;;  %v390_v43 = vmul.f32 %v1890_v5, %v1471_v41  ;;  %v1735_v53 = vld [vmem:[%s1884_s30 + $0x80] sm:$0xff]   ;;  %v1736_v29 = vld [vmem:[%s1884_s30 + $0x88] sm:$0xff]  }
  0x13   : > { %v439_v15 = vadd.f32 %v1899_v9, %v371_v8  ;;  %v440_v17 = vadd.f32 %v1899_v9, %v372_v12  ;;  %v387_v18 = vmul.f32 %v1890_v5, %v1466_v13  ;;  %v388_v19 = vmul.f32 %v1890_v5, %v1467_v14 }
  0x14   : > { %793 = vmatpush.bf16.msra.mxu0 %v1429_v2  ;;  %1788 = vmatpush.bf16.msra.mxu1 %v1429_v2  ;;  %v441_v44 = vadd.f32 %v1899_v9, %v373_v36  ;;  %v442_v45 = vadd.f32 %v1899_v9, %v374_v37  ;;  %v457_v46 = vadd.f32 %v1899_v9, %v389_v42  ;;  %v1498_v54 = vunpack.c.l.bf16 %v1735_v53 }
  0x15   : > { %1789 = vmatpush.bf16.msra.mxu2 %v1429_v2  ;;  %1790 = vmatpush.bf16.msra.mxu3 %v1429_v2  ;;  %v455_v20 = vadd.f32 %v1899_v9, %v387_v18  ;;  %v456_v21 = vadd.f32 %v1899_v9, %v388_v19  ;;  %vm503_vm0 = vcmp.gt.f32.partialorder %v439_v15, 0.0  ;;  %v567_v23 = vmul.f32 0.01, %v439_v15 }
  0x16   : > { %v568_v25 = vmul.f32 0.01, %v440_v17  ;;  %vm504_vm1 = vcmp.gt.f32.partialorder %v440_v17, 0.0  ;;  %v458_v47 = vadd.f32 %v1899_v9, %v390_v43  ;;  %vm505_vm4 = vcmp.gt.f32.partialorder %v441_v44, 0.0 }
  0x17   : > { %v583_v26 = vmul.f32 0.01, %v455_v20  ;;  %v584_v27 = vmul.f32 0.01, %v456_v21  ;;  %vm519_vm2 = vcmp.gt.f32.partialorder %v455_v20, 0.0  ;;  %vm520_vm3 = vcmp.gt.f32.partialorder %v456_v21, 0.0 }
  0x18   : > { %794 = vmatpush.bf16.msra.mxu0 %v1428_v6  ;;  %1791 = vmatpush.bf16.msra.mxu1 %v1428_v6  ;;  %v631_v28 = vsel %vm503_vm0, %v439_v15, %v567_v23  ;;  %v632_v32 = vsel %vm504_vm1, %v440_v17, %v568_v25  ;;  %v569_v48 = vmul.f32 0.01, %v441_v44  ;;  %v570_v49 = vmul.f32 0.01, %v442_v45 }
  0x19   : > { %1792 = vmatpush.bf16.msra.mxu2 %v1428_v6  ;;  %1793 = vmatpush.bf16.msra.mxu3 %v1428_v6  ;;  %v647_v33 = vsel %vm519_vm2, %v455_v20, %v583_v26  ;;  %v648_v34 = vsel %vm520_vm3, %v456_v21, %v584_v27  ;;  %v695_v35 = vpack.c.bf16 %v632_v32, %v631_v28  ;;  %vm506_vm5 = vcmp.gt.f32.partialorder %v442_v45, 0.0 }
  0x1a   : > { %v703_v38 = vpack.c.bf16 %v648_v34, %v647_v33  ;;  %v585_v51 = vmul.f32 0.01, %v457_v46  ;;  %v586_v52 = vmul.f32 0.01, %v458_v47  ;;  %vm521_vm6 = vcmp.gt.f32.partialorder %v457_v46, 0.0 }
  0x1b   : > { %vm522_vm7 = vcmp.gt.f32.partialorder %v458_v47, 0.0  ;;  %v1499_v55 = vunpack.c.h.bf16 %v1735_v53  ;;  %v633_v56 = vsel %vm505_vm4, %v441_v44, %v569_v48  ;;  %v634_v57 = vsel %vm506_vm5, %v442_v45, %v570_v49  ;;  %v1730_v44 = vld [vmem:[%s1884_s30 + $0x58] sm:$0xff]  }
  0x1c   : > { %795 = vmatpush.bf16.msra.mxu0 %v1427_v11  ;;  %1794 = vmatpush.bf16.msra.mxu1 %v1427_v11  ;;  %v649_v60 = vsel %vm521_vm6, %v457_v46, %v585_v51  ;;  %v650_v61 = vsel %vm522_vm7, %v458_v47, %v586_v52  ;;  %v403_v62 = vmul.f32 %v1890_v5, %v1498_v54  ;;  %v1475_v12 = vunpack.c.h.bf16 %v1729_v7 }
  0x1d   : > { %1795 = vmatpush.bf16.msra.mxu2 %v1427_v11  ;;  %1796 = vmatpush.bf16.msra.mxu3 %v1427_v11  ;;  %v404_v63 = vmul.f32 %v1890_v5, %v1499_v55  ;;  %v696_v2 = vpack.c.bf16 %v634_v57, %v633_v56  ;;  %v375_v3 = vmul.f32 %v1890_v5, %v1442_v58  ;;  %v1474_v11 = vunpack.c.l.bf16 %v1729_v7  ;;  %v1723_v56 = vld [vmem:[%s1884_s30 + $0x20] sm:$0xff]  }
  0x1e   : > { %v471_v0 = vadd.f32 %v1899_v9, %v403_v62  ;;  %v376_v4 = vmul.f32 %v1890_v5, %v1443_v59  ;;  %v704_v6 = vpack.c.bf16 %v650_v61, %v649_v60  ;;  %v1502_v30 = vunpack.c.l.bf16 %v1736_v29 }
  0x1f   : > { %v472_v1 = vadd.f32 %v1899_v9, %v404_v63  ;;  %v391_v15 = vmul.f32 %v1890_v5, %v1474_v11  ;;  %v443_v17 = vadd.f32 %v1899_v9, %v375_v3  ;;  %v1478_v47 = vunpack.c.l.bf16 %v1730_v44  ;;  %v1743_v3 = vld [vmem:[%s1884_s30 + $0xc0] sm:$0xff]  }
  0x20   : > { %796 = vmatpush.bf16.msra.mxu0 %v1426_v16  ;;  %1797 = vmatpush.bf16.msra.mxu1 %v1426_v16  ;;  %v599_v8 = vmul.f32 0.01, %v471_v0  ;;  %vm535_vm8 = vcmp.gt.f32.partialorder %v471_v0, 0.0  ;;  %v444_v18 = vadd.f32 %v1899_v9, %v376_v4  ;;  %v405_v36 = vmul.f32 %v1890_v5, %v1502_v30 }
  0x21   : > { %1798 = vmatpush.bf16.msra.mxu2 %v1426_v16  ;;  %1799 = vmatpush.bf16.msra.mxu3 %v1426_v16  ;;  %v600_v10 = vmul.f32 0.01, %v472_v1  ;;  %vm536_vm9 = vcmp.gt.f32.partialorder %v472_v1, 0.0  ;;  %v392_v16 = vmul.f32 %v1890_v5, %v1475_v12  ;;  %v459_v20 = vadd.f32 %v1899_v9, %v391_v15 }
  0x22   : > { %v663_v13 = vsel %vm535_vm8, %v471_v0, %v599_v8  ;;  %v571_v23 = vmul.f32 0.01, %v443_v17  ;;  %v572_v24 = vmul.f32 0.01, %v444_v18  ;;  %vm507_vm10 = vcmp.gt.f32.partialorder %v443_v17, 0.0 }
  0x23   : > { %v664_v14 = vsel %vm536_vm9, %v472_v1, %v600_v10  ;;  %v460_v21 = vadd.f32 %v1899_v9, %v392_v16  ;;  %vm508_vm11 = vcmp.gt.f32.partialorder %v444_v18, 0.0  ;;  %v587_v25 = vmul.f32 0.01, %v459_v20 }
  0x24   : > { %797 = vmatpush.bf16.msra.mxu0 %v1425_v22  ;;  %1800 = vmatpush.bf16.msra.mxu1 %v1425_v22  ;;  %v711_v19 = vpack.c.bf16 %v664_v14, %v663_v13  ;;  %vm523_vm12 = vcmp.gt.f32.partialorder %v459_v20, 0.0  ;;  %v635_v32 = vsel %vm507_vm10, %v443_v17, %v571_v23  ;;  %v636_v33 = vsel %vm508_vm11, %v444_v18, %v572_v24 }
  0x25   : > { %1801 = vmatpush.bf16.msra.mxu2 %v1425_v22  ;;  %1802 = vmatpush.bf16.msra.mxu3 %v1425_v22  ;;  %v1722_v22 = vld [vmem:[%s1884_s30 + $0x18] sm:$0xff]   ;;  %v588_v26 = vmul.f32 0.01, %v460_v21  ;;  %vm524_vm13 = vcmp.gt.f32.partialorder %v460_v21, 0.0  ;;  %v651_v34 = vsel %vm523_vm12, %v459_v20, %v587_v25  ;;  %v473_v40 = vadd.f32 %v1899_v9, %v405_v36  ;;  %v1724_v36 = vld [vmem:[%s1884_s30 + $0x28] sm:$0xff]  }
  0x26   : > { %v1446_v27 = vunpack.c.l.bf16 %v1722_v22  ;;  %v1447_v28 = vunpack.c.h.bf16 %v1722_v22  ;;  %v697_v42 = vpack.c.bf16 %v636_v33, %v635_v32  ;;  %v1479_v48 = vunpack.c.h.bf16 %v1730_v44 }
  0x27   : > { %v601_v45 = vmul.f32 0.01, %v473_v40  ;;  %vm537_vm14 = vcmp.gt.f32.partialorder %v473_v40, 0.0  ;;  %v393_v53 = vmul.f32 %v1890_v5, %v1478_v47  ;;  %v1450_v61 = vunpack.c.l.bf16 %v1723_v56 }
  0x28   : > { %798 = vmatpush.bf16.msra.mxu0 %v1424_v31  ;;  %1803 = vmatpush.bf16.msra.mxu1 %v1424_v31  ;;  %v378_v39 = vmul.f32 %v1890_v5, %v1447_v28  ;;  %v394_v54 = vmul.f32 %v1890_v5, %v1479_v48  ;;  %v1530_v7 = vunpack.c.l.bf16 %v1743_v3  ;;  %v1531_v8 = vunpack.c.h.bf16 %v1743_v3 }
  0x29   : > { %1804 = vmatpush.bf16.msra.mxu2 %v1424_v31  ;;  %1805 = vmatpush.bf16.msra.mxu3 %v1424_v31  ;;  %v1503_v31 = vunpack.c.h.bf16 %v1736_v29  ;;  %v665_v51 = vsel %vm537_vm14, %v473_v40, %v601_v45  ;;  %v461_v57 = vadd.f32 %v1899_v9, %v393_v53  ;;  %v1451_v10 = vunpack.c.h.bf16 %v1723_v56 }
  0x2a   : > { %v446_v50 = vadd.f32 %v1899_v9, %v378_v39  ;;  %v462_v58 = vadd.f32 %v1899_v9, %v394_v54  ;;  %v379_v11 = vmul.f32 %v1890_v5, %v1450_v61  ;;  %v419_v16 = vmul.f32 %v1890_v5, %v1530_v7 }
  0x2b   : > { %799 = vmatmul.bf16.vlgmr.msra.gmra.mxu0 %v695_v35  ;;  %839 = vmatmul.bf16.vlgmr.msra.gmra.mxu1 %v703_v38  ;;  %v652_v35 = vsel %vm524_vm13, %v460_v21, %v588_v26  ;;  %v406_v37 = vmul.f32 %v1890_v5, %v1503_v31  ;;  %v377_v38 = vmul.f32 %v1890_v5, %v1446_v27  ;;  %v589_v62 = vmul.f32 0.01, %v461_v57  ;;  %v1731_v26 = vld [vmem:[%s1884_s30 + $0x60] sm:$0xff]  }
  0x2c   : > { %879 = vmatmul.bf16.vlgmr.msra.gmra.mxu2 %v711_v19  ;;  %v705_v43 = vpack.c.bf16 %v652_v35, %v651_v34  ;;  %v574_v60 = vmul.f32 0.01, %v446_v50  ;;  %vm510_vm1 = vcmp.gt.f32.partialorder %v446_v50, 0.0  ;;  %v590_v63 = vmul.f32 0.01, %v462_v58 }
  0x2d   : > { %v474_v41 = vadd.f32 %v1899_v9, %v406_v37  ;;  %v445_v49 = vadd.f32 %v1899_v9, %v377_v38  ;;  %vm525_vm2 = vcmp.gt.f32.partialorder %v461_v57, 0.0  ;;  %vm526_vm3 = vcmp.gt.f32.partialorder %v462_v58, 0.0 }
  0x2e   : > { %v638_v1 = vsel %vm510_vm1, %v446_v50, %v574_v60  ;;  %v653_v12 = vsel %vm525_vm2, %v461_v57, %v589_v62  ;;  %v654_v13 = vsel %vm526_vm3, %v462_v58, %v590_v63  ;;  %v420_v17 = vmul.f32 %v1890_v5, %v1531_v8 }
  0x2f   : > { %v602_v46 = vmul.f32 0.01, %v474_v41  ;;  %vm538_vm15 = vcmp.gt.f32.partialorder %v474_v41, 0.0  ;;  %v573_v59 = vmul.f32 0.01, %v445_v49  ;;  %vm509_vm0 = vcmp.gt.f32.partialorder %v445_v49, 0.0 }
  0x30   : > { %v487_v21 = vadd.f32 %v1899_v9, %v419_v16  ;;  %v380_v22 = vmul.f32 %v1890_v5, %v1451_v10  ;;  %v447_v23 = vadd.f32 %v1899_v9, %v379_v11  ;;  %v706_v24 = vpack.c.bf16 %v654_v13, %v653_v12  ;;  %v1732_v11 = vld [vmem:[%s1884_s30 + $0x68] sm:$0xff]  }
  0x31   : > { %v666_v52 = vsel %vm538_vm15, %v474_v41, %v602_v46  ;;  %v637_v0 = vsel %vm509_vm0, %v445_v49, %v573_v59  ;;  %v488_v25 = vadd.f32 %v1899_v9, %v420_v17  ;;  %v1482_v30 = vunpack.c.l.bf16 %v1731_v26 }
  0x32   : > { %v712_v55 = vpack.c.bf16 %v666_v52, %v665_v51  ;;  %v698_v18 = vpack.c.bf16 %v638_v1, %v637_v0  ;;  %v615_v29 = vmul.f32 0.01, %v487_v21  ;;  %vm551_vm6 = vcmp.gt.f32.partialorder %v487_v21, 0.0  ;;  %v1738_v51 = vld [vmem:[%s1884_s30 + $0x98] sm:$0xff]   ;;  %v1744_v52 = vld [vmem:[%s1884_s30 + $0xc8] sm:$0xff]  }
  0x33   : > { %vm552_vm7 = vcmp.gt.f32.partialorder %v488_v25, 0.0  ;;  %v616_v33 = vmul.f32 0.01, %v488_v25  ;;  %v448_v35 = vadd.f32 %v1899_v9, %v380_v22  ;;  %v1483_v38 = vunpack.c.h.bf16 %v1731_v26 }
  0x34   : > { %v679_v34 = vsel %vm551_vm6, %v487_v21, %v615_v29  ;;  %v395_v39 = vmul.f32 %v1890_v5, %v1482_v30  ;;  %v575_v44 = vmul.f32 0.01, %v447_v23  ;;  %v1454_v45 = vunpack.c.l.bf16 %v1724_v36 }
  0x35   : > { %v680_v40 = vsel %vm552_vm7, %v488_v25, %v616_v33  ;;  %vm511_vm8 = vcmp.gt.f32.partialorder %v447_v23, 0.0  ;;  %v576_v46 = vmul.f32 0.01, %v448_v35  ;;  %vm512_vm9 = vcmp.gt.f32.partialorder %v448_v35, 0.0 }
  0x36   : > { %v719_v41 = vpack.c.bf16 %v680_v40, %v679_v34  ;;  %v1455_v48 = vunpack.c.h.bf16 %v1724_v36  ;;  %v639_v53 = vsel %vm511_vm8, %v447_v23, %v575_v44  ;;  %v381_v54 = vmul.f32 %v1890_v5, %v1454_v45  ;;  %v1725_v23 = vld [vmem:[%s1884_s30 + $0x30] sm:$0xff]  }
  0x37   : > { %v1510_v56 = vunpack.c.l.bf16 %v1738_v51  ;;  %v1511_v57 = vunpack.c.h.bf16 %v1738_v51  ;;  %v1534_v58 = vunpack.c.l.bf16 %v1744_v52  ;;  %v1535_v62 = vunpack.c.h.bf16 %v1744_v52 }
  0x38   : > { %919 = vmatmul.bf16.vlgmr.msra.gmra.mxu3 %v719_v41  ;;  %v382_v59 = vmul.f32 %v1890_v5, %v1455_v48  ;;  %v449_v3 = vadd.f32 %v1899_v9, %v381_v54  ;;  %v1458_v33 = vunpack.c.l.bf16 %v1725_v23  ;;  %v1459_v34 = vunpack.c.h.bf16 %v1725_v23  ;;  %v1740_v23 = vld [vmem:[%s1884_s30 + $0xa8] sm:$0xff]  }
  0x39   : > { %v409_v63 = vmul.f32 %v1890_v5, %v1510_v56  ;;  %v410_v0 = vmul.f32 %v1890_v5, %v1511_v57  ;;  %v421_v1 = vmul.f32 %v1890_v5, %v1534_v58 }
  0x3a   : > { %v450_v12 = vadd.f32 %v1899_v9, %v382_v59  ;;  %vm513_vm0 = vcmp.gt.f32.partialorder %v449_v3, 0.0  ;;  %v577_v30 = vmul.f32 0.01, %v449_v3  ;;  %v383_v44 = vmul.f32 %v1890_v5, %v1458_v33 }
  0x3b   : > { %804 = vmatmul.bf16.gmra.mxu0 %v696_v2  ;;  %844 = vmatmul.bf16.gmra.mxu1 %v704_v6  ;;  %v1737_v2 = vld [vmem:[%s1884_s30 + $0x90] sm:$0xff]   ;;  %v477_v7 = vadd.f32 %v1899_v9, %v409_v63  ;;  %v478_v8 = vadd.f32 %v1899_v9, %v410_v0  ;;  %v489_v10 = vadd.f32 %v1899_v9, %v421_v1 }
  0x3c   : > { %884 = vmatmul.bf16.gmra.mxu2 %v712_v55  ;;  %v1506_v4 = vunpack.c.l.bf16 %v1737_v2  ;;  %v1507_v6 = vunpack.c.h.bf16 %v1737_v2  ;;  %v640_v55 = vsel %vm512_vm9, %v448_v35, %v576_v46  ;;  %vm514_vm1 = vcmp.gt.f32.partialorder %v450_v12, 0.0 }
  0x3d   : > { %v699_v2 = vpack.c.bf16 %v640_v55, %v639_v53  ;;  %vm541_vm12 = vcmp.gt.f32.partialorder %v477_v7, 0.0  ;;  %vm542_vm13 = vcmp.gt.f32.partialorder %v478_v8, 0.0  ;;  %v605_v16 = vmul.f32 0.01, %v477_v7 }
  0x3e   : > { %v407_v14 = vmul.f32 %v1890_v5, %v1506_v4  ;;  %v408_v15 = vmul.f32 %v1890_v5, %v1507_v6  ;;  %v422_v4 = vmul.f32 %v1890_v5, %v1535_v62  ;;  %v606_v17 = vmul.f32 0.01, %v478_v8 }
  0x3f   : > { %vm553_vm14 = vcmp.gt.f32.partialorder %v489_v10, 0.0  ;;  %v384_v45 = vmul.f32 %v1890_v5, %v1459_v34  ;;  %v451_v56 = vadd.f32 %v1899_v9, %v383_v44 }
  0x40   : > { %v475_v19 = vadd.f32 %v1899_v9, %v407_v14  ;;  %v476_v20 = vadd.f32 %v1899_v9, %v408_v15  ;;  %v490_v13 = vadd.f32 %v1899_v9, %v422_v4  ;;  %v1486_v14 = vunpack.c.l.bf16 %v1732_v11 }
  0x41   : > { %v1487_v15 = vunpack.c.h.bf16 %v1732_v11  ;;  %v670_v21 = vsel %vm542_vm13, %v478_v8, %v606_v17  ;;  %v452_v57 = vadd.f32 %v1899_v9, %v384_v45  ;;  %v1726_v11 = vld [vmem:[%s1884_s30 + $0x38] sm:$0xff]   ;;  %vm515_vm8 = vcmp.gt.f32.partialorder %v451_v56, 0.0 }
  0x42   : > { %v603_v27 = vmul.f32 0.01, %v475_v19  ;;  %v604_v28 = vmul.f32 0.01, %v476_v20  ;;  %vm539_vm4 = vcmp.gt.f32.partialorder %v475_v19, 0.0  ;;  %vm540_vm5 = vcmp.gt.f32.partialorder %v476_v20, 0.0 }
  0x43   : > { %vm554_vm15 = vcmp.gt.f32.partialorder %v490_v13, 0.0  ;;  %v397_v22 = vmul.f32 %v1890_v5, %v1486_v14  ;;  %v580_v17 = vmul.f32 0.01, %v452_v57  ;;  %vm516_vm9 = vcmp.gt.f32.partialorder %v452_v57, 0.0 }
  0x44   : > { %v667_v31 = vsel %vm539_vm4, %v475_v19, %v603_v27  ;;  %v668_v32 = vsel %vm540_vm5, %v476_v20, %v604_v28  ;;  %v618_v19 = vmul.f32 0.01, %v490_v13  ;;  %v669_v20 = vsel %vm541_vm12, %v477_v7, %v605_v16 }
  0x45   : > { %v713_v37 = vpack.c.bf16 %v668_v32, %v667_v31  ;;  %v398_v27 = vmul.f32 %v1890_v5, %v1487_v15  ;;  %v465_v29 = vadd.f32 %v1899_v9, %v397_v22  ;;  %v578_v32 = vmul.f32 0.01, %v450_v12 }
  0x46   : > { %v682_v26 = vsel %vm554_vm15, %v490_v13, %v618_v19  ;;  %v579_v13 = vmul.f32 0.01, %v451_v56 }
  0x47   : > { %v466_v31 = vadd.f32 %v1899_v9, %v398_v27  ;;  %v593_v35 = vmul.f32 0.01, %v465_v29  ;;  %vm529_vm2 = vcmp.gt.f32.partialorder %v465_v29, 0.0 }
  0x49   : > { %v594_v36 = vmul.f32 0.01, %v466_v31  ;;  %vm530_vm3 = vcmp.gt.f32.partialorder %v466_v31, 0.0  ;;  %v657_v46 = vsel %vm529_vm2, %v465_v29, %v593_v35  ;;  %v644_v29 = vsel %vm516_vm9, %v452_v57, %v580_v17 }
  0x4b   : > { %809 = vmatmul.bf16.gmra.mxu0 %v697_v42  ;;  %849 = vmatmul.bf16.gmra.mxu1 %v705_v43  ;;  %v396_v42 = vmul.f32 %v1890_v5, %v1483_v38  ;;  %v463_v43 = vadd.f32 %v1899_v9, %v395_v39  ;;  %v1745_v38 = vld [vmem:[%s1884_s30 + $0xd0] sm:$0xff]   ;;  %v641_v39 = vsel %vm513_vm0, %v449_v3, %v577_v30  ;;  %v1463_v30 = vunpack.c.h.bf16 %v1726_v11 }
  0x4c   : > { %889 = vmatmul.bf16.gmra.mxu2 %v713_v37  ;;  %v1739_v37 = vld [vmem:[%s1884_s30 + $0xa0] sm:$0xff]  }
  0x4d   : > { %v464_v47 = vadd.f32 %v1899_v9, %v396_v42  ;;  %v591_v49 = vmul.f32 0.01, %v463_v43  ;;  %vm527_vm10 = vcmp.gt.f32.partialorder %v463_v43, 0.0  ;;  %v1514_v40 = vunpack.c.l.bf16 %v1739_v37 }
  0x4e   : > { %v1515_v41 = vunpack.c.h.bf16 %v1739_v37  ;;  %v1538_v42 = vunpack.c.l.bf16 %v1745_v38 }
  0x4f   : > { %vm528_vm11 = vcmp.gt.f32.partialorder %v464_v47, 0.0  ;;  %v592_v50 = vmul.f32 0.01, %v464_v47  ;;  %v655_v60 = vsel %vm527_vm10, %v463_v43, %v591_v49  ;;  %v642_v43 = vsel %vm514_vm1, %v450_v12, %v578_v32 }
  0x50   : > { %v411_v48 = vmul.f32 %v1890_v5, %v1514_v40  ;;  %v412_v49 = vmul.f32 %v1890_v5, %v1515_v41  ;;  %v423_v51 = vmul.f32 %v1890_v5, %v1538_v42  ;;  %v700_v52 = vpack.c.bf16 %v642_v43, %v641_v39 }
  0x51   : > { %v656_v61 = vsel %vm528_vm11, %v464_v47, %v592_v50  ;;  %v658_v47 = vsel %vm530_vm3, %v466_v31, %v594_v36  ;;  %v1539_v50 = vunpack.c.h.bf16 %v1745_v38  ;;  %v386_v42 = vmul.f32 %v1890_v5, %v1463_v30 }
  0x52   : > { %v707_v6 = vpack.c.bf16 %v656_v61, %v655_v60  ;;  %v479_v53 = vadd.f32 %v1899_v9, %v411_v48  ;;  %v480_v54 = vadd.f32 %v1899_v9, %v412_v49  ;;  %v708_v58 = vpack.c.bf16 %v658_v47, %v657_v46  ;;  %v1733_v60 = vld [vmem:[%s1884_s30 + $0x70] sm:$0xff]   ;;  %v1734_v46 = vld [vmem:[%s1884_s30 + $0x78] sm:$0xff]  }
  0x53   : > { %v424_v55 = vmul.f32 %v1890_v5, %v1539_v50  ;;  %v491_v59 = vadd.f32 %v1899_v9, %v423_v51  ;;  %v1490_v0 = vunpack.c.l.bf16 %v1733_v60  ;;  %v1491_v8 = vunpack.c.h.bf16 %v1733_v60 }
  0x54   : > { %v607_v61 = vmul.f32 0.01, %v479_v53  ;;  %v608_v62 = vmul.f32 0.01, %v480_v54  ;;  %vm543_vm4 = vcmp.gt.f32.partialorder %v479_v53, 0.0  ;;  %vm544_vm5 = vcmp.gt.f32.partialorder %v480_v54, 0.0 }
  0x55   : > { %v492_v63 = vadd.f32 %v1899_v9, %v424_v55  ;;  %vm555_vm6 = vcmp.gt.f32.partialorder %v491_v59, 0.0  ;;  %v619_v1 = vmul.f32 0.01, %v491_v59  ;;  %v400_v15 = vmul.f32 %v1890_v5, %v1491_v8 }
  0x56   : > { %v672_v3 = vsel %vm544_vm5, %v480_v54, %v608_v62  ;;  %v1494_v50 = vunpack.c.l.bf16 %v1734_v46  ;;  %v454_v55 = vadd.f32 %v1899_v9, %v386_v42  ;;  %v1495_v57 = vunpack.c.h.bf16 %v1734_v46 }
  0x57   : > { %vm556_vm7 = vcmp.gt.f32.partialorder %v492_v63, 0.0  ;;  %v620_v4 = vmul.f32 0.01, %v492_v63  ;;  %v683_v7 = vsel %vm555_vm6, %v491_v59, %v619_v1  ;;  %v468_v19 = vadd.f32 %v1899_v9, %v400_v15 }
  0x58   : > { %vm518_vm1 = vcmp.gt.f32.partialorder %v454_v55, 0.0 }
  0x59   : > { %v684_v12 = vsel %vm556_vm7, %v492_v63, %v620_v4  ;;  %vm532_vm11 = vcmp.gt.f32.partialorder %v468_v19, 0.0  ;;  %v596_v22 = vmul.f32 0.01, %v468_v19  ;;  %v1741_v4 = vld [vmem:[%s1884_s30 + $0xb0] sm:$0xff]  }
  0x5a   : > { %v721_v14 = vpack.c.bf16 %v684_v12, %v683_v7  ;;  %v1522_v7 = vunpack.c.l.bf16 %v1741_v4  ;;  %v1523_v8 = vunpack.c.h.bf16 %v1741_v4 }
  0x5b   : > { %814 = vmatmul.bf16.gmra.mxu0 %v698_v18  ;;  %854 = vmatmul.bf16.gmra.mxu1 %v706_v24  ;;  %v617_v18 = vmul.f32 0.01, %v489_v10  ;;  %v714_v24 = vpack.c.bf16 %v670_v21, %v669_v20  ;;  %v643_v21 = vsel %vm515_vm8, %v451_v56, %v579_v13  ;;  %v660_v33 = vsel %vm532_vm11, %v468_v19, %v596_v22 }
  0x5c   : > { %v701_v38 = vpack.c.bf16 %v644_v29, %v643_v21  ;;  %v416_v17 = vmul.f32 %v1890_v5, %v1523_v8 }
  0x5d   : > { %v681_v25 = vsel %vm553_vm14, %v489_v10, %v617_v18  ;;  %894 = vmatmul.bf16.gmra.mxu2 %v714_v24  ;;  %v399_v10 = vmul.f32 %v1890_v5, %v1490_v0  ;;  %v1462_v18 = vunpack.c.l.bf16 %v1726_v11  ;;  %v1746_v24 = vld [vmem:[%s1884_s30 + $0xd8] sm:$0xff]   ;;  %v582_v0 = vmul.f32 0.01, %v454_v55 }
  0x5e   : > { %v720_v28 = vpack.c.bf16 %v682_v26, %v681_v25  ;;  %v1518_v25 = vunpack.c.l.bf16 %v1740_v23  ;;  %v1519_v26 = vunpack.c.h.bf16 %v1740_v23  ;;  %v1542_v27 = vunpack.c.l.bf16 %v1746_v24 }
  0x5f   : > { %v467_v16 = vadd.f32 %v1899_v9, %v399_v10  ;;  %v385_v31 = vmul.f32 %v1890_v5, %v1462_v18  ;;  %v646_v13 = vsel %vm518_vm1, %v454_v55, %v582_v0  ;;  %v484_v21 = vadd.f32 %v1899_v9, %v416_v17 }
  0x60   : > { %924 = vmatmul.bf16.gmra.mxu3 %v720_v28  ;;  %v1543_v28 = vunpack.c.h.bf16 %v1746_v24  ;;  %v413_v34 = vmul.f32 %v1890_v5, %v1518_v25  ;;  %v414_v35 = vmul.f32 %v1890_v5, %v1519_v26  ;;  %v425_v36 = vmul.f32 %v1890_v5, %v1542_v27 }
  0x61   : > { %v595_v20 = vmul.f32 0.01, %v467_v16  ;;  %vm531_vm10 = vcmp.gt.f32.partialorder %v467_v16, 0.0  ;;  %v453_v43 = vadd.f32 %v1899_v9, %v385_v31  ;;  %v612_v27 = vmul.f32 0.01, %v484_v21 }
  0x62   : > { %v426_v37 = vmul.f32 %v1890_v5, %v1543_v28  ;;  %v481_v39 = vadd.f32 %v1899_v9, %v413_v34  ;;  %v482_v40 = vadd.f32 %v1899_v9, %v414_v35  ;;  %v493_v41 = vadd.f32 %v1899_v9, %v425_v36  ;;  %v1742_v36 = vld [vmem:[%s1884_s30 + $0xb8] sm:$0xff]  }
  0x63   : > { %v659_v32 = vsel %vm531_vm10, %v467_v16, %v595_v20  ;;  %v581_v63 = vmul.f32 0.01, %v453_v43  ;;  %vm517_vm0 = vcmp.gt.f32.partialorder %v453_v43, 0.0  ;;  %v415_v16 = vmul.f32 %v1890_v5, %v1522_v7 }
  0x64   : > { %v709_v44 = vpack.c.bf16 %v660_v33, %v659_v32  ;;  %v494_v45 = vadd.f32 %v1899_v9, %v426_v37  ;;  %v609_v47 = vmul.f32 0.01, %v481_v39  ;;  %v610_v48 = vmul.f32 0.01, %v482_v40  ;;  %v1748_v37 = vld [vmem:[%s1884_s30 + $0xe8] sm:$0xff]  }
  0x65   : > { %v621_v49 = vmul.f32 0.01, %v493_v41  ;;  %vm545_vm12 = vcmp.gt.f32.partialorder %v481_v39, 0.0  ;;  %vm546_vm13 = vcmp.gt.f32.partialorder %v482_v40, 0.0  ;;  %vm557_vm14 = vcmp.gt.f32.partialorder %v493_v41, 0.0 }
  0x66   : > { %vm558_vm15 = vcmp.gt.f32.partialorder %v494_v45, 0.0  ;;  %v673_v51 = vsel %vm545_vm12, %v481_v39, %v609_v47  ;;  %v645_v12 = vsel %vm517_vm0, %v453_v43, %v581_v63  ;;  %v483_v20 = vadd.f32 %v1899_v9, %v415_v16 }
  0x67   : > { %v685_v54 = vsel %vm557_vm14, %v493_v41, %v621_v49  ;;  %v702_v23 = vpack.c.bf16 %v646_v13, %v645_v12  ;;  %vm548_vm5 = vcmp.gt.f32.partialorder %v484_v21, 0.0  ;;  %v1527_v39 = vunpack.c.h.bf16 %v1742_v36 }
  0x68   : > { %v611_v26 = vmul.f32 0.01, %v483_v20  ;;  %v676_v30 = vsel %vm548_vm5, %v484_v21, %v612_v27  ;;  %v1551_v41 = vunpack.c.h.bf16 %v1748_v37  ;;  %vm1290_vm0 = vcmask 1040384  }
  0x69   : > { %v418_v43 = vmul.f32 %v1890_v5, %v1527_v39 }
  0x6b   : > { %819 = vmatmul.bf16.gmra.mxu0 %v699_v2  ;;  %859 = vmatmul.bf16.gmra.mxu1 %v707_v6  ;;  %v671_v2 = vsel %vm543_vm4, %v479_v53, %v607_v61  ;;  %v622_v53 = vmul.f32 0.01, %v494_v45  ;;  %v402_v61 = vmul.f32 %v1890_v5, %v1495_v57  ;;  %vm547_vm4 = vcmp.gt.f32.partialorder %v483_v20, 0.0 }
  0x6c   : > { %v715_v6 = vpack.c.bf16 %v672_v3, %v671_v2  ;;  %v675_v29 = vsel %vm547_vm4, %v483_v20, %v611_v26  ;;  %v486_v47 = vadd.f32 %v1899_v9, %v418_v43 }
  0x6d   : > { %v686_v59 = vsel %vm558_vm15, %v494_v45, %v622_v53  ;;  %v470_v1 = vadd.f32 %v1899_v9, %v402_v61  ;;  %v717_v33 = vpack.c.bf16 %v676_v30, %v675_v29  ;;  %v430_v45 = vmul.f32 %v1890_v5, %v1551_v41  ;;  %v1750_v30 = vld [vmem:[%s1884_s30 + $0xf8] sm:$0xff]  }
  0x6e   : > { %899 = vmatmul.bf16.gmra.mxu2 %v715_v6  ;;  %v722_v60 = vpack.c.bf16 %v686_v59, %v685_v54  ;;  %v1747_v6 = vld [vmem:[%s1884_s30 + $0xe0] sm:$0xff]   ;;  %v614_v53 = vmul.f32 0.01, %v486_v47  ;;  %vm550_vm9 = vcmp.gt.f32.partialorder %v486_v47, 0.0 }
  0x6f   : > { %vm534_vm3 = vcmp.gt.f32.partialorder %v470_v1, 0.0  ;;  %v598_v3 = vmul.f32 0.01, %v470_v1  ;;  %v1546_v10 = vunpack.c.l.bf16 %v1747_v6  ;;  %v1547_v11 = vunpack.c.h.bf16 %v1747_v6  ;;  %v1749_v6 = vld [vmem:[%s1884_s30 + $0xf0] sm:$0xff]  }
  0x70   : > { %929 = vmatmul.bf16.gmra.mxu3 %v721_v14  ;;  %v498_v49 = vadd.f32 %v1899_v9, %v430_v45  ;;  %v1554_v7 = vunpack.c.l.bf16 %v1749_v6  ;;  %v1555_v8 = vunpack.c.h.bf16 %v1749_v6 }
  0x71   : > { %v662_v15 = vsel %vm534_vm3, %v470_v1, %v598_v3  ;;  %v427_v18 = vmul.f32 %v1890_v5, %v1546_v10  ;;  %v428_v19 = vmul.f32 %v1890_v5, %v1547_v11 }
  0x72   : > { %vm562_vm11 = vcmp.gt.f32.partialorder %v498_v49, 0.0  ;;  %v431_v11 = vmul.f32 %v1890_v5, %v1554_v7  ;;  %v432_v12 = vmul.f32 %v1890_v5, %v1555_v8 }
  0x73   : > { %v495_v22 = vadd.f32 %v1899_v9, %v427_v18  ;;  %v496_v25 = vadd.f32 %v1899_v9, %v428_v19 }
  0x74   : > { %v499_v13 = vadd.f32 %v1899_v9, %v431_v11 }
  0x75   : > { %v623_v28 = vmul.f32 0.01, %v495_v22  ;;  %vm559_vm6 = vcmp.gt.f32.partialorder %v495_v22, 0.0  ;;  %vm560_vm7 = vcmp.gt.f32.partialorder %v496_v25, 0.0  ;;  %v624_v31 = vmul.f32 0.01, %v496_v25 }
  0x76   : > { %v627_v17 = vmul.f32 0.01, %v499_v13  ;;  %vm563_vm12 = vcmp.gt.f32.partialorder %v499_v13, 0.0 }
  0x77   : > { %v687_v32 = vsel %vm559_vm6, %v495_v22, %v623_v28  ;;  %v688_v34 = vsel %vm560_vm7, %v496_v25, %v624_v31  ;;  %v1558_v31 = vunpack.c.l.bf16 %v1750_v30 }
  0x78   : > { %v723_v35 = vpack.c.bf16 %v688_v34, %v687_v32  ;;  %v691_v21 = vsel %vm563_vm12, %v499_v13, %v627_v17  ;;  %v1559_v32 = vunpack.c.h.bf16 %v1750_v30  ;;  %v1816_v34 = vld [vmem:[%s2409_s1] ss:$0 sm:$0xff] }
  0x7b   : > { %824 = vmatmul.bf16.gmra.mxu0 %v700_v52  ;;  %864 = vmatmul.bf16.gmra.mxu1 %v708_v58  ;;  %v674_v52 = vsel %vm546_vm13, %v482_v40, %v610_v48  ;;  %v401_v58 = vmul.f32 %v1890_v5, %v1494_v50  ;;  %v1550_v40 = vunpack.c.l.bf16 %v1748_v37  ;;  %v1817_v37 = vld [vmem:[%s2410_s2] ss:$0 sm:$0xff] }
  0x7c   : > { %v716_v56 = vpack.c.bf16 %v674_v52, %v673_v51 }
  0x7d   : > { %v469_v62 = vadd.f32 %v1899_v9, %v401_v58  ;;  %v626_v58 = vmul.f32 0.01, %v498_v49 }
  0x7e   : > { %904 = vmatmul.bf16.gmra.mxu2 %v716_v56  ;;  %v678_v56 = vsel %vm550_vm9, %v486_v47, %v614_v53 }
  0x7f   : > { %v597_v2 = vmul.f32 0.01, %v469_v62  ;;  %vm533_vm2 = vcmp.gt.f32.partialorder %v469_v62, 0.0 }
  0x80   : > { %934 = vmatmul.bf16.gmra.mxu3 %v722_v60  ;;  %v690_v60 = vsel %vm562_vm11, %v498_v49, %v626_v58 }
  0x81   : > { %v661_v14 = vsel %vm533_vm2, %v469_v62, %v597_v2 }
  0x82   : > { %v710_v24 = vpack.c.bf16 %v662_v15, %v661_v14  ;;  %v500_v14 = vadd.f32 %v1899_v9, %v432_v12 }
  0x84   : > { %v628_v18 = vmul.f32 0.01, %v500_v14  ;;  %vm564_vm13 = vcmp.gt.f32.partialorder %v500_v14, 0.0 }
  0x8b   : > { %829 = vmatmul.bf16.gmra.mxu0 %v701_v38  ;;  %869 = vmatmul.bf16.gmra.mxu1 %v709_v44  ;;  %v1526_v38 = vunpack.c.l.bf16 %v1742_v36  ;;  %v429_v44 = vmul.f32 %v1890_v5, %v1550_v40  ;;  %v434_v36 = vmul.f32 %v1816_v34, %v1559_v32 }
  0x8d   : > { %v417_v42 = vmul.f32 %v1890_v5, %v1526_v38  ;;  %v497_v48 = vadd.f32 %v1899_v9, %v429_v44  ;;  %v502_v39 = vadd.f32 %v1817_v37, %v434_v36 }
  0x8e   : > { %909 = vmatmul.bf16.gmra.mxu2 %v717_v33 }
  0x8f   : > { %v485_v46 = vadd.f32 %v1899_v9, %v417_v42  ;;  %v625_v54 = vmul.f32 0.01, %v497_v48  ;;  %vm561_vm10 = vcmp.gt.f32.partialorder %v497_v48, 0.0  ;;  %v630_v43 = vmul.f32 0.01, %v502_v39 }
  0x90   : > { %939 = vmatmul.bf16.gmra.mxu3 %v723_v35  ;;  %v433_v35 = vmul.f32 %v1816_v34, %v1558_v31  ;;  %vm566_vm15 = vcmp.gt.f32.partialorder %v502_v39, 0.0 }
  0x91   : > { %v613_v52 = vmul.f32 0.01, %v485_v46  ;;  %vm549_vm8 = vcmp.gt.f32.partialorder %v485_v46, 0.0  ;;  %v689_v59 = vsel %vm561_vm10, %v497_v48, %v625_v54 }
  0x92   : > { %v724_v61 = vpack.c.bf16 %v690_v60, %v689_v59  ;;  %v501_v38 = vadd.f32 %v1817_v37, %v433_v35 }
  0x93   : > { %v677_v55 = vsel %vm549_vm8, %v485_v46, %v613_v52 }
  0x94   : > { %v718_v57 = vpack.c.bf16 %v678_v56, %v677_v55  ;;  %v629_v42 = vmul.f32 0.01, %v501_v38  ;;  %vm565_vm14 = vcmp.gt.f32.partialorder %v501_v38, 0.0 }
  0x96   : > { %v693_v48 = vsel %vm565_vm14, %v501_v38, %v629_v42 }
  0x9b   : > { %834 = vmatmul.bf16.gmra.mxu0 %v702_v23  ;;  %874 = vmatmul.bf16.gmra.mxu1 %v710_v24  ;;  %v692_v23 = vsel %vm564_vm13, %v500_v14, %v628_v18 }
  0x9c   : > { %v725_v5 = vpack.c.bf16 %v692_v23, %v691_v21 }
  0x9e   : > { %914 = vmatmul.bf16.gmra.mxu2 %v718_v57 }
  0xa0   : > { %944 = vmatmul.bf16.gmra.mxu3 %v724_v61 }
  0xa8   : > { %v800_v50 = vpop.f32.mrf.mxu0  ;;  %v2061_v51 = vpop.f32.mrf.mxu1 }
  0xa9   : > { %v1157_v62 = vmul.f32 %v800_v50, %v800_v50 }
  0xaf   : > { %v2087_v29 = vpop.f32.mrf.mxu2 }
  0xb0   : > { %v802_v63 = vpop.f32.mrf.mxu0  ;;  %v2070_v0 = vpop.f32.mrf.mxu1  ;;  %949 = vmatmul.bf16.gmra.mxu3 %v725_v5 }
  0xb1   : > { %v1563_v1 = vpack.c.bf16 %v802_v63, %v800_v50  ;;  %v1088_v2 = vadd.f32 %v802_v63, %v800_v50  ;;  %v1158_v3 = vmul.f32 %v802_v63, %v802_v63  ;;  %v1603_v4 = vpack.c.bf16 %v2070_v0, %v2061_v51 }
  0xb2   : > { %v694_v50 = vsel %vm566_vm15, %v502_v39, %v630_v43 }
  0xb3   : > { %1564 = vst [vmem:[%s2068_s26] sm:$0xff] %v1563_v1   ;;  %v1221_v10 = vadd.f32 %v1158_v3, %v1157_v62  ;;  %v726_v52 = vpack.c.bf16 %v694_v50, %v693_v48 }
  0xb4   : > { %1758 = vst [vmem:[%s2068_s26 + $0x40] sm:$0xff] %v1603_v4  }
  0xb7   : > { %v2102_v46 = vpop.f32.mrf.mxu2 }
  0xb8   : > { %v805_v15 = vpop.f32.mrf.mxu0  ;;  %v2081_v16 = vpop.f32.mrf.mxu1  ;;  %v1643_v47 = vpack.c.bf16 %v2102_v46, %v2087_v29 }
  0xb9   : > { %v1089_v19 = vadd.f32 %v1088_v2, %v805_v15  ;;  %v1159_v20 = vmul.f32 %v805_v15, %v805_v15 }
  0xba   : > { %1766 = vst [vmem:[%s2068_s26 + $0x80] sm:$0xff] %v1643_v47  }
  0xbb   : > { %v1222_v22 = vadd.f32 %v1221_v10, %v1159_v20  ;;  %v2130_v4 = vpop.f32.mrf.mxu3 }
  0xbf   : > { %v2113_v57 = vpop.f32.mrf.mxu2 }
  0xc0   : > { %v807_v24 = vpop.f32.mrf.mxu0  ;;  %v2083_v25 = vpop.f32.mrf.mxu1  ;;  %954 = vmatmul.bf16.gmra.mxu3 %v726_v52 }
  0xc1   : > { %v1568_v9 = vpack.c.bf16 %v807_v24, %v805_v15  ;;  %v1090_v26 = vadd.f32 %v1089_v19, %v807_v24  ;;  %v1160_v27 = vmul.f32 %v807_v24, %v807_v24  ;;  %v1608_v28 = vpack.c.bf16 %v2083_v25, %v2081_v16 }
  0xc3   : > { %1751 = vst [vmem:[%s2068_s26 + $0x8] sm:$0xff] %v1568_v9   ;;  %v1223_v33 = vadd.f32 %v1222_v22, %v1160_v27  ;;  %v2140_v11 = vpop.f32.mrf.mxu3 }
  0xc4   : > { %1759 = vst [vmem:[%s2068_s26 + $0x48] sm:$0xff] %v1608_v28   ;;  %v1683_v12 = vpack.c.bf16 %v2140_v11, %v2130_v4 }
  0xc6   : > { %1774 = vst [vmem:[%s2068_s26 + $0xc0] sm:$0xff] %v1683_v12  }
  0xc7   : > { %v2119_v60 = vpop.f32.mrf.mxu2 }
  0xc8   : > { %v810_v40 = vpop.f32.mrf.mxu0  ;;  %v2098_v41 = vpop.f32.mrf.mxu1  ;;  %v1648_v61 = vpack.c.bf16 %v2119_v60, %v2113_v57 }
  0xc9   : > { %v2100_v44 = vadd.f32 %v1090_v26, %v810_v40  ;;  %v1161_v45 = vmul.f32 %v810_v40, %v810_v40 }
  0xca   : > { %1767 = vst [vmem:[%s2068_s26 + $0x88] sm:$0xff] %v1648_v61  }
  0xcb   : > { %v2106_v49 = vadd.f32 %v1223_v33, %v1161_v45 }
  0xcf   : > { %v2128_v3 = vpop.f32.mrf.mxu2 }
  0xd0   : > { %v812_v53 = vpop.f32.mrf.mxu0  ;;  %v2109_v54 = vpop.f32.mrf.mxu1 }
  0xd1   : > { %v1573_v55 = vpack.c.bf16 %v812_v53, %v810_v40  ;;  %v1613_v56 = vpack.c.bf16 %v2109_v54, %v2098_v41  ;;  %v1162_v35 = vmul.f32 %v812_v53, %v812_v53  ;;  %v1092_v40 = vadd.f32 %v2100_v44, %v812_v53 }
  0xd3   : > { %1752 = vst [vmem:[%s2068_s26 + $0x10] sm:$0xff] %v1573_v55   ;;  %v1225_v42 = vadd.f32 %v2106_v49, %v1162_v35 }
  0xd4   : > { %1760 = vst [vmem:[%s2068_s26 + $0x50] sm:$0xff] %v1613_v56  }
  0xd7   : > { %v2136_v8 = vpop.f32.mrf.mxu2 }
  0xd8   : > { %v815_v58 = vpop.f32.mrf.mxu0  ;;  %v2117_v59 = vpop.f32.mrf.mxu1  ;;  %v1653_v10 = vpack.c.bf16 %v2136_v8, %v2128_v3 }
  0xd9   : > { %v1163_v39 = vmul.f32 %v815_v58, %v815_v58  ;;  %v1093_v45 = vadd.f32 %v1092_v40, %v815_v58 }
  0xda   : > { %1768 = vst [vmem:[%s2068_s26 + $0x90] sm:$0xff] %v1653_v10  }
  0xdb   : > { %v1226_v47 = vadd.f32 %v1225_v42, %v1163_v39 }
  0xe0   : > { %v817_v62 = vpop.f32.mrf.mxu0  ;;  %v2124_v63 = vpop.f32.mrf.mxu1 }
  0xe1   : > { %v1578_v1 = vpack.c.bf16 %v817_v62, %v815_v58  ;;  %v1618_v2 = vpack.c.bf16 %v2124_v63, %v2117_v59  ;;  %v2150_v18 = vpop.f32.mrf.mxu2  ;;  %v1164_v43 = vmul.f32 %v817_v62, %v817_v62  ;;  %v1094_v55 = vadd.f32 %v1093_v45, %v817_v62 }
  0xe3   : > { %1753 = vst [vmem:[%s2068_s26 + $0x18] sm:$0xff] %v1578_v1   ;;  %v2152_v19 = vpop.f32.mrf.mxu3  ;;  %v1227_v44 = vadd.f32 %v1226_v47, %v1164_v43 }
  0xe4   : > { %1761 = vst [vmem:[%s2068_s26 + $0x58] sm:$0xff] %v1618_v2  }
  0xe8   : > { %v820_v6 = vpop.f32.mrf.mxu0  ;;  %v2134_v7 = vpop.f32.mrf.mxu1 }
  0xe9   : > { %v2158_v22 = vpop.f32.mrf.mxu2  ;;  %v1165_v48 = vmul.f32 %v820_v6, %v820_v6  ;;  %v1095_v49 = vadd.f32 %v1094_v55, %v820_v6 }
  0xea   : > { %v1658_v23 = vpack.c.bf16 %v2158_v22, %v2150_v18 }
  0xeb   : > { %v2162_v5 = vpop.f32.mrf.mxu3  ;;  %v1228_v58 = vadd.f32 %v1227_v44, %v1165_v48 }
  0xec   : > { %v1688_v24 = vpack.c.bf16 %v2162_v5, %v2152_v19  ;;  %1769 = vst [vmem:[%s2068_s26 + $0x98] sm:$0xff] %v1658_v23  }
  0xee   : > { %1775 = vst [vmem:[%s2068_s26 + $0xc8] sm:$0xff] %v1688_v24  }
  0xf0   : > { %v822_v13 = vpop.f32.mrf.mxu0  ;;  %v2146_v14 = vpop.f32.mrf.mxu1 }
  0xf1   : > { %v1583_v15 = vpack.c.bf16 %v822_v13, %v820_v6  ;;  %v1623_v17 = vpack.c.bf16 %v2146_v14, %v2134_v7  ;;  %v2172_v30 = vpop.f32.mrf.mxu2  ;;  %v1166_v53 = vmul.f32 %v822_v13, %v822_v13  ;;  %v1096_v12 = vadd.f32 %v1095_v49, %v822_v13 }
  0xf3   : > { %1754 = vst [vmem:[%s2068_s26 + $0x20] sm:$0xff] %v1583_v15   ;;  %v2174_v31 = vpop.f32.mrf.mxu3  ;;  %v1229_v15 = vadd.f32 %v1228_v58, %v1166_v53 }
  0xf4   : > { %1762 = vst [vmem:[%s2068_s26 + $0x60] sm:$0xff] %v1623_v17  }
  0xf8   : > { %v825_v20 = vpop.f32.mrf.mxu0  ;;  %v2156_v21 = vpop.f32.mrf.mxu1 }
  0xf9   : > { %v2180_v34 = vpop.f32.mrf.mxu2  ;;  %v1167_v10 = vmul.f32 %v825_v20, %v825_v20  ;;  %v1097_v62 = vadd.f32 %v1096_v12, %v825_v20 }
  0xfa   : > { %v1663_v36 = vpack.c.bf16 %v2180_v34, %v2172_v30 }
  0xfb   : > { %v2184_v37 = vpop.f32.mrf.mxu3  ;;  %v1230_v23 = vadd.f32 %v1229_v15, %v1167_v10  ;;  %v1174_v15 = vmul.f32 %v2070_v0, %v2070_v0 }
  0xfc   : > { %v1693_v38 = vpack.c.bf16 %v2184_v37, %v2174_v31  ;;  %1770 = vst [vmem:[%s2068_s26 + $0xa0] sm:$0xff] %v1663_v36  }
  0xfe   : > { %1776 = vst [vmem:[%s2068_s26 + $0xd0] sm:$0xff] %v1693_v38  }
 0x100   : > { %v827_v9 = vpop.f32.mrf.mxu0  ;;  %v2168_v26 = vpop.f32.mrf.mxu1 }
 0x101   : > { %v1588_v27 = vpack.c.bf16 %v827_v9, %v825_v20  ;;  %v1628_v28 = vpack.c.bf16 %v2168_v26, %v2156_v21  ;;  %v2196_v1 = vpop.f32.mrf.mxu2  ;;  %v1168_v17 = vmul.f32 %v827_v9, %v827_v9  ;;  %v1098_v35 = vadd.f32 %v1097_v62, %v827_v9 }
 0x103   : > { %1755 = vst [vmem:[%s2068_s26 + $0x28] sm:$0xff] %v1588_v27   ;;  %v2198_v2 = vpop.f32.mrf.mxu3  ;;  %v1231_v38 = vadd.f32 %v1230_v23, %v1168_v17  ;;  %v1175_v23 = vmul.f32 %v2081_v16, %v2081_v16 }
 0x104   : > { %1763 = vst [vmem:[%s2068_s26 + $0x68] sm:$0xff] %v1628_v28  }
 0x108   : > { %v830_v32 = vpop.f32.mrf.mxu0  ;;  %v2178_v33 = vpop.f32.mrf.mxu1 }
 0x109   : > { %v1169_v24 = vmul.f32 %v830_v32, %v830_v32  ;;  %v2204_v36 = vpop.f32.mrf.mxu2  ;;  %v1099_v13 = vadd.f32 %v1098_v35, %v830_v32  ;;  %v1176_v35 = vmul.f32 %v2083_v25, %v2083_v25 }
 0x10a   : > { %v1668_v39 = vpack.c.bf16 %v2204_v36, %v2196_v1 }
 0x10b   : > { %v2208_v40 = vpop.f32.mrf.mxu3  ;;  %v1232_v42 = vadd.f32 %v1231_v38, %v1169_v24 }
 0x10c   : > { %v1698_v20 = vpack.c.bf16 %v2208_v40, %v2198_v2  ;;  %1771 = vst [vmem:[%s2068_s26 + $0xa8] sm:$0xff] %v1668_v39  }
 0x10e   : > { %1777 = vst [vmem:[%s2068_s26 + $0xd8] sm:$0xff] %v1698_v20  }
 0x110   : > { %v832_v50 = vpop.f32.mrf.mxu0  ;;  %v2192_v52 = vpop.f32.mrf.mxu1 }
 0x111   : > { %v1593_v56 = vpack.c.bf16 %v832_v50, %v830_v32  ;;  %v1633_v61 = vpack.c.bf16 %v2192_v52, %v2178_v33  ;;  %v1170_v6 = vmul.f32 %v832_v50, %v832_v50  ;;  %v1100_v45 = vadd.f32 %v1099_v13, %v832_v50  ;;  %v2218_v49 = vpop.f32.mrf.mxu2 }
 0x112   : > { %v1173_v50 = vmul.f32 %v2061_v51, %v2061_v51  ;;  %v1177_v13 = vmul.f32 %v2098_v41, %v2098_v41 }
 0x113   : > { %1756 = vst [vmem:[%s2068_s26 + $0x30] sm:$0xff] %v1593_v56   ;;  %v1233_v9 = vadd.f32 %v1232_v42, %v1170_v6  ;;  %v2220_v58 = vpop.f32.mrf.mxu3 }
 0x114   : > { %1764 = vst [vmem:[%s2068_s26 + $0x70] sm:$0xff] %v1633_v61  }
 0x118   : > { %v835_v27 = vpop.f32.mrf.mxu0  ;;  %v2202_v28 = vpop.f32.mrf.mxu1 }
 0x119   : > { %v1171_v43 = vmul.f32 %v835_v27, %v835_v27  ;;  %v1101_v47 = vadd.f32 %v1100_v45, %v835_v27  ;;  %v2236_v6 = vpop.f32.mrf.mxu2 }
 0x11a   : > { %v1673_v39 = vpack.c.bf16 %v2236_v6, %v2218_v49 }
 0x11b   : > { %v1234_v48 = vadd.f32 %v1233_v9, %v1171_v43  ;;  %v1179_v9 = vmul.f32 %v2117_v59, %v2117_v59 }
 0x11c   : > { %1772 = vst [vmem:[%s2068_s26 + $0xb0] sm:$0xff] %v1673_v39  }
 0x120   : > { %v837_v55 = vpop.f32.mrf.mxu0  ;;  %v2214_v56 = vpop.f32.mrf.mxu1 }
 0x121   : > { %v1598_v61 = vpack.c.bf16 %v837_v55, %v835_v27  ;;  %v1102_v44 = vadd.f32 %v1101_v47, %v837_v55  ;;  %v1172_v53 = vmul.f32 %v837_v55, %v837_v55  ;;  %v1638_v32 = vpack.c.bf16 %v2214_v56, %v2202_v28 }
 0x123   : > { %1757 = vst [vmem:[%s2068_s26 + $0x38] sm:$0xff] %v1598_v61   ;;  %v1103_v10 = vadd.f32 %v1102_v44, %v2061_v51  ;;  %v1235_v12 = vadd.f32 %v1234_v48, %v1172_v53  ;;  %v2258_v44 = vpop.f32.mrf.mxu2  ;;  %v1181_v53 = vmul.f32 %v2134_v7, %v2134_v7 }
 0x124   : > { %1765 = vst [vmem:[%s2068_s26 + $0x78] sm:$0xff] %v1638_v32  }
 0x125   : > { %v1104_v17 = vadd.f32 %v1103_v10, %v2070_v0  ;;  %v1236_v62 = vadd.f32 %v1235_v12, %v1173_v50  ;;  %v2240_v0 = vpop.f32.mrf.mxu3 }
 0x126   : > { %v1703_v42 = vpack.c.bf16 %v2240_v0, %v2220_v58 }
 0x127   : > { %v1105_v24 = vadd.f32 %v1104_v17, %v2081_v16  ;;  %v1237_v27 = vadd.f32 %v1236_v62, %v1174_v15 }
 0x128   : > { %1778 = vst [vmem:[%s2068_s26 + $0xe0] sm:$0xff] %v1703_v42  }
 0x129   : > { %v1106_v51 = vadd.f32 %v1105_v24, %v2083_v25  ;;  %v1238_v38 = vadd.f32 %v1237_v27, %v1175_v23  ;;  %v1178_v25 = vmul.f32 %v2109_v54, %v2109_v54 }
 0x12b   : > { %v1107_v16 = vadd.f32 %v1106_v51, %v2098_v41  ;;  %v1239_v20 = vadd.f32 %v1238_v38, %v1176_v35  ;;  %v1180_v41 = vmul.f32 %v2124_v63, %v2124_v63  ;;  %v2274_v24 = vpop.f32.mrf.mxu2  ;;  %v1185_v35 = vmul.f32 %v2178_v33, %v2178_v33 }
 0x12c   : > { %v1678_v27 = vpack.c.bf16 %v2274_v24, %v2258_v44 }
 0x12d   : > { %v1108_v43 = vadd.f32 %v1107_v16, %v2109_v54  ;;  %v1240_v45 = vadd.f32 %v1239_v20, %v1177_v13  ;;  %v2263_v50 = vpop.f32.mrf.mxu3  ;;  %v1186_v13 = vmul.f32 %v2192_v52, %v2192_v52 }
 0x12e   : > { %1773 = vst [vmem:[%s2068_s26 + $0xb8] sm:$0xff] %v1678_v27   ;;  %v1197_v27 = vmul.f32 %v2172_v30, %v2172_v30 }
 0x12f   : > { %v1241_v47 = vadd.f32 %v1240_v45, %v1178_v25  ;;  %v1109_v48 = vadd.f32 %v1108_v43, %v2117_v59  ;;  %v1182_v59 = vmul.f32 %v2146_v14, %v2146_v14  ;;  %v1188_v43 = vmul.f32 %v2214_v56, %v2214_v56 }
 0x130   : > { %v1189_v45 = vmul.f32 %v2087_v29, %v2087_v29 }
 0x131   : > { %v1110_v55 = vadd.f32 %v1109_v48, %v2124_v63  ;;  %v1242_v61 = vadd.f32 %v1241_v47, %v1179_v9  ;;  %v1183_v63 = vmul.f32 %v2156_v21, %v2156_v21  ;;  %v1190_v48 = vmul.f32 %v2102_v46, %v2102_v46 }
 0x133   : > { %v1111_v54 = vadd.f32 %v1110_v55, %v2134_v7  ;;  %v1243_v32 = vadd.f32 %v1242_v61, %v1180_v41  ;;  %v1184_v7 = vmul.f32 %v2168_v26, %v2168_v26  ;;  %v1191_v55 = vmul.f32 %v2113_v57, %v2113_v57 }
 0x135   : > { %v1112_v10 = vadd.f32 %v1111_v54, %v2146_v14  ;;  %v1244_v12 = vadd.f32 %v1243_v32, %v1181_v53  ;;  %v1192_v53 = vmul.f32 %v2119_v60, %v2119_v60  ;;  %v1193_v32 = vmul.f32 %v2128_v3, %v2128_v3 }
 0x137   : > { %v1113_v15 = vadd.f32 %v1112_v10, %v2156_v21  ;;  %v1245_v17 = vadd.f32 %v1244_v12, %v1182_v59  ;;  %v2281_v21 = vpop.f32.mrf.mxu3 }
 0x138   : > { %v1708_v38 = vpack.c.bf16 %v2281_v21, %v2263_v50 }
 0x139   : > { %v1114_v62 = vadd.f32 %v1113_v15, %v2168_v26  ;;  %v1246_v23 = vadd.f32 %v1245_v17, %v1183_v63 }
 0x13a   : > { %1779 = vst [vmem:[%s2068_s26 + $0xe8] sm:$0xff] %v1708_v38  }
 0x13b   : > { %v1115_v14 = vadd.f32 %v1114_v62, %v2178_v33  ;;  %v1247_v51 = vadd.f32 %v1246_v23, %v1184_v7  ;;  %v1187_v33 = vmul.f32 %v2202_v28, %v2202_v28 }
 0x13d   : > { %v1248_v39 = vadd.f32 %v1247_v51, %v1185_v35  ;;  %v1116_v26 = vadd.f32 %v1115_v14, %v2192_v52  ;;  %v1198_v51 = vmul.f32 %v2180_v34, %v2180_v34 }
 0x13f   : > { %v1249_v16 = vadd.f32 %v1248_v39, %v1186_v13  ;;  %v1117_v20 = vadd.f32 %v1116_v26, %v2202_v28  ;;  %v2299_v52 = vpop.f32.mrf.mxu3  ;;  %v1199_v39 = vmul.f32 %v2196_v1, %v2196_v1 }
 0x141   : > { %v1250_v42 = vadd.f32 %v1249_v16, %v1187_v33  ;;  %v1118_v25 = vadd.f32 %v1117_v20, %v2214_v56 }
 0x143   : > { %v1119_v9 = vadd.f32 %v1118_v25, %v2087_v29  ;;  %v1251_v47 = vadd.f32 %v1250_v42, %v1188_v43 }
 0x145   : > { %v1120_v41 = vadd.f32 %v1119_v9, %v2102_v46  ;;  %v1252_v28 = vadd.f32 %v1251_v47, %v1189_v45  ;;  %v1203_v47 = vmul.f32 %v2258_v44, %v2258_v44 }
 0x147   : > { %v1121_v56 = vadd.f32 %v1120_v41, %v2113_v57  ;;  %v1253_v61 = vadd.f32 %v1252_v28, %v1190_v48  ;;  %v2313_v10 = vpop.f32.mrf.mxu3  ;;  %v1194_v57 = vmul.f32 %v2136_v8, %v2136_v8  ;;  %v1205_v28 = vmul.f32 %v2130_v4, %v2130_v4 }
 0x148   : > { %v1713_v12 = vpack.c.bf16 %v2313_v10, %v2299_v52 }
 0x149   : > { %v1122_v29 = vadd.f32 %v1121_v56, %v2119_v60  ;;  %v1254_v54 = vadd.f32 %v1253_v61, %v1191_v55  ;;  %v1195_v60 = vmul.f32 %v2150_v18, %v2150_v18 }
 0x14a   : > { %1780 = vst [vmem:[%s2068_s26 + $0xf0] sm:$0xff] %v1713_v12  }
 0x14b   : > { %v1123_v59 = vadd.f32 %v1122_v29, %v2128_v3  ;;  %v1255_v46 = vadd.f32 %v1254_v54, %v1192_v53  ;;  %v1196_v3 = vmul.f32 %v2158_v22, %v2158_v22 }
 0x14d   : > { %v1124_v63 = vadd.f32 %v1123_v59, %v2136_v8  ;;  %v1256_v15 = vadd.f32 %v1255_v46, %v1193_v32 }
 0x14f   : > { %v1257_v17 = vadd.f32 %v1256_v15, %v1194_v57  ;;  %v1125_v7 = vadd.f32 %v1124_v63, %v2150_v18  ;;  %v2330_v35 = vpop.f32.mrf.mxu3 }
 0x151   : > { %v1126_v62 = vadd.f32 %v1125_v7, %v2158_v22  ;;  %v1258_v23 = vadd.f32 %v1257_v17, %v1195_v60 }
 0x153   : > { %v1127_v14 = vadd.f32 %v1126_v62, %v2172_v30  ;;  %v1259_v8 = vadd.f32 %v1258_v23, %v1196_v3  ;;  %v1200_v30 = vmul.f32 %v2204_v36, %v2204_v36 }
 0x155   : > { %v1128_v38 = vadd.f32 %v1127_v14, %v2180_v34  ;;  %v1260_v18 = vadd.f32 %v1259_v8, %v1197_v27  ;;  %v1201_v34 = vmul.f32 %v2218_v49, %v2218_v49 }
 0x157   : > { %v1129_v22 = vadd.f32 %v1128_v38, %v2196_v1  ;;  %v1261_v26 = vadd.f32 %v1260_v18, %v1198_v51  ;;  %v957_v42 = vpop.f32.mrf.mxu3  ;;  %v1202_v1 = vmul.f32 %v2236_v6, %v2236_v6  ;;  %v1216_v51 = vmul.f32 %v2281_v21, %v2281_v21 }
 0x158   : > { %v1718_v25 = vpack.c.bf16 %v957_v42, %v2330_v35 }
 0x159   : > { %v1130_v13 = vadd.f32 %v1129_v22, %v2204_v36  ;;  %v1262_v16 = vadd.f32 %v1261_v26, %v1199_v39 }
 0x15a   : > { %1781 = vst [vmem:[%s2068_s26 + $0xf8] sm:$0xff] %v1718_v25  }
 0x15b   : > { %v1263_v20 = vadd.f32 %v1262_v16, %v1200_v30  ;;  %v1131_v33 = vadd.f32 %v1130_v13, %v2218_v49  ;;  %v1204_v49 = vmul.f32 %v2274_v24, %v2274_v24 }
 0x15d   : > { %v1264_v43 = vadd.f32 %v1263_v20, %v1201_v34  ;;  %v1132_v45 = vadd.f32 %v1131_v33, %v2236_v6  ;;  %v1206_v6 = vmul.f32 %v2140_v11, %v2140_v11  ;;  %v1220_v20 = vmul.f32 %v957_v42, %v957_v42 }
 0x15f   : > { %v1265_v9 = vadd.f32 %v1264_v43, %v1202_v1  ;;  %v1133_v36 = vadd.f32 %v1132_v45, %v2258_v44  ;;  %v1207_v44 = vmul.f32 %v2152_v19, %v2152_v19 }
 0x161   : > { %v1266_v48 = vadd.f32 %v1265_v9, %v1203_v47  ;;  %v1134_v41 = vadd.f32 %v1133_v36, %v2274_v24  ;;  %v1208_v24 = vmul.f32 %v2162_v5, %v2162_v5 }
 0x163   : > { %v1135_v55 = vadd.f32 %v1134_v41, %v2130_v4  ;;  %v1267_v56 = vadd.f32 %v1266_v48, %v1204_v49  ;;  %v1209_v4 = vmul.f32 %v2174_v31, %v2174_v31 }
 0x165   : > { %v1136_v61 = vadd.f32 %v1135_v55, %v2140_v11  ;;  %v1268_v53 = vadd.f32 %v1267_v56, %v1205_v28  ;;  %v1210_v11 = vmul.f32 %v2184_v37, %v2184_v37 }
 0x167   : > { %v1137_v29 = vadd.f32 %v1136_v61, %v2152_v19  ;;  %v1269_v54 = vadd.f32 %v1268_v53, %v1206_v6  ;;  %v1211_v19 = vmul.f32 %v2198_v2, %v2198_v2 }
 0x169   : > { %v1138_v32 = vadd.f32 %v1137_v29, %v2162_v5  ;;  %v1270_v59 = vadd.f32 %v1269_v54, %v1207_v44  ;;  %v1212_v5 = vmul.f32 %v2208_v40, %v2208_v40 }
 0x16b   : > { %v1139_v46 = vadd.f32 %v1138_v32, %v2174_v31  ;;  %v1271_v12 = vadd.f32 %v1270_v59, %v1208_v24  ;;  %v1213_v31 = vmul.f32 %v2220_v58, %v2220_v58 }
 0x16d   : > { %v1140_v57 = vadd.f32 %v1139_v46, %v2184_v37  ;;  %v1272_v63 = vadd.f32 %v1271_v12, %v1209_v4  ;;  %v1214_v37 = vmul.f32 %v2240_v0, %v2240_v0 }
 0x16f   : > { %v1273_v15 = vadd.f32 %v1272_v63, %v1210_v11  ;;  %v1141_v60 = vadd.f32 %v1140_v57, %v2198_v2  ;;  %v1215_v2 = vmul.f32 %v2263_v50, %v2263_v50 }
 0x171   : > { %v1142_v17 = vadd.f32 %v1141_v60, %v2208_v40  ;;  %v1274_v7 = vadd.f32 %v1273_v15, %v1211_v19 }
 0x173   : > { %v1143_v3 = vadd.f32 %v1142_v17, %v2220_v58  ;;  %v1275_v62 = vadd.f32 %v1274_v7, %v1212_v5 }
 0x175   : > { %v1144_v23 = vadd.f32 %v1143_v3, %v2240_v0  ;;  %v1276_v27 = vadd.f32 %v1275_v62, %v1213_v31  ;;  %v1217_v0 = vmul.f32 %v2299_v52, %v2299_v52 }
 0x177   : > { %v1145_v14 = vadd.f32 %v1144_v23, %v2263_v50  ;;  %v1277_v8 = vadd.f32 %v1276_v27, %v1214_v37  ;;  %v1218_v50 = vmul.f32 %v2313_v10, %v2313_v10 }
 0x179   : > { %v1146_v40 = vadd.f32 %v1145_v14, %v2281_v21  ;;  %v1278_v58 = vadd.f32 %v1277_v8, %v1215_v2  ;;  %v1219_v21 = vmul.f32 %v2330_v35, %v2330_v35 }
 0x17b   : > { %v1279_v38 = vadd.f32 %v1278_v58, %v1216_v51  ;;  %v1147_v18 = vadd.f32 %v1146_v40, %v2299_v52 }
 0x17d   : > { %v1280_v39 = vadd.f32 %v1279_v38, %v1217_v0  ;;  %v1148_v22 = vadd.f32 %v1147_v18, %v2313_v10 }
 0x17f   : > { %v1281_v26 = vadd.f32 %v1280_v39, %v1218_v50  ;;  %v1149_v13 = vadd.f32 %v1148_v22, %v2330_v35 }
 0x181   : > { %v1282_v30 = vadd.f32 %v1281_v26, %v1219_v21  ;;  %v1150_v16 = vadd.f32 %v1149_v13, %v957_v42 }
 0x183   : > { %v1151_v33 = vrot.slane %v1150_v16, 4  ;;  %v1283_v34 = vadd.f32 %v1282_v30, %v1220_v20 }
 0x185   : > { %v1152_v52 = vadd.f32 %v1151_v33, %v1150_v16  ;;  %v1284_v25 = vrot.slane %v1283_v34, 4 }
 0x187   : > { %v1153_v43 = vrot.slane %v1152_v52, 2  ;;  %v1285_v45 = vadd.f32 %v1284_v25, %v1283_v34 }
 0x189   : > { %v1154_v1 = vadd.f32 %v1153_v43, %v1152_v52  ;;  %v1286_v9 = vrot.slane %v1285_v45, 2 }
 0x18b   : > { %v1155_v10 = vrot.slane %v1154_v1, 1  ;;  %v1287_v36 = vadd.f32 %v1286_v9, %v1285_v45 }
 0x18d   : > { %v1288_v47 = vrot.slane %v1287_v36, 1  ;;  %v1156_v35 = vadd.f32 %v1155_v10, %v1154_v1 }
 0x18f   : > { %v1289_v42 = vadd.f32 %v1288_v47, %v1287_v36 }
 0x191   : > { %v1291_v48 = vsel %vm1290_vm0, %v1156_v35, %v1289_v42 }
 0x192   : > { %1292 = vst [vmem:[%s238_s7] sm:$0x3] %v1291_v48 }
 0x193 PF: > { %s16_s18 = sadd.s32 1, %s1824_s18  }
 0x194   : > { %p13_p5 = scmp.ge.s32.totalorder %s16_s18, 4  }
 0x196   :  { %15 = sbr.rel (!%p13_p5) target bundleno = 1 (0x1), region = 78 }

// kernel: bottleneck_block.7
= control target key start
LH: loop header
LB: loop body
LE: loop exit
PB: predicated region body
PF: predicated region fallthrough
CT: control target
= control target key end

     0   :  { %9 = vsyncpa [#allocation3], 0  ;;  %s1697_s0 = inlined_call_operand.vmem [shape: bf16[1024,128], index: 0, kind: input, shape index: {}]   ;;  %s1698_s1 = inlined_call_operand.vmem [shape: f32[1,128], index: 1, kind: input, shape index: {}]   ;;  %s1699_s2 = inlined_call_operand.vmem [shape: f32[1,128], index: 2, kind: input, shape index: {}]   ;;  %s1700_s3 = inlined_call_operand.vmem [shape: f32[1024,128], index: 3, kind: input, shape index: {}]   ;;  %s1701_s4 = inlined_call_operand.hbm [shape: f32[1024,128], index: 4, kind: output, shape index: {}]  }
   0x1   :  { %11 = vsyncpa [#allocation3 + $0x1], 0  ;;  %s1269_s15 = smov 0   ;;  %s1271_s16 = smov 0  }
   0x2   :  { %s1273_s17 = smov 0   ;;  %s1275_s18 = smov 0  }
   0x3 LB: > { %s1290_s19 = sadd.s32 4294967295, %s1240_s18   ;;  %s959_s20 = sadd.s32 4294967294, %s1240_s18   ;;  %s1240_s18 = sphi %s1275_s18, %s1707_s18   ;;  %s1236_s17 = sphi %s1273_s17, %s1706_s17   ;;  %s1232_s16 = sphi %s1271_s16, %s1705_s16   ;;  %s1228_s15 = sphi %s1269_s15, %s1704_s15  }
   0x4   : > { %s1294_s21 = sadd.s32 1, %s1240_s18   ;;  %s118_s22 = sadd.s32 1, %s1236_s17 }
   0x5   : > { %s115_s23 = ssub.s32 %s1240_s18, %s1294_s21  ;;  %p128_p0 = scmp.ne.s32.totalorder %s1236_s17, %s1232_s16 }
   0x6   : > { %p116_p1 = scmp.eq.s32.totalorder %s115_s23, 0  ;;  %p129_p2 = scmp.eq.s32.totalorder %s1290_s19, 1 }
   0x7   : > { %p134_p3 = scmp.ne.s32.totalorder %s1232_s16, %s1228_s15  ;;  %p135_p4 = scmp.eq.s32.totalorder %s959_s20, 1 }
   0x8   : > { %s1305_s24 = scalar_select %p116_p1, %s1236_s17, %s118_s22  }
   0x9   : > { %p1307_p5 = por %p129_p2, %p128_p0  ;;  %p1311_p6 = por %p135_p4, %p134_p3 }
   0xa   : > { %p962_p7 = scmp.ge.s32.totalorder %s1240_s18, 1  ;;  %p177_p8 = scmp.lt.s32.totalorder %s1240_s18, 3 }
   0xc   : > { %p178_p9 = pnand %p962_p7, %p177_p8 }
   0xd   : > { %s964_s27 = sshll.u32 (!%p178_p9), %s1290_s19, 6  ;;  %s205_s14 = sand.u32 (!%p178_p9), 1, %s1232_s16  }
   0xe   : > { %181 = sbr.rel (%p178_p9) target bundleno = 146 (0x92), region = 36  ;;  %p209_p10 = scmp.lt.s32.totalorder (!%p178_p9), %s964_s27, 127 }
   0xf   : > { %s1354_s20 = sshll.u32 (!%p178_p9), %s205_s14, 9  ;;  %s973_s30 = sshll.u32 (!%p178_p9), %s1290_s19, 9 }
  0x10   : > { %s1369_s22 = scalar_lea.vmem (!%p178_p9), [#allocation2], %s1354_s20  ;;  %s881_s7 = scalar_lea.hbm (!%p178_p9), %s1701_s4, %s973_s30 }
  0x11   : > { %s882_s19 = sshll.u32 (!%p178_p9), %s1369_s22, 4  ;;  %s884_s8 = sshll.u32 (!%p178_p9), %s881_s7, 4  ;;  %s883_s19 = int_to_ptr.vmem [resolvable:$true] %s882_s19  ;;  %s885_s8 = int_to_ptr.hbm [resolvable:$true] %s884_s8 }
  0x12   : > { %s870_s9 = scalar_lea.sflag (!%p178_p9), [#allocation3], %s205_s14  ;;  %s1192_s10 = sshra.s32 (!%p178_p9), %s885_s8, 4  ;;  %s1193_s10 = int_to_ptr.hbm [resolvable:$true] %s1192_s10 }
  0x13   : > { %s1709_s27 = smov (!%p209_p10, %s964_s27), 127  ;;  %v1326_v0 = vld [vmem:[%s1698_s1] ss:$0 sm:$0xff]  ;;  %s1194_s11 = scalar_lea.hbm %s1193_s10, 512 }
  0x14   : > { %s965_s28 = sshll.u32 %s1709_s27, 2  ;;  %s967_s6 = sshll.u32 %s1709_s27, 3  ;;  %v1332_v3 = vld [vmem:[%s1699_s2] ss:$0 sm:$0xff] }
  0x15   : > { %s1321_s5 = scalar_lea.vmem %s1697_s0, %s965_s28  ;;  %s1338_s13 = scalar_lea.vmem %s1700_s3, %s967_s6 }
  0x16   : > { %v975_v1 = vld [vmem:[%s1321_s5] sm:$0xff]   ;;  %v1102_v5 = vld [vmem:[%s1321_s5 + $0x8] sm:$0xff]   ;;  %v1103_v8 = vld [vmem:[%s1321_s5 + $0x10] sm:$0xff]   ;;  %p1195_p11 = scmp.ne.s32.totalorder %s1193_s10, %s1194_s11  ;;  %s1198_s20 = scalar_lea.hbm %s1701_s4, 1024 }
  0x17   : > { %v976_v2 = vunpack.c.l.bf16 %v975_v1  ;;  %v977_v4 = vunpack.c.h.bf16 %v975_v1  ;;  %v980_v6 = vunpack.c.l.bf16 %v1102_v5  ;;  %v981_v7 = vunpack.c.h.bf16 %v1102_v5  ;;  %v1104_v13 = vld [vmem:[%s1321_s5 + $0x18] sm:$0xff]   ;;  %v677_v19 = vld [vmem:[%s1338_s13] sm:$0xff]  ;;  %v678_v23 = vld [vmem:[%s1338_s13 + $0x8] sm:$0xff]  ;;  %p1199_p0 = scmp.lt.s32.totalorder %s1193_s10, %s1701_s4  ;;  %p1200_p1 = scmp.lt.s32.totalorder %s1198_s20, %s1194_s11 }
  0x18   : > { %v984_v11 = vunpack.c.l.bf16 %v1103_v8  ;;  %v985_v12 = vunpack.c.h.bf16 %v1103_v8  ;;  %v988_v16 = vunpack.c.l.bf16 %v1104_v13  ;;  %v989_v17 = vunpack.c.h.bf16 %v1104_v13  ;;  %v679_v25 = vld [vmem:[%s1338_s13 + $0x10] sm:$0xff]  ;;  %v680_v27 = vld [vmem:[%s1338_s13 + $0x18] sm:$0xff]  ;;  %v1105_v42 = vld [vmem:[%s1321_s5 + $0x20] sm:$0xff]   ;;  %p1196_p12 = pnand %p1195_p11, %p1307_p5 }
  0x19   : > { %v353_v9 = vmul.f32 %v1326_v0, %v976_v2  ;;  %v354_v10 = vmul.f32 %v1326_v0, %v977_v4  ;;  %v355_v14 = vmul.f32 %v1326_v0, %v980_v6  ;;  %v356_v15 = vmul.f32 %v1326_v0, %v981_v7  ;;  %v1106_v43 = vld [vmem:[%s1321_s5 + $0x28] sm:$0xff]   ;;  %v681_v47 = vld [vmem:[%s1338_s13 + $0x20] sm:$0xff]  ;;  %v683_v59 = vld [vmem:[%s1338_s13 + $0x30] sm:$0xff]  ;;  %p1201_p2 = por %p1200_p1, %p1199_p0 }
  0x1a   : > { %v357_v21 = vmul.f32 %v1326_v0, %v984_v11  ;;  %v358_v22 = vmul.f32 %v1326_v0, %v985_v12  ;;  %v359_v28 = vmul.f32 %v1326_v0, %v988_v16  ;;  %v360_v29 = vmul.f32 %v1326_v0, %v989_v17  ;;  %v682_v49 = vld [vmem:[%s1338_s13 + $0x28] sm:$0xff]  ;;  %v1107_v60 = vld [vmem:[%s1321_s5 + $0x30] sm:$0xff]   ;;  %v684_v63 = vld [vmem:[%s1338_s13 + $0x38] sm:$0xff]  ;;  %p1197_p13 = pneg %p1196_p12 }
  0x1b   : > { %v421_v18 = vadd.f32 %v1332_v3, %v353_v9  ;;  %v422_v20 = vadd.f32 %v1332_v3, %v354_v10  ;;  %v423_v24 = vadd.f32 %v1332_v3, %v355_v14  ;;  %v424_v26 = vadd.f32 %v1332_v3, %v356_v15  ;;  %v685_v16 = vld [vmem:[%s1338_s13 + $0x40] sm:$0xff] }
  0x1c   : > { %v425_v36 = vadd.f32 %v1332_v3, %v357_v21  ;;  %v426_v37 = vadd.f32 %v1332_v3, %v358_v22  ;;  %v427_v50 = vadd.f32 %v1332_v3, %v359_v28  ;;  %v428_v51 = vadd.f32 %v1332_v3, %v360_v29  ;;  %p1202_p3 = pnand %p1201_p2, %p1197_p13 }
  0x1d   : > { %vm485_vm0 = vcmp.gt.f32.partialorder %v421_v18, 0.0  ;;  %v549_v30 = vmul.f32 0.01, %v421_v18  ;;  %vm486_vm1 = vcmp.gt.f32.partialorder %v422_v20, 0.0  ;;  %v550_v31 = vmul.f32 0.01, %v422_v20 }
  0x1e   : > { %vm487_vm2 = vcmp.gt.f32.partialorder %v423_v24, 0.0  ;;  %v551_v32 = vmul.f32 0.01, %v423_v24  ;;  %vm488_vm3 = vcmp.gt.f32.partialorder %v424_v26, 0.0  ;;  %v552_v33 = vmul.f32 0.01, %v424_v26 }
  0x1f   : > { %v613_v34 = vsel %vm485_vm0, %v421_v18, %v549_v30  ;;  %v614_v35 = vsel %vm486_vm1, %v422_v20, %v550_v31  ;;  %vm489_vm4 = vcmp.gt.f32.partialorder %v425_v36, 0.0  ;;  %v553_v46 = vmul.f32 0.01, %v425_v36  ;;  %v686_v20 = vld [vmem:[%s1338_s13 + $0x48] sm:$0xff]  ;;  %v688_v31 = vld [vmem:[%s1338_s13 + $0x58] sm:$0xff] }
  0x20   : > { %v741_v38 = vadd.f32 %v677_v19, %v613_v34  ;;  %v742_v39 = vadd.f32 %v678_v23, %v614_v35  ;;  %v615_v40 = vsel %vm487_vm2, %v423_v24, %v551_v32  ;;  %v616_v41 = vsel %vm488_vm3, %v424_v26, %v552_v33  ;;  %v687_v24 = vld [vmem:[%s1338_s13 + $0x50] sm:$0xff]  ;;  %v1109_v32 = vld [vmem:[%s1321_s5 + $0x40] sm:$0xff]  }
  0x21   : > { %v743_v44 = vadd.f32 %v679_v25, %v615_v40  ;;  %v744_v45 = vadd.f32 %v680_v27, %v616_v41  ;;  %vm490_vm5 = vcmp.gt.f32.partialorder %v426_v37, 0.0  ;;  %v554_v48 = vmul.f32 0.01, %v426_v37  ;;  %v1108_v27 = vld [vmem:[%s1321_s5 + $0x38] sm:$0xff]   ;;  %v1110_v41 = vld [vmem:[%s1321_s5 + $0x48] sm:$0xff]  }
  0x22   : > { %805 = vst [vmem:[%s1369_s22] sm:$0xff] %v741_v38  ;;  %v617_v52 = vsel %vm489_vm4, %v425_v36, %v553_v46  ;;  %v992_v53 = vunpack.c.l.bf16 %v1105_v42  ;;  %v993_v54 = vunpack.c.h.bf16 %v1105_v42  ;;  %v996_v55 = vunpack.c.l.bf16 %v1106_v43  ;;  %v689_v36 = vld [vmem:[%s1338_s13 + $0x60] sm:$0xff]  ;;  %v1408_v46 = vld [vmem:[%s1321_s5 + $0x50] sm:$0xff]  }
  0x23   : > { %806 = vst [vmem:[%s1369_s22 + $0x8] sm:$0xff] %v742_v39  ;;  %v745_v56 = vadd.f32 %v681_v47, %v617_v52  ;;  %v618_v57 = vsel %vm490_vm5, %v426_v37, %v554_v48  ;;  %vm491_vm6 = vcmp.gt.f32.partialorder %v427_v50, 0.0  ;;  %v555_v58 = vmul.f32 0.01, %v427_v50 }
  0x24   : > { %807 = vst [vmem:[%s1369_s22 + $0x10] sm:$0xff] %v743_v44  ;;  %v746_v61 = vadd.f32 %v682_v49, %v618_v57  ;;  %vm492_vm7 = vcmp.gt.f32.partialorder %v428_v51, 0.0  ;;  %v556_v62 = vmul.f32 0.01, %v428_v51  ;;  %v361_v1 = vmul.f32 %v1326_v0, %v992_v53  ;;  %v690_v49 = vld [vmem:[%s1338_s13 + $0x68] sm:$0xff] }
  0x25   : > { %808 = vst [vmem:[%s1369_s22 + $0x18] sm:$0xff] %v744_v45  ;;  %v619_v2 = vsel %vm491_vm6, %v427_v50, %v555_v58  ;;  %v362_v4 = vmul.f32 %v1326_v0, %v993_v54  ;;  %v363_v5 = vmul.f32 %v1326_v0, %v996_v55  ;;  %v997_v6 = vunpack.c.h.bf16 %v1106_v43 }
  0x26   : > { %809 = vst [vmem:[%s1369_s22 + $0x20] sm:$0xff] %v745_v56  ;;  %v747_v7 = vadd.f32 %v683_v59, %v619_v2  ;;  %v620_v8 = vsel %vm492_vm7, %v428_v51, %v556_v62  ;;  %v429_v9 = vadd.f32 %v1332_v3, %v361_v1  ;;  %v1000_v10 = vunpack.c.l.bf16 %v1107_v60  ;;  %v691_v1 = vld [vmem:[%s1338_s13 + $0x70] sm:$0xff] }
  0x27   : > { %810 = vst [vmem:[%s1369_s22 + $0x28] sm:$0xff] %v746_v61  ;;  %v748_v11 = vadd.f32 %v684_v63, %v620_v8  ;;  %v430_v12 = vadd.f32 %v1332_v3, %v362_v4  ;;  %v431_v13 = vadd.f32 %v1332_v3, %v363_v5  ;;  %v364_v14 = vmul.f32 %v1326_v0, %v997_v6  ;;  %v692_v6 = vld [vmem:[%s1338_s13 + $0x78] sm:$0xff] }
  0x28   : > { %811 = vst [vmem:[%s1369_s22 + $0x30] sm:$0xff] %v747_v7  ;;  %vm493_vm8 = vcmp.gt.f32.partialorder %v429_v9, 0.0  ;;  %v557_v15 = vmul.f32 0.01, %v429_v9  ;;  %v365_v17 = vmul.f32 %v1326_v0, %v1000_v10  ;;  %v1001_v18 = vunpack.c.h.bf16 %v1107_v60  ;;  %v693_v10 = vld [vmem:[%s1338_s13 + $0x80] sm:$0xff] }
  0x29   : > { %812 = vst [vmem:[%s1369_s22 + $0x38] sm:$0xff] %v748_v11  ;;  %vm494_vm9 = vcmp.gt.f32.partialorder %v430_v12, 0.0  ;;  %v558_v19 = vmul.f32 0.01, %v430_v12  ;;  %vm495_vm10 = vcmp.gt.f32.partialorder %v431_v13, 0.0  ;;  %v432_v21 = vadd.f32 %v1332_v3, %v364_v14 }
  0x2a   : > { %v621_v22 = vsel %vm493_vm8, %v429_v9, %v557_v15  ;;  %v559_v23 = vmul.f32 0.01, %v431_v13  ;;  %v433_v25 = vadd.f32 %v1332_v3, %v365_v17  ;;  %v366_v26 = vmul.f32 %v1326_v0, %v1001_v18 }
  0x2b   : > { %v749_v28 = vadd.f32 %v685_v16, %v621_v22  ;;  %v622_v29 = vsel %vm494_vm9, %v430_v12, %v558_v19  ;;  %vm496_vm11 = vcmp.gt.f32.partialorder %v432_v21, 0.0  ;;  %v560_v30 = vmul.f32 0.01, %v432_v21  ;;  %v694_v16 = vld [vmem:[%s1338_s13 + $0x88] sm:$0xff] }
  0x2c   : > { %v750_v33 = vadd.f32 %v686_v20, %v622_v29  ;;  %v623_v34 = vsel %vm495_vm10, %v431_v13, %v559_v23  ;;  %vm497_vm12 = vcmp.gt.f32.partialorder %v433_v25, 0.0  ;;  %v561_v35 = vmul.f32 0.01, %v433_v25  ;;  %v695_v20 = vld [vmem:[%s1338_s13 + $0x90] sm:$0xff] }
  0x2d   : > { %813 = vst [vmem:[%s1369_s22 + $0x40] sm:$0xff] %v749_v28  ;;  %v751_v37 = vadd.f32 %v687_v24, %v623_v34  ;;  %v624_v38 = vsel %vm496_vm11, %v432_v21, %v560_v30  ;;  %v434_v39 = vadd.f32 %v1332_v3, %v366_v26  ;;  %v1004_v40 = vunpack.c.l.bf16 %v1108_v27  ;;  %v1112_v21 = vld [vmem:[%s1321_s5 + $0x58] sm:$0xff]   ;;  %v1113_v26 = vld [vmem:[%s1321_s5 + $0x60] sm:$0xff]  }
  0x2e   : > { %814 = vst [vmem:[%s1369_s22 + $0x48] sm:$0xff] %v750_v33  ;;  %v752_v42 = vadd.f32 %v688_v31, %v624_v38  ;;  %v625_v43 = vsel %vm497_vm12, %v433_v25, %v561_v35  ;;  %v1005_v44 = vunpack.c.h.bf16 %v1108_v27  ;;  %v1008_v45 = vunpack.c.l.bf16 %v1109_v32  ;;  %v696_v25 = vld [vmem:[%s1338_s13 + $0x98] sm:$0xff]  ;;  %v1441_v31 = vld [vmem:[%s1321_s5 + $0x68] sm:$0xff]  }
  0x2f   : > { %815 = vst [vmem:[%s1369_s22 + $0x50] sm:$0xff] %v751_v37  ;;  %v753_v47 = vadd.f32 %v689_v36, %v625_v43  ;;  %vm498_vm13 = vcmp.gt.f32.partialorder %v434_v39, 0.0  ;;  %v562_v48 = vmul.f32 0.01, %v434_v39  ;;  %v367_v50 = vmul.f32 %v1326_v0, %v1004_v40 }
  0x30   : > { %816 = vst [vmem:[%s1369_s22 + $0x58] sm:$0xff] %v752_v42  ;;  %v368_v51 = vmul.f32 %v1326_v0, %v1005_v44  ;;  %v369_v52 = vmul.f32 %v1326_v0, %v1008_v45  ;;  %v1009_v53 = vunpack.c.h.bf16 %v1109_v32  ;;  %v1012_v54 = vunpack.c.l.bf16 %v1110_v41  ;;  %v697_v45 = vld [vmem:[%s1338_s13 + $0xa0] sm:$0xff] }
  0x31   : > { %817 = vst [vmem:[%s1369_s22 + $0x60] sm:$0xff] %v753_v47  ;;  %v626_v55 = vsel %vm498_vm13, %v434_v39, %v562_v48  ;;  %v435_v56 = vadd.f32 %v1332_v3, %v367_v50  ;;  %v1013_v57 = vunpack.c.h.bf16 %v1110_v41  ;;  %v1016_v58 = vunpack.c.l.bf16 %v1408_v46 }
  0x32   : > { %v754_v59 = vadd.f32 %v690_v49, %v626_v55  ;;  %v436_v60 = vadd.f32 %v1332_v3, %v368_v51  ;;  %v437_v61 = vadd.f32 %v1332_v3, %v369_v52  ;;  %v370_v62 = vmul.f32 %v1326_v0, %v1009_v53 }
  0x33   : > { %vm499_vm14 = vcmp.gt.f32.partialorder %v435_v56, 0.0  ;;  %v563_v63 = vmul.f32 0.01, %v435_v56  ;;  %v371_v2 = vmul.f32 %v1326_v0, %v1012_v54  ;;  %v372_v4 = vmul.f32 %v1326_v0, %v1013_v57  ;;  %v698_v54 = vld [vmem:[%s1338_s13 + $0xa8] sm:$0xff] }
  0x34   : > { %818 = vst [vmem:[%s1369_s22 + $0x68] sm:$0xff] %v754_v59  ;;  %vm500_vm15 = vcmp.gt.f32.partialorder %v436_v60, 0.0  ;;  %v564_v5 = vmul.f32 0.01, %v436_v60  ;;  %vm501_vm0 = vcmp.gt.f32.partialorder %v437_v61, 0.0  ;;  %v438_v7 = vadd.f32 %v1332_v3, %v370_v62  ;;  %v700_v59 = vld [vmem:[%s1338_s13 + $0xb8] sm:$0xff] }
  0x35   : > { %v627_v8 = vsel %vm499_vm14, %v435_v56, %v563_v63  ;;  %v565_v9 = vmul.f32 0.01, %v437_v61  ;;  %v439_v11 = vadd.f32 %v1332_v3, %v371_v2  ;;  %v440_v12 = vadd.f32 %v1332_v3, %v372_v4  ;;  %v701_v63 = vld [vmem:[%s1338_s13 + $0xc0] sm:$0xff] }
  0x36   : > { %v755_v13 = vadd.f32 %v691_v1, %v627_v8  ;;  %v628_v14 = vsel %vm500_vm15, %v436_v60, %v564_v5  ;;  %vm502_vm1 = vcmp.gt.f32.partialorder %v438_v7, 0.0  ;;  %v566_v15 = vmul.f32 0.01, %v438_v7 }
  0x37   : > { %v756_v17 = vadd.f32 %v692_v6, %v628_v14  ;;  %v629_v18 = vsel %vm501_vm0, %v437_v61, %v565_v9  ;;  %vm503_vm2 = vcmp.gt.f32.partialorder %v439_v11, 0.0  ;;  %v567_v19 = vmul.f32 0.01, %v439_v11  ;;  %v1115_v6 = vld [vmem:[%s1321_s5 + $0x70] sm:$0xff]  }
  0x38   : > { %819 = vst [vmem:[%s1369_s22 + $0x70] sm:$0xff] %v755_v13  ;;  %v757_v22 = vadd.f32 %v693_v10, %v629_v18  ;;  %v630_v23 = vsel %vm502_vm1, %v438_v7, %v566_v15  ;;  %vm504_vm3 = vcmp.gt.f32.partialorder %v440_v12, 0.0  ;;  %v568_v24 = vmul.f32 0.01, %v440_v12  ;;  %v702_v15 = vld [vmem:[%s1338_s13 + $0xc8] sm:$0xff] }
  0x39   : > { %820 = vst [vmem:[%s1369_s22 + $0x78] sm:$0xff] %v756_v17  ;;  %v758_v27 = vadd.f32 %v694_v16, %v630_v23  ;;  %v631_v28 = vsel %vm503_vm2, %v439_v11, %v567_v19  ;;  %v373_v29 = vmul.f32 %v1326_v0, %v1016_v58  ;;  %v1017_v30 = vunpack.c.h.bf16 %v1408_v46  ;;  %v699_v58 = vld [vmem:[%s1338_s13 + $0xb0] sm:$0xff]  ;;  %v1116_v11 = vld [vmem:[%s1321_s5 + $0x78] sm:$0xff]  }
  0x3a   : > { %821 = vst [vmem:[%s1369_s22 + $0x80] sm:$0xff] %v757_v22  ;;  %v759_v32 = vadd.f32 %v695_v20, %v631_v28  ;;  %v632_v33 = vsel %vm504_vm3, %v440_v12, %v568_v24  ;;  %v1020_v34 = vunpack.c.l.bf16 %v1112_v21  ;;  %v1021_v35 = vunpack.c.h.bf16 %v1112_v21  ;;  %v703_v17 = vld [vmem:[%s1338_s13 + $0xd0] sm:$0xff]  ;;  %v1117_v24 = vld [vmem:[%s1321_s5 + $0x80] sm:$0xff]  }
  0x3b   : > { %822 = vst [vmem:[%s1369_s22 + $0x88] sm:$0xff] %v758_v27  ;;  %v760_v36 = vadd.f32 %v696_v25, %v632_v33  ;;  %v441_v37 = vadd.f32 %v1332_v3, %v373_v29  ;;  %v374_v38 = vmul.f32 %v1326_v0, %v1017_v30  ;;  %v1024_v39 = vunpack.c.l.bf16 %v1113_v26 }
  0x3c   : > { %823 = vst [vmem:[%s1369_s22 + $0x90] sm:$0xff] %v759_v32  ;;  %v375_v40 = vmul.f32 %v1326_v0, %v1020_v34  ;;  %v376_v41 = vmul.f32 %v1326_v0, %v1021_v35  ;;  %v1025_v42 = vunpack.c.h.bf16 %v1113_v26  ;;  %v1028_v43 = vunpack.c.l.bf16 %v1441_v31  ;;  %v704_v34 = vld [vmem:[%s1338_s13 + $0xd8] sm:$0xff] }
  0x3d   : > { %824 = vst [vmem:[%s1369_s22 + $0x98] sm:$0xff] %v760_v36  ;;  %vm505_vm4 = vcmp.gt.f32.partialorder %v441_v37, 0.0  ;;  %v569_v44 = vmul.f32 0.01, %v441_v37  ;;  %v442_v46 = vadd.f32 %v1332_v3, %v374_v38  ;;  %v377_v47 = vmul.f32 %v1326_v0, %v1024_v39 }
  0x3e   : > { %v443_v48 = vadd.f32 %v1332_v3, %v375_v40  ;;  %v444_v49 = vadd.f32 %v1332_v3, %v376_v41  ;;  %v378_v50 = vmul.f32 %v1326_v0, %v1025_v42  ;;  %v379_v51 = vmul.f32 %v1326_v0, %v1028_v43  ;;  %v705_v43 = vld [vmem:[%s1338_s13 + $0xe0] sm:$0xff] }
  0x3f   : > { %v633_v52 = vsel %vm505_vm4, %v441_v37, %v569_v44  ;;  %vm506_vm5 = vcmp.gt.f32.partialorder %v442_v46, 0.0  ;;  %v570_v53 = vmul.f32 0.01, %v442_v46  ;;  %v445_v55 = vadd.f32 %v1332_v3, %v377_v47 }
  0x40   : > { %v761_v56 = vadd.f32 %v697_v45, %v633_v52  ;;  %vm507_vm6 = vcmp.gt.f32.partialorder %v443_v48, 0.0  ;;  %v571_v57 = vmul.f32 0.01, %v443_v48  ;;  %vm508_vm7 = vcmp.gt.f32.partialorder %v444_v49, 0.0  ;;  %v1118_v45 = vld [vmem:[%s1321_s5 + $0x88] sm:$0xff]  }
  0x41   : > { %v634_v60 = vsel %vm506_vm5, %v442_v46, %v570_v53  ;;  %v572_v61 = vmul.f32 0.01, %v444_v49  ;;  %vm509_vm8 = vcmp.gt.f32.partialorder %v445_v55, 0.0  ;;  %v573_v62 = vmul.f32 0.01, %v445_v55  ;;  %v708_v53 = vld [vmem:[%s1338_s13 + $0xf8] sm:$0xff] }
  0x42   : > { %825 = vst [vmem:[%s1369_s22 + $0xa0] sm:$0xff] %v761_v56  ;;  %v762_v1 = vadd.f32 %v698_v54, %v634_v60  ;;  %v635_v2 = vsel %vm507_vm6, %v443_v48, %v571_v57  ;;  %v446_v4 = vadd.f32 %v1332_v3, %v378_v50  ;;  %v447_v5 = vadd.f32 %v1332_v3, %v379_v51  ;;  %v706_v48 = vld [vmem:[%s1338_s13 + $0xe8] sm:$0xff] }
  0x43   : > { %v763_v7 = vadd.f32 %v699_v58, %v635_v2  ;;  %v636_v8 = vsel %vm508_vm7, %v444_v49, %v572_v61  ;;  %v637_v9 = vsel %vm509_vm8, %v445_v55, %v573_v62  ;;  %v1029_v10 = vunpack.c.h.bf16 %v1441_v31  ;;  %v707_v49 = vld [vmem:[%s1338_s13 + $0xf0] sm:$0xff] }
  0x44   : > { %826 = vst [vmem:[%s1369_s22 + $0xa8] sm:$0xff] %v762_v1  ;;  %v764_v12 = vadd.f32 %v700_v59, %v636_v8  ;;  %v765_v13 = vadd.f32 %v701_v63, %v637_v9  ;;  %vm510_vm9 = vcmp.gt.f32.partialorder %v446_v4, 0.0  ;;  %v574_v14 = vmul.f32 0.01, %v446_v4  ;;  %v1119_v58 = vld [vmem:[%s1321_s5 + $0x90] sm:$0xff]   ;;  %v1120_v63 = vld [vmem:[%s1321_s5 + $0x98] sm:$0xff]  }
  0x45   : > { %827 = vst [vmem:[%s1369_s22 + $0xb0] sm:$0xff] %v763_v7  ;;  %vm511_vm10 = vcmp.gt.f32.partialorder %v447_v5, 0.0  ;;  %v575_v16 = vmul.f32 0.01, %v447_v5  ;;  %v380_v18 = vmul.f32 %v1326_v0, %v1029_v10  ;;  %v1032_v19 = vunpack.c.l.bf16 %v1115_v6 }
  0x46   : > { %828 = vst [vmem:[%s1369_s22 + $0xb8] sm:$0xff] %v764_v12  ;;  %v638_v20 = vsel %vm510_vm9, %v446_v4, %v574_v14  ;;  %v1033_v21 = vunpack.c.h.bf16 %v1115_v6  ;;  %v1036_v22 = vunpack.c.l.bf16 %v1116_v11  ;;  %v1037_v23 = vunpack.c.h.bf16 %v1116_v11 }
  0x47   : > { %829 = vst [vmem:[%s1369_s22 + $0xc0] sm:$0xff] %v765_v13  ;;  %v766_v25 = vadd.f32 %v702_v15, %v638_v20  ;;  %v639_v26 = vsel %vm511_vm10, %v447_v5, %v575_v16  ;;  %v448_v27 = vadd.f32 %v1332_v3, %v380_v18  ;;  %v381_v28 = vmul.f32 %v1326_v0, %v1032_v19  ;;  %v709_v5 = vld [vmem:[%s1338_s13 + $0x100] sm:$0xff]  ;;  %v710_v16 = vld [vmem:[%s1338_s13 + $0x108] sm:$0xff] }
  0x48   : > { %v767_v29 = vadd.f32 %v703_v17, %v639_v26  ;;  %v382_v30 = vmul.f32 %v1326_v0, %v1033_v21  ;;  %v383_v31 = vmul.f32 %v1326_v0, %v1036_v22  ;;  %v384_v32 = vmul.f32 %v1326_v0, %v1037_v23  ;;  %v1121_v22 = vld [vmem:[%s1321_s5 + $0xa0] sm:$0xff]  }
  0x49   : > { %830 = vst [vmem:[%s1369_s22 + $0xc8] sm:$0xff] %v766_v25  ;;  %vm512_vm11 = vcmp.gt.f32.partialorder %v448_v27, 0.0  ;;  %v576_v33 = vmul.f32 0.01, %v448_v27  ;;  %v449_v35 = vadd.f32 %v1332_v3, %v381_v28  ;;  %v1040_v36 = vunpack.c.l.bf16 %v1117_v24  ;;  %v711_v25 = vld [vmem:[%s1338_s13 + $0x110] sm:$0xff] }
  0x4a   : > { %831 = vst [vmem:[%s1369_s22 + $0xd0] sm:$0xff] %v767_v29  ;;  %v450_v37 = vadd.f32 %v1332_v3, %v382_v30  ;;  %v451_v38 = vadd.f32 %v1332_v3, %v383_v31  ;;  %v452_v39 = vadd.f32 %v1332_v3, %v384_v32  ;;  %v1041_v40 = vunpack.c.h.bf16 %v1117_v24  ;;  %v712_v32 = vld [vmem:[%s1338_s13 + $0x118] sm:$0xff] }
  0x4b   : > { %v640_v41 = vsel %vm512_vm11, %v448_v27, %v576_v33  ;;  %vm513_vm12 = vcmp.gt.f32.partialorder %v449_v35, 0.0  ;;  %v577_v42 = vmul.f32 0.01, %v449_v35  ;;  %v385_v44 = vmul.f32 %v1326_v0, %v1040_v36  ;;  %v713_v33 = vld [vmem:[%s1338_s13 + $0x120] sm:$0xff] }
  0x4c   : > { %v768_v46 = vadd.f32 %v704_v34, %v640_v41  ;;  %vm514_vm13 = vcmp.gt.f32.partialorder %v450_v37, 0.0  ;;  %v578_v47 = vmul.f32 0.01, %v450_v37  ;;  %vm515_vm14 = vcmp.gt.f32.partialorder %v451_v38, 0.0  ;;  %v714_v34 = vld [vmem:[%s1338_s13 + $0x128] sm:$0xff]  ;;  %v716_v41 = vld [vmem:[%s1338_s13 + $0x138] sm:$0xff] }
  0x4d   : > { %v641_v50 = vsel %vm513_vm12, %v449_v35, %v577_v42  ;;  %v579_v51 = vmul.f32 0.01, %v451_v38  ;;  %vm516_vm15 = vcmp.gt.f32.partialorder %v452_v39, 0.0  ;;  %v580_v52 = vmul.f32 0.01, %v452_v39 }
  0x4e   : > { %832 = vst [vmem:[%s1369_s22 + $0xd8] sm:$0xff] %v768_v46  ;;  %v769_v54 = vadd.f32 %v705_v43, %v641_v50  ;;  %v642_v55 = vsel %vm514_vm13, %v450_v37, %v578_v47  ;;  %v453_v56 = vadd.f32 %v1332_v3, %v385_v44  ;;  %v386_v57 = vmul.f32 %v1326_v0, %v1041_v40  ;;  %v715_v40 = vld [vmem:[%s1338_s13 + $0x130] sm:$0xff] }
  0x4f   : > { %v770_v59 = vadd.f32 %v706_v48, %v642_v55  ;;  %v643_v60 = vsel %vm515_vm14, %v451_v38, %v579_v51  ;;  %v644_v61 = vsel %vm516_vm15, %v452_v39, %v580_v52  ;;  %v1044_v62 = vunpack.c.l.bf16 %v1118_v45  ;;  %v1122_v51 = vld [vmem:[%s1321_s5 + $0xa8] sm:$0xff]   ;;  %v1123_v52 = vld [vmem:[%s1321_s5 + $0xb0] sm:$0xff]  }
  0x50   : > { %833 = vst [vmem:[%s1369_s22 + $0xe0] sm:$0xff] %v769_v54  ;;  %v771_v1 = vadd.f32 %v707_v49, %v643_v60  ;;  %v772_v2 = vadd.f32 %v708_v53, %v644_v61  ;;  %vm517_vm0 = vcmp.gt.f32.partialorder %v453_v56, 0.0  ;;  %v581_v4 = vmul.f32 0.01, %v453_v56 }
  0x51   : > { %834 = vst [vmem:[%s1369_s22 + $0xe8] sm:$0xff] %v770_v59  ;;  %v454_v6 = vadd.f32 %v1332_v3, %v386_v57  ;;  %v387_v7 = vmul.f32 %v1326_v0, %v1044_v62  ;;  %v1045_v8 = vunpack.c.h.bf16 %v1118_v45  ;;  %v1048_v9 = vunpack.c.l.bf16 %v1119_v58  ;;  %v1534_v57 = vld [vmem:[%s1321_s5 + $0xb8] sm:$0xff]  }
  0x52   : > { %835 = vst [vmem:[%s1369_s22 + $0xf0] sm:$0xff] %v771_v1  ;;  %v645_v10 = vsel %vm517_vm0, %v453_v56, %v581_v4  ;;  %v1049_v11 = vunpack.c.h.bf16 %v1119_v58  ;;  %v1052_v12 = vunpack.c.l.bf16 %v1120_v63  ;;  %v1053_v13 = vunpack.c.h.bf16 %v1120_v63 }
  0x53   : > { %836 = vst [vmem:[%s1369_s22 + $0xf8] sm:$0xff] %v772_v2  ;;  %v773_v14 = vadd.f32 %v709_v5, %v645_v10  ;;  %vm518_vm1 = vcmp.gt.f32.partialorder %v454_v6, 0.0  ;;  %v582_v15 = vmul.f32 0.01, %v454_v6  ;;  %v455_v17 = vadd.f32 %v1332_v3, %v387_v7  ;;  %v717_v5 = vld [vmem:[%s1338_s13 + $0x140] sm:$0xff] }
  0x54   : > { %v388_v18 = vmul.f32 %v1326_v0, %v1045_v8  ;;  %v389_v19 = vmul.f32 %v1326_v0, %v1048_v9  ;;  %v390_v20 = vmul.f32 %v1326_v0, %v1049_v11  ;;  %v391_v21 = vmul.f32 %v1326_v0, %v1052_v12 }
  0x55   : > { %837 = vst [vmem:[%s1369_s22 + $0x100] sm:$0xff] %v773_v14  ;;  %v646_v23 = vsel %vm518_vm1, %v454_v6, %v582_v15  ;;  %vm519_vm2 = vcmp.gt.f32.partialorder %v455_v17, 0.0  ;;  %v583_v24 = vmul.f32 0.01, %v455_v17  ;;  %v392_v26 = vmul.f32 %v1326_v0, %v1053_v13 }
  0x56   : > { %v774_v27 = vadd.f32 %v710_v16, %v646_v23  ;;  %v456_v28 = vadd.f32 %v1332_v3, %v388_v18  ;;  %v457_v29 = vadd.f32 %v1332_v3, %v389_v19  ;;  %v458_v30 = vadd.f32 %v1332_v3, %v390_v20  ;;  %v720_v23 = vld [vmem:[%s1338_s13 + $0x158] sm:$0xff] }
  0x57   : > { %v647_v31 = vsel %vm519_vm2, %v455_v17, %v583_v24  ;;  %v459_v35 = vadd.f32 %v1332_v3, %v391_v21  ;;  %v460_v36 = vadd.f32 %v1332_v3, %v392_v26  ;;  %v1056_v37 = vunpack.c.l.bf16 %v1121_v22  ;;  %v718_v21 = vld [vmem:[%s1338_s13 + $0x148] sm:$0xff] }
  0x58   : > { %838 = vst [vmem:[%s1369_s22 + $0x108] sm:$0xff] %v774_v27  ;;  %v775_v38 = vadd.f32 %v711_v25, %v647_v31  ;;  %vm520_vm3 = vcmp.gt.f32.partialorder %v456_v28, 0.0  ;;  %v584_v39 = vmul.f32 0.01, %v456_v28  ;;  %vm521_vm4 = vcmp.gt.f32.partialorder %v457_v29, 0.0 }
  0x59   : > { %v585_v42 = vmul.f32 0.01, %v457_v29  ;;  %vm522_vm5 = vcmp.gt.f32.partialorder %v458_v30, 0.0  ;;  %v586_v43 = vmul.f32 0.01, %v458_v30  ;;  %vm523_vm6 = vcmp.gt.f32.partialorder %v459_v35, 0.0 }
  0x5a   : > { %839 = vst [vmem:[%s1369_s22 + $0x110] sm:$0xff] %v775_v38  ;;  %v648_v44 = vsel %vm520_vm3, %v456_v28, %v584_v39  ;;  %v587_v45 = vmul.f32 0.01, %v459_v35  ;;  %vm524_vm7 = vcmp.gt.f32.partialorder %v460_v36, 0.0  ;;  %v588_v46 = vmul.f32 0.01, %v460_v36 }
  0x5b   : > { %v776_v47 = vadd.f32 %v712_v32, %v648_v44  ;;  %v649_v48 = vsel %vm521_vm4, %v457_v29, %v585_v42  ;;  %v650_v49 = vsel %vm522_vm5, %v458_v30, %v586_v43  ;;  %v393_v50 = vmul.f32 %v1326_v0, %v1056_v37  ;;  %v721_v30 = vld [vmem:[%s1338_s13 + $0x160] sm:$0xff] }
  0x5c   : > { %v777_v53 = vadd.f32 %v713_v33, %v649_v48  ;;  %v778_v54 = vadd.f32 %v714_v34, %v650_v49  ;;  %v651_v55 = vsel %vm523_vm6, %v459_v35, %v587_v45  ;;  %v652_v56 = vsel %vm524_vm7, %v460_v36, %v588_v46  ;;  %v722_v34 = vld [vmem:[%s1338_s13 + $0x168] sm:$0xff]  ;;  %v1125_v35 = vld [vmem:[%s1321_s5 + $0xc0] sm:$0xff]   ;;  %v1127_v46 = vld [vmem:[%s1321_s5 + $0xd0] sm:$0xff]  }
  0x5d   : > { %840 = vst [vmem:[%s1369_s22 + $0x118] sm:$0xff] %v776_v47  ;;  %v779_v58 = vadd.f32 %v715_v40, %v651_v55  ;;  %v780_v59 = vadd.f32 %v716_v41, %v652_v56  ;;  %v461_v60 = vadd.f32 %v1332_v3, %v393_v50  ;;  %v1057_v61 = vunpack.c.h.bf16 %v1121_v22  ;;  %v719_v22 = vld [vmem:[%s1338_s13 + $0x150] sm:$0xff]  ;;  %v1126_v41 = vld [vmem:[%s1321_s5 + $0xc8] sm:$0xff]  }
  0x5e   : > { %841 = vst [vmem:[%s1369_s22 + $0x120] sm:$0xff] %v777_v53  ;;  %v1060_v62 = vunpack.c.l.bf16 %v1122_v51  ;;  %v1061_v63 = vunpack.c.h.bf16 %v1122_v51  ;;  %v1064_v1 = vunpack.c.l.bf16 %v1123_v52  ;;  %v1065_v2 = vunpack.c.h.bf16 %v1123_v52  ;;  %v723_v40 = vld [vmem:[%s1338_s13 + $0x170] sm:$0xff] }
  0x5f   : > { %842 = vst [vmem:[%s1369_s22 + $0x128] sm:$0xff] %v778_v54  ;;  %vm525_vm8 = vcmp.gt.f32.partialorder %v461_v60, 0.0  ;;  %v589_v4 = vmul.f32 0.01, %v461_v60  ;;  %v394_v6 = vmul.f32 %v1326_v0, %v1057_v61  ;;  %v1068_v7 = vunpack.c.l.bf16 %v1534_v57  ;;  %v724_v61 = vld [vmem:[%s1338_s13 + $0x178] sm:$0xff] }
  0x60   : > { %843 = vst [vmem:[%s1369_s22 + $0x130] sm:$0xff] %v779_v58  ;;  %v395_v8 = vmul.f32 %v1326_v0, %v1060_v62  ;;  %v396_v9 = vmul.f32 %v1326_v0, %v1061_v63  ;;  %v397_v10 = vmul.f32 %v1326_v0, %v1064_v1  ;;  %v398_v11 = vmul.f32 %v1326_v0, %v1065_v2 }
  0x61   : > { %844 = vst [vmem:[%s1369_s22 + $0x138] sm:$0xff] %v780_v59  ;;  %v653_v12 = vsel %vm525_vm8, %v461_v60, %v589_v4  ;;  %v462_v13 = vadd.f32 %v1332_v3, %v394_v6  ;;  %v399_v14 = vmul.f32 %v1326_v0, %v1068_v7  ;;  %v1069_v15 = vunpack.c.h.bf16 %v1534_v57  ;;  %v1578_v59 = vld [vmem:[%s1321_s5 + $0xd8] sm:$0xff]   ;;  %v725_v7 = vld [vmem:[%s1338_s13 + $0x180] sm:$0xff] }
  0x62   : > { %v781_v16 = vadd.f32 %v717_v5, %v653_v12  ;;  %v463_v17 = vadd.f32 %v1332_v3, %v395_v8  ;;  %v464_v18 = vadd.f32 %v1332_v3, %v396_v9  ;;  %v465_v19 = vadd.f32 %v1332_v3, %v397_v10 }
  0x63   : > { %vm526_vm9 = vcmp.gt.f32.partialorder %v462_v13, 0.0  ;;  %v590_v20 = vmul.f32 0.01, %v462_v13  ;;  %v466_v24 = vadd.f32 %v1332_v3, %v398_v11  ;;  %v467_v25 = vadd.f32 %v1332_v3, %v399_v14  ;;  %v727_v14 = vld [vmem:[%s1338_s13 + $0x190] sm:$0xff] }
  0x64   : > { %845 = vst [vmem:[%s1369_s22 + $0x140] sm:$0xff] %v781_v16  ;;  %vm527_vm10 = vcmp.gt.f32.partialorder %v463_v17, 0.0  ;;  %v591_v26 = vmul.f32 0.01, %v463_v17  ;;  %vm528_vm11 = vcmp.gt.f32.partialorder %v464_v18, 0.0  ;;  %vm529_vm12 = vcmp.gt.f32.partialorder %v465_v19, 0.0 }
  0x65   : > { %v654_v27 = vsel %vm526_vm9, %v462_v13, %v590_v20  ;;  %v592_v28 = vmul.f32 0.01, %v464_v18  ;;  %v593_v29 = vmul.f32 0.01, %v465_v19  ;;  %vm530_vm13 = vcmp.gt.f32.partialorder %v466_v24, 0.0  ;;  %v726_v13 = vld [vmem:[%s1338_s13 + $0x188] sm:$0xff] }
  0x66   : > { %v782_v31 = vadd.f32 %v718_v21, %v654_v27  ;;  %v655_v32 = vsel %vm527_vm10, %v463_v17, %v591_v26  ;;  %v594_v33 = vmul.f32 0.01, %v466_v24  ;;  %vm531_vm14 = vcmp.gt.f32.partialorder %v467_v25, 0.0  ;;  %v1129_v26 = vld [vmem:[%s1321_s5 + $0xe0] sm:$0xff]  }
  0x67   : > { %v783_v36 = vadd.f32 %v719_v22, %v655_v32  ;;  %v656_v37 = vsel %vm528_vm11, %v464_v18, %v592_v28  ;;  %v657_v38 = vsel %vm529_vm12, %v465_v19, %v593_v29  ;;  %v595_v39 = vmul.f32 0.01, %v467_v25  ;;  %v728_v19 = vld [vmem:[%s1338_s13 + $0x198] sm:$0xff]  ;;  %v1130_v32 = vld [vmem:[%s1321_s5 + $0xe8] sm:$0xff]  }
  0x68   : > { %846 = vst [vmem:[%s1369_s22 + $0x148] sm:$0xff] %v782_v31  ;;  %v784_v42 = vadd.f32 %v720_v23, %v656_v37  ;;  %v785_v43 = vadd.f32 %v721_v30, %v657_v38  ;;  %v658_v44 = vsel %vm530_vm13, %v466_v24, %v594_v33  ;;  %v400_v45 = vmul.f32 %v1326_v0, %v1069_v15  ;;  %v729_v30 = vld [vmem:[%s1338_s13 + $0x1a0] sm:$0xff]  ;;  %v730_v31 = vld [vmem:[%s1338_s13 + $0x1a8] sm:$0xff] }
  0x69   : > { %847 = vst [vmem:[%s1369_s22 + $0x150] sm:$0xff] %v783_v36  ;;  %v786_v47 = vadd.f32 %v722_v34, %v658_v44  ;;  %v659_v48 = vsel %vm531_vm14, %v467_v25, %v595_v39  ;;  %v1072_v49 = vunpack.c.l.bf16 %v1125_v35  ;;  %v1073_v50 = vunpack.c.h.bf16 %v1125_v35 }
  0x6a   : > { %848 = vst [vmem:[%s1369_s22 + $0x158] sm:$0xff] %v784_v42  ;;  %v787_v51 = vadd.f32 %v723_v40, %v659_v48  ;;  %v468_v52 = vadd.f32 %v1332_v3, %v400_v45  ;;  %v1076_v53 = vunpack.c.l.bf16 %v1126_v41  ;;  %v1077_v54 = vunpack.c.h.bf16 %v1126_v41  ;;  %v1621_v48 = vld [vmem:[%s1698_s1] ss:$0 sm:$0xff] }
  0x6b   : > { %849 = vst [vmem:[%s1369_s22 + $0x160] sm:$0xff] %v785_v43  ;;  %v401_v55 = vmul.f32 %v1326_v0, %v1072_v49  ;;  %v402_v56 = vmul.f32 %v1326_v0, %v1073_v50  ;;  %v1080_v57 = vunpack.c.l.bf16 %v1127_v46  ;;  %v1081_v58 = vunpack.c.h.bf16 %v1127_v46  ;;  %v1131_v43 = vld [vmem:[%s1321_s5 + $0xf0] sm:$0xff]  }
  0x6c   : > { %850 = vst [vmem:[%s1369_s22 + $0x168] sm:$0xff] %v786_v47  ;;  %vm532_vm15 = vcmp.gt.f32.partialorder %v468_v52, 0.0  ;;  %v596_v60 = vmul.f32 0.01, %v468_v52  ;;  %v403_v62 = vmul.f32 %v1326_v0, %v1076_v53  ;;  %v404_v63 = vmul.f32 %v1326_v0, %v1077_v54  ;;  %v731_v47 = vld [vmem:[%s1338_s13 + $0x1b0] sm:$0xff] }
  0x6d   : > { %851 = vst [vmem:[%s1369_s22 + $0x170] sm:$0xff] %v787_v51  ;;  %v469_v1 = vadd.f32 %v1332_v3, %v401_v55  ;;  %v470_v2 = vadd.f32 %v1332_v3, %v402_v56  ;;  %v405_v4 = vmul.f32 %v1326_v0, %v1080_v57  ;;  %v406_v5 = vmul.f32 %v1326_v0, %v1081_v58 }
  0x6e   : > { %v660_v6 = vsel %vm532_vm15, %v468_v52, %v596_v60  ;;  %v471_v8 = vadd.f32 %v1332_v3, %v403_v62  ;;  %v472_v9 = vadd.f32 %v1332_v3, %v404_v63  ;;  %v1084_v10 = vunpack.c.l.bf16 %v1578_v59  ;;  %v733_v62 = vld [vmem:[%s1338_s13 + $0x1c0] sm:$0xff]  ;;  %v734_v63 = vld [vmem:[%s1338_s13 + $0x1c8] sm:$0xff] }
  0x6f   : > { %v788_v11 = vadd.f32 %v724_v61, %v660_v6  ;;  %vm533_vm0 = vcmp.gt.f32.partialorder %v469_v1, 0.0  ;;  %v597_v12 = vmul.f32 0.01, %v469_v1  ;;  %vm534_vm1 = vcmp.gt.f32.partialorder %v470_v2, 0.0  ;;  %v732_v61 = vld [vmem:[%s1338_s13 + $0x1b8] sm:$0xff] }
  0x70   : > { %v598_v15 = vmul.f32 0.01, %v470_v2  ;;  %vm535_vm2 = vcmp.gt.f32.partialorder %v471_v8, 0.0  ;;  %v599_v16 = vmul.f32 0.01, %v471_v8  ;;  %vm536_vm3 = vcmp.gt.f32.partialorder %v472_v9, 0.0 }
  0x71   : > { %852 = vst [vmem:[%s1369_s22 + $0x178] sm:$0xff] %v788_v11  ;;  %v661_v17 = vsel %vm533_vm0, %v469_v1, %v597_v12  ;;  %v600_v18 = vmul.f32 0.01, %v472_v9  ;;  %v473_v20 = vadd.f32 %v1332_v3, %v405_v4  ;;  %v474_v21 = vadd.f32 %v1332_v3, %v406_v5  ;;  %v735_v11 = vld [vmem:[%s1338_s13 + $0x1d0] sm:$0xff] }
  0x72   : > { %v789_v22 = vadd.f32 %v725_v7, %v661_v17  ;;  %v662_v23 = vsel %vm534_vm1, %v470_v2, %v598_v15  ;;  %v663_v24 = vsel %vm535_vm2, %v471_v8, %v599_v16  ;;  %v407_v25 = vmul.f32 %v1326_v0, %v1084_v10  ;;  %v1609_v0 = vld [vmem:[%s1699_s2] ss:$0 sm:$0xff] }
  0x73   : > { %v790_v27 = vadd.f32 %v726_v13, %v662_v23  ;;  %v791_v28 = vadd.f32 %v727_v14, %v663_v24  ;;  %v664_v29 = vsel %vm536_vm3, %v472_v9, %v600_v18  ;;  %vm537_vm4 = vcmp.gt.f32.partialorder %v473_v20, 0.0  ;;  %v736_v13 = vld [vmem:[%s1338_s13 + $0x1d8] sm:$0xff] }
  0x74   : > { %853 = vst [vmem:[%s1369_s22 + $0x180] sm:$0xff] %v789_v22  ;;  %v792_v33 = vadd.f32 %v728_v19, %v664_v29  ;;  %v601_v3 = vmul.f32 0.01, %v473_v20  ;;  %vm538_vm5 = vcmp.gt.f32.partialorder %v474_v21, 0.0  ;;  %v602_v34 = vmul.f32 0.01, %v474_v21 }
  0x75   : > { %854 = vst [vmem:[%s1369_s22 + $0x188] sm:$0xff] %v790_v27  ;;  %v475_v35 = vadd.f32 %v1609_v0, %v407_v25  ;;  %v1085_v36 = vunpack.c.h.bf16 %v1578_v59  ;;  %v1088_v37 = vunpack.c.l.bf16 %v1129_v26  ;;  %v1089_v38 = vunpack.c.h.bf16 %v1129_v26  ;;  %v1132_v19 = vld [vmem:[%s1321_s5 + $0xf8] sm:$0xff]   ;;  %v737_v27 = vld [vmem:[%s1338_s13 + $0x1e0] sm:$0xff]  ;;  %v738_v29 = vld [vmem:[%s1338_s13 + $0x1e8] sm:$0xff] }
  0x76   : > { %855 = vst [vmem:[%s1369_s22 + $0x190] sm:$0xff] %v791_v28  ;;  %v665_v39 = vsel %vm537_vm4, %v473_v20, %v601_v3  ;;  %v666_v40 = vsel %vm538_vm5, %v474_v21, %v602_v34  ;;  %v1092_v41 = vunpack.c.l.bf16 %v1130_v32  ;;  %v1093_v42 = vunpack.c.h.bf16 %v1130_v32 }
  0x77   : > { %856 = vst [vmem:[%s1369_s22 + $0x198] sm:$0xff] %v792_v33  ;;  %v793_v44 = vadd.f32 %v729_v30, %v665_v39  ;;  %v794_v45 = vadd.f32 %v730_v31, %v666_v40  ;;  %vm539_vm6 = vcmp.gt.f32.partialorder %v475_v35, 0.0  ;;  %v603_v46 = vmul.f32 0.01, %v475_v35  ;;  %v739_v39 = vld [vmem:[%s1338_s13 + $0x1f0] sm:$0xff]  ;;  %v740_v40 = vld [vmem:[%s1338_s13 + $0x1f8] sm:$0xff] }
  0x78   : > { %v408_v49 = vmul.f32 %v1621_v48, %v1085_v36  ;;  %v409_v50 = vmul.f32 %v1621_v48, %v1088_v37  ;;  %v410_v51 = vmul.f32 %v1621_v48, %v1089_v38  ;;  %v411_v52 = vmul.f32 %v1621_v48, %v1092_v41 }
  0x79   : > { %857 = vst [vmem:[%s1369_s22 + $0x1a0] sm:$0xff] %v793_v44  ;;  %v667_v53 = vsel %vm539_vm6, %v475_v35, %v603_v46  ;;  %v412_v54 = vmul.f32 %v1621_v48, %v1093_v42  ;;  %v1096_v55 = vunpack.c.l.bf16 %v1131_v43  ;;  %v1097_v56 = vunpack.c.h.bf16 %v1131_v43 }
  0x7a   : > { %858 = vst [vmem:[%s1369_s22 + $0x1a8] sm:$0xff] %v794_v45  ;;  %v795_v57 = vadd.f32 %v731_v47, %v667_v53  ;;  %v476_v58 = vadd.f32 %v1609_v0, %v408_v49  ;;  %v477_v59 = vadd.f32 %v1609_v0, %v409_v50  ;;  %v478_v60 = vadd.f32 %v1609_v0, %v410_v51 }
  0x7b   : > { %v479_v1 = vadd.f32 %v1609_v0, %v411_v52  ;;  %v480_v2 = vadd.f32 %v1609_v0, %v412_v54  ;;  %v413_v4 = vmul.f32 %v1621_v48, %v1096_v55  ;;  %v414_v5 = vmul.f32 %v1621_v48, %v1097_v56 }
  0x7c   : > { %859 = vst [vmem:[%s1369_s22 + $0x1b0] sm:$0xff] %v795_v57  ;;  %vm540_vm7 = vcmp.gt.f32.partialorder %v476_v58, 0.0  ;;  %v604_v6 = vmul.f32 0.01, %v476_v58  ;;  %vm541_vm8 = vcmp.gt.f32.partialorder %v477_v59, 0.0  ;;  %vm542_vm9 = vcmp.gt.f32.partialorder %v478_v60, 0.0 }
  0x7d   : > { %v605_v7 = vmul.f32 0.01, %v477_v59  ;;  %v606_v8 = vmul.f32 0.01, %v478_v60  ;;  %vm543_vm10 = vcmp.gt.f32.partialorder %v479_v1, 0.0  ;;  %vm544_vm11 = vcmp.gt.f32.partialorder %v480_v2, 0.0 }
  0x7e   : > { %v668_v9 = vsel %vm540_vm7, %v476_v58, %v604_v6  ;;  %v607_v10 = vmul.f32 0.01, %v479_v1  ;;  %v608_v12 = vmul.f32 0.01, %v480_v2  ;;  %v481_v14 = vadd.f32 %v1609_v0, %v413_v4 }
  0x7f   : > { %v796_v15 = vadd.f32 %v732_v61, %v668_v9  ;;  %v669_v16 = vsel %vm541_vm8, %v477_v59, %v605_v7  ;;  %v670_v17 = vsel %vm542_vm9, %v478_v60, %v606_v8  ;;  %v482_v18 = vadd.f32 %v1609_v0, %v414_v5 }
  0x80   : > { %v797_v20 = vadd.f32 %v733_v62, %v669_v16  ;;  %v798_v21 = vadd.f32 %v734_v63, %v670_v17  ;;  %v671_v22 = vsel %vm543_vm10, %v479_v1, %v607_v10  ;;  %v672_v23 = vsel %vm544_vm11, %v480_v2, %v608_v12 }
  0x81   : > { %860 = vst [vmem:[%s1369_s22 + $0x1b8] sm:$0xff] %v796_v15  ;;  %v799_v24 = vadd.f32 %v735_v11, %v671_v22  ;;  %v800_v25 = vadd.f32 %v736_v13, %v672_v23  ;;  %vm545_vm12 = vcmp.gt.f32.partialorder %v481_v14, 0.0  ;;  %v609_v26 = vmul.f32 0.01, %v481_v14 }
  0x82   : > { %861 = vst [vmem:[%s1369_s22 + $0x1c0] sm:$0xff] %v797_v20  ;;  %vm546_vm13 = vcmp.gt.f32.partialorder %v482_v18, 0.0  ;;  %v610_v28 = vmul.f32 0.01, %v482_v18  ;;  %v1100_v30 = vunpack.c.l.bf16 %v1132_v19  ;;  %v1101_v31 = vunpack.c.h.bf16 %v1132_v19 }
  0x83   : > { %862 = vst [vmem:[%s1369_s22 + $0x1c8] sm:$0xff] %v798_v21  ;;  %v673_v32 = vsel %vm545_vm12, %v481_v14, %v609_v26 }
  0x84   : > { %863 = vst [vmem:[%s1369_s22 + $0x1d0] sm:$0xff] %v799_v24  ;;  %v801_v33 = vadd.f32 %v737_v27, %v673_v32  ;;  %v674_v3 = vsel %vm546_vm13, %v482_v18, %v610_v28  ;;  %v415_v34 = vmul.f32 %v1621_v48, %v1100_v30  ;;  %v416_v35 = vmul.f32 %v1621_v48, %v1101_v31 }
  0x85   : > { %864 = vst [vmem:[%s1369_s22 + $0x1d8] sm:$0xff] %v800_v25  ;;  %v802_v36 = vadd.f32 %v738_v29, %v674_v3 }
  0x86   : > { %865 = vst [vmem:[%s1369_s22 + $0x1e0] sm:$0xff] %v801_v33  ;;  %v483_v37 = vadd.f32 %v1609_v0, %v415_v34  ;;  %v484_v38 = vadd.f32 %v1609_v0, %v416_v35 }
  0x87   : > { %866 = vst [vmem:[%s1369_s22 + $0x1e8] sm:$0xff] %v802_v36 }
  0x88   : > { %vm547_vm14 = vcmp.gt.f32.partialorder %v483_v37, 0.0  ;;  %v611_v41 = vmul.f32 0.01, %v483_v37  ;;  %vm548_vm15 = vcmp.gt.f32.partialorder %v484_v38, 0.0  ;;  %v612_v42 = vmul.f32 0.01, %v484_v38 }
  0x8a   : > { %v675_v43 = vsel %vm547_vm14, %v483_v37, %v611_v41  ;;  %v676_v44 = vsel %vm548_vm15, %v484_v38, %v612_v42 }
  0x8b   : > { %v803_v0 = vadd.f32 %v739_v39, %v675_v43  ;;  %v804_v45 = vadd.f32 %v740_v40, %v676_v44 }
  0x8d   : > { %867 = vst [vmem:[%s1369_s22 + $0x1f0] sm:$0xff] %v803_v0 }
  0x8e   : > { %868 = vst [vmem:[%s1369_s22 + $0x1f8] sm:$0xff] %v804_v45 }
  0x8f   : > { %1205 = shalt.err (!%p1202_p3)
}
  0x90   : > { %s1242_s14 = smov 128   ;;  %s1243_s22 = smov 8  }
  0x91   : > { %1133 = dma.vmem_to_hbm [thread:$0]  (%p1307_p5), %s883_s19, 8192, %s885_s8, %s870_s9, %s1242_s14, %s1242_s14, %s1243_s22  }
  0x92 PF: > { %p1139_p4 = scmp.ge.s32.totalorder %s1240_s18, 2  ;;  %s899_s28 = sand.u32 1, %s1228_s15  }
  0x93   : > { %s900_s29 = scalar_lea.sflag [#allocation3], %s899_s28 }
  0x94   : > { %p1136_p7 = pnand %p1139_p4, %p1311_p6 }
  0x96   : > { %p1137_p8 = pneg %p1136_p7 }
  0x98   : > { %1223 = dma.done.wait (%p1137_p8), %s900_s29, 8192  }
  0x99   : > { %1225 = vsyncadd (%p1137_p8), %s900_s29, 4294959104  ;;  %p14_p9 = scmp.ge.s32.totalorder %s1294_s21, 4   ;;  %s1704_s15 = smov %s1232_s16 }
  0x9a   : > { %s1705_s16 = smov %s1236_s17  ;;  %s1706_s17 = smov %s1305_s24 }
  0x9b   : > { %s1707_s18 = smov %s1294_s21  ;;  %16 = sbr.rel (!%p14_p9) target bundleno = 3 (0x3), region = 74 }
  0xa0   :  { %906 = vsyncpa [#allocation3], 1 }
  0xa1   :  { %908 = vsyncpa [#allocation3 + $0x1], 1 }

// kernel: bottleneck_block.5
= control target key start
LH: loop header
LB: loop body
LE: loop exit
PB: predicated region body
PF: predicated region fallthrough
CT: control target
= control target key end

     0   :  { %s6877_s27 = smov 0   ;;  %s6879_s28 = smov 0   ;;  %s9868_s0 = inlined_call_operand.vmem [shape: bf16[16,64,128], index: 0, kind: input, shape index: {}, may-alias: {0,1,2}]   ;;  %s9869_s1 = inlined_call_operand.vmem [shape: bf16[16,64,128], index: 1, kind: input, shape index: {}, may-alias: {0,1,2}]   ;;  %s9870_s2 = inlined_call_operand.vmem [shape: bf16[16,64,128], index: 2, kind: input, shape index: {}, may-alias: {0,1,2}]   ;;  %s9871_s3 = inlined_call_operand.vmem [shape: f32[1,128], index: 3, kind: input, shape index: {}]   ;;  %s9872_s4 = inlined_call_operand.vmem [shape: f32[1,128], index: 4, kind: input, shape index: {}]   ;;  %s9873_s5 = inlined_call_operand.vmem [shape: bf16[9,384,128], index: 5, kind: input, shape index: {}]   ;;  %s9874_s6 = inlined_call_operand.vmem [shape: f32[9,64,1], index: 6, kind: input, shape index: {}]   ;;  %s9875_s7 = inlined_call_operand.vmem [shape: bf16[16,64,128], index: 7, kind: output, shape index: {0}]   ;;  %s9876_s8 = inlined_call_operand.vmem [shape: f32[16,2,128], index: 8, kind: output, shape index: {1}]  }
   0x1   :  { %s6881_s29 = smov 0   ;;  %s6883_s30 = smov 0  }
   0x2   :  { %s6885_s9 = smov 0  }
   0x3 LB: > { %s28_s10 = sadd.s32 1, %s6821_s29  ;;  %s31_s11 = sadd.s32 1, %s6825_s30  ;;  %s6829_s9 = sphi %s6885_s9, %s19_s9   ;;  %s6825_s30 = sphi %s6883_s30, %s10174_s30   ;;  %s6821_s29 = sphi %s6881_s29, %s10173_s29   ;;  %s6817_s28 = sphi %s6879_s28, %s10172_s28   ;;  %s6813_s27 = sphi %s6877_s27, %s10171_s27  }
   0x4   : > { %p29_p0 = scmp.ge.s32.totalorder %s28_s10, 8  ;;  %p5017_p1 = scmp.ge.s32.totalorder %s6829_s9, 1 }
   0x5   : > { %p353_p2 = scmp.lt.s32.totalorder %s6829_s9, 17 }
   0x6   : > { %s10176_s10 = smov (%p29_p0, %s28_s10), 0  ;;  %s10178_s11 = smov (!%p29_p0, %s31_s11), %s6825_s30 }
   0x7   : > { %p354_p3 = pnand %p5017_p1, %p353_p2  ;;  %p33_p4 = scmp.ge.s32.totalorder %s10178_s11, 2 }
   0x9   : > { %s10180_s11 = smov (%p33_p4, %s10178_s11), 0  ;;  %357 = sbr.rel (%p354_p3) target bundleno = 751 (0x2ef), region = 48 }
   0xe   : > { %v5045_v0 = vld [vmem:[%s9874_s6 + $0x60] sm:$0xff]  ;;  %v5043_v1 = vld [vmem:[%s9874_s6 + $0x50] sm:$0xff]  ;;  %v9879_v3 = vmov 0   ;;  %v5046_v7 = vld [vmem:[%s9874_s6 + $0x68] sm:$0xff]  ;;  %s5019_s15 = sadd.s32 4294967295, %s6813_s27  ;;  %s7024_s22 = sshll.u32 %s6817_s28, 3 }
   0xf   : > { %v5041_v2 = vld [vmem:[%s9874_s6 + $0x40] sm:$0xff]  ;;  %6786 = vset.pattern.permute.xlu2 %v9879_v3  ;;  %6785 = vset.pattern.permute.xlu1 %v9879_v3  ;;  %vm1127_vm0 = vcmp.gt.f32.partialorder %v5045_v0, 0.5  ;;  %vm1125_vm1 = vcmp.gt.f32.partialorder %v5043_v1, 0.5  ;;  %v5044_v8 = vld [vmem:[%s9874_s6 + $0x58] sm:$0xff]  ;;  %v5042_v9 = vld [vmem:[%s9874_s6 + $0x48] sm:$0xff]  ;;  %vm1128_vm3 = vcmp.gt.f32.partialorder %v5046_v7, 0.5  ;;  %s7117_s17 = sadd.s32 %s6813_s27, %s7024_s22 }
  0x10   : > { %vm1123_vm2 = vcmp.gt.f32.partialorder %v5041_v2, 0.5  ;;  %6784 = vset.pattern.permute.xlu0 %v9879_v3  ;;  %v1135_v4 = vsel %vm1127_vm0, 1, %v9879_v3  ;;  %v1133_v5 = vsel %vm1125_vm1, 1, %v9879_v3  ;;  %vm1126_vm4 = vcmp.gt.f32.partialorder %v5044_v8, 0.5  ;;  %v5048_v13 = vld [vmem:[%s9874_s6 + $0x78] sm:$0xff]  ;;  %v898_v14 = vld [vmem:[%s9874_s6] sm:$0xff] }
  0x11   : > { %v1131_v6 = vsel %vm1123_vm2, 1, %v9879_v3  ;;  %1152 = vperm.xlu1 %6785, %v1135_v4   ;;  %1146 = vperm.xlu2 %6786, %v1133_v5   ;;  %vm1124_vm5 = vcmp.gt.f32.partialorder %v5042_v9, 0.5  ;;  %v1136_v10 = vsel %vm1128_vm3, 1, %v9879_v3  ;;  %v1134_v11 = vsel %vm1126_vm4, 1, %v9879_v3  ;;  %v5047_v15 = vld [vmem:[%s9874_s6 + $0x70] sm:$0xff]  ;;  %v901_v20 = vld [vmem:[%s9874_s6 + $0x18] sm:$0xff] }
  0x12   : > { %1140 = vperm.xlu0 %6784, %v1131_v6   ;;  %v1132_v12 = vsel %vm1124_vm5, 1, %v9879_v3  ;;  %vm1130_vm6 = vcmp.gt.f32.partialorder %v5048_v13, 0.5  ;;  %vm906_vm7 = vcmp.gt.f32.partialorder %v898_v14, 0.5  ;;  %vm1129_vm8 = vcmp.gt.f32.partialorder %v5047_v15, 0.5  ;;  %v900_v19 = vld [vmem:[%s9874_s6 + $0x10] sm:$0xff]  ;;  %v899_v21 = vld [vmem:[%s9874_s6 + $0x8] sm:$0xff] }
  0x13   : > { %v1138_v16 = vsel %vm1130_vm6, 1, %v9879_v3  ;;  %v914_v17 = vsel %vm906_vm7, 1, %v9879_v3  ;;  %v1137_v18 = vsel %vm1129_vm8, 1, %v9879_v3  ;;  %vm908_vm9 = vcmp.gt.f32.partialorder %v900_v19, 0.5  ;;  %v903_v25 = vld [vmem:[%s9874_s6 + $0x28] sm:$0xff]  ;;  %v5297_v26 = vld [vmem:[%s9874_s6 + $0x80] sm:$0xff] }
  0x14   : > { %vm909_vm10 = vcmp.gt.f32.partialorder %v901_v20, 0.5  ;;  %vm907_vm11 = vcmp.gt.f32.partialorder %v899_v21, 0.5  ;;  %v916_v22 = vsel %vm908_vm9, 1, %v9879_v3  ;;  %v902_v27 = vld [vmem:[%s9874_s6 + $0x20] sm:$0xff]  ;;  %vm911_vm12 = vcmp.gt.f32.partialorder %v903_v25, 0.5  ;;  %v904_v31 = vld [vmem:[%s9874_s6 + $0x30] sm:$0xff] }
  0x15   : > { %v917_v23 = vsel %vm909_vm10, 1, %v9879_v3  ;;  %v915_v24 = vsel %vm907_vm11, 1, %v9879_v3  ;;  %vm1824_vm13 = vcmp.gt.f32.partialorder %v5297_v26, 0.5  ;;  %vm910_vm14 = vcmp.gt.f32.partialorder %v902_v27, 0.5  ;;  %v905_v32 = vld [vmem:[%s9874_s6 + $0x38] sm:$0xff]  ;;  %v5298_v33 = vld [vmem:[%s9874_s6 + $0x88] sm:$0xff] }
  0x16   : > { %v919_v28 = vsel %vm911_vm12, 1, %v9879_v3  ;;  %v1832_v29 = vsel %vm1824_vm13, 1, %v9879_v3  ;;  %v918_v30 = vsel %vm910_vm14, 1, %v9879_v3  ;;  %vm912_vm15 = vcmp.gt.f32.partialorder %v904_v31, 0.5  ;;  %v5300_v37 = vld [vmem:[%s9874_s6 + $0x98] sm:$0xff]  ;;  %v5301_v38 = vld [vmem:[%s9874_s6 + $0xa0] sm:$0xff] }
  0x17   : > { %vm913_vm0 = vcmp.gt.f32.partialorder %v905_v32, 0.5  ;;  %vm1825_vm1 = vcmp.gt.f32.partialorder %v5298_v33, 0.5  ;;  %v920_v34 = vsel %vm912_vm15, 1, %v9879_v3  ;;  %v5299_v39 = vld [vmem:[%s9874_s6 + $0x90] sm:$0xff]  ;;  %vm1827_vm2 = vcmp.gt.f32.partialorder %v5300_v37, 0.5  ;;  %v5304_v44 = vld [vmem:[%s9874_s6 + $0xb8] sm:$0xff] }
  0x18   : > { %v921_v35 = vsel %vm913_vm0, 1, %v9879_v3  ;;  %v1833_v36 = vsel %vm1825_vm1, 1, %v9879_v3  ;;  %vm1828_vm3 = vcmp.gt.f32.partialorder %v5301_v38, 0.5  ;;  %vm1826_vm4 = vcmp.gt.f32.partialorder %v5299_v39, 0.5  ;;  %v5303_v43 = vld [vmem:[%s9874_s6 + $0xb0] sm:$0xff]  ;;  %v5302_v45 = vld [vmem:[%s9874_s6 + $0xa8] sm:$0xff] }
  0x19   : > { %1155 = vperm.xlu1 %6785, %v1136_v10   ;;  %1149 = vperm.xlu2 %6786, %v1134_v11   ;;  %v1835_v40 = vsel %vm1827_vm2, 1, %v9879_v3  ;;  %v1836_v41 = vsel %vm1828_vm3, 1, %v9879_v3  ;;  %v1834_v42 = vsel %vm1826_vm4, 1, %v9879_v3  ;;  %vm1830_vm5 = vcmp.gt.f32.partialorder %v5303_v43, 0.5  ;;  %v5458_v49 = vld [vmem:[%s9874_s6 + $0xc8] sm:$0xff]  ;;  %v5459_v50 = vld [vmem:[%s9874_s6 + $0xd0] sm:$0xff] }
  0x1a   : > { %1143 = vperm.xlu0 %6784, %v1132_v12   ;;  %vm1831_vm6 = vcmp.gt.f32.partialorder %v5304_v44, 0.5  ;;  %vm1829_vm7 = vcmp.gt.f32.partialorder %v5302_v45, 0.5  ;;  %v1838_v46 = vsel %vm1830_vm5, 1, %v9879_v3  ;;  %v5457_v51 = vld [vmem:[%s9874_s6 + $0xc0] sm:$0xff]  ;;  %p419_p5 = scmp.gt.s32.totalorder %s5019_s15, 0  ;;  %vm2292_vm8 = vcmp.gt.f32.partialorder %v5458_v49, 0.5 }
  0x1b   : > { %v1839_v47 = vsel %vm1831_vm6, 1, %v9879_v3  ;;  %v1837_v48 = vsel %vm1829_vm7, 1, %v9879_v3  ;;  %vm2293_vm9 = vcmp.gt.f32.partialorder %v5459_v50, 0.5  ;;  %vm2291_vm10 = vcmp.gt.f32.partialorder %v5457_v51, 0.5  ;;  %v5617_v55 = vld [vmem:[%s9874_s6 + $0x100] sm:$0xff]  ;;  %v5618_v56 = vld [vmem:[%s9874_s6 + $0x108] sm:$0xff] }
  0x1c   : > { %v2300_v52 = vsel %vm2292_vm8, 1, %v9879_v3  ;;  %v2301_v53 = vsel %vm2293_vm9, 1, %v9879_v3  ;;  %s10182_s15 = smov (!%p419_p5, %s5019_s15), 0  ;;  %v2299_v54 = vsel %vm2291_vm10, 1, %v9879_v3  ;;  %v5460_v57 = vld [vmem:[%s9874_s6 + $0xd8] sm:$0xff]  ;;  %vm2704_vm11 = vcmp.gt.f32.partialorder %v5617_v55, 0.5 }
  0x1d   : > { %s421_s14 = sadd.s32 %s7024_s22, %s10182_s15  ;;  %vm2705_vm12 = vcmp.gt.f32.partialorder %v5618_v56, 0.5  ;;  %vm2294_vm13 = vcmp.gt.f32.partialorder %v5460_v57, 0.5  ;;  %v2712_v58 = vsel %vm2704_vm11, 1, %v9879_v3  ;;  %v6454_v60 = vld [vmem:[%s9873_s5 + $0xf8] sm:$0xff]  ;;  %v5462_v0 = vld [vmem:[%s9874_s6 + $0xe8] sm:$0xff]  ;;  %v5619_v1 = vld [vmem:[%s9874_s6 + $0x110] sm:$0xff] }
  0x1e   : > { %p422_p6 = scmp.lt.s32.totalorder %s421_s14, 15  ;;  %v2713_v59 = vsel %vm2705_vm12, 1, %v9879_v3  ;;  %v6462_v61 = vld [vmem:[%s9873_s5 + $0x138] sm:$0xff]  ;;  %v2302_v62 = vsel %vm2294_vm13, 1, %v9879_v3  ;;  %1432 = vmatpush.bf16.msra.mxu0 %v6454_v60  ;;  %6719 = vmatpush.bf16.msra.mxu3 %v6454_v60  ;;  %v5461_v2 = vld [vmem:[%s9874_s6 + $0xe0] sm:$0xff]  ;;  %v6453_v4 = vld [vmem:[%s9873_s5 + $0xf0] sm:$0xff] }
  0x1f   : > { %v6470_v63 = vld [vmem:[%s9873_s5 + $0x178] sm:$0xff]  ;;  %1461 = vmatpush.bf16.msra.mxu1 %v6462_v61  ;;  %v6461_v5 = vld [vmem:[%s9873_s5 + $0x130] sm:$0xff]  ;;  %vm2296_vm14 = vcmp.gt.f32.partialorder %v5462_v0, 0.5  ;;  %vm2706_vm15 = vcmp.gt.f32.partialorder %v5619_v1, 0.5  ;;  %vm2295_vm0 = vcmp.gt.f32.partialorder %v5461_v2, 0.5  ;;  %v6452_v9 = vld [vmem:[%s9873_s5 + $0xe8] sm:$0xff] }
  0x20   : > { %s10184_s14 = smov (!%p422_p6, %s421_s14), 15  ;;  %1490 = vmatpush.bf16.msra.mxu2 %v6470_v63  ;;  %v6469_v6 = vld [vmem:[%s9873_s5 + $0x170] sm:$0xff]  ;;  %v2304_v7 = vsel %vm2296_vm14, 1, %v9879_v3  ;;  %v2714_v8 = vsel %vm2706_vm15, 1, %v9879_v3  ;;  %v6460_v10 = vld [vmem:[%s9873_s5 + $0x128] sm:$0xff]  ;;  %v2303_v11 = vsel %vm2295_vm0, 1, %v9879_v3 }
  0x21   : > { %1161 = vperm.xlu1 %6785, %v1138_v16   ;;  %923 = vperm.xlu2 %6786, %v914_v17   ;;  %s6419_s19 = sshll.u32 %s10184_s14, 5  ;;  %v5463_v12 = vld [vmem:[%s9874_s6 + $0xf0] sm:$0xff]  ;;  %v5620_v13 = vld [vmem:[%s9874_s6 + $0x118] sm:$0xff]  ;;  %v6468_v14 = vld [vmem:[%s9873_s5 + $0x168] sm:$0xff]  ;;  %p478_p7 = scmp.gt.s32.totalorder %s6813_s27, 0 }
  0x22   : > { %1158 = vperm.xlu0 %6784, %v1137_v18   ;;  %1433 = vmatpush.bf16.msra.mxu0 %v6453_v4  ;;  %v5464_v15 = vld [vmem:[%s9874_s6 + $0xf8] sm:$0xff]  ;;  %v5622_v16 = vld [vmem:[%s9874_s6 + $0x128] sm:$0xff]  ;;  %s7094_s21 = scalar_lea.vmem %s9868_s0, %s6419_s19  ;;  %v5621_v17 = vld [vmem:[%s9874_s6 + $0x120] sm:$0xff]  ;;  %vm2297_vm1 = vcmp.gt.f32.partialorder %v5463_v12, 0.5  ;;  %vm2707_vm2 = vcmp.gt.f32.partialorder %v5620_v13, 0.5  ;;  %p434_p8 = scmp.lt.s32.totalorder %s7117_s17, 15 }
  0x23   : > { %6720 = vmatpush.bf16.msra.mxu3 %v6453_v4  ;;  %1462 = vmatpush.bf16.msra.mxu1 %v6461_v5  ;;  %v6451_v18 = vld [vmem:[%s9873_s5 + $0xe0] sm:$0xff]  ;;  %vm2298_vm3 = vcmp.gt.f32.partialorder %v5464_v15, 0.5  ;;  %vm2709_vm4 = vcmp.gt.f32.partialorder %v5622_v16, 0.5  ;;  %vm2708_vm5 = vcmp.gt.f32.partialorder %v5621_v17, 0.5  ;;  %v5624_v26 = vld [vmem:[%s9874_s6 + $0x138] sm:$0xff]  ;;  %v5778_v31 = vld [vmem:[%s9874_s6 + $0x148] sm:$0xff] }
  0x24   : > { %1491 = vmatpush.bf16.msra.mxu2 %v6469_v6  ;;  %v6459_v19 = vld [vmem:[%s9873_s5 + $0x120] sm:$0xff]  ;;  %v5780_v32 = vld [vmem:[%s9874_s6 + $0x158] sm:$0xff]  ;;  %v5779_v43 = vld [vmem:[%s9874_s6 + $0x150] sm:$0xff]  ;;  %vm2711_vm8 = vcmp.gt.f32.partialorder %v5624_v26, 0.5  ;;  %vm3172_vm9 = vcmp.gt.f32.partialorder %v5778_v31, 0.5  ;;  %s442_s18 = sadd.s32 1, %s6813_s27 }
  0x25   : > { %v6467_v20 = vld [vmem:[%s9873_s5 + $0x160] sm:$0xff]  ;;  %v6458_v37 = vld [vmem:[%s9873_s5 + $0x118] sm:$0xff]  ;;  %vm3174_vm10 = vcmp.gt.f32.partialorder %v5780_v32, 0.5  ;;  %s7177_s12 = scalar_select %p478_p7, 1, 0  ;;  %vm3173_vm11 = vcmp.gt.f32.partialorder %v5779_v43, 0.5 }
  0x26   : > { %1434 = vmatpush.bf16.msra.mxu0 %v6452_v9  ;;  %v6640_v21 = vld [vmem:[%s7094_s21] sm:$0xff]   ;;  %v6466_v44 = vld [vmem:[%s9873_s5 + $0x158] sm:$0xff]  ;;  %s10186_s17 = smov (!%p434_p8, %s7117_s17), 15  ;;  %v7215_v63 = vsel %vm3174_vm10, 1, %v9879_v3  ;;  %v7220_v2 = vsel %vm3173_vm11, 1, %v9879_v3  ;;  %v5782_v5 = vld [vmem:[%s9874_s6 + $0x168] sm:$0xff] }
  0x27   : > { %6721 = vmatpush.bf16.msra.mxu3 %v6452_v9  ;;  %1463 = vmatpush.bf16.msra.mxu1 %v6460_v10  ;;  %v5777_v25 = vld [vmem:[%s9874_s6 + $0x140] sm:$0xff]  ;;  %v6641_v27 = vunpack.c.l.bf16 %v6640_v21  ;;  %p7233_p9 = scmp.lt.s32.totalorder %s442_s18, 7  ;;  %v7238_v9 = vunpack.c.l.b16 %v9879_v3  ;;  %v5938_v10 = vld [vmem:[%s9874_s6 + $0x188] sm:$0xff]  ;;  %s480_s20 = scvt.s32.f32 %s7177_s12 }
  0x28   : > { %1492 = vmatpush.bf16.msra.mxu2 %v6468_v14  ;;  %v7140_v33 = vld [vmem:[%s9872_s4] ss:$0 sm:$0xff]  ;;  %vm3171_vm7 = vcmp.gt.f32.partialorder %v5777_v25, 0.5  ;;  %v6456_v12 = vld [vmem:[%s9873_s5 + $0x108] sm:$0xff]  ;;  %s6420_s25 = sshll.u32 %s10186_s17, 5  ;;  %p624_p11 = scmp.lt.s32.totalorder %s6813_s27, 7 }
  0x29   : > { %929 = vperm.xlu1 %6785, %v916_v22   ;;  %932 = vperm.xlu2 %6786, %v917_v23   ;;  %v6709_v22 = vld [vmem:[%s7094_s21 + $0x18] sm:$0xff]   ;;  %v7113_v23 = vld [vmem:[%s9871_s3] ss:$0 sm:$0xff]  ;;  %v7194_v57 = vsel %vm3171_vm7, 1, %v9879_v3  ;;  %v6464_v15 = vld [vmem:[%s9873_s5 + $0x148] sm:$0xff]  ;;  %s10188_s18 = smov (!%p7233_p9, %s442_s18), 7  ;;  %s7294_s28 = scalar_lea.vmem %s9869_s1, %s6420_s25 }
  0x2a   : > { %926 = vperm.xlu0 %6784, %v915_v24   ;;  %v5623_v24 = vld [vmem:[%s9874_s6 + $0x130] sm:$0xff]  ;;  %1435 = vmatpush.bf16.msra.mxu0 %v6451_v18  ;;  %v500_v38 = vmul.f32 %v7113_v23, %v6641_v27  ;;  %v6654_v45 = vunpack.c.h.bf16 %v6709_v22  ;;  %v5937_v4 = vld [vmem:[%s9874_s6 + $0x180] sm:$0xff]  ;;  %s7454_s14 = scalar_select %p624_p11, 1, 0 }
  0x2b   : > { %6722 = vmatpush.bf16.msra.mxu3 %v6451_v18  ;;  %1464 = vmatpush.bf16.msra.mxu1 %v6459_v19  ;;  %vm2710_vm6 = vcmp.gt.f32.partialorder %v5623_v24, 0.5  ;;  %vm3584_vm0 = vcmp.gt.f32.partialorder %v5937_v4, 0.5  ;;  %v6447_v24 = vld [vmem:[%s9873_s5 + $0xc0] sm:$0xff] }
  0x2c   : > { %1493 = vmatpush.bf16.msra.mxu2 %v6467_v20  ;;  %v7180_v49 = vadd.f32 %v7140_v33, %v500_v38  ;;  %v507_v60 = vmul.f32 %v7113_v23, %v6654_v45  ;;  %v6455_v25 = vld [vmem:[%s9873_s5 + $0x100] sm:$0xff]  ;;  %v5784_v38 = vld [vmem:[%s9874_s6 + $0x178] sm:$0xff]  ;;  %s626_s27 = scvt.s32.f32 %s7454_s14 }
  0x2d   : > { %v6463_v32 = vld [vmem:[%s9873_s5 + $0x140] sm:$0xff]  ;;  %vm3178_vm10 = vcmp.gt.f32.partialorder %v5784_v38, 0.5 }
  0x2e   : > { %v527_v6 = vmul.f32 0.01, %v7180_v49  ;;  %v518_v16 = vadd.f32 %v7140_v33, %v507_v60  ;;  %vm519_vm14 = vcmp.gt.f32.partialorder %v7180_v49, 0.0 }
  0x2f   : > { %1465 = vmatpush.bf16.msra.mxu1 %v6458_v37 }
  0x30   : > { %1494 = vmatpush.bf16.msra.mxu2 %v6466_v44  ;;  %v535_v26 = vsel %vm519_vm14, %v7180_v49, %v527_v6  ;;  %v6656_v44 = vld [vmem:[%s7294_s28] sm:$0xff]  }
  0x31   : > { %938 = vperm.xlu1 %6785, %v919_v28   ;;  %1841 = vperm.xlu2 %6786, %v1832_v29   ;;  %v6642_v28 = vunpack.c.h.bf16 %v6640_v21  ;;  %v6653_v29 = vunpack.c.l.bf16 %v6709_v22 }
  0x32   : > { %935 = vperm.xlu0 %6784, %v918_v30   ;;  %v2305_v30 = vsel %vm2297_vm1, 1, %v9879_v3  ;;  %vm3176_vm1 = vcmp.gt.f32.partialorder %v5782_v5, 0.5 }
  0x33   : > { %v501_v39 = vmul.f32 %v7113_v23, %v6642_v28  ;;  %v543_v28 = vstv %s480_s20  ;;  %v7302_v31 = vsel %vm3176_vm1, 1, %v9879_v3 }
  0x35   : > { %v512_v55 = vadd.f32 %v7140_v33, %v501_v39 }
  0x37   : > { %v528_v13 = vmul.f32 0.01, %v512_v55  ;;  %vm520_vm15 = vcmp.gt.f32.partialorder %v512_v55, 0.0 }
  0x39   : > { %941 = vperm.xlu1 %6785, %v920_v34   ;;  %944 = vperm.xlu2 %6786, %v921_v35   ;;  %v2715_v34 = vsel %vm2707_vm2, 1, %v9879_v3  ;;  %v2306_v35 = vsel %vm2298_vm3, 1, %v9879_v3  ;;  %vm3585_vm3 = vcmp.gt.f32.partialorder %v5938_v10, 0.5  ;;  %v536_v27 = vsel %vm520_vm15, %v512_v55, %v528_v13 }
  0x3a   : > { %1844 = vperm.xlu0 %6784, %v1833_v36   ;;  %v6450_v36 = vld [vmem:[%s9873_s5 + $0xd8] sm:$0xff]  ;;  %v7315_v37 = vsel %vm3585_vm3, 1, %v9879_v3  ;;  %v545_v43 = vmul.f32 %v543_v28, %v536_v27 }
  0x3b   : > { %1436 = vmatpush.bf16.msra.mxu0 %v6450_v36  ;;  %6723 = vmatpush.bf16.msra.mxu3 %v6450_v36 }
  0x3c   : > { %v553_v6 = vpack.c.bf16 %v545_v43, %v545_v43 }
  0x3e   : > { %v709_v27 = vunpack.c.l.b16 %v553_v6 }
  0x41   : > { %1850 = vperm.xlu1 %6785, %v1835_v40   ;;  %1853 = vperm.xlu2 %6786, %v1836_v41   ;;  %v6707_v40 = vld [vmem:[%s7094_s21 + $0x8] sm:$0xff]   ;;  %v7158_v41 = vsel %vm2709_vm4, 1, %v9879_v3 }
  0x42   : > { %1847 = vperm.xlu0 %6784, %v1834_v42   ;;  %v7162_v42 = vsel %vm2708_vm5, 1, %v9879_v3  ;;  %v6645_v50 = vunpack.c.l.bf16 %v6707_v40  ;;  %v6646_v51 = vunpack.c.h.bf16 %v6707_v40  ;;  %vm526_vm5 = vcmp.gt.f32.partialorder %v518_v16, 0.0  ;;  %v5783_v40 = vld [vmem:[%s9874_s6 + $0x170] sm:$0xff] }
  0x43   : > { %vm3177_vm11 = vcmp.gt.f32.partialorder %v5783_v40, 0.5 }
  0x44   : > { %v7358_v13 = vsel %vm3177_vm11, 1, %v9879_v3 }
  0x49   : > { %1859 = vperm.xlu1 %6785, %v1838_v46   ;;  %1862 = vperm.xlu2 %6786, %v1839_v47   ;;  %v6708_v46 = vld [vmem:[%s7094_s21 + $0x10] sm:$0xff]   ;;  %v506_v47 = vmul.f32 %v7113_v23, %v6653_v29  ;;  %s7330_s21 = sadd.s32 %s7024_s22, %s10188_s18  ;;  %s9839_s18 = scalar_lea.vmem %s9875_s7, %s6420_s25 }
  0x4a   : > { %1856 = vperm.xlu0 %6784, %v1837_v48   ;;  %v5781_v48 = vld [vmem:[%s9874_s6 + $0x160] sm:$0xff]  ;;  %v6649_v56 = vunpack.c.l.bf16 %v6708_v46  ;;  %v6650_v61 = vunpack.c.h.bf16 %v6708_v46  ;;  %p446_p10 = scmp.lt.s32.totalorder %s7330_s21, 15  ;;  %s5032_s25 = sshll.u32 %s10186_s17, 1 }
  0x4b   : > { %vm3175_vm12 = vcmp.gt.f32.partialorder %v5781_v48, 0.5  ;;  %v517_v0 = vadd.f32 %v7140_v33, %v506_v47  ;;  %s470_s16 = scalar_lea.vmem %s9876_s8, %s5032_s25 }
  0x4c   : > { %v504_v14 = vmul.f32 %v7113_v23, %v6649_v56  ;;  %v505_v17 = vmul.f32 %v7113_v23, %v6650_v61  ;;  %v7260_v18 = vsel %vm3175_vm12, 1, %v9879_v3  ;;  %v6657_v56 = vunpack.c.l.bf16 %v6656_v44  ;;  %s10190_s21 = smov (!%p446_p10, %s7330_s21), 15 }
  0x4d   : > { %v533_v19 = vmul.f32 0.01, %v517_v0  ;;  %vm525_vm4 = vcmp.gt.f32.partialorder %v517_v0, 0.0  ;;  %s6421_s22 = sshll.u32 %s10190_s21, 5 }
  0x4e   : > { %v515_v29 = vadd.f32 %v7140_v33, %v504_v14  ;;  %v576_v10 = vmul.f32 %v7113_v23, %v6657_v56  ;;  %s7381_s13 = scalar_lea.vmem %s9870_s2, %s6421_s22 }
  0x4f   : > { %v541_v39 = vsel %vm525_vm4, %v517_v0, %v533_v19 }
  0x50   : > { %v531_v48 = vmul.f32 0.01, %v515_v29 }
  0x51   : > { %2311 = vperm.xlu1 %6785, %v2300_v52   ;;  %2314 = vperm.xlu2 %6786, %v2301_v53   ;;  %v2718_v52 = vsel %vm2710_vm6, 1, %v9879_v3  ;;  %v6449_v53 = vld [vmem:[%s9873_s5 + $0xd0] sm:$0xff] }
  0x52   : > { %2308 = vperm.xlu0 %6784, %v2299_v54   ;;  %v6457_v54 = vld [vmem:[%s9873_s5 + $0x110] sm:$0xff]  ;;  %1437 = vmatpush.bf16.msra.mxu0 %v6449_v53 }
  0x53   : > { %6724 = vmatpush.bf16.msra.mxu3 %v6449_v53  ;;  %1466 = vmatpush.bf16.msra.mxu1 %v6457_v54  ;;  %v6712_v53 = vld [vmem:[%s7294_s28 + $0x18] sm:$0xff]  }
  0x54   : > { %v6670_v4 = vunpack.c.h.bf16 %v6712_v53 }
  0x56   : > { %v583_v20 = vmul.f32 %v7113_v23, %v6670_v4  ;;  %v6429_v4 = vld [vmem:[%s9873_s5 + $0x30] sm:$0xff] }
  0x57   : > { %1467 = vmatpush.bf16.msra.mxu1 %v6456_v12 }
  0x59   : > { %2721 = vperm.xlu1 %6785, %v2712_v58   ;;  %2724 = vperm.xlu2 %6786, %v2713_v59   ;;  %v7198_v58 = vsel %vm2711_vm8, 1, %v9879_v3  ;;  %v6465_v59 = vld [vmem:[%s9873_s5 + $0x150] sm:$0xff]  ;;  %vm523_vm8 = vcmp.gt.f32.partialorder %v515_v29, 0.0 }
  0x5a   : > { %2317 = vperm.xlu0 %6784, %v2302_v62   ;;  %v7211_v62 = vsel %vm3172_vm9, 1, %v9879_v3  ;;  %1495 = vmatpush.bf16.msra.mxu2 %v6465_v59  ;;  %v539_v54 = vsel %vm523_vm8, %v515_v29, %v531_v48  ;;  %v7344_v59 = vsel %vm3178_vm10, 1, %v9879_v3 }
  0x5b   : > { %1468 = vmatpush.bf16.msra.mxu1 %v6455_v25  ;;  %v548_v0 = vmul.f32 %v543_v28, %v539_v54 }
  0x5d   : > { %v556_v19 = vpack.c.bf16 %v548_v0, %v548_v0 }
  0x5e   : > { %1496 = vmatpush.bf16.msra.mxu2 %v6464_v15 }
  0x61   : > { %2323 = vperm.xlu1 %6785, %v2304_v7   ;;  %2727 = vperm.xlu2 %6786, %v2714_v8   ;;  %v502_v7 = vmul.f32 %v7113_v23, %v6645_v50  ;;  %v503_v8 = vmul.f32 %v7113_v23, %v6646_v51  ;;  %v550_v50 = vmul.f32 %v543_v28, %v541_v39  ;;  %v712_v39 = vunpack.c.l.b16 %v556_v19 }
  0x62   : > { %2320 = vperm.xlu0 %6784, %v2303_v11   ;;  %v6448_v11 = vld [vmem:[%s9873_s5 + $0xc8] sm:$0xff]  ;;  %1497 = vmatpush.bf16.msra.mxu2 %v6463_v32  ;;  %v591_v32 = vadd.f32 %v7140_v33, %v583_v20 }
  0x63   : > { %1438 = vmatpush.bf16.msra.mxu0 %v6448_v11  ;;  %6725 = vmatpush.bf16.msra.mxu3 %v6448_v11  ;;  %v513_v21 = vadd.f32 %v7140_v33, %v502_v7  ;;  %v514_v22 = vadd.f32 %v7140_v33, %v503_v8  ;;  %v558_v7 = vpack.c.bf16 %v550_v50, %v550_v50 }
  0x65   : > { %vm521_vm6 = vcmp.gt.f32.partialorder %v513_v21, 0.0  ;;  %vm522_vm7 = vcmp.gt.f32.partialorder %v514_v22, 0.0  ;;  %v529_v45 = vmul.f32 0.01, %v513_v21  ;;  %v530_v46 = vmul.f32 0.01, %v514_v22 }
  0x67   : > { %1439 = vmatpush.bf16.msra.mxu0 %v6447_v24  ;;  %6726 = vmatpush.bf16.msra.mxu3 %v6447_v24  ;;  %v537_v51 = vsel %vm521_vm6, %v513_v21, %v529_v45  ;;  %v584_v21 = vadd.f32 %v7140_v33, %v576_v10  ;;  %v6438_v45 = vld [vmem:[%s9873_s5 + $0x78] sm:$0xff] }
  0x68   : > { %v546_v61 = vmul.f32 %v543_v28, %v537_v51 }
  0x69   : > { %2326 = vperm.xlu1 %6785, %v2305_v30   ;;  %2329 = vperm.xlu2 %6786, %v2306_v35   ;;  %v7298_v30 = vsel %vm3584_vm0, 1, %v9879_v3  ;;  %v516_v35 = vadd.f32 %v7140_v33, %v505_v17  ;;  %v7367_v17 = vunpack.c.h.b16 %v9879_v3  ;;  %vm599_vm0 = vcmp.gt.f32.partialorder %v591_v32, 0.0 }
  0x6a   : > { %2730 = vperm.xlu0 %6784, %v2715_v34   ;;  %v534_v34 = vmul.f32 0.01, %v518_v16 }
  0x6b   : > { %v1147_v1 = vpop.permute.xlu2 %1146  ;;  %vm524_vm9 = vcmp.gt.f32.partialorder %v516_v35, 0.0  ;;  %v532_v49 = vmul.f32 0.01, %v516_v35  ;;  %1692 = vmatpush.bf16.msrb.mxu0 %v6438_v45 }
  0x6c   : > { %vm1165_vm13 = vcmp.eq.s32.totalorder %v1147_v1, 1  ;;  %v542_v47 = vsel %vm526_vm5, %v518_v16, %v534_v34  ;;  %v6669_v1 = vunpack.c.l.bf16 %v6712_v53  ;;  %vm1073_vm5 = vcmask 1043456  }
  0x6d   : > { %vm7264_vm2 = vmpackc.low %vm1165_vm13, %vm1165_vm13  ;;  %v540_v55 = vsel %vm524_vm9, %v516_v35, %v532_v49  ;;  %v7346_v60 = vmul.f32 %v543_v28, %v542_v47  ;;  %vm592_vm13 = vcmp.gt.f32.partialorder %v584_v21, 0.0  ;;  %v600_v35 = vmul.f32 0.01, %v584_v21 }
  0x6e   : > { %v7311_v36 = vsel %vm7264_vm2, 65537, %v9879_v3  ;;  %v549_v8 = vmul.f32 %v543_v28, %v540_v55  ;;  %v582_v12 = vmul.f32 %v7113_v23, %v6669_v1  ;;  %v6478_v1 = vld [vmem:[%s9873_s5 + $0x1b8] sm:$0xff] }
  0x6f   : > { %v559_v15 = vpack.c.bf16 %v7346_v60, %v7346_v60  ;;  %v608_v43 = vsel %vm592_vm13, %v584_v21, %v600_v35  ;;  %v6715_v60 = vld [vmem:[%s7381_s13 + $0x18] sm:$0xff]   ;;  %2133 = vmatpush.bf16.msrb.mxu2 %v6478_v1 }
  0x70   : > { %v557_v24 = vpack.c.bf16 %v549_v8, %v549_v8  ;;  %v616_v51 = vpack.c.bf16 %v608_v43, %v608_v43  ;;  %v6686_v21 = vunpack.c.h.bf16 %v6715_v60  ;;  %v6435_v43 = vld [vmem:[%s9873_s5 + $0x60] sm:$0xff] }
  0x71   : > { %2736 = vperm.xlu1 %6785, %v7158_v41   ;;  %2739 = vperm.xlu2 %6786, %v2718_v52   ;;  %v5939_v41 = vld [vmem:[%s9874_s6 + $0x190] sm:$0xff]  ;;  %v538_v52 = vsel %vm522_vm7, %v514_v22, %v530_v46  ;;  %v6430_v46 = vld [vmem:[%s9873_s5 + $0x38] sm:$0xff]  ;;  %v715_v53 = vunpack.c.l.b16 %v559_v15  ;;  %v6685_v15 = vunpack.c.l.bf16 %v6715_v60 }
  0x72   : > { %2733 = vperm.xlu0 %6784, %v7162_v42   ;;  %v544_v42 = vmul.f32 %v543_v28, %v535_v26  ;;  %vm3586_vm12 = vcmp.gt.f32.partialorder %v5939_v41, 0.5  ;;  %v590_v26 = vadd.f32 %v7140_v33, %v582_v12  ;;  %1663 = vmatpush.bf16.msrb.mxu3 %v6430_v46 }
  0x73   : > { %v7362_v14 = vsel %vm3586_vm12, 1, %v9879_v3 }
  0x74   : > { %v552_v5 = vpack.c.bf16 %v544_v42, %v544_v42  ;;  %vm598_vm15 = vcmp.gt.f32.partialorder %v590_v26, 0.0  ;;  %v606_v41 = vmul.f32 0.01, %v590_v26 }
  0x76   : > { %v708_v22 = vunpack.c.l.b16 %v552_v5  ;;  %v614_v49 = vsel %vm598_vm15, %v590_v26, %v606_v41  ;;  %v7415_v5 = vpop.permute.xlu2 %1149  ;;  %1664 = vmatpush.bf16.msrb.mxu3 %v6429_v4 }
  0x77   : > { %v622_v56 = vpack.c.bf16 %v614_v49, %v614_v49  ;;  %vm1166_vm6 = vcmp.eq.s32.totalorder %v7415_v5, 1 }
  0x78   : > { %v7383_v42 = vpack.c.b16 %v709_v27, %v708_v22  ;;  %v6428_v22 = vld [vmem:[%s9873_s5 + $0x28] sm:$0xff] }
  0x79   : > { %3188 = vperm.xlu1 %6785, %v7194_v57   ;;  %3191 = vperm.xlu2 %6786, %v7211_v62   ;;  %v547_v57 = vmul.f32 %v543_v28, %v538_v52  ;;  %v6658_v62 = vunpack.c.h.bf16 %v6656_v44  ;;  %v714_v28 = vunpack.c.l.b16 %v558_v7  ;;  %v6672_v52 = vld [vmem:[%s7381_s13] sm:$0xff]   ;;  %v732_v7 = vunpack.c.l.b16 %v616_v51 }
  0x7a   : > { %2742 = vperm.xlu0 %6784, %v7198_v58   ;;  %v554_v58 = vpack.c.bf16 %v546_v61, %v546_v61  ;;  %v6437_v61 = vld [vmem:[%s9873_s5 + $0x70] sm:$0xff]  ;;  %v738_v10 = vunpack.c.l.b16 %v622_v56  ;;  %v6674_v12 = vunpack.c.h.bf16 %v6672_v52  ;;  %1665 = vmatpush.bf16.msrb.mxu3 %v6428_v22  ;;  %v1189_v22 = vunpack.c.l.b16 %v7311_v36 }
  0x7b   : > { %v577_v11 = vmul.f32 %v7113_v23, %v6658_v62  ;;  %v555_v16 = vpack.c.bf16 %v547_v57, %v547_v57  ;;  %v7427_v19 = vpack.c.b16 %v715_v53, %v714_v28  ;;  %1693 = vmatpush.bf16.msrb.mxu0 %v6437_v61 }
  0x7c   : > { %v710_v29 = vunpack.c.l.b16 %v554_v58  ;;  %v6673_v58 = vunpack.c.l.bf16 %v6672_v52 }
  0x7d   : > { %v585_v25 = vadd.f32 %v7140_v33, %v577_v11  ;;  %v711_v34 = vunpack.c.l.b16 %v555_v16  ;;  %v6446_v16 = vld [vmem:[%s9873_s5 + $0xb8] sm:$0xff]  ;;  %9937 = vst [vmem:[#allocation3_spill] sm:$0xff] %v7427_v19  ;;  %v1070_v46 = vrot.slane %v7427_v19, 4 }
  0x7e   : > { %1721 = vmatpush.bf16.msrb.mxu1 %v6446_v16 }
  0x7f   : > { %vm593_vm14 = vcmp.gt.f32.partialorder %v585_v25, 0.0  ;;  %v601_v40 = vmul.f32 0.01, %v585_v25  ;;  %v7401_v54 = vpack.c.b16 %v711_v34, %v710_v29  ;;  %v644_v34 = vmul.f32 %v7113_v23, %v6674_v12 }
  0x80   : > { %v7526_v12 = vstv %s626_s27 }
  0x81   : > { %3197 = vperm.xlu1 %6785, %v7215_v63   ;;  %3200 = vperm.xlu2 %6786, %v7260_v18   ;;  %v713_v18 = vunpack.c.l.b16 %v557_v24  ;;  %v609_v44 = vsel %vm593_vm14, %v585_v25, %v601_v40  ;;  %v1077_v20 = vrot.slane %v7401_v54, 4  ;;  %v6477_v24 = vld [vmem:[%s9873_s5 + $0x1b0] sm:$0xff]  ;;  %v650_v40 = vmul.f32 %v7113_v23, %v6686_v21  ;;  %v5941_v21 = vld [vmem:[%s9874_s6 + $0x1a0] sm:$0xff] }
  0x82   : > { %3194 = vperm.xlu0 %6784, %v7220_v2   ;;  %v607_v2 = vmul.f32 0.01, %v591_v32  ;;  %v617_v55 = vpack.c.bf16 %v609_v44, %v609_v44  ;;  %2134 = vmatpush.bf16.msrb.mxu2 %v6477_v24  ;;  %v6427_v44 = vld [vmem:[%s9873_s5 + $0x20] sm:$0xff] }
  0x83   : > { %v1153_v38 = vpop.permute.xlu1 %1152  ;;  %v7407_v0 = vpack.c.b16 %v713_v18, %v712_v39  ;;  %v649_v39 = vmul.f32 %v7113_v23, %v6685_v15  ;;  %v658_v51 = vadd.f32 %v7140_v33, %v650_v40  ;;  %1666 = vmatpush.bf16.msrb.mxu3 %v6427_v44 }
  0x84   : > { %vm1167_vm1 = vcmp.eq.s32.totalorder %v1153_v38, 1  ;;  %v1141_v63 = vpop.permute.xlu0 %1140  ;;  %v615_v50 = vsel %vm599_vm0, %v591_v32, %v607_v2  ;;  %v733_v8 = vunpack.c.l.b16 %v617_v55  ;;  %v643_v32 = vmul.f32 %v7113_v23, %v6673_v58 }
  0x85   : > { %vm1175_vm2 = vmpackc.low %vm1167_vm1, %vm1167_vm1  ;;  %vm1163_vm3 = vcmp.eq.s32.totalorder %v1141_v63, 1  ;;  %9936 = vst [vmem:[#allocation2_spill] sm:$0xff] %v7407_v0  ;;  %v623_v62 = vpack.c.bf16 %v615_v50, %v615_v50  ;;  %v1083_v28 = vrot.slane %v7407_v0, 4  ;;  %v652_v2 = vadd.f32 %v7140_v33, %v644_v34 }
  0x86   : > { %v1183_v47 = vsel %vm1175_vm2, 65537, %v9879_v3  ;;  %vm7394_vm4 = vmpackc.low %vm1163_vm3, %vm1163_vm3  ;;  %v7442_v29 = vpack.c.b16 %v733_v8, %v732_v7  ;;  %v651_v41 = vadd.f32 %v7140_v33, %v643_v32  ;;  %v657_v48 = vadd.f32 %v7140_v33, %v649_v39 }
  0x87   : > { %v1191_v57 = vunpack.c.l.b16 %v1183_v47  ;;  %v1179_v6 = vsel %vm7394_vm4, 65537, %v9879_v3  ;;  %v739_v11 = vunpack.c.l.b16 %v623_v62  ;;  %v7470_v47 = vsel %vm1073_vm5, %v1077_v20, %v1083_v28  ;;  %vm7491_vm3 = vmpackc.low %vm1166_vm6, %vm1166_vm6 }
  0x88   : > { %v1187_v26 = vunpack.c.l.b16 %v1179_v6  ;;  %9938 = vst [vmem:[#allocation4_spill] sm:$0xff] %v7442_v29  ;;  %v1075_v55 = vrot.slane %v7442_v29, 4  ;;  %v667_v56 = vmul.f32 0.01, %v651_v41  ;;  %vm659_vm13 = vcmp.gt.f32.partialorder %v651_v41, 0.0 }
  0x89   : > { %3601 = vperm.xlu1 %6785, %v7298_v30   ;;  %3604 = vperm.xlu2 %6786, %v7315_v37   ;;  %v1074_v37 = vrot.slane %v7383_v42, 4  ;;  %v5053_v25 = vunpack.i.l.s16 %v1191_v57  ;;  %v7447_v38 = vpack.c.b16 %v739_v11, %v738_v10  ;;  %9940 = vst [vmem:[#allocation6_spill] sm:$0xff] %v7470_v47  ;;  %vm660_vm14 = vcmp.gt.f32.partialorder %v652_v2, 0.0 }
  0x8a   : > { %3203 = vperm.xlu0 %6784, %v7302_v31   ;;  %v6436_v31 = vld [vmem:[%s9873_s5 + $0x68] sm:$0xff]  ;;  %v5049_v49 = vunpack.i.l.s16 %v1187_v26  ;;  %vm665_vm1 = vcmp.gt.f32.partialorder %v657_v48, 0.0  ;;  %vm666_vm2 = vcmp.gt.f32.partialorder %v658_v51, 0.0  ;;  %v673_v61 = vmul.f32 0.01, %v657_v48 }
  0x8b   : > { %v1156_v30 = vpop.permute.xlu1 %1155  ;;  %9939 = vst [vmem:[#allocation5_spill] sm:$0xff] %v7447_v38  ;;  %1694 = vmatpush.bf16.msrb.mxu0 %v6436_v31  ;;  %vm1217_vm11 = vcmp.ne.s32.totalorder %v5053_v25, %v7238_v9  ;;  %v1071_v53 = vrot.slane %v7447_v38, 4  ;;  %v674_v1 = vmul.f32 0.01, %v658_v51  ;;  %v7508_v5 = vsel %vm1073_vm5, %v1070_v46, %v1074_v37  ;;  %v5940_v31 = vld [vmem:[%s9874_s6 + $0x198] sm:$0xff] }
  0x8c   : > { %vm1168_vm7 = vcmp.eq.s32.totalorder %v1156_v30, 1  ;;  %v1144_v27 = vpop.permute.xlu0 %1143  ;;  %9947 = vst [vmem:[#allocation7_spill] sm:$0xff] %v7508_v5  ;;  %v675_v7 = vsel %vm659_vm13, %v651_v41, %v667_v56  ;;  %v681_v10 = vsel %vm665_vm1, %v657_v48, %v673_v61  ;;  %v1182_v24 = vsel %vm7491_vm3, 65537, %v9879_v3  ;;  %v5943_v56 = vld [vmem:[%s9874_s6 + $0x1b0] sm:$0xff]  ;;  %v6426_v61 = vld [vmem:[%s9873_s5 + $0x18] sm:$0xff] }
  0x8d   : > { %vm1176_vm8 = vmpackc.low %vm1168_vm7, %vm1168_vm7  ;;  %vm1164_vm9 = vcmp.eq.s32.totalorder %v1144_v27, 1  ;;  %v7515_v6 = vsel %vm1073_vm5, %v1071_v53, %v1075_v55  ;;  %v682_v11 = vsel %vm666_vm2, %v658_v51, %v674_v1  ;;  %v684_v16 = vmul.f32 %v7526_v12, %v675_v7  ;;  %1667 = vmatpush.bf16.msrb.mxu3 %v6426_v61  ;;  %v6433_v7 = vld [vmem:[%s9873_s5 + $0x50] sm:$0xff] }
  0x8e   : > { %v1184_v35 = vsel %vm1176_vm8, 65537, %v9879_v3  ;;  %vm1172_vm10 = vmpackc.low %vm1164_vm9, %vm1164_vm9  ;;  %9948 = vst [vmem:[#allocation8_spill] sm:$0xff] %v7515_v6  ;;  %vm1203_vm9 = vcmp.ne.s32.totalorder %v5049_v49, %v7238_v9  ;;  %v690_v36 = vmul.f32 %v7526_v12, %v681_v10  ;;  %v691_v32 = vmul.f32 %v7526_v12, %v682_v11 }
  0x8f   : > { %v1192_v63 = vunpack.c.l.b16 %v1184_v35  ;;  %v1180_v18 = vsel %vm1172_vm10, 65537, %v9879_v3  ;;  %1695 = vmatpush.bf16.msrb.mxu0 %v6435_v43  ;;  %v692_v34 = vpack.c.bf16 %v684_v16, %v684_v16  ;;  %v5942_v35 = vld [vmem:[%s9874_s6 + $0x1a8] sm:$0xff]  ;;  %v5944_v43 = vld [vmem:[%s9874_s6 + $0x1b8] sm:$0xff]  ;;  %v1190_v44 = vunpack.c.l.b16 %v1182_v24 }
  0x90   : > { %v1188_v45 = vunpack.c.l.b16 %v1180_v18  ;;  %v699_v18 = vpack.c.bf16 %v691_v32, %v691_v32  ;;  %vm3589_vm13 = vcmp.gt.f32.partialorder %v5942_v35, 0.5  ;;  %v5051_v1 = vunpack.i.l.s16 %v1189_v22  ;;  %v6425_v22 = vld [vmem:[%s9873_s5 + $0x10] sm:$0xff]  ;;  %v6713_v32 = vld [vmem:[%s7381_s13 + $0x8] sm:$0xff]   ;;  %v6475_v35 = vld [vmem:[%s9873_s5 + $0x1a0] sm:$0xff] }
  0x91   : > { %v5054_v50 = vunpack.i.l.s16 %v1192_v63  ;;  %3209 = vperm.xlu1 %6785, %v7344_v59   ;;  %3607 = vperm.xlu2 %6786, %v7362_v14   ;;  %v668_v59 = vmul.f32 0.01, %v652_v2  ;;  %v698_v63 = vpack.c.bf16 %v690_v36, %v690_v36  ;;  %v756_v41 = vunpack.c.l.b16 %v692_v34  ;;  %v6432_v34 = vld [vmem:[%s9873_s5 + $0x48] sm:$0xff] }
  0x92   : > { %v5050_v52 = vunpack.i.l.s16 %v1188_v45  ;;  %3206 = vperm.xlu0 %6784, %v7358_v13   ;;  %v763_v51 = vunpack.c.l.b16 %v699_v18  ;;  %v5052_v58 = vunpack.i.l.s16 %v1190_v44  ;;  %vm1210_vm2 = vcmp.ne.s32.totalorder %v5051_v1, %v7238_v9  ;;  %1668 = vmatpush.bf16.msrb.mxu3 %v6425_v22  ;;  %v6423_v1 = vld [vmem:[%s9873_s5] sm:$0xff] }
  0x93   : > { %v1162_v60 = vpop.permute.xlu1 %1161  ;;  %vm1218_vm12 = vcmp.ne.s32.totalorder %v5054_v50, %v7367_v17  ;;  %v676_v8 = vsel %vm660_vm14, %v652_v2, %v668_v59  ;;  %v762_v50 = vunpack.c.l.b16 %v698_v63  ;;  %vm3591_vm14 = vcmp.gt.f32.partialorder %v5944_v43, 0.5  ;;  %v6501_v43 = vld [vmem:[%s9873_s5 + $0x270] sm:$0xff] }
  0x94   : > { %vm1170_vm15 = vcmp.eq.s32.totalorder %v1162_v60, 1  ;;  %v1159_v14 = vpop.permute.xlu0 %1158  ;;  %vm7484_vm0 = vmpackc.low %vm1218_vm12, %vm1217_vm11  ;;  %vm1204_vm7 = vcmp.ne.s32.totalorder %v5050_v52, %v7367_v17  ;;  %v685_v30 = vmul.f32 %v7526_v12, %v676_v8  ;;  %vm3588_vm11 = vcmp.gt.f32.partialorder %v5941_v21, 0.5  ;;  %v6445_v8 = vld [vmem:[%s9873_s5 + $0xb0] sm:$0xff] }
  0x95   : > { %vm1169_vm4 = vcmp.eq.s32.totalorder %v1159_v14, 1  ;;  %v1233_v62 = vsel %vm7484_vm0, %v7470_v47, 0  ;;  %vm7499_vm8 = vmpackc.low %vm1170_vm15, %vm1170_vm15  ;;  %vm3587_vm12 = vcmp.gt.f32.partialorder %v5940_v31, 0.5  ;;  %v3596_v2 = vsel %vm3588_vm11, 1, %v9879_v3  ;;  %v6434_v14 = vld [vmem:[%s9873_s5 + $0x58] sm:$0xff]  ;;  %1722 = vmatpush.bf16.msrb.mxu1 %v6445_v8 }
  0x96   : > { %1450 = vmatmul.bf16.vlgmr.msra.gmra.mxu3 %v1233_v62  ;;  %vm7519_vm6 = vmpackc.low %vm1169_vm4, %vm1169_vm4  ;;  %v1186_v27 = vsel %vm7499_vm8, 65537, %v9879_v3  ;;  %v693_v40 = vpack.c.bf16 %v685_v30, %v685_v30  ;;  %v3595_v48 = vsel %vm3587_vm12, 1, %v9879_v3  ;;  %v3597_v52 = vsel %vm3589_vm13, 1, %v9879_v3  ;;  %v6097_v62 = vld [vmem:[%s9874_s6 + $0x1c0] sm:$0xff]  ;;  %1696 = vmatpush.bf16.msrb.mxu0 %v6434_v14  ;;  %v6476_v30 = vld [vmem:[%s9873_s5 + $0x1a8] sm:$0xff] }
  0x97   : > { %vm7528_vm10 = vmpackc.low %vm1204_vm7, %vm1203_vm9  ;;  %v1185_v39 = vsel %vm7519_vm6, 65537, %v9879_v3  ;;  %v1194_v60 = vunpack.c.l.b16 %v1186_v27  ;;  %v7578_v57 = vpack.c.b16 %v763_v51, %v762_v50  ;;  %vm3590_vm15 = vcmp.gt.f32.partialorder %v5943_v56, 0.5  ;;  %2135 = vmatpush.bf16.msrb.mxu2 %v6476_v30  ;;  %v6444_v27 = vld [vmem:[%s9873_s5 + $0xa8] sm:$0xff] }
  0x98   : > { %v1227_v25 = vsel %vm7528_vm10, %v7508_v5, 0  ;;  %v1228_v26 = vsel %vm7528_vm10, %v7515_v6, 0  ;;  %v757_v45 = vunpack.c.l.b16 %v693_v40  ;;  %v1193_v49 = vunpack.c.l.b16 %v1185_v39  ;;  %v6481_v5 = vld [vmem:[%s9873_s5 + $0x1d0] sm:$0xff] }
  0x99   : > { %1440 = vmatmul.bf16.vlgmr.msra.gmra.mxu0 %v1227_v25  ;;  %1469 = vmatmul.bf16.vlgmr.msra.gmra.mxu1 %v1228_v26  ;;  %9954 = vst [vmem:[#allocation10_spill] sm:$0xff] %v7578_v57  ;;  %v9878_v11 = vrot.slane %v7578_v57, 4  ;;  %v3599_v16 = vsel %vm3591_vm14, 1, %v9879_v3  ;;  %v5056_v21 = vunpack.i.l.s16 %v1194_v60  ;;  %v3598_v31 = vsel %vm3590_vm15, 1, %v9879_v3  ;;  %v6710_v26 = vld [vmem:[%s7294_s28 + $0x8] sm:$0xff]   ;;  %v6100_v60 = vld [vmem:[%s9874_s6 + $0x1d8] sm:$0xff] }
  0x9a   : > { %3613 = vperm.xlu1 %6785, %v3596_v2   ;;  %3610 = vperm.xlu0 %6784, %v3595_v48   ;;  %v7570_v59 = vpack.c.b16 %v757_v45, %v756_v41  ;;  %v5055_v10 = vunpack.i.l.s16 %v1193_v49  ;;  %vm3997_vm1 = vcmp.gt.f32.partialorder %v6097_v62, 0.5  ;;  %v7627_v15 = vsel %vm1073_vm5, %v1074_v37, %v1077_v20  ;;  %v6099_v41 = vld [vmem:[%s9874_s6 + $0x1d0] sm:$0xff]  ;;  %v6098_v45 = vld [vmem:[%s9874_s6 + $0x1c8] sm:$0xff]  ;;  %v6431_v48 = vld [vmem:[%s9873_s5 + $0x40] sm:$0xff] }
  0x9b   : > { %3616 = vperm.xlu2 %6786, %v3597_v52   ;;  %v4005_v25 = vsel %vm3997_vm1, 1, %v9879_v3  ;;  %1697 = vmatpush.bf16.msrb.mxu0 %v6433_v7  ;;  %9956 = vst [vmem:[#allocation12_spill] sm:$0xff] %v7627_v15  ;;  %vm1211_vm3 = vcmp.ne.s32.totalorder %v5052_v58, %v7367_v17  ;;  %v7636_v39 = vsel %vm1073_vm5, %v1083_v28, %v1070_v46  ;;  %v6661_v40 = vunpack.c.l.bf16 %v6710_v26  ;;  %v6424_v28 = vld [vmem:[%s9873_s5 + $0x8] sm:$0xff]  ;;  %v924_v46 = vpop.permute.xlu2 %923 }
  0x9c   : > { %9953 = vst [vmem:[#allocation9_spill] sm:$0xff] %v7570_v59  ;;  %v1076_v4 = vrot.slane %v7570_v59, 4  ;;  %vm1224_vm4 = vcmp.ne.s32.totalorder %v5055_v10, %v7238_v9  ;;  %vm1225_vm7 = vcmp.ne.s32.totalorder %v5056_v21, %v7367_v17  ;;  %v927_v63 = vpop.permute.xlu0 %926  ;;  %vm7641_vm8 = vmpackc.low %vm1211_vm3, %vm1210_vm2  ;;  %v6662_v20 = vunpack.c.h.bf16 %v6710_v26  ;;  %1723 = vmatpush.bf16.msrb.mxu1 %v6444_v27  ;;  %2136 = vmatpush.bf16.msrb.mxu2 %v6475_v35  ;;  %v6258_v26 = vld [vmem:[%s9874_s6 + $0x208] sm:$0xff] }
  0x9d   : > { %9957 = vst [vmem:[#allocation13_spill] sm:$0xff] %v7636_v39  ;;  %v6677_v18 = vunpack.c.l.bf16 %v6713_v32  ;;  %v1230_v2 = vsel %vm7641_vm8, %v7627_v15, 0  ;;  %vm7656_vm6 = vmpackc.low %vm1225_vm7, %vm1224_vm4  ;;  %v578_v44 = vmul.f32 %v7113_v23, %v6661_v40  ;;  %vm946_vm9 = vcmp.eq.s32.totalorder %v924_v46, 1  ;;  %1669 = vmatpush.bf16.msrb.mxu3 %v6424_v28 }
  0x9e   : > { %v7604_v24 = vsel %vm1073_vm5, %v9878_v11, %v1076_v4  ;;  %v1236_v49 = vsel %vm7656_vm6, %v7636_v39, 0  ;;  %v579_v50 = vmul.f32 %v7113_v23, %v6662_v20  ;;  %v6678_v51 = vunpack.c.h.bf16 %v6713_v32  ;;  %vm954_vm3 = vmpackc.low %vm946_vm9, %vm946_vm9 }
  0x9f   : > { %9955 = vst [vmem:[#allocation11_spill] sm:$0xff] %v7604_v24  ;;  %v1229_v36 = vsel %vm7528_vm10, %v7604_v24, 0  ;;  %1698 = vmatpush.bf16.msrb.mxu0 %v6432_v34  ;;  %vm947_vm10 = vcmp.eq.s32.totalorder %v927_v63, 1  ;;  %v586_v52 = vadd.f32 %v7140_v33, %v578_v44  ;;  %v645_v56 = vmul.f32 %v7113_v23, %v6677_v18  ;;  %v6257_v18 = vld [vmem:[%s9874_s6 + $0x200] sm:$0xff] }
  0xa0   : > { %1498 = vmatmul.bf16.vlgmr.msra.gmra.mxu2 %v1229_v36  ;;  %vm3999_vm11 = vcmp.gt.f32.partialorder %v6099_v41, 0.5  ;;  %v587_v14 = vadd.f32 %v7140_v33, %v579_v50  ;;  %v646_v61 = vmul.f32 %v7113_v23, %v6678_v51  ;;  %vm3998_vm12 = vcmp.gt.f32.partialorder %v6098_v45, 0.5  ;;  %vm7694_vm4 = vmpackc.low %vm947_vm10, %vm947_vm10  ;;  %v6494_v41 = vld [vmem:[%s9873_s5 + $0x238] sm:$0xff] }
  0xa1   : > { %v4007_v62 = vsel %vm3999_vm11, 1, %v9879_v3  ;;  %vm594_vm13 = vcmp.gt.f32.partialorder %v586_v52, 0.0  ;;  %v602_v7 = vmul.f32 0.01, %v586_v52  ;;  %v653_v8 = vadd.f32 %v7140_v33, %v645_v56  ;;  %1670 = vmatpush.bf16.msrb.mxu3 %v6423_v1  ;;  %v6474_v50 = vld [vmem:[%s9873_s5 + $0x198] sm:$0xff]  ;;  %v6711_v1 = vld [vmem:[%s7294_s28 + $0x10] sm:$0xff]  }
  0xa2   : > { %3622 = vperm.xlu1 %6785, %v3599_v16   ;;  %3619 = vperm.xlu0 %6784, %v3598_v31   ;;  %v4006_v58 = vsel %vm3998_vm12, 1, %v9879_v3  ;;  %vm595_vm14 = vcmp.gt.f32.partialorder %v587_v14, 0.0  ;;  %v603_v10 = vmul.f32 0.01, %v587_v14  ;;  %v654_v23 = vadd.f32 %v7140_v33, %v646_v61  ;;  %v6486_v56 = vld [vmem:[%s9873_s5 + $0x1f8] sm:$0xff] }
  0xa3   : > { %4014 = vperm.xlu2 %6786, %v4005_v25   ;;  %1699 = vmatpush.bf16.msrb.mxu0 %v6431_v48  ;;  %vm4000_vm15 = vcmp.gt.f32.partialorder %v6100_v60, 0.5  ;;  %v610_v16 = vsel %vm594_vm13, %v586_v52, %v602_v7  ;;  %vm661_vm1 = vcmp.gt.f32.partialorder %v653_v8, 0.0  ;;  %v669_v30 = vmul.f32 0.01, %v653_v8  ;;  %v6101_v48 = vld [vmem:[%s9874_s6 + $0x1e0] sm:$0xff]  ;;  %v6493_v60 = vld [vmem:[%s9873_s5 + $0x230] sm:$0xff] }
  0xa4   : > { %v4008_v21 = vsel %vm4000_vm15, 1, %v9879_v3  ;;  %v611_v31 = vsel %vm595_vm14, %v587_v14, %v603_v10  ;;  %v618_v22 = vpack.c.bf16 %v610_v16, %v610_v16  ;;  %vm662_vm2 = vcmp.gt.f32.partialorder %v654_v23, 0.0  ;;  %2137 = vmatpush.bf16.msrb.mxu2 %v6474_v50 }
  0xa5   : > { %v670_v25 = vmul.f32 0.01, %v654_v23  ;;  %v619_v27 = vpack.c.bf16 %v611_v31, %v611_v31  ;;  %v677_v36 = vsel %vm661_vm1, %v653_v8, %v669_v30  ;;  %vm4411_vm7 = vcmp.gt.f32.partialorder %v6258_v26, 0.5  ;;  %2162 = vmatpush.bf16.msra.mxu3 %v6486_v56  ;;  %v6442_v8 = vld [vmem:[%s9873_s5 + $0x98] sm:$0xff] }
  0xa6   : > { %1455 = vmatmul.bf16.gmra.mxu3 %v1236_v49  ;;  %v734_v33 = vunpack.c.l.b16 %v618_v22  ;;  %v686_v34 = vmul.f32 %v7526_v12, %v677_v36  ;;  %v4419_v63 = vsel %vm4411_vm7, 1, %v9879_v3  ;;  %v962_v46 = vsel %vm954_vm3, 65537, %v9879_v3  ;;  %v6443_v49 = vld [vmem:[%s9873_s5 + $0xa0] sm:$0xff] }
  0xa7   : > { %v678_v32 = vsel %vm662_vm2, %v654_v23, %v670_v25  ;;  %v735_v40 = vunpack.c.l.b16 %v619_v27  ;;  %2191 = vmatpush.bf16.msra.mxu0 %v6494_v41  ;;  %v963_v51 = vsel %vm7694_vm4, 65537, %v9879_v3  ;;  %vm4410_vm9 = vcmp.gt.f32.partialorder %v6257_v18, 0.5  ;;  %1724 = vmatpush.bf16.msrb.mxu1 %v6443_v49  ;;  %v6790_v18 = vld [vmem:[%s9872_s4] ss:$0 sm:$0xff] }
  0xa8   : > { %v687_v20 = vmul.f32 %v7526_v12, %v678_v32  ;;  %v694_v28 = vpack.c.bf16 %v686_v34, %v686_v34  ;;  %v970_v7 = vunpack.c.l.b16 %v962_v46  ;;  %vm4001_vm11 = vcmp.gt.f32.partialorder %v6101_v48, 0.5  ;;  %v933_v32 = vpop.permute.xlu2 %932 }
  0xa9   : > { %1445 = vmatmul.bf16.gmra.mxu0 %v1230_v2  ;;  %v930_v2 = vpop.permute.xlu1 %929  ;;  %v7707_v44 = vpack.c.b16 %v735_v40, %v734_v33  ;;  %v971_v10 = vunpack.c.l.b16 %v963_v51  ;;  %v4009_v30 = vsel %vm4001_vm11, 1, %v9879_v3  ;;  %v6665_v22 = vunpack.c.l.bf16 %v6711_v1 }
  0xaa   : > { %4020 = vperm.xlu1 %6785, %v4007_v62   ;;  %4017 = vperm.xlu0 %6784, %v4006_v58   ;;  %v695_v45 = vpack.c.bf16 %v687_v20, %v687_v20  ;;  %v758_v52 = vunpack.c.l.b16 %v694_v28  ;;  %v4418_v62 = vsel %vm4410_vm9, 1, %v9879_v3  ;;  %vm948_vm10 = vcmp.eq.s32.totalorder %v930_v2, 1  ;;  %v6473_v58 = vld [vmem:[%s9873_s5 + $0x190] sm:$0xff] }
  0xab   : > { %4023 = vperm.xlu2 %6786, %v4008_v21   ;;  %9964 = vst [vmem:[#allocation14_spill] sm:$0xff] %v7707_v44  ;;  %v1079_v14 = vrot.slane %v7707_v44, 4  ;;  %v6714_v21 = vld [vmem:[%s7381_s13 + $0x10] sm:$0xff]   ;;  %2192 = vmatpush.bf16.msra.mxu0 %v6493_v60  ;;  %v6666_v26 = vunpack.c.h.bf16 %v6711_v1  ;;  %vm956_vm12 = vmpackc.low %vm948_vm10, %vm948_vm10  ;;  %v7756_v33 = vunpack.i.l.s16 %v970_v7  ;;  %v7758_v34 = vunpack.i.l.s16 %v971_v10 }
  0xac   : > { %v759_v61 = vunpack.c.l.b16 %v695_v45  ;;  %2138 = vmatpush.bf16.msrb.mxu2 %v6473_v58  ;;  %v6681_v36 = vunpack.c.l.bf16 %v6714_v21  ;;  %1725 = vmatpush.bf16.msrb.mxu1 %v6442_v8  ;;  %vm949_vm13 = vcmp.eq.s32.totalorder %v933_v32, 1  ;;  %v6682_v28 = vunpack.c.h.bf16 %v6714_v21  ;;  %v6485_v7 = vld [vmem:[%s9873_s5 + $0x1f0] sm:$0xff]  ;;  %v6492_v8 = vld [vmem:[%s9873_s5 + $0x228] sm:$0xff] }
  0xad   : > { %v7741_v23 = vsel %vm1073_vm5, %v1075_v55, %v1079_v14  ;;  %v6789_v55 = vld [vmem:[%s9871_s3] ss:$0 sm:$0xff]  ;;  %v7780_v37 = vshll.u32 %v7427_v19, 16  ;;  %vm987_vm15 = vcmp.ne.s32.totalorder %v7758_v34, %v7367_v17  ;;  %v6441_v21 = vld [vmem:[%s9873_s5 + $0x90] sm:$0xff]  ;;  %vm799_vm4 = vsmask.f32 4352  ;;  %2163 = vmatpush.bf16.msra.mxu3 %v6485_v7  ;;  %vm7828_vm9 = vmpackc.low %vm949_vm13, %vm949_vm13 }
  0xae   : > { %9965 = vst [vmem:[#allocation15_spill] sm:$0xff] %v7741_v23  ;;  %v7743_v16 = vpack.c.b16 %v759_v61, %v758_v52  ;;  %v1231_v31 = vsel %vm7641_vm8, %v7741_v23, 0  ;;  %v580_v27 = vmul.f32 %v6789_v55, %v6665_v22  ;;  %v581_v40 = vmul.f32 %v6789_v55, %v6666_v26  ;;  %v6260_v34 = vld [vmem:[%s9874_s6 + $0x218] sm:$0xff] }
  0xaf   : > { %1474 = vmatmul.bf16.gmra.mxu1 %v1231_v31  ;;  %v647_v2 = vmul.f32 %v6789_v55, %v6681_v36  ;;  %v648_v48 = vmul.f32 %v6789_v55, %v6682_v28  ;;  %v778_v60 = vrot.slane %v7780_v37, 4  ;;  %v7800_v26 = vshrl.u32 %v7383_v42, 16  ;;  %2193 = vmatpush.bf16.msra.mxu0 %v6492_v8  ;;  %v6472_v55 = vld [vmem:[%s9873_s5 + $0x188] sm:$0xff] }
  0xb0   : > { %9966 = vst [vmem:[#allocation16_spill] sm:$0xff] %v7743_v16  ;;  %v1081_v25 = vrot.slane %v7743_v16, 4  ;;  %v588_v41 = vadd.f32 %v6790_v18, %v580_v27  ;;  %v589_v46 = vadd.f32 %v6790_v18, %v581_v40  ;;  %1726 = vmatpush.bf16.msrb.mxu1 %v6441_v21  ;;  %v6440_v28 = vld [vmem:[%s9873_s5 + $0x88] sm:$0xff]  ;;  %vm893_vm7 = vcmask 1044480   ;;  %2139 = vmatpush.bf16.msrb.mxu2 %v6472_v55 }
  0xb1   : > { %v655_v50 = vadd.f32 %v6790_v18, %v647_v2  ;;  %v656_v52 = vadd.f32 %v6790_v18, %v648_v48  ;;  %v6484_v18 = vld [vmem:[%s9873_s5 + $0x1e8] sm:$0xff]  ;;  %v803_v2 = vrot.slane %v7800_v26, 3  ;;  %v6471_v48 = vld [vmem:[%s9873_s5 + $0x180] sm:$0xff]  ;;  %vm7842_vm10 = vmand %vm893_vm7, %vm799_vm4  ;;  %v8142_v23 = vshll.u32 %v7570_v59, 16 }
  0xb2   : > { %4430 = vperm.xlu1 %6785, %v4419_v63   ;;  %4427 = vperm.xlu0 %6784, %v4418_v62   ;;  %v7765_v35 = vsel %vm1073_vm5, %v1076_v4, %v1081_v25  ;;  %v7774_v63 = vsel %vm956_vm12, 65537, %v9879_v3  ;;  %v7777_v4 = vshrl.u32 %v7427_v19, 16  ;;  %vm596_vm14 = vcmp.gt.f32.partialorder %v588_v41, 0.0 }
  0xb3   : > { %4026 = vperm.xlu2 %6786, %v4009_v30   ;;  %9967 = vst [vmem:[#allocation17_spill] sm:$0xff] %v7765_v35  ;;  %v1232_v20 = vsel %vm7641_vm8, %v7765_v35, 0  ;;  %v604_v45 = vmul.f32 0.01, %v588_v41  ;;  %vm986_vm8 = vcmp.ne.s32.totalorder %v7756_v33, %v7238_v9  ;;  %vm597_vm1 = vcmp.gt.f32.partialorder %v589_v46, 0.0  ;;  %2164 = vmatpush.bf16.msra.mxu3 %v6484_v18  ;;  %v6102_v33 = vld [vmem:[%s9874_s6 + $0x1e8] sm:$0xff] }
  0xb4   : > { %1503 = vmatmul.bf16.gmra.mxu2 %v1232_v20  ;;  %v605_v49 = vmul.f32 0.01, %v589_v46  ;;  %v775_v56 = vrot.slane %v7777_v4, 3  ;;  %vm663_vm2 = vcmp.gt.f32.partialorder %v655_v50, 0.0  ;;  %v671_v1 = vmul.f32 0.01, %v655_v50  ;;  %vm7862_vm11 = vmpackc.low %vm987_vm15, %vm986_vm8  ;;  %1727 = vmatpush.bf16.msrb.mxu1 %v6440_v28 }
  0xb5   : > { %v612_v51 = vsel %vm596_vm14, %v588_v41, %v604_v45  ;;  %vm664_vm3 = vcmp.gt.f32.partialorder %v656_v52, 0.0  ;;  %v672_v10 = vmul.f32 0.01, %v656_v52  ;;  %v7807_v20 = vshll.u32 %v7383_v42, 16  ;;  %v6491_v41 = vld [vmem:[%s9873_s5 + $0x220] sm:$0xff]  ;;  %2140 = vmatpush.bf16.msrb.mxu2 %v6471_v48 }
  0xb6   : > { %v613_v61 = vsel %vm597_vm1, %v589_v46, %v605_v49  ;;  %v620_v62 = vpack.c.bf16 %v612_v51, %v612_v51  ;;  %v7794_v30 = vor.u32 %v778_v60, %v775_v56  ;;  %v679_v22 = vsel %vm663_vm2, %v655_v50, %v671_v1  ;;  %v6259_v56 = vld [vmem:[%s9874_s6 + $0x210] sm:$0xff]  ;;  %2194 = vmatpush.bf16.msra.mxu0 %v6491_v41 }
  0xb7   : > { %v621_v58 = vpack.c.bf16 %v613_v61, %v613_v61  ;;  %v680_v36 = vsel %vm664_vm3, %v656_v52, %v672_v10  ;;  %v688_v40 = vmul.f32 %v7526_v12, %v679_v22  ;;  %v7821_v45 = vshrl.u32 %v7447_v38, 16  ;;  %v6103_v49 = vld [vmem:[%s9874_s6 + $0x1f0] sm:$0xff] }
  0xb8   : > { %v736_v31 = vunpack.c.l.b16 %v620_v62  ;;  %v689_v46 = vmul.f32 %v7526_v12, %v680_v36  ;;  %v806_v51 = vrot.slane %v7807_v20, 4  ;;  %v7836_v52 = vshll.u32 %v7447_v38, 16  ;;  %v7878_v36 = vpop.permute.xlu0 %935 }
  0xb9   : > { %v737_v27 = vunpack.c.l.b16 %v621_v58  ;;  %v696_v12 = vpack.c.bf16 %v688_v40, %v688_v40  ;;  %v783_v61 = vrot.slane %v7821_v45, 3  ;;  %v7848_v62 = vshrl.u32 %v7442_v29, 16 }
  0xba   : > { %v697_v60 = vpack.c.bf16 %v689_v46, %v689_v46  ;;  %v7851_v1 = vshll.u32 %v7442_v29, 16  ;;  %v7854_v58 = vor.u32 %v806_v51, %v803_v2  ;;  %v786_v21 = vrot.slane %v7836_v52, 4 }
  0xbb   : > { %v7832_v50 = vpack.c.b16 %v737_v27, %v736_v31  ;;  %v760_v8 = vunpack.c.l.b16 %v696_v12  ;;  %v811_v22 = vrot.slane %v7848_v62, 3  ;;  %vm4412_vm12 = vcmp.gt.f32.partialorder %v6259_v56, 0.5  ;;  %v6439_v27 = vld [vmem:[%s9873_s5 + $0x80] sm:$0xff]  ;;  %v6104_v12 = vld [vmem:[%s9874_s6 + $0x1f8] sm:$0xff]  ;;  %v939_v56 = vpop.permute.xlu1 %938 }
  0xbc   : > { %v761_v31 = vunpack.c.l.b16 %v697_v60  ;;  %v814_v55 = vrot.slane %v7851_v1, 4  ;;  %v7891_v18 = vsel %vm7842_vm10, %v7794_v30, %v7854_v58  ;;  %v7893_v41 = vor.u32 %v786_v21, %v783_v61  ;;  %1728 = vmatpush.bf16.msrb.mxu1 %v6439_v27 }
  0xbd   : > { %9970 = vst [vmem:[#allocation18_spill] sm:$0xff] %v7832_v50  ;;  %v1085_v7 = vrot.slane %v7832_v50, 4  ;;  %v4420_v28 = vsel %vm4412_vm12, 1, %v9879_v3  ;;  %v965_v51 = vsel %vm7828_vm9, 65537, %v9879_v3  ;;  %vm4002_vm13 = vcmp.gt.f32.partialorder %v6102_v33, 0.5 }
  0xbe   : > { %9976 = vst [vmem:[#allocation20_spill] sm:$0xff] %v7891_v18  ;;  %v7899_v2 = vpack.c.b16 %v761_v31, %v760_v8  ;;  %v7904_v48 = vor.u32 %v814_v55, %v811_v22  ;;  %4433 = vperm.xlu1 %6785, %v4420_v28   ;;  %vm4413_vm14 = vcmp.gt.f32.partialorder %v6260_v34, 0.5  ;;  %v4010_v8 = vsel %vm4002_vm13, 1, %v9879_v3  ;;  %v6261_v55 = vld [vmem:[%s9874_s6 + $0x220] sm:$0xff] }
  0xbf   : > { %v7885_v40 = vsel %vm1073_vm5, %v1079_v14, %v1085_v7  ;;  %v1010_v14 = vsel %vm7862_vm11, %v7891_v18, 0  ;;  %v4421_v21 = vsel %vm4413_vm14, 1, %v9879_v3  ;;  %v972_v31 = vunpack.c.l.b16 %v7774_v63  ;;  %4029 = vperm.xlu0 %6784, %v4010_v8   ;;  %v6483_v28 = vld [vmem:[%s9873_s5 + $0x1e0] sm:$0xff] }
  0xc0   : > { %9975 = vst [vmem:[#allocation19_spill] sm:$0xff] %v7885_v40  ;;  %v1234_v46 = vsel %vm7484_vm0, %v7885_v40, 0  ;;  %1671 = vmatmul.bf16.vlgmr.msrb.gmra.mxu3 %v1010_v14  ;;  %v9877_v60 = vrot.slane %v7899_v2, 4  ;;  %v7917_v61 = vsel %vm7842_vm10, %v7893_v41, %v7904_v48  ;;  %4436 = vperm.xlu2 %6786, %v4421_v21   ;;  %vm4004_vm8 = vcmp.gt.f32.partialorder %v6104_v12, 0.5  ;;  %v1842_v21 = vpop.permute.xlu2 %1841 }
  0xc1   : > { %9977 = vst [vmem:[#allocation21_spill] sm:$0xff] %v7899_v2  ;;  %1479 = vmatmul.bf16.gmra.mxu1 %v1234_v46  ;;  %v1011_v22 = vsel %vm7862_vm11, %v7917_v61, 0  ;;  %v973_v63 = vunpack.c.l.b16 %v965_v51  ;;  %v4012_v27 = vsel %vm4004_vm8, 1, %v9879_v3  ;;  %vm4003_vm15 = vcmp.gt.f32.partialorder %v6103_v49, 0.5  ;;  %v6510_v46 = vld [vmem:[%s9873_s5 + $0x2b8] sm:$0xff]  ;;  %2165 = vmatpush.bf16.msra.mxu3 %v6483_v28  ;;  %v1845_v49 = vpop.permute.xlu0 %1844  ;;  %v6262_v28 = vld [vmem:[%s9874_s6 + $0x228] sm:$0xff] }
  0xc2   : > { %9978 = vst [vmem:[#allocation22_spill] sm:$0xff] %v7917_v61  ;;  %v7936_v33 = vsel %vm1073_vm5, %v1081_v25, %v9877_v60  ;;  %1700 = vmatmul.bf16.vlgmr.msrb.gmra.mxu0 %v1011_v22  ;;  %vm4414_vm1 = vcmp.gt.f32.partialorder %v6261_v55, 0.5  ;;  %v6490_v25 = vld [vmem:[%s9873_s5 + $0x218] sm:$0xff]  ;;  %v5035_v14 = vunpack.i.l.s16 %v972_v31  ;;  %vm951_vm2 = vcmp.eq.s32.totalorder %v939_v56, 1  ;;  %2629 = vmatpush.bf16.msra.mxu2 %v6510_v46  ;;  %v6489_v31 = vld [vmem:[%s9873_s5 + $0x210] sm:$0xff] }
  0xc3   : > { %9979 = vst [vmem:[#allocation23_spill] sm:$0xff] %v7936_v33  ;;  %v1235_v34 = vsel %vm7484_vm0, %v7936_v33, 0  ;;  %v4011_v13 = vsel %vm4003_vm15, 1, %v9879_v3  ;;  %v4422_v12 = vsel %vm4414_vm1, 1, %v9879_v3  ;;  %v6482_v51 = vld [vmem:[%s9873_s5 + $0x1d8] sm:$0xff]  ;;  %v5036_v8 = vunpack.i.l.s16 %v973_v63  ;;  %2195 = vmatpush.bf16.msra.mxu0 %v6490_v25  ;;  %v6509_v63 = vld [vmem:[%s9873_s5 + $0x2b0] sm:$0xff]  ;;  %vm7980_vm7 = vmpackc.low %vm951_vm2, %vm951_vm2  ;;  %v7993_v11 = vpop.permute.xlu1 %941 }
  0xc4   : > { %1508 = vmatmul.bf16.gmra.mxu2 %v1235_v34  ;;  %vm950_vm0 = vcmp.eq.s32.totalorder %v7878_v36, 1  ;;  %v7958_v22 = vshrl.u32 %v7401_v54, 16  ;;  %v6502_v55 = vld [vmem:[%s9873_s5 + $0x278] sm:$0xff]  ;;  %vm1864_vm3 = vcmp.eq.s32.totalorder %v1842_v21, 1  ;;  %v7970_v34 = vshll.u32 %v7401_v54, 16 }
  0xc5   : > { %vm993_vm9 = vcmp.ne.s32.totalorder %v5035_v14, %v7238_v9  ;;  %vm7989_vm12 = vmpackc.low %vm950_vm0, %vm950_vm0  ;;  %vm1865_vm13 = vcmp.eq.s32.totalorder %v1845_v49, 1  ;;  %v8000_v56 = vsel %vm1073_vm5, %v1085_v7, %v1071_v53  ;;  %2166 = vmatpush.bf16.msra.mxu3 %v6482_v51  ;;  %2600 = vmatpush.bf16.msra.mxu1 %v6502_v55  ;;  %vm994_vm8 = vcmp.ne.s32.totalorder %v5036_v8, %v7367_v17  ;;  %v6264_v53 = vld [vmem:[%s9874_s6 + $0x238] sm:$0xff] }
  0xc6   : > { %4035 = vperm.xlu1 %6785, %v4012_v27   ;;  %v6263_v27 = vld [vmem:[%s9874_s6 + $0x230] sm:$0xff]  ;;  %v827_v46 = vrot.slane %v7958_v22, 3  ;;  %9984 = vst [vmem:[#allocation24_spill] sm:$0xff] %v8000_v56  ;;  %vm8008_vm14 = vmpackc.low %vm1864_vm3, %vm1864_vm3  ;;  %v8014_v3 = vshll.u32 %v7707_v44, 16  ;;  %vm4415_vm1 = vcmp.gt.f32.partialorder %v6262_v28, 0.5  ;;  %2630 = vmatpush.bf16.msra.mxu2 %v6509_v63  ;;  %v9989_v21 = vmov 0  }
  0xc7   : > { %4032 = vperm.xlu0 %6784, %v4011_v13   ;;  %v830_v13 = vrot.slane %v7970_v34, 4  ;;  %vm4416_vm15 = vcmp.gt.f32.partialorder %v6263_v27, 0.5  ;;  %2196 = vmatpush.bf16.msra.mxu0 %v6489_v31  ;;  %vm8023_vm2 = vmpackc.low %vm994_vm8, %vm993_vm9  ;;  %v967_v55 = vsel %vm7980_vm7, 65537, %v9989_v21  ;;  %v966_v27 = vsel %vm7989_vm12, 65537, %v9989_v21 }
  0xc8   : > { %4439 = vperm.xlu2 %6786, %v4422_v12   ;;  %v8004_v12 = vshrl.u32 %v7707_v44, 16  ;;  %vm1873_vm0 = vmpackc.low %vm1865_vm13, %vm1865_vm13  ;;  %v839_v31 = vrot.slane %v8014_v3, 4  ;;  %v4424_v14 = vsel %vm4416_vm15, 1, %v9989_v21  ;;  %v1237_v63 = vsel %vm7656_vm6, %v8000_v56, 0 }
  0xc9   : > { %v8019_v7 = vor.u32 %v830_v13, %v827_v46  ;;  %v4423_v60 = vsel %vm4415_vm1, 1, %v9989_v21  ;;  %vm4417_vm3 = vcmp.gt.f32.partialorder %v6264_v53, 0.5  ;;  %v1880_v49 = vsel %vm8008_vm14, 65537, %v9989_v21  ;;  %v1848_v56 = vpop.permute.xlu0 %1847  ;;  %2167 = vmatpush.bf16.msra.mxu3 %v6481_v5  ;;  %2601 = vmatpush.bf16.msra.mxu1 %v6501_v43  ;;  %v6500_v5 = vld [vmem:[%s9873_s5 + $0x268] sm:$0xff] }
  0xca   : > { %v836_v8 = vrot.slane %v8004_v12, 3  ;;  %v4425_v13 = vsel %vm4417_vm3, 1, %v9989_v21  ;;  %v974_v24 = vunpack.c.l.b16 %v966_v27  ;;  %v9992_v53 = vrot.slane %v7899_v2, 4 }
  0xcb   : > { %v8044_v28 = vsel %vm799_vm4, %v7854_v58, %v8019_v7  ;;  %v1881_v58 = vsel %vm1873_vm0, 65537, %v9989_v21  ;;  %v975_v36 = vunpack.c.l.b16 %v967_v55  ;;  %v1888_v27 = vunpack.c.l.b16 %v1880_v49 }
  0xcc   : > { %9990 = vst [vmem:[#allocation25_spill] sm:$0xff] %v8044_v28  ;;  %v1013_v25 = vsel %vm8023_vm2, %v8044_v28, 0  ;;  %v8053_v46 = vor.u32 %v839_v31, %v836_v8  ;;  %v8070_v8 = vshrl.u32 %v7407_v0, 16  ;;  %v1889_v55 = vunpack.c.l.b16 %v1881_v58  ;;  %v6488_v58 = vld [vmem:[%s9873_s5 + $0x208] sm:$0xff] }
  0xcd   : > { %v5038_v33 = vunpack.i.l.s16 %v975_v36  ;;  %2197 = vmatpush.bf16.msra.mxu0 %v6488_v58  ;;  %v6487_v36 = vld [vmem:[%s9873_s5 + $0x200] sm:$0xff]  ;;  %vm952_vm7 = vcmp.eq.s32.totalorder %v7993_v11, 1  ;;  %v8105_v35 = vshrl.u32 %v7832_v50, 16  ;;  %vm1866_vm12 = vcmp.eq.s32.totalorder %v1848_v56, 1  ;;  %2602 = vmatpush.bf16.msra.mxu1 %v6500_v5 }
  0xce   : > { %4445 = vperm.xlu1 %6785, %v4424_v14   ;;  %v9991_v14 = vrot.slane %v7578_v57, 4  ;;  %v5306_v39 = vunpack.i.l.s16 %v1889_v55  ;;  %v8118_v55 = vshrl.u32 %v7578_v57, 16  ;;  %v8123_v58 = vshll.u32 %v7578_v57, 16  ;;  %vm8150_vm15 = vmpackc.low %vm952_vm7, %vm952_vm7  ;;  %v6499_v5 = vld [vmem:[%s9873_s5 + $0x260] sm:$0xff] }
  0xcf   : > { %4442 = vperm.xlu0 %6784, %v4423_v60   ;;  %v854_v60 = vrot.slane %v8070_v8, 3  ;;  %vm1001_vm14 = vcmp.ne.s32.totalorder %v5038_v33, %v7367_v17  ;;  %v8126_v43 = vshrl.u32 %v7570_v59, 16  ;;  %v822_v28 = vrot.slane %v8142_v23, 4 }
  0xd0   : > { %v8062_v6 = vsel %vm1073_vm5, %v9992_v53, %v9991_v14  ;;  %1676 = vmatmul.bf16.gmra.mxu3 %v1013_v25  ;;  %4448 = vperm.xlu2 %6786, %v4425_v13   ;;  %v8076_v14 = vshll.u32 %v7407_v0, 16  ;;  %v945_v25 = vpop.permute.xlu2 %944  ;;  %v5037_v13 = vunpack.i.l.s16 %v974_v24  ;;  %v1851_v53 = vpop.permute.xlu1 %1850  ;;  %v6508_v24 = vld [vmem:[%s9873_s5 + $0x2a8] sm:$0xff]  ;;  %9995 = vst [vmem:[#allocation28_spill] sm:$0xff] %v8123_v58  ;;  %v791_v61 = vrot.slane %v8118_v55, 3 }
  0xd1   : > { %1484 = vmatmul.bf16.gmra.mxu1 %v1237_v63  ;;  %9993 = vst [vmem:[#allocation26_spill] sm:$0xff] %v8062_v6  ;;  %v8067_v63 = vsel %vm799_vm4, %v7904_v48, %v8053_v46  ;;  %v1238_v48 = vsel %vm7656_vm6, %v8062_v6, 0  ;;  %vm953_vm6 = vcmp.eq.s32.totalorder %v945_v25, 1  ;;  %v6480_v6 = vld [vmem:[%s9873_s5 + $0x1c8] sm:$0xff]  ;;  %vm1867_vm9 = vcmp.eq.s32.totalorder %v1851_v53, 1  ;;  %2631 = vmatpush.bf16.msra.mxu2 %v6508_v24  ;;  %v6479_v25 = vld [vmem:[%s9873_s5 + $0x1c0] sm:$0xff] }
  0xd2   : > { %9994 = vst [vmem:[#allocation27_spill] sm:$0xff] %v8067_v63  ;;  %v1014_v31 = vsel %vm8023_vm2, %v8067_v63, 0  ;;  %v857_v49 = vrot.slane %v8076_v14, 4  ;;  %vm1000_vm13 = vcmp.ne.s32.totalorder %v5037_v13, %v7238_v9  ;;  %vm8130_vm8 = vmpackc.low %vm953_vm6, %vm953_vm6  ;;  %2168 = vmatpush.bf16.msra.mxu3 %v6480_v6  ;;  %2198 = vmatpush.bf16.msra.mxu0 %v6487_v36  ;;  %v819_v18 = vrot.slane %v8126_v43, 3 }
  0xd3   : > { %1705 = vmatmul.bf16.gmra.mxu0 %v1014_v31  ;;  %v5305_v31 = vunpack.i.l.s16 %v1888_v27  ;;  %v6507_v27 = vld [vmem:[%s9873_s5 + $0x2a0] sm:$0xff]  ;;  %v1750_v63 = vrot.slane %v7777_v4, 4  ;;  %v1751_v6 = vrot.slane %v7780_v37, 5  ;;  %vm8162_vm1 = vmpackc.low %vm1001_vm14, %vm1000_vm13  ;;  %vm1762_vm0 = vsmask.f32 3328  ;;  %2603 = vmatpush.bf16.msra.mxu1 %v6499_v5 }
  0xd4   : > { %1513 = vmatmul.bf16.gmra.mxu2 %v1238_v48  ;;  %v8095_v48 = vor.u32 %v857_v49, %v854_v60  ;;  %v8115_v60 = vshll.u32 %v7832_v50, 16  ;;  %v863_v49 = vrot.slane %v8105_v35, 3  ;;  %v1763_v57 = vrot.slane %v7800_v26, 4  ;;  %vm8173_vm6 = vmpackc.low %vm1867_vm9, %vm1867_vm9 }
  0xd5   : > { %2632 = vmatpush.bf16.msra.mxu2 %v6507_v27  ;;  %vm1905_vm3 = vcmp.ne.s32.totalorder %v5306_v39, %v7367_v17  ;;  %v8179_v13 = vor.u32 %v1751_v6, %v1750_v63  ;;  %v968_v27 = vsel %vm8150_vm15, 65537, %v9989_v21  ;;  %vm8189_vm7 = vmand %vm1073_vm5, %vm1762_vm0  ;;  %vm1904_vm9 = vcmp.ne.s32.totalorder %v5305_v31, %v7238_v9  ;;  %v6526_v6 = vld [vmem:[%s9873_s5 + $0x338] sm:$0xff]  ;;  %v6515_v63 = vld [vmem:[%s9873_s5 + $0x2e0] sm:$0xff] }
  0xd6   : > { %v8137_v40 = vsel %vm799_vm4, %v8019_v7, %v8095_v48  ;;  %v866_v47 = vrot.slane %v8115_v60, 4  ;;  %v794_v7 = vrot.slane %v8123_v58, 4  ;;  %2169 = vmatpush.bf16.msra.mxu3 %v6479_v25  ;;  %vm1874_vm13 = vmpackc.low %vm1866_vm12, %vm1866_vm12  ;;  %3013 = vmatpush.bf16.msrb.mxu0 %v6526_v6  ;;  %v1773_v38 = vrot.slane %v7970_v34, 5 }
  0xd7   : > { %9998 = vst [vmem:[#allocation29_spill] sm:$0xff] %v8137_v40  ;;  %vm8215_vm5 = vmpackc.low %vm1905_vm3, %vm1904_vm9  ;;  %v1882_v39 = vsel %vm1874_vm13, 65537, %v9989_v21  ;;  %v1769_v50 = vrot.slane %v8126_v43, 4  ;;  %v1776_v11 = vrot.slane %v8004_v12, 4 }
  0xd8   : > { %v8166_v36 = vor.u32 %v866_v47, %v863_v49  ;;  %v8177_v33 = vor.u32 %v794_v7, %v791_v61  ;;  %v1764_v47 = vrot.slane %v7807_v20, 5  ;;  %v8185_v49 = vor.u32 %v822_v28, %v819_v18  ;;  %v1854_v6 = vpop.permute.xlu2 %1853  ;;  %v1860_v19 = vpop.permute.xlu1 %1859 }
  0xd9   : > { %v1016_v61 = vsel %vm8162_vm1, %v8137_v40, 0  ;;  %v969_v28 = vsel %vm8130_vm8, 65537, %v9989_v21  ;;  %v1857_v40 = vpop.permute.xlu0 %1856 }
  0xda   : > { %v8202_v15 = vsel %vm799_vm4, %v8053_v46, %v8166_v36  ;;  %v1765_v18 = vor.u32 %v1764_v47, %v1763_v57  ;;  %v8211_v56 = vsel %vm7842_vm10, %v8177_v33, %v8185_v49  ;;  %v976_v46 = vunpack.c.l.b16 %v968_v27 }
  0xdb   : > { %10007 = vst [vmem:[#allocation30_spill] sm:$0xff] %v8202_v15  ;;  %v1883_v57 = vsel %vm8173_vm6, 65537, %v9989_v21  ;;  %v1012_v31 = vsel %vm7862_vm11, %v8211_v56, 0  ;;  %v1017_v24 = vsel %vm8162_vm1, %v8202_v15, 0  ;;  %v977_v25 = vunpack.c.l.b16 %v969_v28  ;;  %v6518_v28 = vld [vmem:[%s9873_s5 + $0x2f8] sm:$0xff] }
  0xdc   : > { %10008 = vst [vmem:[#allocation31_spill] sm:$0xff] %v8211_v56  ;;  %v8228_v32 = vsel %vm8189_vm7, %v8179_v13, %v1765_v18  ;;  %v1891_v10 = vunpack.c.l.b16 %v1883_v57  ;;  %v5039_v47 = vunpack.i.l.s16 %v976_v46  ;;  %v1890_v27 = vunpack.c.l.b16 %v1882_v39  ;;  %v6498_v46 = vld [vmem:[%s9873_s5 + $0x258] sm:$0xff]  ;;  %2658 = vmatpush.bf16.msrb.mxu3 %v6518_v28  ;;  %v6517_v28 = vld [vmem:[%s9873_s5 + $0x2f0] sm:$0xff] }
  0xdd   : > { %10011 = vst [vmem:[#allocation32_spill] sm:$0xff] %v8228_v32  ;;  %v1928_v7 = vsel %vm8215_vm5, %v8228_v32, 0  ;;  %v8250_v57 = vshrl.u32 %v7743_v16, 16  ;;  %v5040_v39 = vunpack.i.l.s16 %v977_v25  ;;  %v1772_v56 = vrot.slane %v7958_v22, 4  ;;  %2604 = vmatpush.bf16.msra.mxu1 %v6498_v46  ;;  %v6497_v46 = vld [vmem:[%s9873_s5 + $0x250] sm:$0xff] }
  0xde   : > { %v5308_v5 = vunpack.i.l.s16 %v1891_v10  ;;  %v5307_v15 = vunpack.i.l.s16 %v1890_v27  ;;  %vm1007_vm10 = vcmp.ne.s32.totalorder %v5039_v47, %v7238_v9  ;;  %vm1868_vm11 = vcmp.eq.s32.totalorder %v1854_v6, 1  ;;  %v6513_v47 = vld [vmem:[%s9873_s5 + $0x2d0] sm:$0xff] }
  0xdf   : > { %v845_v32 = vrot.slane %v8250_v57, 3  ;;  %vm1008_vm12 = vcmp.ne.s32.totalorder %v5040_v39, %v7367_v17  ;;  %vm1869_vm14 = vcmp.eq.s32.totalorder %v1857_v40, 1  ;;  %v8275_v10 = vsel %vm799_vm4, %v8095_v48, %v7794_v30  ;;  %vm1876_vm6 = vmpackc.low %vm1868_vm11, %vm1868_vm11 }
  0xe0   : > { %1681 = vmatmul.bf16.gmra.mxu3 %v1016_v61  ;;  %v6506_v61 = vld [vmem:[%s9873_s5 + $0x298] sm:$0xff]  ;;  %10012 = vst [vmem:[#allocation33_spill] sm:$0xff] %v8275_v10  ;;  %vm8277_vm8 = vmpackc.low %vm1008_vm12, %vm1007_vm10  ;;  %v8281_v27 = vor.u32 %v1773_v38, %v1772_v56  ;;  %vm1911_vm15 = vcmp.ne.s32.totalorder %v5307_v15, %v7238_v9  ;;  %vm1912_vm3 = vcmp.ne.s32.totalorder %v5308_v5, %v7367_v17  ;;  %v8310_v56 = vshrl.u32 %v7899_v2, 16  ;;  %v6504_v5 = vld [vmem:[%s9873_s5 + $0x288] sm:$0xff]  ;;  %v1863_v59 = vpop.permute.xlu2 %1862 }
  0xe1   : > { %1729 = vmatmul.bf16.vlgmr.msrb.gmra.mxu1 %v1012_v31  ;;  %v6525_v31 = vld [vmem:[%s9873_s5 + $0x330] sm:$0xff]  ;;  %2633 = vmatpush.bf16.msra.mxu2 %v6506_v61  ;;  %vm1877_vm9 = vmpackc.low %vm1869_vm14, %vm1869_vm14  ;;  %v1019_v30 = vsel %vm8277_vm8, %v8275_v10, 0  ;;  %v8296_v38 = vsel %vm799_vm4, %v8166_v36, %v7893_v41  ;;  %v1757_v10 = vrot.slane %v8123_v58, 5  ;;  %vm1871_vm11 = vcmp.eq.s32.totalorder %v1863_v59, 1  ;;  %v6520_v15 = vld [vmem:[%s9873_s5 + $0x308] sm:$0xff] }
  0xe2   : > { %3014 = vmatpush.bf16.msrb.mxu0 %v6525_v31  ;;  %10016 = vst [vmem:[#allocation35_spill] sm:$0xff] %v8296_v38  ;;  %v8300_v48 = vsel %vm1762_vm0, %v1765_v18, %v8281_v27  ;;  %vm8302_vm13 = vmpackc.low %vm1912_vm3, %vm1911_vm15  ;;  %v1885_v41 = vsel %vm1877_vm9, 65537, %v9989_v21  ;;  %v1020_v36 = vsel %vm8277_vm8, %v8296_v38, 0  ;;  %v8318_v18 = vshll.u32 %v7899_v2, 16  ;;  %v6524_v31 = vld [vmem:[%s9873_s5 + $0x328] sm:$0xff]  ;;  %2659 = vmatpush.bf16.msrb.mxu3 %v6517_v28 }
  0xe3   : > { %1710 = vmatmul.bf16.gmra.mxu0 %v1017_v24  ;;  %v8259_v24 = vshll.u32 %v7743_v16, 16  ;;  %10017 = vst [vmem:[#allocation36_spill] sm:$0xff] %v8300_v48  ;;  %v1931_v51 = vsel %vm8302_vm13, %v8300_v48, 0  ;;  %v872_v6 = vrot.slane %v8310_v56, 3  ;;  %v1767_v48 = vrot.slane %v7851_v1, 5  ;;  %2605 = vmatpush.bf16.msra.mxu1 %v6497_v46  ;;  %v6496_v28 = vld [vmem:[%s9873_s5 + $0x248] sm:$0xff]  ;;  %vm1879_vm3 = vmpackc.low %vm1871_vm11, %vm1871_vm11 }
  0xe4   : > { %2141 = vmatmul.bf16.vlgmr.msrb.gmra.mxu2 %v1928_v7  ;;  %v6505_v7 = vld [vmem:[%s9873_s5 + $0x290] sm:$0xff]  ;;  %v1756_v38 = vrot.slane %v8118_v55, 4  ;;  %v1770_v16 = vrot.slane %v8142_v23, 5 }
  0xe5   : > { %v848_v25 = vrot.slane %v8259_v24, 4  ;;  %2634 = vmatpush.bf16.msra.mxu2 %v6505_v7  ;;  %v1893_v7 = vunpack.c.l.b16 %v1885_v41  ;;  %v6523_v41 = vld [vmem:[%s9873_s5 + $0x320] sm:$0xff] }
  0xe6   : > { %3015 = vmatpush.bf16.msrb.mxu0 %v6524_v31  ;;  %v6503_v31 = vld [vmem:[%s9873_s5 + $0x280] sm:$0xff]  ;;  %v8363_v0 = vor.u32 %v1757_v10, %v1756_v38  ;;  %v8365_v29 = vor.u32 %v1770_v16, %v1769_v50  ;;  %v1777_v38 = vrot.slane %v8014_v3, 5 }
  0xe7   : > { %v8270_v61 = vor.u32 %v848_v25, %v845_v32  ;;  %v1884_v32 = vsel %vm1876_vm6, 65537, %v9989_v21  ;;  %v875_v25 = vrot.slane %v8318_v18, 4  ;;  %v5310_v44 = vunpack.i.l.s16 %v1893_v7  ;;  %2606 = vmatpush.bf16.msra.mxu1 %v6496_v28 }
  0xe8   : > { %v1892_v39 = vunpack.c.l.b16 %v1884_v32  ;;  %v6516_v32 = vld [vmem:[%s9873_s5 + $0x2e8] sm:$0xff]  ;;  %v8388_v16 = vsel %vm8189_vm7, %v8363_v0, %v8365_v29 }
  0xe9   : > { %v8288_v40 = vsel %vm799_vm4, %v8185_v49, %v8270_v61  ;;  %2635 = vmatpush.bf16.msra.mxu2 %v6504_v5  ;;  %v8361_v5 = vor.u32 %v875_v25, %v872_v6  ;;  %2660 = vmatpush.bf16.msrb.mxu3 %v6516_v32  ;;  %vm1919_vm10 = vcmp.ne.s32.totalorder %v5310_v44, %v7367_v17  ;;  %v1930_v53 = vsel %vm8215_vm5, %v8388_v16, 0  ;;  %v2312_v25 = vpop.permute.xlu1 %2311 }
  0xea   : > { %10015 = vst [vmem:[#allocation34_spill] sm:$0xff] %v8288_v40  ;;  %v1015_v49 = vsel %vm8023_vm2, %v8288_v40, 0  ;;  %v1785_v40 = vrot.slane %v8076_v14, 5  ;;  %3016 = vmatpush.bf16.msrb.mxu0 %v6523_v41  ;;  %v5309_v58 = vunpack.i.l.s16 %v1892_v39  ;;  %vm1870_vm2 = vcmp.eq.s32.totalorder %v1860_v19, 1  ;;  %v6542_v39 = vld [vmem:[%s9873_s5 + $0x3b8] sm:$0xff] }
  0xeb   : > { %v8378_v10 = vsel %vm799_vm4, %v8270_v61, %v8361_v5  ;;  %vm1878_vm12 = vmpackc.low %vm1870_vm2, %vm1870_vm2  ;;  %10021 = vst [vmem:[#allocation38_spill] sm:$0xff] %v8388_v16  ;;  %v1780_v32 = vrot.slane %v8250_v57, 4  ;;  %v1781_v41 = vrot.slane %v8259_v24, 5 }
  0xec   : > { %vm1918_vm14 = vcmp.ne.s32.totalorder %v5309_v58, %v7238_v9  ;;  %v1018_v50 = vsel %vm8162_vm1, %v8378_v10, 0  ;;  %v1886_v58 = vsel %vm1878_vm12, 65537, %v9989_v21  ;;  %vm2332_vm1 = vcmp.eq.s32.totalorder %v2312_v25, 1 }
  0xed   : > { %2636 = vmatpush.bf16.msra.mxu2 %v6503_v31  ;;  %vm8395_vm15 = vmpackc.low %vm1919_vm10, %vm1918_vm14  ;;  %v1894_v6 = vunpack.c.l.b16 %v1886_v58  ;;  %2661 = vmatpush.bf16.msrb.mxu3 %v6515_v63  ;;  %v8450_v63 = vsel %vm799_vm4, %v8361_v5, %v8177_v33  ;;  %v6528_v5 = vld [vmem:[%s9873_s5 + $0x348] sm:$0xff] }
  0xee   : > { %v1021_v25 = vsel %vm8277_vm8, %v8450_v63, 0  ;;  %vm2234_vm8 = vsmask.f32 256 }
  0xef   : > { %v5311_v31 = vunpack.i.l.s16 %v1894_v6 }
  0xf0   : > { %1686 = vmatmul.bf16.gmra.mxu3 %v1019_v30  ;;  %v1753_v30 = vrot.slane %v7821_v45, 4 }
  0xf1   : > { %1734 = vmatmul.bf16.gmra.mxu1 %v1015_v49  ;;  %v1754_v49 = vrot.slane %v7836_v52, 5  ;;  %3071 = vmatpush.bf16.msrb.mxu2 %v6542_v39  ;;  %vm1925_vm9 = vcmp.ne.s32.totalorder %v5311_v31, %v7238_v9  ;;  %v2315_v31 = vpop.permute.xlu2 %2314 }
  0xf3   : > { %1715 = vmatmul.bf16.gmra.mxu0 %v1020_v36  ;;  %v1766_v36 = vrot.slane %v7848_v62, 4  ;;  %v8357_v2 = vor.u32 %v1754_v49, %v1753_v30 }
  0xf4   : > { %2146 = vmatmul.bf16.gmra.mxu2 %v1931_v51  ;;  %v1784_v51 = vrot.slane %v8070_v8, 4 }
  0xf5   : > { %v1768_v46 = vor.u32 %v1767_v48, %v1766_v36  ;;  %v6522_v48 = vld [vmem:[%s9873_s5 + $0x318] sm:$0xff]  ;;  %v2309_v36 = vpop.permute.xlu0 %2308 }
  0xf6   : > { %v8367_v30 = vor.u32 %v1785_v40, %v1784_v51  ;;  %v1887_v40 = vsel %vm1879_vm3, 65537, %v9989_v21  ;;  %3017 = vmatpush.bf16.msrb.mxu0 %v6522_v48  ;;  %v8426_v51 = vor.u32 %v1777_v38, %v1776_v11  ;;  %v6534_v11 = vld [vmem:[%s9873_s5 + $0x378] sm:$0xff]  ;;  %v6541_v38 = vld [vmem:[%s9873_s5 + $0x3b0] sm:$0xff]  ;;  %vm2333_vm3 = vcmp.eq.s32.totalorder %v2315_v31, 1  ;;  %v6539_v31 = vld [vmem:[%s9873_s5 + $0x3a0] sm:$0xff] }
  0xf7   : > { %v8372_v7 = vsel %vm8189_vm7, %v8357_v2, %v1768_v46  ;;  %v1895_v49 = vunpack.c.l.b16 %v1887_v40  ;;  %vm2331_vm7 = vcmp.eq.s32.totalorder %v2309_v36, 1  ;;  %3072 = vmatpush.bf16.msrb.mxu2 %v6541_v38  ;;  %v1793_v38 = vrot.slane %v8318_v18, 5 }
  0xf8   : > { %10020 = vst [vmem:[#allocation37_spill] sm:$0xff] %v8372_v7  ;;  %v1929_v19 = vsel %vm8215_vm5, %v8372_v7, 0  ;;  %v8393_v59 = vsel %vm1762_vm0, %v8281_v27, %v8367_v30  ;;  %v6495_v27 = vld [vmem:[%s9873_s5 + $0x240] sm:$0xff]  ;;  %vm2340_vm5 = vmpackc.low %vm2332_vm1, %vm2332_vm1  ;;  %v8438_v40 = vsel %vm1762_vm0, %v1768_v46, %v8426_v51  ;;  %v8466_v33 = vsel %vm1762_vm0, %v8367_v30, %v8179_v13 }
  0xf9   : > { %10022 = vst [vmem:[#allocation39_spill] sm:$0xff] %v8393_v59  ;;  %v1934_v61 = vsel %vm8395_vm15, %v8393_v59, 0  ;;  %2607 = vmatpush.bf16.msra.mxu1 %v6495_v27  ;;  %v5312_v58 = vunpack.i.l.s16 %v1895_v49  ;;  %v6521_v27 = vld [vmem:[%s9873_s5 + $0x310] sm:$0xff]  ;;  %vm2339_vm6 = vmpackc.low %vm2331_vm7, %vm2331_vm7  ;;  %v1932_v46 = vsel %vm8302_vm13, %v8438_v40, 0  ;;  %v2348_v39 = vsel %vm2340_vm5, 65537, %v9989_v21 }
  0xfa   : > { %10025 = vst [vmem:[#allocation40_spill] sm:$0xff] %v8438_v40  ;;  %3018 = vmatpush.bf16.msrb.mxu0 %v6521_v27  ;;  %v2347_v6 = vsel %vm2339_vm6, 65537, %v9989_v21  ;;  %v2356_v49 = vunpack.c.l.b16 %v2348_v39  ;;  %v1788_v30 = vrot.slane %v8105_v35, 4  ;;  %v9918_v39 = vrot.slane %v7848_v62, 7  ;;  %vm2341_vm5 = vmpackc.low %vm2333_vm3, %vm2333_vm3  ;;  %v6538_v40 = vld [vmem:[%s9873_s5 + $0x398] sm:$0xff] }
  0xfb   : > { %vm1926_vm2 = vcmp.ne.s32.totalorder %v5312_v58, %v7367_v17  ;;  %10027 = vst [vmem:[#allocation42_spill] sm:$0xff] %v8466_v33  ;;  %v2355_v36 = vunpack.c.l.b16 %v2347_v6  ;;  %v9917_v6 = vrot.slane %v7777_v4, 7 }
  0xfc   : > { %vm8468_vm4 = vmpackc.low %vm1926_vm2, %vm1925_vm9  ;;  %v5466_v58 = vunpack.i.l.s16 %v2356_v49 }
  0xfd   : > { %3042 = vmatpush.bf16.msrb.mxu1 %v6534_v11  ;;  %v1937_v13 = vsel %vm8468_vm4, %v8466_v33, 0  ;;  %v2318_v27 = vpop.permute.xlu0 %2317  ;;  %v1792_v11 = vrot.slane %v8310_v56, 4  ;;  %v10046_v33 = vrot.slane %v8126_v43, 7 }
  0xfe   : > { %3019 = vmatpush.bf16.msrb.mxu0 %v6520_v15  ;;  %vm2334_vm10 = vcmp.eq.s32.totalorder %v2318_v27, 1  ;;  %vm2372_vm11 = vcmp.ne.s32.totalorder %v5466_v58, %v7367_v17  ;;  %v2722_v15 = vpop.permute.xlu1 %2721 }
  0xff   : > { %vm2342_vm1 = vmpackc.low %vm2334_vm10, %vm2334_vm10 }
 0x100   : > { %2170 = vmatmul.bf16.vlgmr.msra.gmra.mxu3 %v1929_v19 }
 0x101   : > { %1739 = vmatmul.bf16.gmra.mxu1 %v1018_v50 }
 0x103   : > { %2199 = vmatmul.bf16.vlgmr.msra.gmra.mxu0 %v1930_v53  ;;  %v8428_v53 = vor.u32 %v1781_v41, %v1780_v32  ;;  %v1789_v32 = vrot.slane %v8115_v60, 5  ;;  %v6533_v41 = vld [vmem:[%s9873_s5 + $0x370] sm:$0xff] }
 0x104   : > { %2151 = vmatmul.bf16.gmra.mxu2 %v1934_v61  ;;  %v6514_v61 = vld [vmem:[%s9873_s5 + $0x2d8] sm:$0xff]  ;;  %3043 = vmatpush.bf16.msrb.mxu1 %v6533_v41 }
 0x105   : > { %2662 = vmatpush.bf16.msrb.mxu3 %v6514_v61  ;;  %v8459_v48 = vsel %vm1762_vm0, %v8365_v29, %v8428_v53  ;;  %v5465_v61 = vunpack.i.l.s16 %v2355_v36  ;;  %v8509_v36 = vor.u32 %v1793_v38, %v1792_v11  ;;  %v6532_v11 = vld [vmem:[%s9873_s5 + $0x368] sm:$0xff] }
 0x106   : > { %10026 = vst [vmem:[#allocation41_spill] sm:$0xff] %v8459_v48  ;;  %v1933_v29 = vsel %vm8302_vm13, %v8459_v48, 0  ;;  %vm2277_vm13 = vcmask 1040384   ;;  %v2324_v44 = vpop.permute.xlu1 %2323 }
 0x107   : > { %vm2371_vm12 = vcmp.ne.s32.totalorder %v5465_v61, %v7238_v9  ;;  %vm8513_vm14 = vmand %vm2277_vm13, %vm2234_vm8  ;;  %v8562_v58 = vsel %vm1762_vm0, %v8428_v53, %v8509_v36  ;;  %vm2336_vm6 = vcmp.eq.s32.totalorder %v2324_v44, 1  ;;  %v6557_v44 = vld [vmem:[%s9873_s5 + $0x430] sm:$0xff] }
 0x108   : > { %vm8548_vm7 = vmpackc.low %vm2372_vm11, %vm2371_vm12  ;;  %3044 = vmatpush.bf16.msrb.mxu1 %v6532_v11  ;;  %10035 = vst [vmem:[#allocation44_spill] sm:$0xff] %v8562_v58  ;;  %v1936_v53 = vsel %vm8395_vm15, %v8562_v58, 0 }
 0x109   : > { %2663 = vmatpush.bf16.msrb.mxu3 %v6513_v47  ;;  %v6519_v47 = vld [vmem:[%s9873_s5 + $0x300] sm:$0xff]  ;;  %vm2344_vm11 = vmpackc.low %vm2336_vm6, %vm2336_vm6 }
 0x10a   : > { %3020 = vmatpush.bf16.msrb.mxu0 %v6519_v47  ;;  %v2350_v47 = vsel %vm2342_vm1, 65537, %v9989_v21 }
 0x110   : > { %2175 = vmatmul.bf16.gmra.mxu3 %v1932_v46  ;;  %v8498_v46 = vor.u32 %v1789_v32, %v1788_v30  ;;  %v6512_v32 = vld [vmem:[%s9873_s5 + $0x2c8] sm:$0xff] }
 0x111   : > { %1744 = vmatmul.bf16.gmra.mxu1 %v1021_v25  ;;  %2664 = vmatpush.bf16.msrb.mxu3 %v6512_v32  ;;  %v2725_v32 = vpop.permute.xlu2 %2724 }
 0x112   : > { %v8528_v41 = vsel %vm1762_vm0, %v8426_v51, %v8498_v46  ;;  %vm2745_vm12 = vcmp.eq.s32.totalorder %v2725_v32, 1  ;;  %v8637_v32 = vsel %vm1762_vm0, %v8509_v36, %v8363_v0 }
 0x113   : > { %2204 = vmatmul.bf16.gmra.mxu0 %v1933_v29  ;;  %10032 = vst [vmem:[#allocation43_spill] sm:$0xff] %v8528_v41  ;;  %v1935_v27 = vsel %vm8395_vm15, %v8528_v41, 0  ;;  %vm2744_vm15 = vcmp.eq.s32.totalorder %v2722_v15, 1  ;;  %v10036_v15 = vrot.slane %v7958_v22, 7 }
 0x114   : > { %2156 = vmatmul.bf16.gmra.mxu2 %v1937_v13  ;;  %vm8602_vm2 = vmpackc.low %vm2744_vm15, %vm2744_vm15  ;;  %10044 = vst [vmem:[#allocation46_spill] sm:$0xff] %v8637_v32  ;;  %v6563_v13 = vld [vmem:[%s9873_s5 + $0x460] sm:$0xff] }
 0x115   : > { %vm2753_vm15 = vmpackc.low %vm2745_vm12, %vm2745_vm12  ;;  %v2760_v0 = vsel %vm8602_vm2, 65537, %v9989_v21 }
 0x116   : > { %v1441_v28 = vpop.f32.mrf.mxu0  ;;  %v1470_v19 = vpop.f32.mrf.mxu1  ;;  %v2768_v48 = vunpack.c.l.b16 %v2760_v0 }
 0x117   : > { %v1471_v50 = vadd.f32 %v1470_v19, %v1441_v28  ;;  %v6540_v28 = vld [vmem:[%s9873_s5 + $0x3a8] sm:$0xff]  ;;  %v9920_v19 = vrot.slane %v7800_v26, 7 }
 0x118   : > { %3073 = vmatpush.bf16.msrb.mxu2 %v6540_v28  ;;  %v9919_v28 = vrot.slane %v7821_v45, 7 }
 0x119   : > { %v2236_v25 = vor.u32 %v9920_v19, %v7807_v20  ;;  %v8505_v29 = vpop.f32.mrf.mxu3  ;;  %v2242_v19 = vor.u32 %v10036_v15, %v7970_v34  ;;  %v10045_v15 = vrot.slane %v7848_v62, 7 }
 0x11c   : > { %3074 = vmatpush.bf16.msrb.mxu2 %v6539_v31  ;;  %v2349_v31 = vsel %vm2341_vm5, 65537, %v9989_v21 }
 0x11e   : > { %v8542_v38 = vpop.f32.mrf.mxu0  ;;  %v8564_v61 = vpop.f32.mrf.mxu1 }
 0x120   : > { %2180 = vmatmul.bf16.gmra.mxu3 %v1935_v27  ;;  %3075 = vmatpush.bf16.msrb.mxu2 %v6538_v40  ;;  %v10040_v40 = vrot.slane %v8004_v12, 7 }
 0x123   : > { %v1499_v49 = vpop.f32.mrf.mxu2  ;;  %2209 = vmatmul.bf16.gmra.mxu0 %v1936_v53  ;;  %v2321_v53 = vpop.permute.xlu0 %2320 }
 0x124   : > { %v8517_v30 = vadd.f32 %v1499_v49, %v1471_v50  ;;  %v2238_v50 = vor.u32 %v9918_v39, %v7851_v1  ;;  %v2279_v49 = vsel %vm8513_vm14, %v9917_v6, %v2236_v25  ;;  %v2358_v6 = vunpack.c.l.b16 %v2350_v47  ;;  %v6511_v39 = vld [vmem:[%s9873_s5 + $0x2c0] sm:$0xff] }
 0x125   : > { %v2395_v11 = vsel %vm8548_vm7, %v2279_v49, 0  ;;  %v6558_v49 = vld [vmem:[%s9873_s5 + $0x438] sm:$0xff]  ;;  %2665 = vmatpush.bf16.msrb.mxu3 %v6511_v39  ;;  %vm2335_vm9 = vcmp.eq.s32.totalorder %v2321_v53, 1  ;;  %v2245_v53 = vor.u32 %v10040_v40, %v8014_v3  ;;  %v6537_v40 = vld [vmem:[%s9873_s5 + $0x390] sm:$0xff] }
 0x126   : > { %v2280_v25 = vsel %vm8513_vm14, %v9919_v28, %v2238_v50  ;;  %2608 = vmatmul.bf16.vlgmr.msra.gmra.mxu1 %v2395_v11  ;;  %v8582_v50 = vpop.f32.mrf.mxu3  ;;  %v2357_v28 = vunpack.c.l.b16 %v2349_v31  ;;  %3509 = vmatpush.bf16.msra.mxu0 %v6558_v49  ;;  %v5468_v11 = vunpack.i.l.s16 %v2358_v6  ;;  %v8597_v49 = vpop.permute.xlu2 %2727  ;;  %vm2343_vm3 = vmpackc.low %vm2335_vm9, %vm2335_vm9 }
 0x127   : > { %v2396_v27 = vsel %vm8548_vm7, %v2280_v25, 0  ;;  %v1446_v25 = vpop.f32.mrf.mxu0  ;;  %3076 = vmatpush.bf16.msrb.mxu2 %v6537_v40  ;;  %v6549_v40 = vld [vmem:[%s9873_s5 + $0x3f0] sm:$0xff] }
 0x128   : > { %2637 = vmatmul.bf16.vlgmr.msra.gmra.mxu2 %v2396_v27  ;;  %v6531_v27 = vld [vmem:[%s9873_s5 + $0x360] sm:$0xff]  ;;  %v5467_v31 = vunpack.i.l.s16 %v2357_v28  ;;  %vm2379_vm10 = vcmp.ne.s32.totalorder %v5468_v11, %v7367_v17  ;;  %v6550_v28 = vld [vmem:[%s9873_s5 + $0x3f8] sm:$0xff]  ;;  %v10041_v11 = vrot.slane %v7800_v26, 7 }
 0x129   : > { %3045 = vmatpush.bf16.msrb.mxu1 %v6531_v27  ;;  %3480 = vmatpush.bf16.msra.mxu3 %v6550_v28  ;;  %v2246_v28 = vsel %vm2234_vm8, %v10045_v15, %v2245_v53 }
 0x12a   : > { %vm2378_vm1 = vcmp.ne.s32.totalorder %v5467_v31, %v7238_v9  ;;  %3510 = vmatpush.bf16.msra.mxu0 %v6557_v44  ;;  %v2352_v31 = vsel %vm2344_vm11, 65537, %v9989_v21  ;;  %v6530_v44 = vld [vmem:[%s9873_s5 + $0x358] sm:$0xff] }
 0x12b   : > { %v8595_v39 = vpop.f32.mrf.mxu2  ;;  %vm8625_vm5 = vmpackc.low %vm2379_vm10, %vm2378_vm1  ;;  %v2360_v15 = vunpack.c.l.b16 %v2352_v31  ;;  %v6556_v31 = vld [vmem:[%s9873_s5 + $0x428] sm:$0xff]  ;;  %v2731_v0 = vpop.permute.xlu0 %2730 }
 0x12c   : > { %v1475_v47 = vpop.f32.mrf.mxu1  ;;  %v2399_v58 = vsel %vm8625_vm5, %v2246_v28, 0  ;;  %v2327_v28 = vpop.permute.xlu1 %2326  ;;  %vm2747_vm6 = vcmp.eq.s32.totalorder %v2731_v0, 1 }
 0x12d   : > { %v1476_v6 = vadd.f32 %v1475_v47, %v1446_v25  ;;  %v8616_v47 = vsel %vm1762_vm0, %v8498_v46, %v8357_v2  ;;  %v2243_v25 = vsel %vm2234_vm8, %v10041_v11, %v2242_v19  ;;  %v2351_v19 = vsel %vm2343_vm3, 65537, %v9989_v21  ;;  %3046 = vmatpush.bf16.msrb.mxu1 %v6530_v44  ;;  %3481 = vmatpush.bf16.msra.mxu3 %v6549_v40  ;;  %v6529_v40 = vld [vmem:[%s9873_s5 + $0x350] sm:$0xff]  ;;  %vm2755_vm1 = vmpackc.low %vm2747_vm6, %vm2747_vm6 }
 0x12e   : > { %10039 = vst [vmem:[#allocation45_spill] sm:$0xff] %v8616_v47  ;;  %v8629_v2 = vpop.f32.mrf.mxu3  ;;  %v1938_v46 = vsel %vm8468_vm4, %v8616_v47, 0  ;;  %v2398_v36 = vsel %vm8625_vm5, %v2243_v25, 0  ;;  %v1939_v11 = vsel %vm8468_vm4, %v8637_v32, 0  ;;  %v2359_v16 = vunpack.c.l.b16 %v2351_v19  ;;  %v2330_v47 = vpop.permute.xlu2 %2329  ;;  %3511 = vmatpush.bf16.msra.mxu0 %v6556_v31 }
 0x12f   : > { %v1448_v19 = vpop.f32.mrf.mxu0  ;;  %v2250_v44 = vrot.slane %v8070_v8, 7  ;;  %vm2338_vm0 = vcmp.eq.s32.totalorder %v2330_v47, 1  ;;  %vm2337_vm4 = vcmp.eq.s32.totalorder %v2327_v28, 1  ;;  %vm2746_vm3 = vcmp.eq.s32.totalorder %v8597_v49, 1 }
 0x130   : > { %2185 = vmatmul.bf16.gmra.mxu3 %v1938_v46  ;;  %v2761_v46 = vsel %vm2753_vm15, 65537, %v9989_v21  ;;  %vm8698_vm9 = vmpackc.low %vm2338_vm0, %vm2338_vm0  ;;  %v2763_v51 = vsel %vm2755_vm1, 65537, %v9989_v21 }
 0x131   : > { %v2251_v32 = vor.u32 %v2250_v44, %v8076_v14  ;;  %3047 = vmatpush.bf16.msrb.mxu1 %v6529_v40  ;;  %vm8707_vm12 = vmpackc.low %vm2337_vm4, %vm2337_vm4 }
 0x132   : > { %vm2754_vm4 = vmpackc.low %vm2746_vm3, %vm2746_vm3 }
 0x133   : > { %2214 = vmatmul.bf16.gmra.mxu0 %v1939_v11  ;;  %v5625_v11 = vunpack.i.l.s16 %v2768_v48  ;;  %v6548_v48 = vld [vmem:[%s9873_s5 + $0x3e8] sm:$0xff] }
 0x134   : > { %v1477_v53 = vpop.f32.mrf.mxu1  ;;  %3482 = vmatpush.bf16.msra.mxu3 %v6548_v48  ;;  %v6543_v48 = vld [vmem:[%s9873_s5 + $0x3c0] sm:$0xff] }
 0x135   : > { %vm2784_vm11 = vcmp.ne.s32.totalorder %v5625_v11, %v7238_v9  ;;  %3048 = vmatpush.bf16.msrb.mxu1 %v6528_v5  ;;  %v6535_v5 = vld [vmem:[%s9873_s5 + $0x380] sm:$0xff] }
 0x136   : > { %2613 = vmatmul.bf16.gmra.mxu1 %v2398_v36  ;;  %v2769_v36 = vunpack.c.l.b16 %v2761_v46  ;;  %v2240_v46 = vor.u32 %v10046_v33, %v8142_v23  ;;  %v1478_v33 = vadd.f32 %v1477_v53, %v1448_v19 }
 0x137   : > { %v1504_v7 = vpop.f32.mrf.mxu2 }
 0x138   : > { %2642 = vmatmul.bf16.gmra.mxu2 %v2399_v58  ;;  %v8661_v25 = vadd.f32 %v1504_v7, %v1476_v6  ;;  %v5470_v58 = vunpack.i.l.s16 %v2360_v15  ;;  %v5469_v6 = vunpack.i.l.s16 %v2359_v16  ;;  %v8671_v7 = vpop.f32.mrf.mxu3  ;;  %v6536_v16 = vld [vmem:[%s9873_s5 + $0x388] sm:$0xff]  ;;  %v6555_v15 = vld [vmem:[%s9873_s5 + $0x420] sm:$0xff]  ;;  %v5626_v31 = vunpack.i.l.s16 %v2769_v36 }
 0x139   : > { %3077 = vmatpush.bf16.msrb.mxu2 %v6536_v16  ;;  %3512 = vmatpush.bf16.msra.mxu0 %v6555_v15  ;;  %v10051_v36 = vrot.slane %v8105_v35, 7  ;;  %v10052_v16 = vrot.slane %v8118_v55, 7 }
 0x13a   : > { %vm2385_vm2 = vcmp.ne.s32.totalorder %v5469_v6, %v7238_v9  ;;  %vm2386_vm10 = vcmp.ne.s32.totalorder %v5470_v58, %v7367_v17  ;;  %vm2785_vm15 = vcmp.ne.s32.totalorder %v5626_v31, %v7367_v17  ;;  %v10058_v6 = vrot.slane %v8004_v12, 7 }
 0x13b   : > { %v2254_v40 = vor.u32 %v10051_v36, %v8115_v60  ;;  %v2281_v58 = vsel %vm8513_vm14, %v10052_v16, %v2240_v46  ;;  %vm8730_vm0 = vmpackc.low %vm2386_vm10, %vm2385_vm2  ;;  %v6527_v46 = vld [vmem:[%s9873_s5 + $0x340] sm:$0xff]  ;;  %v2354_v31 = vsel %vm8698_vm9, 65537, %v9989_v21 }
 0x13c   : > { %vm8734_vm14 = vmpackc.low %vm2785_vm15, %vm2784_vm11  ;;  %3049 = vmatpush.bf16.msrb.mxu1 %v6527_v46  ;;  %v1473_v46 = vadd.f32 %v8564_v61, %v8542_v38  ;;  %v6553_v38 = vld [vmem:[%s9873_s5 + $0x410] sm:$0xff] }
 0x13d   : > { %v2255_v0 = vsel %vm2234_vm8, %v10058_v6, %v2254_v40  ;;  %3078 = vmatpush.bf16.msrb.mxu2 %v6535_v5 }
 0x13e   : > { %v1480_v19 = vpop.f32.mrf.mxu1  ;;  %v2402_v40 = vsel %vm8730_vm0, %v2255_v0, 0  ;;  %v2737_v0 = vpop.permute.xlu1 %2736 }
 0x13f   : > { %v1506_v59 = vpop.f32.mrf.mxu2  ;;  %v1481_v28 = vadd.f32 %v1480_v19, %v8505_v29  ;;  %v1701_v49 = vpop.f32.mrf.mxu0  ;;  %v2397_v29 = vsel %vm8548_vm7, %v2281_v58, 0  ;;  %v2762_v19 = vsel %vm2754_vm4, 65537, %v9989_v21  ;;  %v2771_v58 = vunpack.c.l.b16 %v2763_v51 }
 0x140   : > { %v8711_v47 = vadd.f32 %v1506_v59, %v1478_v33  ;;  %v10053_v59 = vrot.slane %v7958_v22, 7  ;;  %2666 = vmatmul.bf16.vlgmr.msrb.gmra.mxu3 %v2397_v29  ;;  %v2808_v33 = vsel %vm8734_vm14, %v7383_v42, 0  ;;  %v6547_v42 = vld [vmem:[%s9873_s5 + $0x3e0] sm:$0xff]  ;;  %v2362_v29 = vunpack.c.l.b16 %v2354_v31  ;;  %v6546_v31 = vld [vmem:[%s9873_s5 + $0x3d8] sm:$0xff] }
 0x141   : > { %v2770_v6 = vunpack.c.l.b16 %v2762_v19  ;;  %3483 = vmatpush.bf16.msra.mxu3 %v6547_v42  ;;  %vm2749_vm7 = vcmp.eq.s32.totalorder %v2737_v0, 1  ;;  %v1502_v19 = vadd.f32 %v8595_v39, %v1473_v46  ;;  %v10062_v39 = vrot.slane %v7821_v45, 7 }
 0x142   : > { %v2252_v11 = vsel %vm2234_vm8, %v10053_v59, %v2251_v32  ;;  %v2353_v32 = vsel %vm8707_vm12, 65537, %v9989_v21  ;;  %v2247_v59 = vrot.slane %v8250_v57, 7  ;;  %v5472_v61 = vunpack.i.l.s16 %v2362_v29  ;;  %vm8795_vm2 = vmpackc.low %vm2749_vm7, %vm2749_vm7 }
 0x143   : > { %v2401_v15 = vsel %vm8730_vm0, %v2252_v11, 0  ;;  %v1672_v53 = vpop.f32.mrf.mxu3  ;;  %v2361_v36 = vunpack.c.l.b16 %v2353_v32  ;;  %3021 = vmatmul.bf16.vlgmr.msrb.gmra.mxu0 %v2808_v33  ;;  %v6554_v11 = vld [vmem:[%s9873_s5 + $0x418] sm:$0xff]  ;;  %v10063_v0 = vrot.slane %v8126_v43, 7 }
 0x144   : > { %v1673_v16 = vadd.f32 %v1672_v53, %v8517_v30  ;;  %v2734_v30 = vpop.permute.xlu0 %2733  ;;  %3513 = vmatpush.bf16.msra.mxu0 %v6554_v11  ;;  %v6574_v33 = vld [vmem:[%s9873_s5 + $0x4b8] sm:$0xff]  ;;  %v5628_v53 = vunpack.i.l.s16 %v2771_v58  ;;  %vm2393_vm12 = vcmp.ne.s32.totalorder %v5472_v61, %v7367_v17  ;;  %v10070_v61 = vrot.slane %v8105_v35, 7 }
 0x145   : > { %v5471_v5 = vunpack.i.l.s16 %v2361_v36  ;;  %3893 = vmatpush.bf16.msra.mxu2 %v6574_v33  ;;  %v5627_v36 = vunpack.i.l.s16 %v2770_v6  ;;  %vm2748_vm6 = vcmp.eq.s32.totalorder %v2734_v30, 1  ;;  %3484 = vmatpush.bf16.msra.mxu3 %v6546_v31  ;;  %v2261_v6 = vor.u32 %v10062_v39, %v7836_v52 }
 0x146   : > { %2618 = vmatmul.bf16.gmra.mxu1 %v2401_v15  ;;  %v1482_v41 = vpop.f32.mrf.mxu1  ;;  %v8772_v32 = vadd.f32 %v1701_v49, %v1673_v16  ;;  %v2248_v49 = vor.u32 %v2247_v59, %v8259_v24  ;;  %v10059_v16 = vrot.slane %v7777_v4, 7  ;;  %vm2792_vm10 = vcmp.ne.s32.totalorder %v5628_v53, %v7367_v17  ;;  %vm8806_vm11 = vmpackc.low %vm2748_vm6, %vm2748_vm6 }
 0x147   : > { %v1509_v51 = vpop.f32.mrf.mxu2  ;;  %v1703_v15 = vpop.f32.mrf.mxu0  ;;  %vm2392_vm9 = vcmp.ne.s32.totalorder %v5471_v5, %v7238_v9  ;;  %v1483_v33 = vadd.f32 %v1482_v41, %v8582_v50  ;;  %vm2791_vm1 = vcmp.ne.s32.totalorder %v5627_v36, %v7238_v9  ;;  %v6566_v50 = vld [vmem:[%s9873_s5 + $0x478] sm:$0xff]  ;;  %v2262_v27 = vsel %vm2234_vm8, %v10070_v61, %v2261_v6 }
 0x148   : > { %2647 = vmatmul.bf16.gmra.mxu2 %v2402_v40  ;;  %v8779_v40 = vadd.f32 %v1509_v51, %v1481_v28  ;;  %v2259_v58 = vor.u32 %v10059_v16, %v7780_v37  ;;  %3514 = vmatpush.bf16.msra.mxu0 %v6553_v38  ;;  %v2249_v30 = vsel %vm2234_vm8, %v10063_v0, %v2248_v49  ;;  %vm8818_vm3 = vmpackc.low %vm2393_vm12, %vm2392_vm9  ;;  %v2764_v36 = vsel %vm8806_vm11, 65537, %v9989_v21 }
 0x149   : > { %vm8825_vm15 = vmpackc.low %vm2792_vm10, %vm2791_vm1  ;;  %3538 = vmatpush.bf16.msra.mxu1 %v6566_v50  ;;  %v2256_v0 = vrot.slane %v8310_v56, 7 }
 0x14a   : > { %v2260_v31 = vsel %vm2234_vm8, %v2250_v44, %v2259_v58  ;;  %v6573_v44 = vld [vmem:[%s9873_s5 + $0x4b0] sm:$0xff]  ;;  %v2811_v16 = vsel %vm8825_vm15, %v7401_v54, 0  ;;  %v2405_v58 = vsel %vm8818_vm3, %v2262_v27, 0  ;;  %v6552_v54 = vld [vmem:[%s9873_s5 + $0x408] sm:$0xff] }
 0x14b   : > { %v1674_v28 = vpop.f32.mrf.mxu3  ;;  %3894 = vmatpush.bf16.msra.mxu2 %v6573_v44 }
 0x14c   : > { %v1675_v42 = vadd.f32 %v1674_v28, %v1502_v19  ;;  %v2765_v19 = vsel %vm8795_vm2, 65537, %v9989_v21  ;;  %v2404_v28 = vsel %vm8818_vm3, %v2260_v31, 0  ;;  %3515 = vmatpush.bf16.msra.mxu0 %v6552_v54  ;;  %v2743_v44 = vpop.permute.xlu0 %2742 }
 0x14d   : > { %v2773_v11 = vunpack.c.l.b16 %v2765_v19  ;;  %v6551_v19 = vld [vmem:[%s9873_s5 + $0x400] sm:$0xff] }
 0x14e   : > { %v1485_v29 = vpop.f32.mrf.mxu1  ;;  %v8812_v51 = vadd.f32 %v1703_v15, %v1675_v42 }
 0x14f   : > { %v1486_v5 = vadd.f32 %v1485_v29, %v8629_v2  ;;  %v1511_v53 = vpop.f32.mrf.mxu2  ;;  %v2400_v2 = vsel %vm8625_vm5, %v2249_v30, 0  ;;  %v2772_v29 = vunpack.c.l.b16 %v2764_v36  ;;  %v6545_v30 = vld [vmem:[%s9873_s5 + $0x3d0] sm:$0xff]  ;;  %v2740_v36 = vpop.permute.xlu2 %2739  ;;  %vm2751_vm5 = vcmp.eq.s32.totalorder %v2743_v44, 1 }
 0x150   : > { %v8835_v41 = vadd.f32 %v1511_v53, %v1483_v33  ;;  %v1706_v15 = vpop.f32.mrf.mxu0  ;;  %2671 = vmatmul.bf16.gmra.mxu3 %v2400_v2  ;;  %v6572_v53 = vld [vmem:[%s9873_s5 + $0x4a8] sm:$0xff]  ;;  %v5630_v2 = vunpack.i.l.s16 %v2773_v11  ;;  %3516 = vmatpush.bf16.msra.mxu0 %v6551_v19  ;;  %vm2750_vm6 = vcmp.eq.s32.totalorder %v2740_v36, 1  ;;  %vm2759_vm9 = vmpackc.low %vm2751_vm5, %vm2751_vm5  ;;  %v6590_v19 = vld [vmem:[%s9873_s5 + $0x538] sm:$0xff]  ;;  %v3189_v36 = vpop.permute.xlu1 %3188 }
 0x151   : > { %3485 = vmatpush.bf16.msra.mxu3 %v6545_v30  ;;  %v5629_v50 = vunpack.i.l.s16 %v2772_v29  ;;  %3895 = vmatpush.bf16.msra.mxu2 %v6572_v53  ;;  %vm2758_vm10 = vmpackc.low %vm2750_vm6, %vm2750_vm6 }
 0x152   : > { %vm2799_vm4 = vcmp.ne.s32.totalorder %v5630_v2, %v7367_v17  ;;  %v10074_v2 = vld [vmem:[#allocation2_spill] sm:$0xff] }
 0x153   : > { %3026 = vmatmul.bf16.gmra.mxu0 %v2811_v16  ;;  %v1677_v42 = vpop.f32.mrf.mxu3  ;;  %vm2798_vm7 = vcmp.ne.s32.totalorder %v5629_v50, %v7238_v9  ;;  %v10075_v50 = vld [vmem:[#allocation9_spill] sm:$0xff] }
 0x154   : > { %v1678_v39 = vadd.f32 %v1677_v42, %v8661_v25  ;;  %v6565_v25 = vld [vmem:[%s9873_s5 + $0x470] sm:$0xff]  ;;  %vm8891_vm2 = vmpackc.low %vm2799_vm4, %vm2798_vm7  ;;  %v2810_v44 = vsel %vm8734_vm14, %v10075_v50, 0  ;;  %3951 = vmatpush.bf16.msrb.mxu0 %v6590_v19  ;;  %vm3108_vm7 = vsmask.f32 7424  ;;  %v3117_v19 = vrot.slane %v8142_v23, 1 }
 0x155   : > { %3539 = vmatpush.bf16.msra.mxu1 %v6565_v25  ;;  %v10073_v25 = vld [vmem:[#allocation4_spill] sm:$0xff] }
 0x156   : > { %2623 = vmatmul.bf16.gmra.mxu1 %v2404_v28  ;;  %v1487_v6 = vpop.f32.mrf.mxu1  ;;  %v8862_v33 = vadd.f32 %v1706_v15, %v1678_v39  ;;  %v6544_v15 = vld [vmem:[%s9873_s5 + $0x3c8] sm:$0xff]  ;;  %v2809_v53 = vsel %vm8734_vm14, %v10073_v25, 0  ;;  %v6582_v25 = vld [vmem:[%s9873_s5 + $0x4f8] sm:$0xff] }
 0x157   : > { %v1488_v46 = vadd.f32 %v1487_v6, %v8671_v7  ;;  %v1514_v31 = vpop.f32.mrf.mxu2  ;;  %v2257_v7 = vor.u32 %v2256_v0, %v8318_v18  ;;  %3486 = vmatpush.bf16.msra.mxu3 %v6544_v15 }
 0x158   : > { %2652 = vmatmul.bf16.gmra.mxu2 %v2405_v58  ;;  %v8870_v61 = vadd.f32 %v1514_v31, %v1486_v5  ;;  %v1708_v27 = vpop.f32.mrf.mxu0  ;;  %v2767_v31 = vsel %vm2759_vm9, 65537, %v9989_v21 }
 0x159   : > { %v2258_v16 = vsel %vm2234_vm8, %v2247_v59, %v2257_v7  ;;  %v6571_v59 = vld [vmem:[%s9873_s5 + $0x4a0] sm:$0xff]  ;;  %v2775_v7 = vunpack.c.l.b16 %v2767_v31 }
 0x15a   : > { %v2403_v29 = vsel %vm8730_vm0, %v2258_v16, 0  ;;  %3896 = vmatpush.bf16.msra.mxu2 %v6571_v59  ;;  %vm3211_vm0 = vcmp.eq.s32.totalorder %v3189_v36, 1 }
 0x15b   : > { %v1679_v5 = vpop.f32.mrf.mxu3  ;;  %3487 = vmatpush.bf16.msra.mxu3 %v6543_v48  ;;  %v10077_v48 = vrot.slane %v8118_v55, 7  ;;  %vm3219_vm11 = vmpackc.low %vm3211_vm0, %vm3211_vm0 }
 0x15c   : > { %v1680_v28 = vadd.f32 %v1679_v5, %v8711_v47  ;;  %v6564_v47 = vld [vmem:[%s9873_s5 + $0x468] sm:$0xff]  ;;  %v3227_v50 = vsel %vm3219_vm11, 65537, %v9989_v21 }
 0x15d   : > { %3540 = vmatpush.bf16.msra.mxu1 %v6564_v47  ;;  %v3235_v49 = vunpack.c.l.b16 %v3227_v50  ;;  %v3195_v50 = vpop.permute.xlu0 %3194 }
 0x15e   : > { %v8887_v58 = vadd.f32 %v1708_v27, %v1680_v28  ;;  %v1730_v11 = vpop.f32.mrf.mxu1  ;;  %v3192_v28 = vpop.permute.xlu2 %3191 }
 0x15f   : > { %v1516_v42 = vpop.f32.mrf.mxu2  ;;  %v8904_v54 = vadd.f32 %v1730_v11, %v8772_v32  ;;  %v2766_v32 = vsel %vm2758_vm10, 65537, %v9989_v21  ;;  %vm3212_vm14 = vcmp.eq.s32.totalorder %v3192_v28, 1  ;;  %3922 = vmatpush.bf16.msrb.mxu3 %v6582_v25  ;;  %v3198_v25 = vpop.permute.xlu1 %3197 }
 0x160   : > { %v8901_v6 = vadd.f32 %v1516_v42, %v1488_v46  ;;  %v1711_v30 = vpop.f32.mrf.mxu0  ;;  %2676 = vmatmul.bf16.gmra.mxu3 %v2403_v29  ;;  %v2814_v46 = vsel %vm8891_vm2, %v10074_v2, 0  ;;  %v2774_v5 = vunpack.c.l.b16 %v2766_v32  ;;  %v5632_v29 = vunpack.i.l.s16 %v2775_v7  ;;  %vm3220_vm1 = vmpackc.low %vm3212_vm14, %vm3212_vm14 }
 0x161   : > { %3541 = vmatpush.bf16.msra.mxu1 %v6563_v13  ;;  %v3228_v36 = vsel %vm3220_vm1, 65537, %v9989_v21 }
 0x162   : > { %v5631_v2 = vunpack.i.l.s16 %v2774_v5  ;;  %vm2806_vm12 = vcmp.ne.s32.totalorder %v5632_v29, %v7367_v17 }
 0x163   : > { %3031 = vmatmul.bf16.gmra.mxu0 %v2814_v46  ;;  %v1682_v27 = vpop.f32.mrf.mxu3 }
 0x164   : > { %v1683_v15 = vadd.f32 %v1682_v27, %v8779_v40  ;;  %v6570_v40 = vld [vmem:[%s9873_s5 + $0x498] sm:$0xff]  ;;  %vm2805_vm5 = vcmp.ne.s32.totalorder %v5631_v2, %v7238_v9  ;;  %v3109_v2 = vrot.slane %v7807_v20, 1 }
 0x165   : > { %3897 = vmatpush.bf16.msra.mxu2 %v6570_v40  ;;  %vm8959_vm4 = vmpackc.low %vm2806_vm12, %vm2805_vm5  ;;  %v10081_v40 = vld [vmem:[#allocation3_spill] sm:$0xff] }
 0x166   : > { %3050 = vmatmul.bf16.vlgmr.msrb.gmra.mxu1 %v2809_v53  ;;  %v8924_v16 = vadd.f32 %v1711_v30, %v1683_v15  ;;  %v1732_v11 = vpop.f32.mrf.mxu1  ;;  %v10076_v30 = vld [vmem:[#allocation28_spill] sm:$0xff]  ;;  %v2817_v29 = vsel %vm8959_vm4, %v10081_v40, 0  ;;  %v6580_v40 = vld [vmem:[%s9873_s5 + $0x4e8] sm:$0xff] }
 0x167   : > { %v8926_v42 = vpop.f32.mrf.mxu2  ;;  %v8935_v59 = vadd.f32 %v1732_v11, %v8812_v51  ;;  %v2263_v31 = vor.u32 %v10077_v48, %v10076_v30  ;;  %v6589_v53 = vld [vmem:[%s9873_s5 + $0x530] sm:$0xff]  ;;  %v10080_v11 = vld [vmem:[#allocation14_spill] sm:$0xff] }
 0x168   : > { %3079 = vmatmul.bf16.vlgmr.msrb.gmra.mxu2 %v2810_v44  ;;  %v1713_v47 = vpop.f32.mrf.mxu0  ;;  %3952 = vmatpush.bf16.msrb.mxu0 %v6589_v53  ;;  %v2812_v13 = vsel %vm8825_vm15, %v10080_v11, 0  ;;  %v10082_v48 = vld [vmem:[#allocation16_spill] sm:$0xff]  ;;  %v3110_v11 = vor.u32 %v3109_v2, %v7800_v26 }
 0x169   : > { %v2264_v32 = vsel %vm2234_vm8, %v2256_v0, %v2263_v31  ;;  %v6569_v0 = vld [vmem:[%s9873_s5 + $0x490] sm:$0xff]  ;;  %vm3214_vm8 = vcmp.eq.s32.totalorder %v3198_v25, 1  ;;  %v3201_v25 = vpop.permute.xlu2 %3200 }
 0x16a   : > { %v2406_v15 = vsel %vm8818_vm3, %v2264_v32, 0  ;;  %3898 = vmatpush.bf16.msra.mxu2 %v6569_v0  ;;  %v5785_v32 = vunpack.i.l.s16 %v3235_v49  ;;  %v6561_v0 = vld [vmem:[%s9873_s5 + $0x450] sm:$0xff]  ;;  %vm3213_vm3 = vcmp.eq.s32.totalorder %v3195_v50, 1  ;;  %vm3222_vm6 = vmpackc.low %vm3214_vm8, %vm3214_vm8 }
 0x16b   : > { %v1684_v51 = vpop.f32.mrf.mxu3  ;;  %vm3221_vm10 = vmpackc.low %vm3213_vm3, %vm3213_vm3 }
 0x16c   : > { %v1685_v46 = vadd.f32 %v1684_v51, %v8835_v41  ;;  %v6562_v41 = vld [vmem:[%s9873_s5 + $0x458] sm:$0xff]  ;;  %v6581_v51 = vld [vmem:[%s9873_s5 + $0x4f0] sm:$0xff] }
 0x16d   : > { %3542 = vmatpush.bf16.msra.mxu1 %v6562_v41  ;;  %3923 = vmatpush.bf16.msrb.mxu3 %v6581_v51  ;;  %v3113_v41 = vrot.slane %v7851_v1, 1  ;;  %v3229_v51 = vsel %vm3221_vm10, 65537, %v9989_v21  ;;  %v6601_v1 = vld [vmem:[%s9873_s5 + $0x590] sm:$0xff] }
 0x16e   : > { %v8953_v44 = vadd.f32 %v1713_v47, %v1685_v46  ;;  %v1735_v7 = vpop.f32.mrf.mxu1  ;;  %v3236_v47 = vunpack.c.l.b16 %v3228_v36  ;;  %v6588_v46 = vld [vmem:[%s9873_s5 + $0x528] sm:$0xff] }
 0x16f   : > { %v8955_v27 = vpop.f32.mrf.mxu2  ;;  %v8971_v28 = vadd.f32 %v1735_v7, %v8862_v33  ;;  %v2813_v33 = vsel %vm8825_vm15, %v10082_v48, 0  ;;  %3953 = vmatpush.bf16.msrb.mxu0 %v6588_v46  ;;  %v6568_v36 = vld [vmem:[%s9873_s5 + $0x488] sm:$0xff]  ;;  %vm3251_vm15 = vcmp.ne.s32.totalorder %v5785_v32, %v7238_v9 }
 0x170   : > { %v1716_v5 = vpop.f32.mrf.mxu0  ;;  %2681 = vmatmul.bf16.gmra.mxu3 %v2406_v15  ;;  %v5786_v38 = vunpack.i.l.s16 %v3236_v47  ;;  %3899 = vmatpush.bf16.msra.mxu2 %v6568_v36  ;;  %v3115_v47 = vrot.slane %v8014_v3, 1 }
 0x171   : > { %3543 = vmatpush.bf16.msra.mxu1 %v6561_v0  ;;  %3924 = vmatpush.bf16.msrb.mxu3 %v6580_v40  ;;  %v6559_v0 = vld [vmem:[%s9873_s5 + $0x440] sm:$0xff] }
 0x172   : > { %vm3252_vm9 = vcmp.ne.s32.totalorder %v5786_v38, %v7367_v17 }
 0x173   : > { %3036 = vmatmul.bf16.gmra.mxu0 %v2817_v29  ;;  %v1687_v31 = vpop.f32.mrf.mxu3  ;;  %v6587_v29 = vld [vmem:[%s9873_s5 + $0x520] sm:$0xff]  ;;  %vm9027_vm0 = vmpackc.low %vm3252_vm9, %vm3251_vm15 }
 0x174   : > { %v1688_v53 = vadd.f32 %v1687_v31, %v8870_v61  ;;  %3954 = vmatpush.bf16.msrb.mxu0 %v6587_v29 }
 0x176   : > { %3055 = vmatmul.bf16.gmra.mxu1 %v2812_v13  ;;  %v8990_v7 = vadd.f32 %v1716_v5, %v1688_v53  ;;  %v1737_v61 = vpop.f32.mrf.mxu1  ;;  %v3111_v13 = vrot.slane %v7970_v34, 1  ;;  %v3114_v34 = vor.u32 %v3113_v41, %v7848_v62  ;;  %v3230_v53 = vsel %vm3222_vm6, 65537, %v9989_v21 }
 0x177   : > { %v8992_v15 = vpop.f32.mrf.mxu2  ;;  %v9002_v49 = vadd.f32 %v1737_v61, %v8887_v58  ;;  %v6560_v58 = vld [vmem:[%s9873_s5 + $0x448] sm:$0xff]  ;;  %v3238_v36 = vunpack.c.l.b16 %v3230_v53  ;;  %v6586_v53 = vld [vmem:[%s9873_s5 + $0x518] sm:$0xff] }
 0x178   : > { %3084 = vmatmul.bf16.gmra.mxu2 %v2813_v33  ;;  %v1718_v5 = vpop.f32.mrf.mxu0  ;;  %v3112_v31 = vsel %vm3108_vm7, %v3110_v11, %v3111_v13  ;;  %3544 = vmatpush.bf16.msra.mxu1 %v6560_v58  ;;  %v3116_v50 = vsel %vm3108_vm7, %v3114_v34, %v3115_v47  ;;  %v10085_v11 = vld [vmem:[#allocation18_spill] sm:$0xff]  ;;  %v10086_v58 = vld [vmem:[#allocation21_spill] sm:$0xff]  ;;  %v3204_v34 = vpop.permute.xlu0 %3203 }
 0x179   : > { %v3275_v3 = vsel %vm9027_vm0, %v3112_v31, 0  ;;  %v2815_v40 = vsel %vm8891_vm2, %v10085_v11, 0  ;;  %v3276_v29 = vsel %vm9027_vm0, %v3116_v50, 0  ;;  %v6579_v31 = vld [vmem:[%s9873_s5 + $0x4e0] sm:$0xff]  ;;  %3955 = vmatpush.bf16.msrb.mxu0 %v6586_v53  ;;  %vm3216_vm14 = vcmp.eq.s32.totalorder %v3204_v34, 1 }
 0x17a   : > { %3925 = vmatpush.bf16.msrb.mxu3 %v6579_v31  ;;  %v3121_v11 = vor.u32 %v3111_v13, %v7958_v22  ;;  %vm3224_vm8 = vmpackc.low %vm3216_vm14, %vm3216_vm14  ;;  %v3124_v13 = vor.u32 %v3115_v47, %v8004_v12 }
 0x17b   : > { %v1689_v26 = vpop.f32.mrf.mxu3  ;;  %v3232_v34 = vsel %vm3224_vm8, 65537, %v9989_v21 }
 0x17c   : > { %v1690_v33 = vadd.f32 %v1689_v26, %v8901_v6  ;;  %v6567_v6 = vld [vmem:[%s9873_s5 + $0x480] sm:$0xff]  ;;  %3545 = vmatpush.bf16.msra.mxu1 %v6559_v0 }
 0x17d   : > { %3900 = vmatpush.bf16.msra.mxu2 %v6567_v6 }
 0x17e   : > { %v9035_v46 = vadd.f32 %v1718_v5, %v1690_v33  ;;  %v1740_v62 = vpop.f32.mrf.mxu1  ;;  %v3237_v5 = vunpack.c.l.b16 %v3229_v51  ;;  %v5788_v51 = vunpack.i.l.s16 %v3238_v36  ;;  %v6585_v36 = vld [vmem:[%s9873_s5 + $0x510] sm:$0xff] }
 0x17f   : > { %v9037_v32 = vpop.f32.mrf.mxu2  ;;  %v9046_v38 = vadd.f32 %v1740_v62, %v8924_v16  ;;  %v2816_v16 = vsel %vm8891_vm2, %v10086_v58, 0  ;;  %vm3215_vm2 = vcmp.eq.s32.totalorder %v3201_v25, 1  ;;  %v6578_v25 = vld [vmem:[%s9873_s5 + $0x4d8] sm:$0xff]  ;;  %3956 = vmatpush.bf16.msrb.mxu0 %v6585_v36 }
 0x180   : > { %v2200_v61 = vpop.f32.mrf.mxu0  ;;  %3488 = vmatmul.bf16.vlgmr.msra.gmra.mxu3 %v3275_v3  ;;  %v5787_v62 = vunpack.i.l.s16 %v3237_v5  ;;  %v3602_v3 = vpop.permute.xlu1 %3601  ;;  %vm3259_vm11 = vcmp.ne.s32.totalorder %v5788_v51, %v7367_v17  ;;  %vm9086_vm1 = vmpackc.low %vm3215_vm2, %vm3215_vm2 }
 0x181   : > { %v3605_v5 = vpop.permute.xlu2 %3604  ;;  %vm3624_vm5 = vcmp.eq.s32.totalorder %v3602_v3, 1  ;;  %3926 = vmatpush.bf16.msrb.mxu3 %v6578_v25  ;;  %v3231_v51 = vsel %vm9086_vm1, 65537, %v9989_v21  ;;  %v10091_v25 = vld [vmem:[#allocation5_spill] sm:$0xff] }
 0x182   : > { %vm3258_vm12 = vcmp.ne.s32.totalorder %v5787_v62, %v7238_v9  ;;  %vm3625_vm3 = vcmp.eq.s32.totalorder %v3605_v5, 1  ;;  %vm3632_vm6 = vmpackc.low %vm3624_vm5, %vm3624_vm5  ;;  %v2818_v36 = vsel %vm8959_vm4, %v10091_v25, 0  ;;  %v3239_v22 = vunpack.c.l.b16 %v3231_v51 }
 0x183   : > { %3517 = vmatmul.bf16.vlgmr.msra.gmra.mxu0 %v3276_v29  ;;  %v2171_v26 = vpop.f32.mrf.mxu3  ;;  %v3125_v29 = vrot.slane %v8115_v60, 1  ;;  %vm9096_vm15 = vmpackc.low %vm3259_vm11, %vm3258_vm12  ;;  %v3640_v62 = vsel %vm3632_vm6, 65537, %v9989_v21 }
 0x184   : > { %v2172_v33 = vadd.f32 %v2171_v26, %v8926_v42  ;;  %vm3633_vm9 = vmpackc.low %vm3625_vm3, %vm3625_vm3 }
 0x185   : > { %v3126_v53 = vsel %vm3108_vm7, %v3124_v13, %v3125_v29  ;;  %v3641_v5 = vsel %vm3633_vm9, 65537, %v9989_v21  ;;  %v10092_v13 = vld [vmem:[#allocation10_spill] sm:$0xff] }
 0x186   : > { %3060 = vmatmul.bf16.gmra.mxu1 %v2815_v40  ;;  %v9066_v39 = vadd.f32 %v2200_v61, %v2172_v33  ;;  %v1742_v6 = vpop.f32.mrf.mxu1  ;;  %v3122_v40 = vrot.slane %v8076_v14, 1  ;;  %v6606_v61 = vld [vmem:[%s9873_s5 + $0x5b8] sm:$0xff]  ;;  %v3207_v33 = vpop.permute.xlu0 %3206  ;;  %v3649_v51 = vunpack.c.l.b16 %v3641_v5  ;;  %v6597_v5 = vld [vmem:[%s9873_s5 + $0x570] sm:$0xff] }
 0x187   : > { %v9068_v50 = vpop.f32.mrf.mxu2  ;;  %v9071_v42 = vadd.f32 %v1742_v6, %v8953_v44  ;;  %4335 = vmatpush.bf16.msrb.mxu2 %v6606_v61  ;;  %v3240_v61 = vunpack.c.l.b16 %v3232_v34  ;;  %vm3217_vm10 = vcmp.eq.s32.totalorder %v3207_v33, 1 }
 0x188   : > { %3089 = vmatmul.bf16.gmra.mxu2 %v2816_v16  ;;  %v2202_v0 = vpop.f32.mrf.mxu0  ;;  %v3123_v16 = vsel %vm3108_vm7, %v3121_v11, %v3122_v40  ;;  %v6605_v11 = vld [vmem:[%s9873_s5 + $0x5b0] sm:$0xff]  ;;  %v3210_v34 = vpop.permute.xlu1 %3209  ;;  %vm3225_vm1 = vmpackc.low %vm3217_vm10, %vm3217_vm10 }
 0x189   : > { %v3608_v14 = vpop.permute.xlu2 %3607 }
 0x18a   : > { %vm3626_vm6 = vcmp.eq.s32.totalorder %v3608_v14, 1 }
 0x18b   : > { %v2173_v44 = vpop.f32.mrf.mxu3  ;;  %4336 = vmatpush.bf16.msrb.mxu2 %v6605_v11  ;;  %vm3634_vm10 = vmpackc.low %vm3626_vm6, %vm3626_vm6 }
 0x18c   : > { %v2174_v58 = vadd.f32 %v2173_v44, %v8955_v27  ;;  %v3278_v27 = vsel %vm9096_vm15, %v3123_v16, 0  ;;  %v3648_v44 = vunpack.c.l.b16 %v3640_v62  ;;  %v5790_v62 = vunpack.i.l.s16 %v3240_v61 }
 0x18d   : > { %v3131_v61 = vrot.slane %v7780_v37, 1 }
 0x18e   : > { %v9101_v31 = vadd.f32 %v2202_v0, %v2174_v58  ;;  %v1745_v47 = vpop.f32.mrf.mxu1  ;;  %v6598_v0 = vld [vmem:[%s9873_s5 + $0x578] sm:$0xff]  ;;  %v2819_v58 = vsel %vm8959_vm4, %v10092_v13, 0  ;;  %v5945_v25 = vunpack.i.l.s16 %v3648_v44  ;;  %vm3218_vm4 = vcmp.eq.s32.totalorder %v3210_v34, 1 }
 0x18f   : > { %v9103_v12 = vpop.f32.mrf.mxu2  ;;  %v9115_v3 = vadd.f32 %v1745_v47, %v8990_v7  ;;  %v3279_v7 = vsel %vm9096_vm15, %v3126_v53, 0  ;;  %4306 = vmatpush.bf16.msrb.mxu1 %v6598_v0  ;;  %v6584_v53 = vld [vmem:[%s9873_s5 + $0x508] sm:$0xff]  ;;  %v5789_v0 = vunpack.i.l.s16 %v3239_v22  ;;  %v5946_v44 = vunpack.i.l.s16 %v3649_v51  ;;  %vm9166_vm14 = vmpackc.low %vm3218_vm4, %vm3218_vm4 }
 0x190   : > { %v2205_v6 = vpop.f32.mrf.mxu0  ;;  %3493 = vmatmul.bf16.gmra.mxu3 %v3278_v27  ;;  %v6577_v27 = vld [vmem:[%s9873_s5 + $0x4d0] sm:$0xff]  ;;  %3957 = vmatpush.bf16.msrb.mxu0 %v6584_v53  ;;  %v6604_v22 = vld [vmem:[%s9873_s5 + $0x5a8] sm:$0xff]  ;;  %vm3266_vm2 = vcmp.ne.s32.totalorder %v5790_v62, %v7367_v17  ;;  %vm3664_vm12 = vcmp.ne.s32.totalorder %v5945_v25, %v7238_v9  ;;  %v3134_v53 = vrot.slane %v7836_v52, 1  ;;  %v3234_v60 = vsel %vm9166_vm14, 65537, %v9989_v21 }
 0x191   : > { %3927 = vmatpush.bf16.msrb.mxu3 %v6577_v27  ;;  %4337 = vmatpush.bf16.msrb.mxu2 %v6604_v22  ;;  %vm3265_vm11 = vcmp.ne.s32.totalorder %v5789_v0, %v7238_v9  ;;  %v3133_v27 = vor.u32 %v3125_v29, %v8105_v35  ;;  %vm3665_vm3 = vcmp.ne.s32.totalorder %v5946_v44, %v7367_v17  ;;  %v6603_v22 = vld [vmem:[%s9873_s5 + $0x5a0] sm:$0xff]  ;;  %v3242_v44 = vunpack.c.l.b16 %v3234_v60  ;;  %v6618_v35 = vld [vmem:[%s9873_s5 + $0x618] sm:$0xff] }
 0x192   : > { %vm9188_vm8 = vmpackc.low %vm3266_vm2, %vm3265_vm11 }
 0x193   : > { %3522 = vmatmul.bf16.gmra.mxu0 %v3279_v7  ;;  %v2176_v16 = vpop.f32.mrf.mxu3  ;;  %4307 = vmatpush.bf16.msrb.mxu1 %v6597_v5  ;;  %vm9193_vm9 = vmpackc.low %vm3665_vm3, %vm3664_vm12  ;;  %v5792_v60 = vunpack.i.l.s16 %v3242_v44  ;;  %v6602_v44 = vld [vmem:[%s9873_s5 + $0x598] sm:$0xff] }
 0x194   : > { %v2177_v47 = vadd.f32 %v2176_v16, %v8992_v15  ;;  %v3118_v16 = vor.u32 %v3117_v19, %v8126_v43 }
 0x195   : > { %4338 = vmatpush.bf16.msrb.mxu2 %v6603_v22  ;;  %vm3273_vm2 = vcmp.ne.s32.totalorder %v5792_v60, %v7367_v17  ;;  %v6594_v60 = vld [vmem:[%s9873_s5 + $0x558] sm:$0xff] }
 0x196   : > { %3065 = vmatmul.bf16.gmra.mxu1 %v2818_v36  ;;  %v9139_v11 = vadd.f32 %v2205_v6, %v2177_v47  ;;  %v1747_v36 = vpop.f32.mrf.mxu1  ;;  %v3130_v6 = vor.u32 %v3122_v40, %v8070_v8  ;;  %v6583_v8 = vld [vmem:[%s9873_s5 + $0x500] sm:$0xff]  ;;  %v3119_v47 = vrot.slane %v8259_v24, 1 }
 0x197   : > { %v9142_v15 = vpop.f32.mrf.mxu2  ;;  %v9145_v7 = vadd.f32 %v1747_v36, %v9035_v46  ;;  %v6576_v46 = vld [vmem:[%s9873_s5 + $0x4c8] sm:$0xff]  ;;  %3958 = vmatpush.bf16.msrb.mxu0 %v6583_v8 }
 0x198   : > { %3094 = vmatmul.bf16.gmra.mxu2 %v2819_v58  ;;  %v2207_v13 = vpop.f32.mrf.mxu0  ;;  %v3611_v58 = vpop.permute.xlu0 %3610  ;;  %3928 = vmatpush.bf16.msrb.mxu3 %v6576_v46  ;;  %v3132_v51 = vsel %vm3108_vm7, %v3130_v6, %v3131_v61  ;;  %v3120_v62 = vsel %vm3108_vm7, %v3118_v16, %v3119_v47  ;;  %v3135_v6 = vsel %vm3108_vm7, %v3133_v27, %v3134_v53  ;;  %v6575_v46 = vld [vmem:[%s9873_s5 + $0x4c0] sm:$0xff] }
 0x199   : > { %vm3627_vm5 = vcmp.eq.s32.totalorder %v3611_v58, 1  ;;  %v3281_v36 = vsel %vm9188_vm8, %v3132_v51, 0  ;;  %v3277_v8 = vsel %vm9027_vm0, %v3120_v62, 0  ;;  %v3282_v16 = vsel %vm9188_vm8, %v3135_v6, 0  ;;  %v6622_v51 = vld [vmem:[%s9873_s5 + $0x638] sm:$0xff]  ;;  %4339 = vmatpush.bf16.msrb.mxu2 %v6602_v44 }
 0x19a   : > { %vm3635_vm4 = vmpackc.low %vm3627_vm5, %vm3627_vm5  ;;  %vm3157_vm0 = vcmask 1047552  }
 0x19b   : > { %v2178_v34 = vpop.f32.mrf.mxu3  ;;  %v3643_v40 = vsel %vm3635_vm4, 65537, %v9989_v21  ;;  %4719 = vmatpush.bf16.msra.mxu0 %v6622_v51  ;;  %vm9261_vm11 = vmand %vm3157_vm0, %vm3108_vm7  ;;  %v9307_v51 = vadd.f32 %v9101_v31, %v8935_v59  ;;  %v10106_v31 = vld [vmem:[#allocation29_spill] sm:$0xff] }
 0x19c   : > { %v2179_v43 = vadd.f32 %v2178_v34, %v9037_v32  ;;  %v3233_v32 = vsel %vm3225_vm1, 65537, %v9989_v21  ;;  %v10099_v34 = vld [vmem:[#allocation25_spill] sm:$0xff]  ;;  %3929 = vmatpush.bf16.msrb.mxu3 %v6575_v46  ;;  %v3651_v62 = vunpack.c.l.b16 %v3643_v40  ;;  %v9246_v46 = vadd.f32 %v9066_v39, %v8904_v54  ;;  %v6621_v39 = vld [vmem:[%s9873_s5 + $0x630] sm:$0xff] }
 0x19d   : > { %v3241_v58 = vunpack.c.l.b16 %v3233_v32  ;;  %v3688_v27 = vsel %vm9193_vm9, %v10099_v34, 0  ;;  %v3617_v34 = vpop.permute.xlu2 %3616  ;;  %4340 = vmatpush.bf16.msrb.mxu2 %v6601_v1 }
 0x19e   : > { %v9201_v29 = vadd.f32 %v2207_v13, %v2179_v43  ;;  %v6596_v13 = vld [vmem:[%s9873_s5 + $0x568] sm:$0xff]  ;;  %v3642_v43 = vsel %vm3634_vm10, 65537, %v9989_v21  ;;  %v5948_v37 = vunpack.i.l.s16 %v3651_v62  ;;  %vm3629_vm3 = vcmp.eq.s32.totalorder %v3617_v34, 1 }
 0x19f   : > { %v9206_v0 = vpop.f32.mrf.mxu2  ;;  %4308 = vmatpush.bf16.msrb.mxu1 %v6596_v13  ;;  %v5791_v32 = vunpack.i.l.s16 %v3241_v58  ;;  %v3650_v6 = vunpack.c.l.b16 %v3642_v43  ;;  %v3128_v58 = vrot.slane %v8318_v18, 1  ;;  %4720 = vmatpush.bf16.msra.mxu0 %v6621_v39  ;;  %vm3637_vm0 = vmpackc.low %vm3629_vm3, %vm3629_vm3  ;;  %v6600_v34 = vld [vmem:[%s9873_s5 + $0x588] sm:$0xff] }
 0x1a0   : > { %v2210_v5 = vpop.f32.mrf.mxu0  ;;  %3498 = vmatmul.bf16.gmra.mxu3 %v3281_v36  ;;  %vm3672_vm5 = vcmp.ne.s32.totalorder %v5948_v37, %v7367_v17 }
 0x1a1   : > { %vm3272_vm14 = vcmp.ne.s32.totalorder %v5791_v32, %v7238_v9  ;;  %v5947_v40 = vunpack.i.l.s16 %v3650_v6  ;;  %4341 = vmatpush.bf16.msrb.mxu2 %v6600_v34 }
 0x1a2   : > { %vm9284_vm1 = vmpackc.low %vm3273_vm2, %vm3272_vm14 }
 0x1a3   : > { %v2609_v25 = vpop.f32.mrf.mxu1  ;;  %3527 = vmatmul.bf16.gmra.mxu0 %v3282_v16  ;;  %v2181_v14 = vpop.f32.mrf.mxu3  ;;  %vm3671_vm6 = vcmp.ne.s32.totalorder %v5947_v40, %v7238_v9  ;;  %v6593_v40 = vld [vmem:[%s9873_s5 + $0x550] sm:$0xff] }
 0x1a4   : > { %v2182_v48 = vadd.f32 %v2181_v14, %v9068_v50  ;;  %v3139_v50 = vor.u32 %v3131_v61, %v7777_v4  ;;  %v3614_v4 = vpop.permute.xlu1 %3613  ;;  %v3127_v61 = vor.u32 %v3119_v47, %v8250_v57  ;;  %v3140_v14 = vor.u32 %v3134_v53, %v7821_v45  ;;  %vm9301_vm10 = vmpackc.low %vm3672_vm5, %vm3671_vm6 }
 0x1a5   : > { %vm3628_vm12 = vcmp.eq.s32.totalorder %v3614_v4, 1  ;;  %v3691_v62 = vsel %vm9301_vm10, %v10106_v31, 0  ;;  %v6599_v31 = vld [vmem:[%s9873_s5 + $0x580] sm:$0xff]  ;;  %v3693_v54 = vsel %vm9301_vm10, %v8378_v10, 0  ;;  %v6609_v10 = vld [vmem:[%s9873_s5 + $0x5d0] sm:$0xff] }
 0x1a6   : > { %3546 = vmatmul.bf16.vlgmr.msra.gmra.mxu1 %v3277_v8  ;;  %v9237_v36 = vadd.f32 %v2210_v5, %v2182_v48  ;;  %v6595_v5 = vld [vmem:[%s9873_s5 + $0x560] sm:$0xff]  ;;  %v3159_v57 = vsel %vm9261_vm11, %v3139_v50, %v3109_v2  ;;  %v3129_v52 = vsel %vm3108_vm7, %v3127_v61, %v3128_v58  ;;  %vm3636_vm4 = vmpackc.low %vm3628_vm12, %vm3628_vm12  ;;  %v9339_v61 = vadd.f32 %v9139_v11, %v8971_v28 }
 0x1a7   : > { %4309 = vmatpush.bf16.msrb.mxu1 %v6595_v5  ;;  %v3284_v2 = vsel %vm9284_vm1, %v3159_v57, 0  ;;  %v3644_v32 = vsel %vm3636_vm4, 65537, %v9989_v21  ;;  %v6619_v57 = vld [vmem:[%s9873_s5 + $0x620] sm:$0xff]  ;;  %v3136_v28 = vor.u32 %v3128_v58, %v8310_v56  ;;  %v3137_v11 = vrot.slane %v10076_v30, 1  ;;  %4342 = vmatpush.bf16.msrb.mxu2 %v6599_v31 }
 0x1a8   : > { %3901 = vmatmul.bf16.vlgmr.msra.gmra.mxu2 %v3688_v27  ;;  %v2212_v16 = vpop.f32.mrf.mxu0  ;;  %v3652_v50 = vunpack.c.l.b16 %v3644_v32 }
 0x1a9   : > { %v3138_v58 = vsel %vm3108_vm7, %v3136_v28, %v3137_v11 }
 0x1ab   : > { %v2638_v22 = vpop.f32.mrf.mxu2  ;;  %v2611_v13 = vpop.f32.mrf.mxu1  ;;  %4310 = vmatpush.bf16.msrb.mxu1 %v6594_v60  ;;  %v10109_v60 = vld [vmem:[#allocation27_spill] sm:$0xff] }
 0x1ac   : > { %v9239_v8 = vadd.f32 %v2638_v22, %v2609_v25  ;;  %v6614_v25 = vld [vmem:[%s9873_s5 + $0x5f8] sm:$0xff]  ;;  %v2183_v27 = vpop.f32.mrf.mxu3  ;;  %v3645_v22 = vsel %vm3637_vm0, 65537, %v9989_v21  ;;  %v3623_v37 = vpop.permute.xlu1 %3622 }
 0x1ad   : > { %4364 = vmatpush.bf16.msra.mxu3 %v6614_v25  ;;  %v2184_v43 = vadd.f32 %v2183_v27, %v9103_v12  ;;  %v3160_v12 = vsel %vm9261_vm11, %v3140_v14, %v3113_v41  ;;  %v3280_v41 = vsel %vm9096_vm15, %v3129_v52, 0  ;;  %v3653_v44 = vunpack.c.l.b16 %v3645_v22  ;;  %v6612_v27 = vld [vmem:[%s9873_s5 + $0x5e8] sm:$0xff] }
 0x1ae   : > { %v3285_v59 = vsel %vm9284_vm1, %v3160_v12, 0  ;;  %v5949_v14 = vunpack.i.l.s16 %v3652_v50  ;;  %v6592_v52 = vld [vmem:[%s9873_s5 + $0x548] sm:$0xff]  ;;  %vm3631_vm15 = vcmp.eq.s32.totalorder %v3623_v37, 1 }
 0x1af   : > { %v9289_v45 = vadd.f32 %v2212_v16, %v2184_v43  ;;  %v6620_v16 = vld [vmem:[%s9873_s5 + $0x628] sm:$0xff]  ;;  %v3620_v43 = vpop.permute.xlu0 %3619  ;;  %4311 = vmatpush.bf16.msrb.mxu1 %v6593_v40  ;;  %vm9360_vm12 = vmpackc.low %vm3631_vm15, %vm3631_vm15 }
 0x1b0   : > { %v2215_v53 = vpop.f32.mrf.mxu0  ;;  %3503 = vmatmul.bf16.gmra.mxu3 %v3284_v2  ;;  %4721 = vmatpush.bf16.msra.mxu0 %v6620_v16  ;;  %vm3630_vm2 = vcmp.eq.s32.totalorder %v3620_v43, 1  ;;  %vm3678_vm14 = vcmp.ne.s32.totalorder %v5949_v14, %v7238_v9  ;;  %v3647_v22 = vsel %vm9360_vm12, 65537, %v9989_v21  ;;  %v4015_v43 = vpop.permute.xlu2 %4014 }
 0x1b1   : > { %vm3638_vm3 = vmpackc.low %vm3630_vm2, %vm3630_vm2 }
 0x1b3   : > { %v2640_v20 = vpop.f32.mrf.mxu2  ;;  %v2614_v18 = vpop.f32.mrf.mxu1  ;;  %3532 = vmatmul.bf16.gmra.mxu0 %v3285_v59  ;;  %4312 = vmatpush.bf16.msrb.mxu1 %v6592_v52  ;;  %v9381_v59 = vadd.f32 %v9201_v29, %v9002_v49  ;;  %v10112_v49 = vld [vmem:[#allocation34_spill] sm:$0xff]  ;;  %v6617_v52 = vld [vmem:[%s9873_s5 + $0x610] sm:$0xff] }
 0x1b4   : > { %v9299_v47 = vadd.f32 %v2640_v20, %v2611_v13  ;;  %v2186_v6 = vpop.f32.mrf.mxu3  ;;  %v6613_v13 = vld [vmem:[%s9873_s5 + $0x5f0] sm:$0xff]  ;;  %v5950_v20 = vunpack.i.l.s16 %v3653_v44  ;;  %4722 = vmatpush.bf16.msra.mxu0 %v6619_v57  ;;  %v3690_v29 = vsel %vm9193_vm9, %v10112_v49, 0  ;;  %v6611_v44 = vld [vmem:[%s9873_s5 + $0x5e0] sm:$0xff] }
 0x1b5   : > { %v2187_v26 = vadd.f32 %v2186_v6, %v9142_v15  ;;  %4365 = vmatpush.bf16.msra.mxu3 %v6613_v13  ;;  %v3283_v6 = vsel %vm9188_vm8, %v3138_v58, 0  ;;  %v10113_v13 = vld [vmem:[#allocation33_spill] sm:$0xff]  ;;  %vm4037_vm8 = vcmp.eq.s32.totalorder %v4015_v43, 1 }
 0x1b6   : > { %3551 = vmatmul.bf16.gmra.mxu1 %v3280_v41  ;;  %vm3679_vm5 = vcmp.ne.s32.totalorder %v5950_v20, %v7367_v17  ;;  %v9433_v20 = vadd.f32 %v9289_v45, %v9071_v42  ;;  %vm4045_vm15 = vmpackc.low %vm4037_vm8, %vm4037_vm8 }
 0x1b7   : > { %v9333_v5 = vadd.f32 %v2215_v53, %v2187_v26  ;;  %vm9375_vm6 = vmpackc.low %vm3679_vm5, %vm3678_vm14  ;;  %v3646_v26 = vsel %vm3638_vm3, 65537, %v9989_v21 }
 0x1b8   : > { %3906 = vmatmul.bf16.gmra.mxu2 %v3691_v62  ;;  %v2217_v15 = vpop.f32.mrf.mxu0  ;;  %v6591_v62 = vld [vmem:[%s9873_s5 + $0x540] sm:$0xff]  ;;  %v3694_v16 = vsel %vm9375_vm6, %v10113_v13, 0  ;;  %v3654_v37 = vunpack.c.l.b16 %v3646_v26  ;;  %4723 = vmatpush.bf16.msra.mxu0 %v6618_v35 }
 0x1b9   : > { %4366 = vmatpush.bf16.msra.mxu3 %v6612_v27  ;;  %4313 = vmatpush.bf16.msrb.mxu1 %v6591_v62  ;;  %v10117_v62 = vld [vmem:[#allocation20_spill] sm:$0xff]  ;;  %v9484_v26 = vadd.f32 %v9333_v5, %v9115_v3  ;;  %v9500_v5 = vld [vmem:[%s9873_s5 + $0x6a8] sm:$0xff] }
 0x1ba   : > { %v5951_v28 = vunpack.i.l.s16 %v3654_v37  ;;  %v6629_v3 = vld [vmem:[%s9873_s5 + $0x670] sm:$0xff] }
 0x1bb   : > { %v2643_v25 = vpop.f32.mrf.mxu2  ;;  %v2616_v4 = vpop.f32.mrf.mxu1 }
 0x1bc   : > { %v9335_v39 = vadd.f32 %v2643_v25, %v2614_v18  ;;  %v2188_v18 = vpop.f32.mrf.mxu3  ;;  %v9410_v25 = vadd.f32 %v9237_v36, %v9046_v38  ;;  %v3141_v38 = vor.u32 %v3137_v11, %v8118_v55  ;;  %v9423_v36 = vld [vmem:[%s9873_s5 + $0x6b8] sm:$0xff]  ;;  %vm3685_vm4 = vcmp.ne.s32.totalorder %v5951_v28, %v7238_v9  ;;  %4724 = vmatpush.bf16.msra.mxu0 %v6617_v52 }
 0x1bd   : > { %v2189_v2 = vadd.f32 %v2188_v18, %v9206_v0  ;;  %v3689_v0 = vsel %vm9193_vm9, %v10109_v60, 0  ;;  %4367 = vmatpush.bf16.msra.mxu3 %v6611_v44  ;;  %4777 = vmatpush.bf16.msra.mxu2 %v9423_v36  ;;  %v6630_v60 = vld [vmem:[%s9873_s5 + $0x678] sm:$0xff] }
 0x1be   : > { %v3161_v42 = vsel %vm9261_vm11, %v3141_v38, %v3117_v19  ;;  %v4053_v19 = vsel %vm4045_vm15, 65537, %v9989_v21  ;;  %6727 = vmatpush.bf16.msra.mxu1 %v6630_v60 }
 0x1bf   : > { %v9364_v30 = vadd.f32 %v2217_v15, %v2189_v2  ;;  %v4018_v15 = vpop.permute.xlu0 %4017  ;;  %v10114_v2 = vld [vmem:[#allocation30_spill] sm:$0xff]  ;;  %v3286_v23 = vsel %vm9284_vm1, %v3161_v42, 0  ;;  %v4061_v49 = vunpack.c.l.b16 %v4053_v19  ;;  %v10121_v42 = vld [vmem:[#allocation12_spill] sm:$0xff]  ;;  %v10122_v19 = vld [vmem:[#allocation15_spill] sm:$0xff] }
 0x1c0   : > { %v9373_v41 = vpop.f32.mrf.mxu0  ;;  %3930 = vmatmul.bf16.vlgmr.msrb.gmra.mxu3 %v3689_v0  ;;  %vm4038_vm7 = vcmp.eq.s32.totalorder %v4018_v15, 1  ;;  %v3692_v56 = vsel %vm9301_vm10, %v10114_v2, 0  ;;  %v9470_v0 = vld [vmem:[%s9873_s5 + $0x6b0] sm:$0xff]  ;;  %v3696_v2 = vsel %vm9375_vm6, %v8450_v63, 0 }
 0x1c1   : > { %vm4046_vm0 = vmpackc.low %vm4038_vm7, %vm4038_vm7  ;;  %4778 = vmatpush.bf16.msra.mxu2 %v9470_v0  ;;  %v6105_v35 = vunpack.i.l.s16 %v4061_v49  ;;  %v9507_v37 = vadd.f32 %v9364_v30, %v9145_v7 }
 0x1c2   : > { %v4054_v58 = vsel %vm4046_vm0, 65537, %v9989_v21  ;;  %6728 = vmatpush.bf16.msra.mxu1 %v6629_v3 }
 0x1c3   : > { %v2645_v12 = vpop.f32.mrf.mxu2  ;;  %v2619_v53 = vpop.f32.mrf.mxu1  ;;  %3959 = vmatmul.bf16.vlgmr.msrb.gmra.mxu0 %v3690_v29  ;;  %v4062_v31 = vunpack.c.l.b16 %v4054_v58  ;;  %vm4077_vm14 = vcmp.ne.s32.totalorder %v6105_v35, %v7238_v9  ;;  %v6607_v58 = vld [vmem:[%s9873_s5 + $0x5c0] sm:$0xff] }
 0x1c4   : > { %v9371_v1 = vadd.f32 %v2645_v12, %v2616_v4  ;;  %v2667_v50 = vpop.f32.mrf.mxu3  ;;  %v3655_v4 = vunpack.c.l.b16 %v3647_v22  ;;  %v6616_v22 = vld [vmem:[%s9873_s5 + $0x608] sm:$0xff]  ;;  %v4021_v29 = vpop.permute.xlu1 %4020 }
 0x1c5   : > { %v2668_v33 = vadd.f32 %v2667_v50, %v9239_v8  ;;  %4725 = vmatpush.bf16.msra.mxu0 %v6616_v22  ;;  %vm4039_vm11 = vcmp.eq.s32.totalorder %v4021_v29, 1  ;;  %4779 = vmatpush.bf16.msra.mxu2 %v9500_v5 }
 0x1c6   : > { %3556 = vmatmul.bf16.gmra.mxu1 %v3283_v6  ;;  %v5952_v57 = vunpack.i.l.s16 %v3655_v4  ;;  %v4024_v4 = vpop.permute.xlu2 %4023  ;;  %vm4047_vm12 = vmpackc.low %vm4039_vm11, %vm4039_vm11 }
 0x1c7   : > { %v9413_v40 = vadd.f32 %v2668_v33, %v9246_v46  ;;  %v6610_v46 = vld [vmem:[%s9873_s5 + $0x5d8] sm:$0xff]  ;;  %vm4040_vm10 = vcmp.eq.s32.totalorder %v4024_v4, 1  ;;  %v10153_v4 = vld [vmem:[#allocation39_spill] sm:$0xff] }
 0x1c8   : > { %3911 = vmatmul.bf16.gmra.mxu2 %v3694_v16  ;;  %v9417_v14 = vpop.f32.mrf.mxu0  ;;  %4368 = vmatpush.bf16.msra.mxu3 %v6610_v46  ;;  %vm3686_vm9 = vcmp.ne.s32.totalorder %v5952_v57, %v7367_v17  ;;  %vm4048_vm3 = vmpackc.low %vm4040_vm10, %vm4040_vm10  ;;  %v4055_v46 = vsel %vm4047_vm12, 65537, %v9989_v21 }
 0x1c9   : > { %vm9454_vm2 = vmpackc.low %vm3686_vm9, %vm3685_vm4 }
 0x1ca   : > { %v3697_v24 = vsel %vm9454_vm2, %v10117_v62, 0 }
 0x1cb   : > { %v2648_v8 = vpop.f32.mrf.mxu2  ;;  %v2621_v34 = vpop.f32.mrf.mxu1 }
 0x1cc   : > { %v9415_v27 = vadd.f32 %v2648_v8, %v2619_v53  ;;  %v2669_v18 = vpop.f32.mrf.mxu3  ;;  %4369 = vmatpush.bf16.msra.mxu3 %v6609_v10  ;;  %v6615_v8 = vld [vmem:[%s9873_s5 + $0x600] sm:$0xff] }
 0x1cd   : > { %v2670_v55 = vadd.f32 %v2669_v18, %v9299_v47  ;;  %4726 = vmatpush.bf16.msra.mxu0 %v6615_v8 }
 0x1ce   : > { %v4027_v29 = vpop.permute.xlu2 %4026 }
 0x1cf   : > { %v9440_v11 = vadd.f32 %v2670_v55, %v9307_v51  ;;  %vm4041_vm0 = vcmp.eq.s32.totalorder %v4027_v29, 1  ;;  %v6632_v29 = vld [vmem:[%s9873_s5 + $0x688] sm:$0xff] }
 0x1d0   : > { %v9452_v53 = vpop.f32.mrf.mxu0  ;;  %3935 = vmatmul.bf16.gmra.mxu3 %v3692_v56  ;;  %v6628_v56 = vld [vmem:[%s9873_s5 + $0x668] sm:$0xff] }
 0x1d1   : > { %4748 = vmatpush.bf16.msrb.mxu0 %v6630_v60  ;;  %6729 = vmatpush.bf16.msra.mxu1 %v6628_v56 }
 0x1d3   : > { %v2650_v45 = vpop.f32.mrf.mxu2  ;;  %v2624_v47 = vpop.f32.mrf.mxu1  ;;  %3964 = vmatmul.bf16.gmra.mxu0 %v3693_v54 }
 0x1d4   : > { %v9450_v12 = vadd.f32 %v2650_v45, %v2621_v34  ;;  %v2672_v6 = vpop.f32.mrf.mxu3  ;;  %v4428_v34 = vpop.permute.xlu0 %4427  ;;  %v4056_v45 = vsel %vm4048_vm3, 65537, %v9989_v21 }
 0x1d5   : > { %v2673_v48 = vadd.f32 %v2672_v6, %v9335_v39  ;;  %v6106_v39 = vunpack.i.l.s16 %v4062_v31  ;;  %4749 = vmatpush.bf16.msrb.mxu0 %v6629_v3  ;;  %v4064_v60 = vunpack.c.l.b16 %v4056_v45  ;;  %vm4450_vm7 = vcmp.eq.s32.totalorder %v4428_v34, 1 }
 0x1d6   : > { %3561 = vmatmul.bf16.gmra.mxu1 %v3286_v23  ;;  %v4063_v23 = vunpack.c.l.b16 %v4055_v46  ;;  %vm9577_vm15 = vmpackc.low %vm4450_vm7, %vm4450_vm7 }
 0x1d7   : > { %v9488_v13 = vadd.f32 %v2673_v48, %v9339_v61  ;;  %v6608_v61 = vld [vmem:[%s9873_s5 + $0x5c8] sm:$0xff]  ;;  %vm4078_vm1 = vcmp.ne.s32.totalorder %v6106_v39, %v7367_v17  ;;  %v6108_v49 = vunpack.i.l.s16 %v4064_v60 }
 0x1d8   : > { %3916 = vmatmul.bf16.gmra.mxu2 %v3697_v24  ;;  %v9492_v44 = vpop.f32.mrf.mxu0  ;;  %4370 = vmatpush.bf16.msra.mxu3 %v6608_v61  ;;  %vm9516_vm5 = vmpackc.low %vm4078_vm1, %vm4077_vm14  ;;  %v6107_v24 = vunpack.i.l.s16 %v4063_v23 }
 0x1d9   : > { %v4102_v63 = vsel %vm9516_vm5, %v10122_v19, 0  ;;  %4750 = vmatpush.bf16.msrb.mxu0 %v6628_v56  ;;  %vm4085_vm11 = vcmp.ne.s32.totalorder %v6108_v49, %v7367_v17  ;;  %vm4049_vm14 = vmpackc.low %vm4041_vm0, %vm4041_vm0 }
 0x1da   : > { %vm4084_vm9 = vcmp.ne.s32.totalorder %v6107_v24, %v7238_v9 }
 0x1db   : > { %v2653_v16 = vpop.f32.mrf.mxu2  ;;  %v2626_v50 = vpop.f32.mrf.mxu1  ;;  %vm9586_vm10 = vmpackc.low %vm4085_vm11, %vm4084_vm9 }
 0x1dc   : > { %v9490_v33 = vadd.f32 %v2653_v16, %v2624_v47  ;;  %v2674_v15 = vpop.f32.mrf.mxu3  ;;  %v4431_v47 = vpop.permute.xlu1 %4430  ;;  %4371 = vmatpush.bf16.msra.mxu3 %v6607_v58 }
 0x1dd   : > { %v2675_v43 = vadd.f32 %v2674_v15, %v9371_v1  ;;  %v10120_v1 = vld [vmem:[#allocation35_spill] sm:$0xff]  ;;  %v4030_v31 = vpop.permute.xlu0 %4029  ;;  %v10129_v15 = vld [vmem:[#allocation22_spill] sm:$0xff] }
 0x1de   : > { %v3695_v38 = vsel %vm9375_vm6, %v10120_v1, 0  ;;  %vm4451_vm6 = vcmp.eq.s32.totalorder %v4431_v47, 1  ;;  %vm4042_vm8 = vcmp.eq.s32.totalorder %v4030_v31, 1 }
 0x1df   : > { %v9521_v30 = vadd.f32 %v2675_v43, %v9381_v59  ;;  %v4101_v59 = vsel %vm9516_vm5, %v10121_v42, 0  ;;  %vm9573_vm4 = vmpackc.low %vm4451_vm6, %vm4451_vm6 }
 0x1e0   : > { %v9529_v18 = vpop.f32.mrf.mxu0  ;;  %3940 = vmatmul.bf16.gmra.mxu3 %v3695_v38  ;;  %vm4050_vm1 = vmpackc.low %vm4042_vm8, %vm4042_vm8  ;;  %v4467_v8 = vsel %vm9573_vm4, 65537, %v9989_v21  ;;  %v4057_v38 = vsel %vm4049_vm14, 65537, %v9989_v21 }
 0x1e1   : > { %6735 = vmatpush.bf16.msrb.mxu3 %v9423_v36  ;;  %v6634_v36 = vld [vmem:[%s9873_s5 + $0x698] sm:$0xff]  ;;  %v4475_v45 = vunpack.c.l.b16 %v4467_v8  ;;  %v4065_v23 = vunpack.c.l.b16 %v4057_v38  ;;  %v6631_v38 = vld [vmem:[%s9873_s5 + $0x680] sm:$0xff] }
 0x1e3   : > { %v2655_v57 = vpop.f32.mrf.mxu2  ;;  %v3051_v28 = vpop.f32.mrf.mxu1  ;;  %3969 = vmatmul.bf16.gmra.mxu0 %v3696_v2 }
 0x1e4   : > { %v9527_v52 = vadd.f32 %v2655_v57, %v2626_v50  ;;  %v3052_v55 = vadd.f32 %v3051_v28, %v9373_v41  ;;  %v9545_v41 = vld [vmem:[%s9873_s5 + $0x6a0] sm:$0xff]  ;;  %v2677_v32 = vpop.f32.mrf.mxu3  ;;  %v4434_v50 = vpop.permute.xlu1 %4433 }
 0x1e5   : > { %v2678_v54 = vadd.f32 %v2677_v32, %v9415_v27  ;;  %4780 = vmatpush.bf16.msra.mxu2 %v9545_v41  ;;  %6736 = vmatpush.bf16.msrb.mxu3 %v9470_v0  ;;  %v10130_v28 = vld [vmem:[#allocation6_spill] sm:$0xff]  ;;  %v6266_v32 = vunpack.i.l.s16 %v4475_v45 }
 0x1e6   : > { %4314 = vmatmul.bf16.vlgmr.msrb.gmra.mxu1 %v4101_v59  ;;  %v4104_v1 = vsel %vm9586_vm10, %v10130_v28, 0  ;;  %v6633_v59 = vld [vmem:[%s9873_s5 + $0x690] sm:$0xff] }
 0x1e7   : > { %v9556_v62 = vadd.f32 %v2678_v54, %v9410_v25  ;;  %v6627_v25 = vld [vmem:[%s9873_s5 + $0x660] sm:$0xff]  ;;  %vm4491_vm8 = vcmp.ne.s32.totalorder %v6266_v32, %v7367_v17 }
 0x1e8   : > { %4343 = vmatmul.bf16.vlgmr.msrb.gmra.mxu2 %v4102_v63  ;;  %v9559_v22 = vpop.f32.mrf.mxu0  ;;  %6730 = vmatpush.bf16.msra.mxu1 %v6627_v25  ;;  %v4033_v63 = vpop.permute.xlu0 %4032 }
 0x1e9   : > { %4781 = vmatpush.bf16.msra.mxu2 %v6634_v36  ;;  %4751 = vmatpush.bf16.msrb.mxu0 %v6627_v25  ;;  %vm4043_vm3 = vcmp.eq.s32.totalorder %v4033_v63, 1 }
 0x1ea   : > { %6737 = vmatpush.bf16.msrb.mxu3 %v9500_v5  ;;  %v4466_v5 = vsel %vm9577_vm15, 65537, %v9989_v21  ;;  %vm4051_vm11 = vmpackc.low %vm4043_vm3, %vm4043_vm3 }
 0x1eb   : > { %v3080_v6 = vpop.f32.mrf.mxu2  ;;  %v3053_v48 = vpop.f32.mrf.mxu1  ;;  %v4474_v56 = vunpack.c.l.b16 %v4466_v5 }
 0x1ec   : > { %v3081_v10 = vadd.f32 %v3080_v6, %v3052_v55  ;;  %v3054_v27 = vadd.f32 %v3053_v48, %v9417_v14  ;;  %v2679_v16 = vpop.f32.mrf.mxu3  ;;  %v10131_v55 = vld [vmem:[#allocation31_spill] sm:$0xff]  ;;  %v4036_v19 = vpop.permute.xlu1 %4035 }
 0x1ed   : > { %v2680_v35 = vadd.f32 %v2679_v16, %v9450_v12  ;;  %v3698_v12 = vsel %vm9454_vm2, %v10129_v15, 0  ;;  %v3699_v42 = vsel %vm9454_vm2, %v10131_v55, 0  ;;  %4782 = vmatpush.bf16.msra.mxu2 %v6633_v59  ;;  %v6265_v24 = vunpack.i.l.s16 %v4474_v56  ;;  %v6624_v14 = vld [vmem:[%s9873_s5 + $0x648] sm:$0xff]  ;;  %v6623_v55 = vld [vmem:[%s9873_s5 + $0x640] sm:$0xff] }
 0x1ee   : > { %v9563_v39 = vadd.f32 %v3081_v10, %v9413_v40  ;;  %6738 = vmatpush.bf16.msrb.mxu3 %v9545_v41  ;;  %vm4452_vm2 = vcmp.eq.s32.totalorder %v4434_v50, 1  ;;  %v6109_v10 = vunpack.i.l.s16 %v4065_v23  ;;  %vm4044_vm12 = vcmp.eq.s32.totalorder %v4036_v19, 1 }
 0x1ef   : > { %v9584_v0 = vadd.f32 %v2680_v35, %v9433_v20  ;;  %v4058_v20 = vsel %vm4050_vm1, 65537, %v9989_v21  ;;  %vm9640_vm6 = vmpackc.low %vm4452_vm2, %vm4452_vm2  ;;  %vm4490_vm9 = vcmp.ne.s32.totalorder %v6265_v24, %v7238_v9 }
 0x1f0   : > { %v9598_v43 = vpop.f32.mrf.mxu0  ;;  %3945 = vmatmul.bf16.gmra.mxu3 %v3698_v12  ;;  %v4066_v47 = vunpack.c.l.b16 %v4058_v20  ;;  %vm9647_vm4 = vmpackc.low %vm4044_vm12, %vm4044_vm12  ;;  %vm4091_vm0 = vcmp.ne.s32.totalorder %v6109_v10, %v7238_v9  ;;  %v4059_v12 = vsel %vm4051_vm11, 65537, %v9989_v21  ;;  %v4468_v7 = vsel %vm9640_vm6, 65537, %v9989_v21  ;;  %v4443_v56 = vpop.permute.xlu0 %4442 }
 0x1f1   : > { %4783 = vmatpush.bf16.msra.mxu2 %v6632_v29  ;;  %vm9665_vm14 = vmpackc.low %vm4491_vm8, %vm4490_vm9 }
 0x1f2   : > { %6739 = vmatpush.bf16.msrb.mxu3 %v6634_v36  ;;  %v6110_v54 = vunpack.i.l.s16 %v4066_v47 }
 0x1f3   : > { %v3082_v3 = vpop.f32.mrf.mxu2  ;;  %v3056_v61 = vpop.f32.mrf.mxu1  ;;  %3974 = vmatmul.bf16.gmra.mxu0 %v3699_v42 }
 0x1f4   : > { %v3083_v34 = vadd.f32 %v3082_v3, %v3054_v27  ;;  %v3057_v57 = vadd.f32 %v3056_v61, %v9452_v53  ;;  %v6626_v53 = vld [vmem:[%s9873_s5 + $0x658] sm:$0xff]  ;;  %v2682_v51 = vpop.f32.mrf.mxu3  ;;  %v4437_v27 = vpop.permute.xlu2 %4436  ;;  %vm4092_vm7 = vcmp.ne.s32.totalorder %v6110_v54, %v7367_v17 }
 0x1f5   : > { %v2683_v58 = vadd.f32 %v2682_v51, %v9490_v33  ;;  %6731 = vmatpush.bf16.msra.mxu1 %v6626_v53  ;;  %4752 = vmatpush.bf16.msrb.mxu0 %v6626_v53  ;;  %vm4453_vm15 = vcmp.eq.s32.totalorder %v4437_v27, 1  ;;  %vm9661_vm1 = vmpackc.low %vm4092_vm7, %vm4091_vm0  ;;  %v10141_v3 = vld [vmem:[#allocation17_spill] sm:$0xff] }
 0x1f6   : > { %v9609_v46 = vadd.f32 %v3083_v34, %v9440_v11  ;;  %4319 = vmatmul.bf16.gmra.mxu1 %v4104_v1  ;;  %v10132_v11 = vld [vmem:[#allocation19_spill] sm:$0xff]  ;;  %6740 = vmatpush.bf16.msrb.mxu3 %v6633_v59  ;;  %v4103_v61 = vsel %vm9516_vm5, %v10141_v3, 0  ;;  %vm9672_vm2 = vmpackc.low %vm4453_vm15, %vm4453_vm15  ;;  %v10145_v1 = vld [vmem:[#allocation36_spill] sm:$0xff]  ;;  %vm4455_vm5 = vcmp.eq.s32.totalorder %v4443_v56, 1 }
 0x1f7   : > { %v4105_v2 = vsel %vm9586_vm10, %v10132_v11, 0  ;;  %v9626_v41 = vadd.f32 %v2683_v58, %v9484_v26  ;;  %v6625_v26 = vld [vmem:[%s9873_s5 + $0x650] sm:$0xff]  ;;  %v4469_v42 = vsel %vm9672_vm2, 65537, %v9989_v21  ;;  %v4476_v11 = vunpack.c.l.b16 %v4468_v7  ;;  %4784 = vmatpush.bf16.msra.mxu2 %v6631_v38  ;;  %vm4463_vm8 = vmpackc.low %vm4455_vm5, %vm4455_vm5 }
 0x1f8   : > { %4348 = vmatmul.bf16.gmra.mxu2 %v4105_v2  ;;  %v9628_v48 = vpop.f32.mrf.mxu0  ;;  %v10146_v59 = vld [vmem:[#allocation24_spill] sm:$0xff]  ;;  %v4477_v51 = vunpack.c.l.b16 %v4469_v42 }
 0x1f9   : > { %6732 = vmatpush.bf16.msra.mxu1 %v6625_v26  ;;  %4753 = vmatpush.bf16.msrb.mxu0 %v6625_v26  ;;  %v4108_v45 = vsel %vm9661_vm1, %v10146_v59, 0  ;;  %v6267_v32 = vunpack.i.l.s16 %v4476_v11 }
 0x1fa   : > { %6741 = vmatpush.bf16.msrb.mxu3 %v6632_v29  ;;  %v6268_v24 = vunpack.i.l.s16 %v4477_v51  ;;  %v10149_v29 = vld [vmem:[#allocation23_spill] sm:$0xff]  ;;  %v10155_v51 = vld [vmem:[#allocation26_spill] sm:$0xff] }
 0x1fb   : > { %v3085_v60 = vpop.f32.mrf.mxu2  ;;  %v3058_v31 = vpop.f32.mrf.mxu1  ;;  %vm4497_vm6 = vcmp.ne.s32.totalorder %v6267_v32, %v7238_v9  ;;  %v4106_v25 = vsel %vm9586_vm10, %v10149_v29, 0 }
 0x1fc   : > { %v3086_v6 = vadd.f32 %v3085_v60, %v3057_v57  ;;  %v3059_v33 = vadd.f32 %v3058_v31, %v9492_v44  ;;  %v2684_v44 = vpop.f32.mrf.mxu3  ;;  %v10144_v57 = vld [vmem:[#allocation13_spill] sm:$0xff]  ;;  %vm4498_vm9 = vcmp.ne.s32.totalorder %v6268_v24, %v7367_v17 }
 0x1fd   : > { %v2685_v36 = vadd.f32 %v2684_v44, %v9527_v52  ;;  %6733 = vmatpush.bf16.msra.mxu1 %v6624_v14  ;;  %v4107_v5 = vsel %vm9661_vm1, %v10144_v57, 0  ;;  %4754 = vmatpush.bf16.msrb.mxu0 %v6624_v14  ;;  %vm9724_vm0 = vmpackc.low %vm4498_vm9, %vm4497_vm6  ;;  %v10160_v24 = vld [vmem:[#allocation41_spill] sm:$0xff] }
 0x1fe   : > { %v9632_v49 = vadd.f32 %v3086_v6, %v9488_v13  ;;  %6742 = vmatpush.bf16.msrb.mxu3 %v6631_v38  ;;  %v4440_v6 = vpop.permute.xlu2 %4439  ;;  %v4517_v15 = vsel %vm9724_vm0, %v10153_v4, 0 }
 0x1ff   : > { %v9659_v16 = vadd.f32 %v2685_v36, %v9507_v37  ;;  %v4060_v37 = vsel %vm9647_vm4, 65537, %v9989_v21  ;;  %vm4454_vm7 = vcmp.eq.s32.totalorder %v4440_v6, 1  ;;  %v4516_v6 = vsel %vm9665_vm14, %v10160_v24, 0 }
 0x200   : > { %v3518_v34 = vpop.f32.mrf.mxu0  ;;  %4372 = vmatmul.bf16.vlgmr.msra.gmra.mxu3 %v4103_v61  ;;  %v4068_v53 = vunpack.c.l.b16 %v4060_v37  ;;  %vm4462_vm15 = vmpackc.low %vm4454_vm7, %vm4454_vm7 }
 0x201   : > { %6734 = vmatpush.bf16.msra.mxu1 %v6623_v55  ;;  %4755 = vmatpush.bf16.msrb.mxu0 %v6623_v55  ;;  %v4470_v37 = vsel %vm4462_vm15, 65537, %v9989_v21 }
 0x202   : > { %v6112_v58 = vunpack.i.l.s16 %v4068_v53  ;;  %v4478_v7 = vunpack.c.l.b16 %v4470_v37 }
 0x203   : > { %v3087_v50 = vpop.f32.mrf.mxu2  ;;  %v3061_v35 = vpop.f32.mrf.mxu1 }
 0x204   : > { %v3088_v8 = vadd.f32 %v3087_v50, %v3059_v33  ;;  %v3062_v20 = vadd.f32 %v3061_v35, %v9529_v18  ;;  %v4514_v18 = vsel %vm9665_vm14, %v10145_v1, 0  ;;  %v3489_v47 = vpop.f32.mrf.mxu3  ;;  %vm4099_vm12 = vcmp.ne.s32.totalorder %v6112_v58, %v7367_v17  ;;  %v10152_v35 = vld [vmem:[#allocation7_spill] sm:$0xff] }
 0x205   : > { %4727 = vmatmul.bf16.vlgmr.msra.gmra.mxu0 %v4514_v18  ;;  %v9705_v2 = vadd.f32 %v3518_v34, %v3489_v47  ;;  %v4471_v50 = vsel %vm4463_vm8, 65537, %v9989_v21  ;;  %v6269_v42 = vunpack.i.l.s16 %v4478_v7 }
 0x206   : > { %v9688_v28 = vadd.f32 %v3088_v8, %v9521_v30  ;;  %4324 = vmatmul.bf16.gmra.mxu1 %v4107_v5  ;;  %v4067_v30 = vunpack.c.l.b16 %v4059_v12  ;;  %v10154_v12 = vld [vmem:[#allocation8_spill] sm:$0xff]  ;;  %v4446_v5 = vpop.permute.xlu1 %4445  ;;  %v4449_v53 = vpop.permute.xlu2 %4448 }
 0x207   : > { %vm4456_vm10 = vcmp.eq.s32.totalorder %v4446_v5, 1  ;;  %vm4457_vm2 = vcmp.eq.s32.totalorder %v4449_v53, 1  ;;  %vm4504_vm5 = vcmp.ne.s32.totalorder %v6269_v42, %v7238_v9 }
 0x208   : > { %4353 = vmatmul.bf16.gmra.mxu2 %v4108_v45  ;;  %v6111_v23 = vunpack.i.l.s16 %v4067_v30  ;;  %v3520_v31 = vpop.f32.mrf.mxu0  ;;  %vm4465_vm6 = vmpackc.low %vm4457_vm2, %vm4457_vm2 }
 0x20a   : > { %vm4098_vm3 = vcmp.ne.s32.totalorder %v6111_v23, %v7238_v9 }
 0x20b   : > { %v3090_v19 = vpop.f32.mrf.mxu2  ;;  %v3063_v63 = vpop.f32.mrf.mxu1  ;;  %vm9717_vm4 = vmpackc.low %vm4099_vm12, %vm4098_vm3 }
 0x20c   : > { %v3091_v54 = vadd.f32 %v3090_v19, %v3062_v20  ;;  %v3064_v60 = vadd.f32 %v3063_v63, %v9559_v22  ;;  %v3491_v10 = vpop.f32.mrf.mxu3  ;;  %v4110_v3 = vsel %vm9717_vm4, %v10152_v35, 0  ;;  %v4479_v20 = vunpack.c.l.b16 %v4471_v50  ;;  %vm4464_vm12 = vmpackc.low %vm4456_vm10, %vm4456_vm10  ;;  %v10158_v63 = vld [vmem:[#allocation43_spill] sm:$0xff]  ;;  %v10166_v22 = vld [vmem:[#allocation44_spill] sm:$0xff] }
 0x20d   : > { %v9714_v27 = vadd.f32 %v3520_v31, %v3491_v10  ;;  %v4472_v19 = vsel %vm4464_vm12, 65537, %v9989_v21  ;;  %v4518_v32 = vsel %vm9724_vm0, %v10158_v63, 0  ;;  %v4519_v7 = vsel %vm9724_vm0, %v10166_v22, 0 }
 0x20e   : > { %v9709_v33 = vadd.f32 %v3091_v54, %v9556_v62  ;;  %v6270_v1 = vunpack.i.l.s16 %v4479_v20 }
 0x210   : > { %v3523_v14 = vpop.f32.mrf.mxu0  ;;  %4377 = vmatmul.bf16.gmra.mxu3 %v4106_v25  ;;  %vm4505_vm11 = vcmp.ne.s32.totalorder %v6270_v1, %v7367_v17 }
 0x211   : > { %vm9752_vm3 = vmpackc.low %vm4505_vm11, %vm4504_vm5 }
 0x213   : > { %v3092_v26 = vpop.f32.mrf.mxu2  ;;  %v3066_v62 = vpop.f32.mrf.mxu1 }
 0x214   : > { %v3093_v13 = vadd.f32 %v3092_v26, %v3064_v60  ;;  %v3067_v36 = vadd.f32 %v3066_v62, %v9598_v43  ;;  %v4111_v43 = vsel %vm9717_vm4, %v10154_v12, 0  ;;  %v3494_v8 = vpop.f32.mrf.mxu3  ;;  %v10159_v60 = vld [vmem:[#allocation42_spill] sm:$0xff]  ;;  %v4480_v26 = vunpack.c.l.b16 %v4472_v19 }
 0x215   : > { %4732 = vmatmul.bf16.gmra.mxu0 %v4517_v15  ;;  %v3524_v34 = vadd.f32 %v3523_v14, %v3494_v8  ;;  %v4520_v31 = vsel %vm9752_vm3, %v10159_v60, 0  ;;  %v10161_v15 = vld [vmem:[#allocation11_spill] sm:$0xff] }
 0x216   : > { %v9734_v61 = vadd.f32 %v3093_v13, %v9584_v0  ;;  %4329 = vmatmul.bf16.gmra.mxu1 %v4110_v3  ;;  %v6271_v25 = vunpack.i.l.s16 %v4480_v26  ;;  %v4112_v37 = vsel %vm9717_vm4, %v10161_v15, 0 }
 0x218   : > { %4358 = vmatmul.bf16.gmra.mxu2 %v4111_v43  ;;  %v3525_v55 = vpop.f32.mrf.mxu0 }
 0x21b   : > { %v3095_v57 = vpop.f32.mrf.mxu2  ;;  %v3068_v0 = vpop.f32.mrf.mxu1 }
 0x21c   : > { %v3096_v18 = vadd.f32 %v3095_v57, %v3067_v36  ;;  %v3069_v38 = vadd.f32 %v3068_v0, %v9628_v48  ;;  %v3496_v59 = vpop.f32.mrf.mxu3  ;;  %v4109_v48 = vsel %vm9661_vm1, %v10155_v51, 0  ;;  %vm4511_vm1 = vcmp.ne.s32.totalorder %v6271_v25, %v7238_v9  ;;  %v10168_v51 = vld [vmem:[#allocation37_spill] sm:$0xff] }
 0x21d   : > { %v3526_v45 = vadd.f32 %v3525_v55, %v3496_v59  ;;  %v10167_v59 = vld [vmem:[#allocation38_spill] sm:$0xff] }
 0x21e   : > { %v9745_v30 = vadd.f32 %v3096_v18, %v9626_v41 }
 0x220   : > { %v3528_v58 = vpop.f32.mrf.mxu0  ;;  %4382 = vmatmul.bf16.gmra.mxu3 %v4109_v48 }
 0x223   : > { %v3097_v47 = vpop.f32.mrf.mxu2  ;;  %v3547_v11 = vpop.f32.mrf.mxu1 }
 0x224   : > { %v3098_v41 = vadd.f32 %v3097_v47, %v3069_v38  ;;  %v3548_v23 = vadd.f32 %v3547_v11, %v9705_v2  ;;  %v4473_v2 = vsel %vm4465_vm6, 65537, %v9989_v21  ;;  %v3499_v10 = vpop.f32.mrf.mxu3 }
 0x225   : > { %4737 = vmatmul.bf16.gmra.mxu0 %v4520_v31  ;;  %v4481_v62 = vunpack.c.l.b16 %v4473_v2 }
 0x226   : > { %v9762_v54 = vadd.f32 %v3098_v41, %v9659_v16  ;;  %v9765_v40 = vadd.f32 %v3548_v23, %v9563_v39  ;;  %4761 = vmatmul.bf16.vlgmr.msra.gmra.mxu1 %v4518_v32  ;;  %v3529_v16 = vadd.f32 %v3528_v58, %v3499_v10  ;;  %v10170_v58 = vld [vmem:[#allocation46_spill] sm:$0xff] }
 0x227   : > { %v6272_v14 = vunpack.i.l.s16 %v4481_v62  ;;  %v4522_v23 = vsel %vm9752_vm3, %v10170_v58, 0 }
 0x228   : > { %4785 = vmatmul.bf16.vlgmr.msra.gmra.mxu2 %v4516_v6  ;;  %v3530_v13 = vpop.f32.mrf.mxu0 }
 0x229   : > { %vm4512_vm7 = vcmp.ne.s32.totalorder %v6272_v14, %v7367_v17  ;;  %v10165_v17 = vld [vmem:[#allocation32_spill] sm:$0xff] }
 0x22a   : > { %vm9783_vm8 = vmpackc.low %vm4512_vm7, %vm4511_vm1 }
 0x22b   : > { %v3902_v29 = vpop.f32.mrf.mxu2  ;;  %v3549_v39 = vpop.f32.mrf.mxu1  ;;  %v4523_v20 = vsel %vm9783_vm8, %v10165_v17, 0  ;;  %v4525_v47 = vsel %vm9783_vm8, %v10167_v59, 0  ;;  %v4524_v48 = vsel %vm9783_vm8, %v10168_v51, 0 }
 0x22c   : > { %v3550_v36 = vadd.f32 %v3549_v39, %v9714_v27  ;;  %v3501_v21 = vpop.f32.mrf.mxu3 }
 0x22d   : > { %v3531_v35 = vadd.f32 %v3530_v13, %v3501_v21 }
 0x22e   : > { %v9776_v50 = vadd.f32 %v3550_v36, %v9609_v46  ;;  %v10164_v46 = vld [vmem:[#allocation45_spill] sm:$0xff] }
 0x22f   : > { %v4521_v9 = vsel %vm9752_vm3, %v10164_v46, 0 }
 0x230   : > { %v3533_v27 = vpop.f32.mrf.mxu0  ;;  %4387 = vmatmul.bf16.gmra.mxu3 %v4112_v37 }
 0x233   : > { %v3904_v3 = vpop.f32.mrf.mxu2  ;;  %v3552_v4 = vpop.f32.mrf.mxu1 }
 0x234   : > { %v3553_v43 = vadd.f32 %v3552_v4, %v3524_v34  ;;  %v3504_v57 = vpop.f32.mrf.mxu3 }
 0x235   : > { %4742 = vmatmul.bf16.gmra.mxu0 %v4523_v20  ;;  %v3534_v34 = vadd.f32 %v3533_v27, %v3504_v57 }
 0x236   : > { %v9791_v8 = vadd.f32 %v3553_v43, %v9632_v49  ;;  %4766 = vmatmul.bf16.gmra.mxu1 %v4521_v9 }
 0x238   : > { %4790 = vmatmul.bf16.gmra.mxu2 %v4519_v7  ;;  %v3535_v1 = vpop.f32.mrf.mxu0 }
 0x23b   : > { %v3907_v0 = vpop.f32.mrf.mxu2  ;;  %v3554_v5 = vpop.f32.mrf.mxu1 }
 0x23c   : > { %v3555_v18 = vadd.f32 %v3554_v5, %v3526_v45  ;;  %v3506_v38 = vpop.f32.mrf.mxu3 }
 0x23d   : > { %v3536_v55 = vadd.f32 %v3535_v1, %v3506_v38 }
 0x23e   : > { %v9800_v49 = vadd.f32 %v3555_v18, %v9688_v28  ;;  %v10169_v28 = vld [vmem:[#allocation40_spill] sm:$0xff] }
 0x23f   : > { %v4515_v41 = vsel %vm9665_vm14, %v10169_v28, 0 }
 0x240   : > { %v3960_v11 = vpop.f32.mrf.mxu0  ;;  %4800 = vmatmul.bf16.vlgmr.msrb.gmra.mxu3 %v4525_v47 }
 0x243   : > { %v3909_v42 = vpop.f32.mrf.mxu2  ;;  %v3557_v53 = vpop.f32.mrf.mxu1 }
 0x244   : > { %v3558_v44 = vadd.f32 %v3557_v53, %v3529_v16  ;;  %v3931_v19 = vpop.f32.mrf.mxu3 }
 0x245   : > { %4756 = vmatmul.bf16.vlgmr.msrb.gmra.mxu0 %v4515_v41  ;;  %v3932_v63 = vadd.f32 %v3931_v19, %v3902_v29 }
 0x246   : > { %v9809_v45 = vadd.f32 %v3558_v44, %v9709_v33  ;;  %4771 = vmatmul.bf16.gmra.mxu1 %v4524_v48 }
 0x247   : > { %v3961_v32 = vadd.f32 %v3960_v11, %v3932_v63 }
 0x248   : > { %4795 = vmatmul.bf16.gmra.mxu2 %v4522_v23  ;;  %v3962_v24 = vpop.f32.mrf.mxu0 }
 0x249   : > { %v3980_v7 = vadd.f32 %v3961_v32, %v9765_v40 }
 0x24b   : > { %v3912_v60 = vpop.f32.mrf.mxu2  ;;  %v3559_v31 = vpop.f32.mrf.mxu1 }
 0x24c   : > { %v3560_v2 = vadd.f32 %v3559_v31, %v3531_v35  ;;  %v3933_v6 = vpop.f32.mrf.mxu3 }
 0x24d   : > { %v3934_v10 = vadd.f32 %v3933_v6, %v3904_v3 }
 0x24e   : > { %v3572_v33 = vadd.f32 %v3560_v2, %v9734_v61 }
 0x24f   : > { %v3963_v52 = vadd.f32 %v3962_v24, %v3934_v10 }
 0x250   : > { %v3965_v39 = vpop.f32.mrf.mxu0 }
 0x251   : > { %v3981_v38 = vadd.f32 %v3963_v52, %v9776_v50 }
 0x253   : > { %v3914_v26 = vpop.f32.mrf.mxu2  ;;  %v3562_v16 = vpop.f32.mrf.mxu1 }
 0x254   : > { %v3563_v62 = vadd.f32 %v3562_v16, %v3534_v34  ;;  %v3936_v25 = vpop.f32.mrf.mxu3 }
 0x255   : > { %v3937_v13 = vadd.f32 %v3936_v25, %v3907_v0 }
 0x256   : > { %v3573_v56 = vadd.f32 %v3563_v62, %v9745_v30 }
 0x257   : > { %v3966_v36 = vadd.f32 %v3965_v39, %v3937_v13 }
 0x258   : > { %v3967_v4 = vpop.f32.mrf.mxu0 }
 0x259   : > { %v3982_v51 = vadd.f32 %v3966_v36, %v9791_v8 }
 0x25b   : > { %v3917_v29 = vpop.f32.mrf.mxu2  ;;  %v3564_v14 = vpop.f32.mrf.mxu1 }
 0x25c   : > { %v3565_v21 = vadd.f32 %v3564_v14, %v3536_v55  ;;  %v3938_v61 = vpop.f32.mrf.mxu3 }
 0x25d   : > { %v3939_v15 = vadd.f32 %v3938_v61, %v3909_v42 }
 0x25e   : > { %v9820_v35 = vadd.f32 %v3565_v21, %v9762_v54 }
 0x25f   : > { %v3968_v3 = vadd.f32 %v3967_v4, %v3939_v15 }
 0x260   : > { %v3970_v27 = vpop.f32.mrf.mxu0 }
 0x261   : > { %v3983_v19 = vadd.f32 %v3968_v3, %v9800_v49 }
 0x263   : > { %v3919_v37 = vpop.f32.mrf.mxu2  ;;  %v4315_v12 = vpop.f32.mrf.mxu1 }
 0x264   : > { %v3941_v43 = vpop.f32.mrf.mxu3 }
 0x265   : > { %v3942_v46 = vadd.f32 %v3941_v43, %v3912_v60 }
 0x267   : > { %v3971_v9 = vadd.f32 %v3970_v27, %v3942_v46 }
 0x268   : > { %v3972_v22 = vpop.f32.mrf.mxu0 }
 0x269   : > { %v3984_v63 = vadd.f32 %v3971_v9, %v9809_v45 }
 0x26b   : > { %v4344_v30 = vpop.f32.mrf.mxu2  ;;  %v4317_v17 = vpop.f32.mrf.mxu1 }
 0x26c   : > { %v4345_v20 = vadd.f32 %v4344_v30, %v4315_v12  ;;  %v3943_v57 = vpop.f32.mrf.mxu3 }
 0x26d   : > { %v3944_v34 = vadd.f32 %v3943_v57, %v3914_v26 }
 0x26f   : > { %v3973_v0 = vadd.f32 %v3972_v22, %v3944_v34 }
 0x270   : > { %v3975_v18 = vpop.f32.mrf.mxu0 }
 0x271   : > { %v3985_v10 = vadd.f32 %v3973_v0, %v3572_v33 }
 0x273   : > { %v4346_v54 = vpop.f32.mrf.mxu2  ;;  %v4320_v5 = vpop.f32.mrf.mxu1 }
 0x274   : > { %v4347_v1 = vadd.f32 %v4346_v54, %v4317_v17  ;;  %v3946_v55 = vpop.f32.mrf.mxu3 }
 0x275   : > { %v3947_v42 = vadd.f32 %v3946_v55, %v3917_v29 }
 0x277   : > { %v3976_v53 = vadd.f32 %v3975_v18, %v3947_v42 }
 0x278   : > { %v3977_v11 = vpop.f32.mrf.mxu0 }
 0x279   : > { %v9831_v25 = vadd.f32 %v3976_v53, %v3573_v56 }
 0x27b   : > { %v4349_v59 = vpop.f32.mrf.mxu2  ;;  %v4322_v47 = vpop.f32.mrf.mxu1 }
 0x27c   : > { %v4350_v44 = vadd.f32 %v4349_v59, %v4320_v5  ;;  %v3948_v48 = vpop.f32.mrf.mxu3 }
 0x27d   : > { %v3949_v40 = vadd.f32 %v3948_v48, %v3919_v37 }
 0x27f   : > { %v3978_v28 = vadd.f32 %v3977_v11, %v3949_v40 }
 0x281   : > { %v3987_v33 = vadd.f32 %v3978_v28, %v9820_v35 }
 0x282   : > { %v4728_v23 = vpop.f32.mrf.mxu0 }
 0x283   : > { %v4351_v41 = vpop.f32.mrf.mxu2  ;;  %v4325_v58 = vpop.f32.mrf.mxu1 }
 0x284   : > { %v4373_v50 = vpop.f32.mrf.mxu3  ;;  %v4352_v21 = vadd.f32 %v4351_v41, %v4322_v47 }
 0x285   : > { %v4374_v32 = vadd.f32 %v4373_v50, %v4345_v20 }
 0x287   : > { %v4393_v60 = vadd.f32 %v4374_v32, %v3980_v7 }
 0x28a   : > { %v9827_v6 = vpop.f32.mrf.mxu0 }
 0x28b   : > { %v4354_v31 = vpop.f32.mrf.mxu2  ;;  %v4327_v2 = vpop.f32.mrf.mxu1 }
 0x28c   : > { %v4355_v24 = vadd.f32 %v4354_v31, %v4325_v58  ;;  %v4375_v8 = vpop.f32.mrf.mxu3 }
 0x28d   : > { %v4376_v52 = vadd.f32 %v4375_v8, %v4347_v1 }
 0x28f   : > { %v9829_v26 = vadd.f32 %v4376_v52, %v3981_v38 }
 0x292   : > { %v4733_v39 = vpop.f32.mrf.mxu0 }
 0x293   : > { %v4356_v16 = vpop.f32.mrf.mxu2  ;;  %v4330_v62 = vpop.f32.mrf.mxu1 }
 0x294   : > { %v4378_v49 = vpop.f32.mrf.mxu3  ;;  %v4357_v17 = vadd.f32 %v4356_v16, %v4327_v2 }
 0x295   : > { %v4379_v45 = vadd.f32 %v4378_v49, %v4350_v44 }
 0x297   : > { %v4395_v13 = vadd.f32 %v4379_v45, %v3982_v51 }
 0x29a   : > { %v4735_v14 = vpop.f32.mrf.mxu0 }
 0x29b   : > { %v4359_v36 = vpop.f32.mrf.mxu2  ;;  %v4332_v29 = vpop.f32.mrf.mxu1 }
 0x29c   : > { %v4380_v4 = vpop.f32.mrf.mxu3 }
 0x29d   : > { %v4381_v61 = vadd.f32 %v4380_v4, %v4352_v21 }
 0x29f   : > { %v4396_v15 = vadd.f32 %v4381_v61, %v3983_v19  ;;  %v4360_v19 = vadd.f32 %v4359_v36, %v4330_v62 }
 0x2a2   : > { %v4738_v12 = vpop.f32.mrf.mxu0 }
 0x2a3   : > { %v4361_v3 = vpop.f32.mrf.mxu2  ;;  %v4762_v37 = vpop.f32.mrf.mxu1 }
 0x2a4   : > { %v4383_v27 = vpop.f32.mrf.mxu3  ;;  %v4763_v38 = vadd.f32 %v4762_v37, %v4733_v39 }
 0x2a5   : > { %v4384_v43 = vadd.f32 %v4383_v27, %v4355_v24 }
 0x2a7   : > { %v4397_v46 = vadd.f32 %v4384_v43, %v3984_v63  ;;  %v4362_v63 = vadd.f32 %v4361_v3, %v4332_v29 }
 0x2aa   : > { %v4740_v30 = vpop.f32.mrf.mxu0 }
 0x2ab   : > { %v4786_v56 = vpop.f32.mrf.mxu2  ;;  %v4764_v9 = vpop.f32.mrf.mxu1 }
 0x2ac   : > { %v4385_v20 = vpop.f32.mrf.mxu3  ;;  %v4765_v55 = vadd.f32 %v4764_v9, %v4735_v14 }
 0x2ad   : > { %v4386_v22 = vadd.f32 %v4385_v20, %v4357_v17 }
 0x2af   : > { %v4398_v7 = vadd.f32 %v4386_v22, %v3985_v10 }
 0x2b2   : > { %v4743_v0 = vpop.f32.mrf.mxu0 }
 0x2b3   : > { %v4788_v57 = vpop.f32.mrf.mxu2  ;;  %v4767_v34 = vpop.f32.mrf.mxu1 }
 0x2b4   : > { %v4388_v54 = vpop.f32.mrf.mxu3  ;;  %v4768_v16 = vadd.f32 %v4767_v34, %v4738_v12 }
 0x2b5   : > { %v4389_v31 = vadd.f32 %v4388_v54, %v4360_v19 }
 0x2b7   : > { %v4399_v45 = vadd.f32 %v4389_v31, %v9831_v25 }
 0x2ba   : > { %v4745_v1 = vpop.f32.mrf.mxu0 }
 0x2bb   : > { %v4791_v35 = vpop.f32.mrf.mxu2  ;;  %v4769_v5 = vpop.f32.mrf.mxu1 }
 0x2bc   : > { %v4390_v18 = vpop.f32.mrf.mxu3  ;;  %v4792_v42 = vadd.f32 %v4791_v35, %v4763_v38  ;;  %v4770_v29 = vadd.f32 %v4769_v5, %v4740_v30 }
 0x2be   : > { %v4808_v51 = vadd.f32 %v4792_v42, %v4395_v13 }
 0x2c0   : > { %v4845_v27 = vmul.f32 %v4808_v51, %v4808_v51 }
 0x2c2   : > { %v4757_v44 = vpop.f32.mrf.mxu0 }
 0x2c3   : > { %v4793_v53 = vpop.f32.mrf.mxu2  ;;  %v4772_v59 = vpop.f32.mrf.mxu1  ;;  %v4758_v11 = vadd.f32 %v4757_v44, %v4728_v23  ;;  %v4391_v23 = vadd.f32 %v4390_v18, %v4362_v63 }
 0x2c4   : > { %v4794_v47 = vadd.f32 %v4793_v53, %v4765_v55  ;;  %v4801_v28 = vpop.f32.mrf.mxu3  ;;  %v4773_v2 = vadd.f32 %v4772_v59, %v4743_v0 }
 0x2c5   : > { %v4787_v40 = vadd.f32 %v4786_v56, %v4758_v11  ;;  %v4400_v13 = vadd.f32 %v4391_v23, %v3987_v33 }
 0x2c6   : > { %v4809_v48 = vadd.f32 %v4794_v47, %v4396_v15  ;;  %v4802_v8 = vadd.f32 %v4801_v28, %v4773_v2 }
 0x2c7   : > { %v4806_v58 = vadd.f32 %v4787_v40, %v4393_v60 }
 0x2c8   : > { %v6695_v41 = vpack.c.bf16 %v4809_v48, %v4808_v51  ;;  %v4812_v14 = vadd.f32 %v4802_v8, %v4399_v45 }
 0x2c9   : > { %v4843_v4 = vmul.f32 %v4806_v58, %v4806_v58 }
 0x2ca   : > { %6716 = vst [vmem:[%s9839_s18 + $0x8] sm:$0xff] %v6695_v41   ;;  %v4759_v24 = vpop.f32.mrf.mxu0  ;;  %v4849_v35 = vmul.f32 %v4812_v14, %v4812_v14 }
 0x2cb   : > { %v4796_v50 = vpop.f32.mrf.mxu2  ;;  %v4774_v32 = vpop.f32.mrf.mxu1  ;;  %v4760_v10 = vadd.f32 %v4759_v24, %v9827_v6 }
 0x2cc   : > { %v4775_v52 = vadd.f32 %v4774_v32, %v4745_v1  ;;  %v4803_v49 = vpop.f32.mrf.mxu3  ;;  %v4797_v62 = vadd.f32 %v4796_v50, %v4768_v16 }
 0x2cd   : > { %v4789_v39 = vadd.f32 %v4788_v57, %v4760_v10 }
 0x2ce   : > { %v4804_v60 = vadd.f32 %v4803_v49, %v4775_v52  ;;  %v4810_v25 = vadd.f32 %v4797_v62, %v4397_v46 }
 0x2cf   : > { %v4807_v36 = vadd.f32 %v4789_v39, %v9829_v26  ;;  %v4846_v26 = vmul.f32 %v4809_v48, %v4809_v48 }
 0x2d0   : > { %v4813_v21 = vadd.f32 %v4804_v60, %v4400_v13  ;;  %v4847_v20 = vmul.f32 %v4810_v25, %v4810_v25 }
 0x2d1   : > { %v6690_v61 = vpack.c.bf16 %v4807_v36, %v4806_v58  ;;  %v4830_v6 = vadd.f32 %v4807_v36, %v4806_v58  ;;  %v4844_v15 = vmul.f32 %v4807_v36, %v4807_v36 }
 0x2d2   : > { %v6705_v12 = vpack.c.bf16 %v4813_v21, %v4812_v14  ;;  %v4850_v18 = vmul.f32 %v4813_v21, %v4813_v21 }
 0x2d3   : > { %v4798_v3 = vpop.f32.mrf.mxu2  ;;  %6691 = vst [vmem:[%s9839_s18] sm:$0xff] %v6690_v61   ;;  %v4831_v33 = vadd.f32 %v4830_v6, %v4808_v51  ;;  %v4851_v43 = vadd.f32 %v4844_v15, %v4843_v4 }
 0x2d4   : > { %v4799_v37 = vadd.f32 %v4798_v3, %v4770_v29  ;;  %6718 = vst [vmem:[%s9839_s18 + $0x18] sm:$0xff] %v6705_v12  }
 0x2d5   : > { %v4852_v9 = vadd.f32 %v4851_v43, %v4845_v27  ;;  %v4832_v30 = vadd.f32 %v4831_v33, %v4809_v48 }
 0x2d6   : > { %v4811_v56 = vadd.f32 %v4799_v37, %v4398_v7 }
 0x2d7   : > { %v4833_v22 = vadd.f32 %v4832_v30, %v4810_v25  ;;  %v4853_v57 = vadd.f32 %v4852_v9, %v4846_v26 }
 0x2d8   : > { %v6700_v17 = vpack.c.bf16 %v4811_v56, %v4810_v25  ;;  %v4848_v0 = vmul.f32 %v4811_v56, %v4811_v56 }
 0x2d9   : > { %v4834_v34 = vadd.f32 %v4833_v22, %v4811_v56  ;;  %v4854_v54 = vadd.f32 %v4853_v57, %v4847_v20 }
 0x2da   : > { %6717 = vst [vmem:[%s9839_s18 + $0x10] sm:$0xff] %v6700_v17  }
 0x2db   : > { %v4855_v5 = vadd.f32 %v4854_v54, %v4848_v0  ;;  %v4835_v46 = vadd.f32 %v4834_v34, %v4812_v14 }
 0x2dd   : > { %v4836_v1 = vadd.f32 %v4835_v46, %v4813_v21  ;;  %v4856_v38 = vadd.f32 %v4855_v5, %v4849_v35 }
 0x2df   : > { %v4837_v7 = vrot.slane %v4836_v1, 4  ;;  %v4857_v55 = vadd.f32 %v4856_v38, %v4850_v18 }
 0x2e1   : > { %v4838_v42 = vadd.f32 %v4837_v7, %v4836_v1  ;;  %v4858_v53 = vrot.slane %v4857_v55, 4 }
 0x2e3   : > { %v4839_v59 = vrot.slane %v4838_v42, 2  ;;  %v4859_v47 = vadd.f32 %v4858_v53, %v4857_v55 }
 0x2e5   : > { %v4840_v44 = vadd.f32 %v4839_v59, %v4838_v42  ;;  %v4860_v11 = vrot.slane %v4859_v47, 2 }
 0x2e7   : > { %v4841_v51 = vrot.slane %v4840_v44, 1  ;;  %v4861_v48 = vadd.f32 %v4860_v11, %v4859_v47 }
 0x2e9   : > { %v4862_v40 = vrot.slane %v4861_v48, 1  ;;  %v4842_v28 = vadd.f32 %v4841_v51, %v4840_v44 }
 0x2eb   : > { %v4863_v41 = vadd.f32 %v4862_v40, %v4861_v48 }
 0x2ed   : > { %v4865_v58 = vsel %vm2277_vm13, %v4842_v28, %v4863_v41 }
 0x2ee   : > { %4866 = vst [vmem:[%s470_s16] sm:$0x3] %v4865_v58 }
 0x2ef PF: > { %s19_s9 = sadd.s32 1, %s6829_s9   ;;  %s10171_s27 = smov %s6821_s29 }
 0x2f0   : > { %p16_p12 = scmp.ge.s32.totalorder %s19_s9, 18   ;;  %s10172_s28 = smov %s6825_s30 }
 0x2f1   : > { %s10173_s29 = smov %s10176_s10  ;;  %s10174_s30 = smov %s10180_s11 }
 0x2f2   :  { %18 = sbr.rel (!%p16_p12) target bundleno = 3 (0x3), region = 112 }

</bundles_post_ra>
